<compile_context>
chip_gen: v7x
topology: tpu7x:2x2x1
jax: 0.10.0
libtpu: 0.0.40
codegen_flags: <defaults>
</compile_context>

<pallas_src>
import functools

import jax
import jax.numpy as jnp
from jax.experimental import pallas as pl
from jax.experimental.pallas import tpu as pltpu

# scale_factor = 2  ->  kernel=6, stride=2, padding=2  (as in Net_7.__init__)
KER, STR, PAD = 6, 2, 2


def _rup(x, m):
    return ((x + m - 1) // m) * m


# ---------------------------------------------------------------------------
# Pallas kernel: Y(Cout, M) = W @ X + b, optional PReLU, optional residual add
# ---------------------------------------------------------------------------
def _mm_bias_act_kernel(w_ref, x_ref, b_ref, alpha_ref, *rest,
                        apply_prelu, has_residual):
    if has_residual:
        res_ref, o_ref = rest
    else:
        (o_ref,) = rest
    acc = jnp.dot(w_ref[...], x_ref[...], preferred_element_type=jnp.float32)
    acc = acc + b_ref[...]                         # (Cout, 1) broadcast over lanes
    if apply_prelu:
        a = alpha_ref[0, 0]                        # single-parameter PReLU
        acc = jnp.where(acc >= 0, acc, a * acc)
    if has_residual:
        acc = acc + res_ref[...].astype(jnp.float32)
    o_ref[...] = acc.astype(o_ref.dtype)


def matmul_bias_act(w, cols, b, alpha, apply_prelu, residual=None):
    """y(Cout, M) = prelu(w(Cout,K) @ cols(K,M) + b) [+ residual]; lane-dense tiles over M."""
    co, kdim = w.shape
    k2, m = cols.shape
    assert kdim == k2, (kdim, k2)

    mp = _rup(m, 128)
    tm = 512 if mp % 512 == 0 else (256 if mp % 256 == 0 else 128)
    if mp != m:
        cols = jnp.pad(cols, ((0, 0), (0, mp - m)))
        if residual is not None:
            residual = jnp.pad(residual, ((0, 0), (0, mp - m)))

    has_res = residual is not None
    kern = functools.partial(_mm_bias_act_kernel,
                             apply_prelu=apply_prelu, has_residual=has_res)
    in_specs = [
        pl.BlockSpec((co, kdim), lambda i: (0, 0)),          # weights (stay resident)
        pl.BlockSpec((kdim, tm), lambda i: (0, i)),          # activation cols tile
        pl.BlockSpec((co, 1), lambda i: (0, 0)),             # bias
        pl.BlockSpec(memory_space=pltpu.MemorySpace.SMEM),   # PReLU alpha
    ]
    args = [w, cols, b, alpha]
    if has_res:
        in_specs.append(pl.BlockSpec((co, tm), lambda i: (0, i)))
        args.append(residual)

    bytes_accessed = (w.size * w.dtype.itemsize
                      + cols.size * cols.dtype.itemsize
                      + b.size * 4 + co * mp * 2
                      + (residual.size * residual.dtype.itemsize if has_res else 0))
    out = pl.pallas_call(
        kern,
        out_shape=jax.ShapeDtypeStruct((co, mp), jnp.bfloat16),
        grid=(mp // tm,),
        in_specs=in_specs,
        out_specs=pl.BlockSpec((co, tm), lambda i: (0, i)),
        compiler_params=pltpu.CompilerParams(
            dimension_semantics=("parallel",),
            vmem_limit_bytes=32 * 1024 * 1024),
        cost_estimate=pl.CostEstimate(flops=2 * co * kdim * mp,
                                      transcendentals=0,
                                      bytes_accessed=int(bytes_accessed)),
    )(*args)
    return out[:, :m] if mp != m else out


# ---------------------------------------------------------------------------
# im2col (CNHW layout, no transposes) + conv / deconv wrappers
# ---------------------------------------------------------------------------
def _im2col_cnhw(x, k, s, p):
    """x: (C, N, H, W) -> cols (k*k*C, N*Ho*Wo); feature order (ki, kj, c)."""
    if p > 0:
        x = jnp.pad(x, ((0, 0), (0, 0), (p, p), (p, p)))
    c, n, h, w = x.shape
    ho = (h - k) // s + 1
    wo = (w - k) // s + 1
    taps = []
    for i in range(k):
        for j in range(k):
            taps.append(x[:, :, i:i + (ho - 1) * s + 1:s, j:j + (wo - 1) * s + 1:s])
    cols = jnp.stack(taps, axis=0)                  # (k*k, C, N, Ho, Wo)
    return cols.reshape(k * k * c, n * ho * wo), ho, wo


def conv_apply(x, prm, k, s, p, act=True, residual2d=None):
    cols, ho, wo = _im2col_cnhw(x, k, s, p)
    y = matmul_bias_act(prm['w'], cols, prm['b'], prm['alpha'], act,
                        residual=residual2d)
    return y.reshape(y.shape[0], x.shape[1], ho, wo)


def deconv_apply(x, prm, residual_stacked=None):
    # ConvTranspose2d(k=6, s=2, p=2) == 4 sub-pixel 3x3 / stride-1 convs sharing
    # a single im2col; their weights are pre-stacked along Cout so one Pallas
    # matmul computes all 4 phases, which are then interleaved to HR.
    # TODO(synk): phase decomposition is hard-coded for scale_factor=2.
    c, n, h, w = x.shape
    cols, ho, wo = _im2col_cnhw(x, 3, 1, 1)         # ho == h, wo == w
    y = matmul_bias_act(prm['w'], cols, prm['b'], prm['alpha'], True,
                        residual=residual_stacked)  # (4*Cout, N*h*w)
    co = y.shape[0] // 4
    y4 = y.reshape(2, 2, co, n, ho, wo)             # (py, px, c, n, q, r)
    hr = jnp.transpose(y4, (2, 3, 4, 0, 5, 1)).reshape(co, n, 2 * ho, 2 * wo)
    return hr, y                                    # HR output + phase-stacked form


# ---------------------------------------------------------------------------
# DBPN blocks (residual adds fused into the matmul epilogue)
# ---------------------------------------------------------------------------
def up_block(x, P):
    h0, h0_stk = deconv_apply(x, P['c1'])                              # LR -> HR
    l0 = conv_apply(h0, P['c2'], KER, STR, PAD)                        # HR -> LR
    h1, _ = deconv_apply(l0 - x, P['c3'], residual_stacked=h0_stk)     # fused + h0
    return h1


def down_block(x, P):
    l0 = conv_apply(x, P['c1'], KER, STR, PAD)                         # HR -> LR
    h0, _ = deconv_apply(l0, P['c2'])                                  # LR -> HR
    res = l0.reshape(l0.shape[0], -1)
    return conv_apply(h0 - x, P['c3'], KER, STR, PAD, residual2d=res)  # fused + l0


def d_up_block(x, P):
    return up_block(conv_apply(x, P['c0'], 1, 1, 0), P)


def d_down_block(x, P):
    return down_block(conv_apply(x, P['c0'], 1, 1, 0), P)


# ---------------------------------------------------------------------------
# Parameter construction (kaiming_normal_, zero bias, PReLU alpha = 0.25);
# weights pre-transposed / pre-stacked into the lane-dense matmul layout (bf16).
# ---------------------------------------------------------------------------
class KeyGen:
    def __init__(self, seed):
        self.key = jax.random.PRNGKey(seed)

    def __call__(self):
        self.key, sub = jax.random.split(self.key)
        return sub


def init_conv(kg, cin, cout, k):
    # PyTorch Conv2d weight (cout, cin, k, k); kaiming fan_in = cin*k*k.
    w = jax.random.normal(kg(), (cout, cin, k, k), jnp.float32)
    w = w * jnp.sqrt(2.0 / (cin * k * k))
    wmat = jnp.transpose(w, (0, 2, 3, 1)).reshape(cout, k * k * cin)
    return {'w': wmat.astype(jnp.bfloat16),
            'b': jnp.zeros((cout, 1), jnp.float32),
            'alpha': jnp.full((1, 1), 0.25, jnp.float32)}


def init_deconv(kg, cin, cout, k):
    # PyTorch ConvTranspose2d weight (cin, cout, k, k); kaiming fan_in = cout*k*k.
    wt = jax.random.normal(kg(), (cin, cout, k, k), jnp.float32)
    wt = wt * jnp.sqrt(2.0 / (cout * k * k))
    # Pre-build the 4 sub-pixel phase kernels (3x3 each) stacked along Cout:
    #   Weff[(py,px)][cout, ki, kj, cin] = Wt[cin, cout, 4-2*ki+py, 4-2*kj+px]
    phases = []
    for py in range(2):
        for px in range(2):
            sub = jnp.flip(wt[:, :, py::2, px::2], (2, 3))      # (cin, cout, 3, 3)
            eff = jnp.transpose(sub, (1, 2, 3, 0)).reshape(cout, 9 * cin)
            phases.append(eff)
    wall = jnp.concatenate(phases, axis=0)                      # (4*cout, 9*cin)
    return {'w': wall.astype(jnp.bfloat16),
            'b': jnp.zeros((4 * cout, 1), jnp.float32),
            'alpha': jnp.full((1, 1), 0.25, jnp.float32)}


def init_net7_params(seed, num_channels=3, base_filter=64, feat=256):
    kg = KeyGen(seed)
    P = {'feat0': init_conv(kg, num_channels, feat, 3),
         'feat1': init_conv(kg, feat, base_filter, 1)}

    def up_p():
        return {'c1': init_deconv(kg, base_filter, base_filter, KER),
                'c2': init_conv(kg, base_filter, base_filter, KER),
                'c3': init_deconv(kg, base_filter, base_filter, KER)}

    def down_p():
        return {'c1': init_conv(kg, base_filter, base_filter, KER),
                'c2': init_deconv(kg, base_filter, base_filter, KER),
                'c3': init_conv(kg, base_filter, base_filter, KER)}

    P['up1'], P['down1'], P['up2'] = up_p(), down_p(), up_p()
    for t in range(2, 7):                     # D_DownBlock(t) / D_UpBlock(t)
        d = down_p()
        d['c0'] = init_conv(kg, t * base_filter, base_filter, 1)
        P[f'down{t}'] = d
        u = up_p()
        u['c0'] = init_conv(kg, t * base_filter, base_filter, 1)
        P[f'up{t + 1}'] = u
    P['output'] = init_conv(kg, 7 * base_filter, num_channels, 3)  # no activation
    return P


# ---------------------------------------------------------------------------
# Net_7 forward (mirrors the PyTorch forward exactly)
# ---------------------------------------------------------------------------
def net7_forward(P, x_nchw):
    # Internal layout is CNHW: channels on sublanes, N*H*W on lanes.
    x = jnp.transpose(x_nchw, (1, 0, 2, 3)).astype(jnp.bfloat16)
    x = conv_apply(x, P['feat0'], 3, 1, 1)
    x = conv_apply(x, P['feat1'], 1, 1, 0)

    h1 = up_block(x, P['up1'])
    l1 = down_block(h1, P['down1'])
    h2 = up_block(l1, P['up2'])

    concat_h = jnp.concatenate([h2, h1], axis=0)
    l = d_down_block(concat_h, P['down2'])
    concat_l = jnp.concatenate([l, l1], axis=0)
    h = d_up_block(concat_l, P['up3'])
    concat_h = jnp.concatenate([h, concat_h], axis=0)

    for t in range(3, 7):
        l = d_down_block(concat_h, P[f'down{t}'])
        concat_l = jnp.concatenate([l, concat_l], axis=0)
        h = d_up_block(concat_l, P[f'up{t + 1}'])
        concat_h = jnp.concatenate([h, concat_h], axis=0)

    y = conv_apply(concat_h, P['output'], 3, 1, 1, act=False)
    return jnp.transpose(y, (1, 0, 2, 3)).astype(jnp.float32)      # CNHW -> NCHW


if __name__ == "__main__":
    # small shapes: batch=2, channels=3, LR spatial=8x8, scale=2 -> HR 16x16
    key = jax.random.PRNGKey(0)
    x = jax.random.normal(key, (2, 3, 8, 8), jnp.float32)

    # Small test config (the spec defaults are base_filter=64, feat=256).
    params = init_net7_params(seed=0, num_channels=3, base_filter=32, feat=64)

    fwd = jax.jit(net7_forward)
    y = fwd(params, x)
    jax.block_until_ready(y)
    assert y.shape == (2, 3, 16, 16), y.shape
    assert bool(jnp.all(jnp.isfinite(y)))
    print("KERNEL_OK")
</pallas_src>

<mosaic_0001>
module attributes {stable_mosaic.version = 11 : i64} {
  func.func @_mm_bias_act_kernel(%arg0: i32, %arg1: memref<64x27xbf16, #tpu.memory_space<vmem>>, %arg2: memref<27x128xbf16, #tpu.memory_space<vmem>>, %arg3: memref<64x1xf32, #tpu.memory_space<vmem>>, %arg4: memref<1x1xf32, #tpu.memory_space<smem>>, %arg5: memref<64x128xbf16, #tpu.memory_space<vmem>>) attributes {dimension_semantics = [#tpu.dimension_semantics<parallel>], iteration_bounds = array<i64: 1>, scalar_prefetch = 0 : i64, scratch_operands = 0 : i64, tpu.core_type = #tpu.core_type<tc>, window_params = [{pipeline_mode = #tpu.pipeline_mode<synchronous>, transform_indices = @transform_0, window_bounds = array<i64: 64, 27>}, {transform_indices = @transform_1, window_bounds = array<i64: 27, 128>}, {pipeline_mode = #tpu.pipeline_mode<synchronous>, transform_indices = @transform_2, window_bounds = array<i64: 64, 1>}, {transform_indices = @transform_3, window_bounds = array<i64: 1, 1>}, {transform_indices = @transform_4, window_bounds = array<i64: 64, 128>}]} {
    %c0 = arith.constant 0 : index
    %c0_0 = arith.constant 0 : index
    %0 = vector.load %arg1[%c0, %c0_0] : memref<64x27xbf16, #tpu.memory_space<vmem>>, vector<64x27xbf16>
    %c0_1 = arith.constant 0 : index
    %c0_2 = arith.constant 0 : index
    %1 = vector.load %arg2[%c0_1, %c0_2] : memref<27x128xbf16, #tpu.memory_space<vmem>>, vector<27x128xbf16>
    %cst = arith.constant dense<0.000000e+00> : vector<64x128xf32>
    %2 = tpu.matmul %0, %1, %cst {dimension_numbers = #tpu.dot_dimension_numbers<[1], [0], [0], [1], [0, 0, 1, 1], [], []>} : vector<64x27xbf16>, vector<27x128xbf16>, vector<64x128xf32> -> vector<64x128xf32>
    %c0_3 = arith.constant 0 : index
    %c0_4 = arith.constant 0 : index
    %3 = vector.load %arg3[%c0_3, %c0_4] : memref<64x1xf32, #tpu.memory_space<vmem>>, vector<64x1xf32>
    %4 = vector.broadcast %3 : vector<64x1xf32> to vector<64x128xf32>
    %5 = arith.addf %2, %4 : vector<64x128xf32>
    %c0_5 = arith.constant 0 : index
    %c0_6 = arith.constant 0 : index
    %6 = memref.load %arg4[%c0_5, %c0_6] : memref<1x1xf32, #tpu.memory_space<smem>>
    %cst_7 = arith.constant 0.000000e+00 : f32
    %7 = vector.broadcast %cst_7 : f32 to vector<64x128xf32>
    %8 = arith.cmpf oge, %5, %7 : vector<64x128xf32>
    %9 = vector.broadcast %6 : f32 to vector<64x128xf32>
    %10 = arith.mulf %9, %5 : vector<64x128xf32>
    %11 = arith.select %8, %5, %10 : vector<64x128xi1>, vector<64x128xf32>
    %12 = arith.truncf %11 : vector<64x128xf32> to vector<64x128xbf16>
    %c0_8 = arith.constant 0 : index
    %c0_9 = arith.constant 0 : index
    %13 = vector.load %arg5[%c0_8, %c0_9] : memref<64x128xbf16, #tpu.memory_space<vmem>>, vector<64x128xbf16>
    tpu.vector_store %arg5[%c0_8, %c0_9], %12 {strides = array<i32>} : memref<64x128xbf16, #tpu.memory_space<vmem>>, vector<64x128xbf16>,
    return
  }
  func.func @transform_0(%arg0: i32) -> (i32, i32) {
    %c0_i32 = arith.constant 0 : i32
    %c0_i32_0 = arith.constant 0 : i32
    %c0_i32_1 = arith.constant 0 : i32
    return %c0_i32, %c0_i32_0 : i32, i32
  }
  func.func @transform_1(%arg0: i32) -> (i32, i32) {
    %c0_i32 = arith.constant 0 : i32
    %c0_i32_0 = arith.constant 0 : i32
    return %c0_i32, %arg0 : i32, i32
  }
  func.func @transform_2(%arg0: i32) -> (i32, i32) {
    %c0_i32 = arith.constant 0 : i32
    %c0_i32_0 = arith.constant 0 : i32
    %c0_i32_1 = arith.constant 0 : i32
    return %c0_i32, %c0_i32_0 : i32, i32
  }
  func.func @transform_3(%arg0: i32) -> (i32, i32) {
    %c0_i32 = arith.constant 0 : i32
    %c0_i32_0 = arith.constant 0 : i32
    %c0_i32_1 = arith.constant 0 : i32
    return %c0_i32, %c0_i32_0 : i32, i32
  }
  func.func @transform_4(%arg0: i32) -> (i32, i32) {
    %c0_i32 = arith.constant 0 : i32
    %c0_i32_0 = arith.constant 0 : i32
    return %c0_i32, %arg0 : i32, i32
  }
}

module attributes {stable_mosaic.version = 11 : i64} {
  func.func @_mm_bias_act_kernel(%arg0: i32, %arg1: memref<32x64xbf16, #tpu.memory_space<vmem>>, %arg2: memref<64x128xbf16, #tpu.memory_space<vmem>>, %arg3: memref<32x1xf32, #tpu.memory_space<vmem>>, %arg4: memref<1x1xf32, #tpu.memory_space<smem>>, %arg5: memref<32x128xbf16, #tpu.memory_space<vmem>>) attributes {dimension_semantics = [#tpu.dimension_semantics<parallel>], iteration_bounds = array<i64: 1>, scalar_prefetch = 0 : i64, scratch_operands = 0 : i64, tpu.core_type = #tpu.core_type<tc>, window_params = [{pipeline_mode = #tpu.pipeline_mode<synchronous>, transform_indices = @transform_0, window_bounds = array<i64: 32, 64>}, {transform_indices = @transform_1, window_bounds = array<i64: 64, 128>}, {pipeline_mode = #tpu.pipeline_mode<synchronous>, transform_indices = @transform_2, window_bounds = array<i64: 32, 1>}, {transform_indices = @transform_3, window_bounds = array<i64: 1, 1>}, {transform_indices = @transform_4, window_bounds = array<i64: 32, 128>}]} {
    %c0 = arith.constant 0 : index
    %c0_0 = arith.constant 0 : index
    %0 = vector.load %arg1[%c0, %c0_0] : memref<32x64xbf16, #tpu.memory_space<vmem>>, vector<32x64xbf16>
    %c0_1 = arith.constant 0 : index
    %c0_2 = arith.constant 0 : index
    %1 = vector.load %arg2[%c0_1, %c0_2] : memref<64x128xbf16, #tpu.memory_space<vmem>>, vector<64x128xbf16>
    %cst = arith.constant dense<0.000000e+00> : vector<32x128xf32>
    %2 = tpu.matmul %0, %1, %cst {dimension_numbers = #tpu.dot_dimension_numbers<[1], [0], [0], [1], [0, 0, 1, 1], [], []>} : vector<32x64xbf16>, vector<64x128xbf16>, vector<32x128xf32> -> vector<32x128xf32>
    %c0_3 = arith.constant 0 : index
    %c0_4 = arith.constant 0 : index
    %3 = vector.load %arg3[%c0_3, %c0_4] : memref<32x1xf32, #tpu.memory_space<vmem>>, vector<32x1xf32>
    %4 = vector.broadcast %3 : vector<32x1xf32> to vector<32x128xf32>
    %5 = arith.addf %2, %4 : vector<32x128xf32>
    %c0_5 = arith.constant 0 : index
    %c0_6 = arith.constant 0 : index
    %6 = memref.load %arg4[%c0_5, %c0_6] : memref<1x1xf32, #tpu.memory_space<smem>>
    %cst_7 = arith.constant 0.000000e+00 : f32
    %7 = vector.broadcast %cst_7 : f32 to vector<32x128xf32>
    %8 = arith.cmpf oge, %5, %7 : vector<32x128xf32>
    %9 = vector.broadcast %6 : f32 to vector<32x128xf32>
    %10 = arith.mulf %9, %5 : vector<32x128xf32>
    %11 = arith.select %8, %5, %10 : vector<32x128xi1>, vector<32x128xf32>
    %12 = arith.truncf %11 : vector<32x128xf32> to vector<32x128xbf16>
    %c0_8 = arith.constant 0 : index
    %c0_9 = arith.constant 0 : index
    %13 = vector.load %arg5[%c0_8, %c0_9] : memref<32x128xbf16, #tpu.memory_space<vmem>>, vector<32x128xbf16>
    tpu.vector_store %arg5[%c0_8, %c0_9], %12 {strides = array<i32>} : memref<32x128xbf16, #tpu.memory_space<vmem>>, vector<32x128xbf16>,
    return
  }
  func.func @transform_0(%arg0: i32) -> (i32, i32) {
    %c0_i32 = arith.constant 0 : i32
    %c0_i32_0 = arith.constant 0 : i32
    %c0_i32_1 = arith.constant 0 : i32
    return %c0_i32, %c0_i32_0 : i32, i32
  }
  func.func @transform_1(%arg0: i32) -> (i32, i32) {
    %c0_i32 = arith.constant 0 : i32
    %c0_i32_0 = arith.constant 0 : i32
    return %c0_i32, %arg0 : i32, i32
  }
  func.func @transform_2(%arg0: i32) -> (i32, i32) {
    %c0_i32 = arith.constant 0 : i32
    %c0_i32_0 = arith.constant 0 : i32
    %c0_i32_1 = arith.constant 0 : i32
    return %c0_i32, %c0_i32_0 : i32, i32
  }
  func.func @transform_3(%arg0: i32) -> (i32, i32) {
    %c0_i32 = arith.constant 0 : i32
    %c0_i32_0 = arith.constant 0 : i32
    %c0_i32_1 = arith.constant 0 : i32
    return %c0_i32, %c0_i32_0 : i32, i32
  }
  func.func @transform_4(%arg0: i32) -> (i32, i32) {
    %c0_i32 = arith.constant 0 : i32
    %c0_i32_0 = arith.constant 0 : i32
    return %c0_i32, %arg0 : i32, i32
  }
}

module attributes {stable_mosaic.version = 11 : i64} {
  func.func @_mm_bias_act_kernel(%arg0: i32, %arg1: memref<128x288xbf16, #tpu.memory_space<vmem>>, %arg2: memref<288x128xbf16, #tpu.memory_space<vmem>>, %arg3: memref<128x1xf32, #tpu.memory_space<vmem>>, %arg4: memref<1x1xf32, #tpu.memory_space<smem>>, %arg5: memref<128x128xbf16, #tpu.memory_space<vmem>>) attributes {dimension_semantics = [#tpu.dimension_semantics<parallel>], iteration_bounds = array<i64: 1>, scalar_prefetch = 0 : i64, scratch_operands = 0 : i64, tpu.core_type = #tpu.core_type<tc>, window_params = [{pipeline_mode = #tpu.pipeline_mode<synchronous>, transform_indices = @transform_0, window_bounds = array<i64: 128, 288>}, {transform_indices = @transform_1, window_bounds = array<i64: 288, 128>}, {pipeline_mode = #tpu.pipeline_mode<synchronous>, transform_indices = @transform_2, window_bounds = array<i64: 128, 1>}, {transform_indices = @transform_3, window_bounds = array<i64: 1, 1>}, {transform_indices = @transform_4, window_bounds = array<i64: 128, 128>}]} {
    %c0 = arith.constant 0 : index
    %c0_0 = arith.constant 0 : index
    %0 = vector.load %arg1[%c0, %c0_0] : memref<128x288xbf16, #tpu.memory_space<vmem>>, vector<128x288xbf16>
    %c0_1 = arith.constant 0 : index
    %c0_2 = arith.constant 0 : index
    %1 = vector.load %arg2[%c0_1, %c0_2] : memref<288x128xbf16, #tpu.memory_space<vmem>>, vector<288x128xbf16>
    %cst = arith.constant dense<0.000000e+00> : vector<128x128xf32>
    %2 = tpu.matmul %0, %1, %cst {dimension_numbers = #tpu.dot_dimension_numbers<[1], [0], [0], [1], [0, 0, 1, 1], [], []>} : vector<128x288xbf16>, vector<288x128xbf16>, vector<128x128xf32> -> vector<128x128xf32>
    %c0_3 = arith.constant 0 : index
    %c0_4 = arith.constant 0 : index
    %3 = vector.load %arg3[%c0_3, %c0_4] : memref<128x1xf32, #tpu.memory_space<vmem>>, vector<128x1xf32>
    %4 = vector.broadcast %3 : vector<128x1xf32> to vector<128x128xf32>
    %5 = arith.addf %2, %4 : vector<128x128xf32>
    %c0_5 = arith.constant 0 : index
    %c0_6 = arith.constant 0 : index
    %6 = memref.load %arg4[%c0_5, %c0_6] : memref<1x1xf32, #tpu.memory_space<smem>>
    %cst_7 = arith.constant 0.000000e+00 : f32
    %7 = vector.broadcast %cst_7 : f32 to vector<128x128xf32>
    %8 = arith.cmpf oge, %5, %7 : vector<128x128xf32>
    %9 = vector.broadcast %6 : f32 to vector<128x128xf32>
    %10 = arith.mulf %9, %5 : vector<128x128xf32>
    %11 = arith.select %8, %5, %10 : vector<128x128xi1>, vector<128x128xf32>
    %12 = arith.truncf %11 : vector<128x128xf32> to vector<128x128xbf16>
    %c0_8 = arith.constant 0 : index
    %c0_9 = arith.constant 0 : index
    %13 = vector.load %arg5[%c0_8, %c0_9] : memref<128x128xbf16, #tpu.memory_space<vmem>>, vector<128x128xbf16>
    tpu.vector_store %arg5[%c0_8, %c0_9], %12 {strides = array<i32>} : memref<128x128xbf16, #tpu.memory_space<vmem>>, vector<128x128xbf16>,
    return
  }
  func.func @transform_0(%arg0: i32) -> (i32, i32) {
    %c0_i32 = arith.constant 0 : i32
    %c0_i32_0 = arith.constant 0 : i32
    %c0_i32_1 = arith.constant 0 : i32
    return %c0_i32, %c0_i32_0 : i32, i32
  }
  func.func @transform_1(%arg0: i32) -> (i32, i32) {
    %c0_i32 = arith.constant 0 : i32
    %c0_i32_0 = arith.constant 0 : i32
    return %c0_i32, %arg0 : i32, i32
  }
  func.func @transform_2(%arg0: i32) -> (i32, i32) {
    %c0_i32 = arith.constant 0 : i32
    %c0_i32_0 = arith.constant 0 : i32
    %c0_i32_1 = arith.constant 0 : i32
    return %c0_i32, %c0_i32_0 : i32, i32
  }
  func.func @transform_3(%arg0: i32) -> (i32, i32) {
    %c0_i32 = arith.constant 0 : i32
    %c0_i32_0 = arith.constant 0 : i32
    %c0_i32_1 = arith.constant 0 : i32
    return %c0_i32, %c0_i32_0 : i32, i32
  }
  func.func @transform_4(%arg0: i32) -> (i32, i32) {
    %c0_i32 = arith.constant 0 : i32
    %c0_i32_0 = arith.constant 0 : i32
    return %c0_i32, %arg0 : i32, i32
  }
}

module attributes {stable_mosaic.version = 11 : i64} {
  func.func @_mm_bias_act_kernel(%arg0: i32, %arg1: memref<32x1152xbf16, #tpu.memory_space<vmem>>, %arg2: memref<1152x128xbf16, #tpu.memory_space<vmem>>, %arg3: memref<32x1xf32, #tpu.memory_space<vmem>>, %arg4: memref<1x1xf32, #tpu.memory_space<smem>>, %arg5: memref<32x128xbf16, #tpu.memory_space<vmem>>) attributes {dimension_semantics = [#tpu.dimension_semantics<parallel>], iteration_bounds = array<i64: 1>, scalar_prefetch = 0 : i64, scratch_operands = 0 : i64, tpu.core_type = #tpu.core_type<tc>, window_params = [{pipeline_mode = #tpu.pipeline_mode<synchronous>, transform_indices = @transform_0, window_bounds = array<i64: 32, 1152>}, {transform_indices = @transform_1, window_bounds = array<i64: 1152, 128>}, {pipeline_mode = #tpu.pipeline_mode<synchronous>, transform_indices = @transform_2, window_bounds = array<i64: 32, 1>}, {transform_indices = @transform_3, window_bounds = array<i64: 1, 1>}, {transform_indices = @transform_4, window_bounds = array<i64: 32, 128>}]} {
    %c0 = arith.constant 0 : index
    %c0_0 = arith.constant 0 : index
    %0 = vector.load %arg1[%c0, %c0_0] : memref<32x1152xbf16, #tpu.memory_space<vmem>>, vector<32x1152xbf16>
    %c0_1 = arith.constant 0 : index
    %c0_2 = arith.constant 0 : index
    %1 = vector.load %arg2[%c0_1, %c0_2] : memref<1152x128xbf16, #tpu.memory_space<vmem>>, vector<1152x128xbf16>
    %cst = arith.constant dense<0.000000e+00> : vector<32x128xf32>
    %2 = tpu.matmul %0, %1, %cst {dimension_numbers = #tpu.dot_dimension_numbers<[1], [0], [0], [1], [0, 0, 1, 1], [], []>} : vector<32x1152xbf16>, vector<1152x128xbf16>, vector<32x128xf32> -> vector<32x128xf32>
    %c0_3 = arith.constant 0 : index
    %c0_4 = arith.constant 0 : index
    %3 = vector.load %arg3[%c0_3, %c0_4] : memref<32x1xf32, #tpu.memory_space<vmem>>, vector<32x1xf32>
    %4 = vector.broadcast %3 : vector<32x1xf32> to vector<32x128xf32>
    %5 = arith.addf %2, %4 : vector<32x128xf32>
    %c0_5 = arith.constant 0 : index
    %c0_6 = arith.constant 0 : index
    %6 = memref.load %arg4[%c0_5, %c0_6] : memref<1x1xf32, #tpu.memory_space<smem>>
    %cst_7 = arith.constant 0.000000e+00 : f32
    %7 = vector.broadcast %cst_7 : f32 to vector<32x128xf32>
    %8 = arith.cmpf oge, %5, %7 : vector<32x128xf32>
    %9 = vector.broadcast %6 : f32 to vector<32x128xf32>
    %10 = arith.mulf %9, %5 : vector<32x128xf32>
    %11 = arith.select %8, %5, %10 : vector<32x128xi1>, vector<32x128xf32>
    %12 = arith.truncf %11 : vector<32x128xf32> to vector<32x128xbf16>
    %c0_8 = arith.constant 0 : index
    %c0_9 = arith.constant 0 : index
    %13 = vector.load %arg5[%c0_8, %c0_9] : memref<32x128xbf16, #tpu.memory_space<vmem>>, vector<32x128xbf16>
    tpu.vector_store %arg5[%c0_8, %c0_9], %12 {strides = array<i32>} : memref<32x128xbf16, #tpu.memory_space<vmem>>, vector<32x128xbf16>,
    return
  }
  func.func @transform_0(%arg0: i32) -> (i32, i32) {
    %c0_i32 = arith.constant 0 : i32
    %c0_i32_0 = arith.constant 0 : i32
    %c0_i32_1 = arith.constant 0 : i32
    return %c0_i32, %c0_i32_0 : i32, i32
  }
  func.func @transform_1(%arg0: i32) -> (i32, i32) {
    %c0_i32 = arith.constant 0 : i32
    %c0_i32_0 = arith.constant 0 : i32
    return %c0_i32, %arg0 : i32, i32
  }
  func.func @transform_2(%arg0: i32) -> (i32, i32) {
    %c0_i32 = arith.constant 0 : i32
    %c0_i32_0 = arith.constant 0 : i32
    %c0_i32_1 = arith.constant 0 : i32
    return %c0_i32, %c0_i32_0 : i32, i32
  }
  func.func @transform_3(%arg0: i32) -> (i32, i32) {
    %c0_i32 = arith.constant 0 : i32
    %c0_i32_0 = arith.constant 0 : i32
    %c0_i32_1 = arith.constant 0 : i32
    return %c0_i32, %c0_i32_0 : i32, i32
  }
  func.func @transform_4(%arg0: i32) -> (i32, i32) {
    %c0_i32 = arith.constant 0 : i32
    %c0_i32_0 = arith.constant 0 : i32
    return %c0_i32, %arg0 : i32, i32
  }
}

module attributes {stable_mosaic.version = 11 : i64} {
  func.func @_mm_bias_act_kernel(%arg0: i32, %arg1: memref<128x288xbf16, #tpu.memory_space<vmem>>, %arg2: memref<288x128xbf16, #tpu.memory_space<vmem>>, %arg3: memref<128x1xf32, #tpu.memory_space<vmem>>, %arg4: memref<1x1xf32, #tpu.memory_space<smem>>, %arg5: memref<128x128xbf16, #tpu.memory_space<vmem>>, %arg6: memref<128x128xbf16, #tpu.memory_space<vmem>>) attributes {dimension_semantics = [#tpu.dimension_semantics<parallel>], iteration_bounds = array<i64: 1>, scalar_prefetch = 0 : i64, scratch_operands = 0 : i64, tpu.core_type = #tpu.core_type<tc>, window_params = [{pipeline_mode = #tpu.pipeline_mode<synchronous>, transform_indices = @transform_0, window_bounds = array<i64: 128, 288>}, {transform_indices = @transform_1, window_bounds = array<i64: 288, 128>}, {pipeline_mode = #tpu.pipeline_mode<synchronous>, transform_indices = @transform_2, window_bounds = array<i64: 128, 1>}, {transform_indices = @transform_3, window_bounds = array<i64: 1, 1>}, {transform_indices = @transform_4, window_bounds = array<i64: 128, 128>}, {transform_indices = @transform_5, window_bounds = array<i64: 128, 128>}]} {
    %c0 = arith.constant 0 : index
    %c0_0 = arith.constant 0 : index
    %0 = vector.load %arg1[%c0, %c0_0] : memref<128x288xbf16, #tpu.memory_space<vmem>>, vector<128x288xbf16>
    %c0_1 = arith.constant 0 : index
    %c0_2 = arith.constant 0 : index
    %1 = vector.load %arg2[%c0_1, %c0_2] : memref<288x128xbf16, #tpu.memory_space<vmem>>, vector<288x128xbf16>
    %cst = arith.constant dense<0.000000e+00> : vector<128x128xf32>
    %2 = tpu.matmul %0, %1, %cst {dimension_numbers = #tpu.dot_dimension_numbers<[1], [0], [0], [1], [0, 0, 1, 1], [], []>} : vector<128x288xbf16>, vector<288x128xbf16>, vector<128x128xf32> -> vector<128x128xf32>
    %c0_3 = arith.constant 0 : index
    %c0_4 = arith.constant 0 : index
    %3 = vector.load %arg3[%c0_3, %c0_4] : memref<128x1xf32, #tpu.memory_space<vmem>>, vector<128x1xf32>
    %4 = vector.broadcast %3 : vector<128x1xf32> to vector<128x128xf32>
    %5 = arith.addf %2, %4 : vector<128x128xf32>
    %c0_5 = arith.constant 0 : index
    %c0_6 = arith.constant 0 : index
    %6 = memref.load %arg4[%c0_5, %c0_6] : memref<1x1xf32, #tpu.memory_space<smem>>
    %cst_7 = arith.constant 0.000000e+00 : f32
    %7 = vector.broadcast %cst_7 : f32 to vector<128x128xf32>
    %8 = arith.cmpf oge, %5, %7 : vector<128x128xf32>
    %9 = vector.broadcast %6 : f32 to vector<128x128xf32>
    %10 = arith.mulf %9, %5 : vector<128x128xf32>
    %11 = arith.select %8, %5, %10 : vector<128x128xi1>, vector<128x128xf32>
    %c0_8 = arith.constant 0 : index
    %c0_9 = arith.constant 0 : index
    %12 = vector.load %arg5[%c0_8, %c0_9] : memref<128x128xbf16, #tpu.memory_space<vmem>>, vector<128x128xbf16>
    %13 = arith.extf %12 : vector<128x128xbf16> to vector<128x128xf32>
    %14 = arith.addf %11, %13 : vector<128x128xf32>
    %15 = arith.truncf %14 : vector<128x128xf32> to vector<128x128xbf16>
    %c0_10 = arith.constant 0 : index
    %c0_11 = arith.constant 0 : index
    %16 = vector.load %arg6[%c0_10, %c0_11] : memref<128x128xbf16, #tpu.memory_space<vmem>>, vector<128x128xbf16>
    tpu.vector_store %arg6[%c0_10, %c0_11], %15 {strides = array<i32>} : memref<128x128xbf16, #tpu.memory_space<vmem>>, vector<128x128xbf16>,
    return
  }
  func.func @transform_0(%arg0: i32) -> (i32, i32) {
    %c0_i32 = arith.constant 0 : i32
    %c0_i32_0 = arith.constant 0 : i32
    %c0_i32_1 = arith.constant 0 : i32
    return %c0_i32, %c0_i32_0 : i32, i32
  }
  func.func @transform_1(%arg0: i32) -> (i32, i32) {
    %c0_i32 = arith.constant 0 : i32
    %c0_i32_0 = arith.constant 0 : i32
    return %c0_i32, %arg0 : i32, i32
  }
  func.func @transform_2(%arg0: i32) -> (i32, i32) {
    %c0_i32 = arith.constant 0 : i32
    %c0_i32_0 = arith.constant 0 : i32
    %c0_i32_1 = arith.constant 0 : i32
    return %c0_i32, %c0_i32_0 : i32, i32
  }
  func.func @transform_3(%arg0: i32) -> (i32, i32) {
    %c0_i32 = arith.constant 0 : i32
    %c0_i32_0 = arith.constant 0 : i32
    %c0_i32_1 = arith.constant 0 : i32
    return %c0_i32, %c0_i32_0 : i32, i32
  }
  func.func @transform_4(%arg0: i32) -> (i32, i32) {
    %c0_i32 = arith.constant 0 : i32
    %c0_i32_0 = arith.constant 0 : i32
    return %c0_i32, %arg0 : i32, i32
  }
  func.func @transform_5(%arg0: i32) -> (i32, i32) {
    %c0_i32 = arith.constant 0 : i32
    %c0_i32_0 = arith.constant 0 : i32
    return %c0_i32, %arg0 : i32, i32
  }
}

module attributes {stable_mosaic.version = 11 : i64} {
  func.func @_mm_bias_act_kernel(%arg0: i32, %arg1: memref<32x1152xbf16, #tpu.memory_space<vmem>>, %arg2: memref<1152x128xbf16, #tpu.memory_space<vmem>>, %arg3: memref<32x1xf32, #tpu.memory_space<vmem>>, %arg4: memref<1x1xf32, #tpu.memory_space<smem>>, %arg5: memref<32x128xbf16, #tpu.memory_space<vmem>>, %arg6: memref<32x128xbf16, #tpu.memory_space<vmem>>) attributes {dimension_semantics = [#tpu.dimension_semantics<parallel>], iteration_bounds = array<i64: 1>, scalar_prefetch = 0 : i64, scratch_operands = 0 : i64, tpu.core_type = #tpu.core_type<tc>, window_params = [{pipeline_mode = #tpu.pipeline_mode<synchronous>, transform_indices = @transform_0, window_bounds = array<i64: 32, 1152>}, {transform_indices = @transform_1, window_bounds = array<i64: 1152, 128>}, {pipeline_mode = #tpu.pipeline_mode<synchronous>, transform_indices = @transform_2, window_bounds = array<i64: 32, 1>}, {transform_indices = @transform_3, window_bounds = array<i64: 1, 1>}, {transform_indices = @transform_4, window_bounds = array<i64: 32, 128>}, {transform_indices = @transform_5, window_bounds = array<i64: 32, 128>}]} {
    %c0 = arith.constant 0 : index
    %c0_0 = arith.constant 0 : index
    %0 = vector.load %arg1[%c0, %c0_0] : memref<32x1152xbf16, #tpu.memory_space<vmem>>, vector<32x1152xbf16>
    %c0_1 = arith.constant 0 : index
    %c0_2 = arith.constant 0 : index
    %1 = vector.load %arg2[%c0_1, %c0_2] : memref<1152x128xbf16, #tpu.memory_space<vmem>>, vector<1152x128xbf16>
    %cst = arith.constant dense<0.000000e+00> : vector<32x128xf32>
    %2 = tpu.matmul %0, %1, %cst {dimension_numbers = #tpu.dot_dimension_numbers<[1], [0], [0], [1], [0, 0, 1, 1], [], []>} : vector<32x1152xbf16>, vector<1152x128xbf16>, vector<32x128xf32> -> vector<32x128xf32>
    %c0_3 = arith.constant 0 : index
    %c0_4 = arith.constant 0 : index
    %3 = vector.load %arg3[%c0_3, %c0_4] : memref<32x1xf32, #tpu.memory_space<vmem>>, vector<32x1xf32>
    %4 = vector.broadcast %3 : vector<32x1xf32> to vector<32x128xf32>
    %5 = arith.addf %2, %4 : vector<32x128xf32>
    %c0_5 = arith.constant 0 : index
    %c0_6 = arith.constant 0 : index
    %6 = memref.load %arg4[%c0_5, %c0_6] : memref<1x1xf32, #tpu.memory_space<smem>>
    %cst_7 = arith.constant 0.000000e+00 : f32
    %7 = vector.broadcast %cst_7 : f32 to vector<32x128xf32>
    %8 = arith.cmpf oge, %5, %7 : vector<32x128xf32>
    %9 = vector.broadcast %6 : f32 to vector<32x128xf32>
    %10 = arith.mulf %9, %5 : vector<32x128xf32>
    %11 = arith.select %8, %5, %10 : vector<32x128xi1>, vector<32x128xf32>
    %c0_8 = arith.constant 0 : index
    %c0_9 = arith.constant 0 : index
    %12 = vector.load %arg5[%c0_8, %c0_9] : memref<32x128xbf16, #tpu.memory_space<vmem>>, vector<32x128xbf16>
    %13 = arith.extf %12 : vector<32x128xbf16> to vector<32x128xf32>
    %14 = arith.addf %11, %13 : vector<32x128xf32>
    %15 = arith.truncf %14 : vector<32x128xf32> to vector<32x128xbf16>
    %c0_10 = arith.constant 0 : index
    %c0_11 = arith.constant 0 : index
    %16 = vector.load %arg6[%c0_10, %c0_11] : memref<32x128xbf16, #tpu.memory_space<vmem>>, vector<32x128xbf16>
    tpu.vector_store %arg6[%c0_10, %c0_11], %15 {strides = array<i32>} : memref<32x128xbf16, #tpu.memory_space<vmem>>, vector<32x128xbf16>,
    return
  }
  func.func @transform_0(%arg0: i32) -> (i32, i32) {
    %c0_i32 = arith.constant 0 : i32
    %c0_i32_0 = arith.constant 0 : i32
    %c0_i32_1 = arith.constant 0 : i32
    return %c0_i32, %c0_i32_0 : i32, i32
  }
  func.func @transform_1(%arg0: i32) -> (i32, i32) {
    %c0_i32 = arith.constant 0 : i32
    %c0_i32_0 = arith.constant 0 : i32
    return %c0_i32, %arg0 : i32, i32
  }
  func.func @transform_2(%arg0: i32) -> (i32, i32) {
    %c0_i32 = arith.constant 0 : i32
    %c0_i32_0 = arith.constant 0 : i32
    %c0_i32_1 = arith.constant 0 : i32
    return %c0_i32, %c0_i32_0 : i32, i32
  }
  func.func @transform_3(%arg0: i32) -> (i32, i32) {
    %c0_i32 = arith.constant 0 : i32
    %c0_i32_0 = arith.constant 0 : i32
    %c0_i32_1 = arith.constant 0 : i32
    return %c0_i32, %c0_i32_0 : i32, i32
  }
  func.func @transform_4(%arg0: i32) -> (i32, i32) {
    %c0_i32 = arith.constant 0 : i32
    %c0_i32_0 = arith.constant 0 : i32
    return %c0_i32, %arg0 : i32, i32
  }
  func.func @transform_5(%arg0: i32) -> (i32, i32) {
    %c0_i32 = arith.constant 0 : i32
    %c0_i32_0 = arith.constant 0 : i32
    return %c0_i32, %arg0 : i32, i32
  }
}

module attributes {stable_mosaic.version = 11 : i64} {
  func.func @_mm_bias_act_kernel(%arg0: i32, %arg1: memref<32x64xbf16, #tpu.memory_space<vmem>>, %arg2: memref<64x512xbf16, #tpu.memory_space<vmem>>, %arg3: memref<32x1xf32, #tpu.memory_space<vmem>>, %arg4: memref<1x1xf32, #tpu.memory_space<smem>>, %arg5: memref<32x512xbf16, #tpu.memory_space<vmem>>) attributes {dimension_semantics = [#tpu.dimension_semantics<parallel>], iteration_bounds = array<i64: 1>, scalar_prefetch = 0 : i64, scratch_operands = 0 : i64, tpu.core_type = #tpu.core_type<tc>, window_params = [{pipeline_mode = #tpu.pipeline_mode<synchronous>, transform_indices = @transform_0, window_bounds = array<i64: 32, 64>}, {transform_indices = @transform_1, window_bounds = array<i64: 64, 512>}, {pipeline_mode = #tpu.pipeline_mode<synchronous>, transform_indices = @transform_2, window_bounds = array<i64: 32, 1>}, {transform_indices = @transform_3, window_bounds = array<i64: 1, 1>}, {transform_indices = @transform_4, window_bounds = array<i64: 32, 512>}]} {
    %c0 = arith.constant 0 : index
    %c0_0 = arith.constant 0 : index
    %0 = vector.load %arg1[%c0, %c0_0] : memref<32x64xbf16, #tpu.memory_space<vmem>>, vector<32x64xbf16>
    %c0_1 = arith.constant 0 : index
    %c0_2 = arith.constant 0 : index
    %1 = vector.load %arg2[%c0_1, %c0_2] : memref<64x512xbf16, #tpu.memory_space<vmem>>, vector<64x512xbf16>
    %cst = arith.constant dense<0.000000e+00> : vector<32x512xf32>
    %2 = tpu.matmul %0, %1, %cst {dimension_numbers = #tpu.dot_dimension_numbers<[1], [0], [0], [1], [0, 0, 1, 1], [], []>} : vector<32x64xbf16>, vector<64x512xbf16>, vector<32x512xf32> -> vector<32x512xf32>
    %c0_3 = arith.constant 0 : index
    %c0_4 = arith.constant 0 : index
    %3 = vector.load %arg3[%c0_3, %c0_4] : memref<32x1xf32, #tpu.memory_space<vmem>>, vector<32x1xf32>
    %4 = vector.broadcast %3 : vector<32x1xf32> to vector<32x512xf32>
    %5 = arith.addf %2, %4 : vector<32x512xf32>
    %c0_5 = arith.constant 0 : index
    %c0_6 = arith.constant 0 : index
    %6 = memref.load %arg4[%c0_5, %c0_6] : memref<1x1xf32, #tpu.memory_space<smem>>
    %cst_7 = arith.constant 0.000000e+00 : f32
    %7 = vector.broadcast %cst_7 : f32 to vector<32x512xf32>
    %8 = arith.cmpf oge, %5, %7 : vector<32x512xf32>
    %9 = vector.broadcast %6 : f32 to vector<32x512xf32>
    %10 = arith.mulf %9, %5 : vector<32x512xf32>
    %11 = arith.select %8, %5, %10 : vector<32x512xi1>, vector<32x512xf32>
    %12 = arith.truncf %11 : vector<32x512xf32> to vector<32x512xbf16>
    %c0_8 = arith.constant 0 : index
    %c0_9 = arith.constant 0 : index
    %13 = vector.load %arg5[%c0_8, %c0_9] : memref<32x512xbf16, #tpu.memory_space<vmem>>, vector<32x512xbf16>
    tpu.vector_store %arg5[%c0_8, %c0_9], %12 {strides = array<i32>} : memref<32x512xbf16, #tpu.memory_space<vmem>>, vector<32x512xbf16>,
    return
  }
  func.func @transform_0(%arg0: i32) -> (i32, i32) {
    %c0_i32 = arith.constant 0 : i32
    %c0_i32_0 = arith.constant 0 : i32
    %c0_i32_1 = arith.constant 0 : i32
    return %c0_i32, %c0_i32_0 : i32, i32
  }
  func.func @transform_1(%arg0: i32) -> (i32, i32) {
    %c0_i32 = arith.constant 0 : i32
    %c0_i32_0 = arith.constant 0 : i32
    return %c0_i32, %arg0 : i32, i32
  }
  func.func @transform_2(%arg0: i32) -> (i32, i32) {
    %c0_i32 = arith.constant 0 : i32
    %c0_i32_0 = arith.constant 0 : i32
    %c0_i32_1 = arith.constant 0 : i32
    return %c0_i32, %c0_i32_0 : i32, i32
  }
  func.func @transform_3(%arg0: i32) -> (i32, i32) {
    %c0_i32 = arith.constant 0 : i32
    %c0_i32_0 = arith.constant 0 : i32
    %c0_i32_1 = arith.constant 0 : i32
    return %c0_i32, %c0_i32_0 : i32, i32
  }
  func.func @transform_4(%arg0: i32) -> (i32, i32) {
    %c0_i32 = arith.constant 0 : i32
    %c0_i32_0 = arith.constant 0 : i32
    return %c0_i32, %arg0 : i32, i32
  }
}

module attributes {stable_mosaic.version = 11 : i64} {
  func.func @_mm_bias_act_kernel(%arg0: i32, %arg1: memref<32x64xbf16, #tpu.memory_space<vmem>>, %arg2: memref<64x128xbf16, #tpu.memory_space<vmem>>, %arg3: memref<32x1xf32, #tpu.memory_space<vmem>>, %arg4: memref<1x1xf32, #tpu.memory_space<smem>>, %arg5: memref<32x128xbf16, #tpu.memory_space<vmem>>) attributes {dimension_semantics = [#tpu.dimension_semantics<parallel>], iteration_bounds = array<i64: 1>, scalar_prefetch = 0 : i64, scratch_operands = 0 : i64, tpu.core_type = #tpu.core_type<tc>, window_params = [{pipeline_mode = #tpu.pipeline_mode<synchronous>, transform_indices = @transform_0, window_bounds = array<i64: 32, 64>}, {transform_indices = @transform_1, window_bounds = array<i64: 64, 128>}, {pipeline_mode = #tpu.pipeline_mode<synchronous>, transform_indices = @transform_2, window_bounds = array<i64: 32, 1>}, {transform_indices = @transform_3, window_bounds = array<i64: 1, 1>}, {transform_indices = @transform_4, window_bounds = array<i64: 32, 128>}]} {
    %c0 = arith.constant 0 : index
    %c0_0 = arith.constant 0 : index
    %0 = vector.load %arg1[%c0, %c0_0] : memref<32x64xbf16, #tpu.memory_space<vmem>>, vector<32x64xbf16>
    %c0_1 = arith.constant 0 : index
    %c0_2 = arith.constant 0 : index
    %1 = vector.load %arg2[%c0_1, %c0_2] : memref<64x128xbf16, #tpu.memory_space<vmem>>, vector<64x128xbf16>
    %cst = arith.constant dense<0.000000e+00> : vector<32x128xf32>
    %2 = tpu.matmul %0, %1, %cst {dimension_numbers = #tpu.dot_dimension_numbers<[1], [0], [0], [1], [0, 0, 1, 1], [], []>} : vector<32x64xbf16>, vector<64x128xbf16>, vector<32x128xf32> -> vector<32x128xf32>
    %c0_3 = arith.constant 0 : index
    %c0_4 = arith.constant 0 : index
    %3 = vector.load %arg3[%c0_3, %c0_4] : memref<32x1xf32, #tpu.memory_space<vmem>>, vector<32x1xf32>
    %4 = vector.broadcast %3 : vector<32x1xf32> to vector<32x128xf32>
    %5 = arith.addf %2, %4 : vector<32x128xf32>
    %c0_5 = arith.constant 0 : index
    %c0_6 = arith.constant 0 : index
    %6 = memref.load %arg4[%c0_5, %c0_6] : memref<1x1xf32, #tpu.memory_space<smem>>
    %cst_7 = arith.constant 0.000000e+00 : f32
    %7 = vector.broadcast %cst_7 : f32 to vector<32x128xf32>
    %8 = arith.cmpf oge, %5, %7 : vector<32x128xf32>
    %9 = vector.broadcast %6 : f32 to vector<32x128xf32>
    %10 = arith.mulf %9, %5 : vector<32x128xf32>
    %11 = arith.select %8, %5, %10 : vector<32x128xi1>, vector<32x128xf32>
    %12 = arith.truncf %11 : vector<32x128xf32> to vector<32x128xbf16>
    %c0_8 = arith.constant 0 : index
    %c0_9 = arith.constant 0 : index
    %13 = vector.load %arg5[%c0_8, %c0_9] : memref<32x128xbf16, #tpu.memory_space<vmem>>, vector<32x128xbf16>
    tpu.vector_store %arg5[%c0_8, %c0_9], %12 {strides = array<i32>} : memref<32x128xbf16, #tpu.memory_space<vmem>>, vector<32x128xbf16>,
    return
  }
  func.func @transform_0(%arg0: i32) -> (i32, i32) {
    %c0_i32 = arith.constant 0 : i32
    %c0_i32_0 = arith.constant 0 : i32
    %c0_i32_1 = arith.constant 0 : i32
    return %c0_i32, %c0_i32_0 : i32, i32
  }
  func.func @transform_1(%arg0: i32) -> (i32, i32) {
    %c0_i32 = arith.constant 0 : i32
    %c0_i32_0 = arith.constant 0 : i32
    return %c0_i32, %arg0 : i32, i32
  }
  func.func @transform_2(%arg0: i32) -> (i32, i32) {
    %c0_i32 = arith.constant 0 : i32
    %c0_i32_0 = arith.constant 0 : i32
    %c0_i32_1 = arith.constant 0 : i32
    return %c0_i32, %c0_i32_0 : i32, i32
  }
  func.func @transform_3(%arg0: i32) -> (i32, i32) {
    %c0_i32 = arith.constant 0 : i32
    %c0_i32_0 = arith.constant 0 : i32
    %c0_i32_1 = arith.constant 0 : i32
    return %c0_i32, %c0_i32_0 : i32, i32
  }
  func.func @transform_4(%arg0: i32) -> (i32, i32) {
    %c0_i32 = arith.constant 0 : i32
    %c0_i32_0 = arith.constant 0 : i32
    return %c0_i32, %arg0 : i32, i32
  }
}

module attributes {stable_mosaic.version = 11 : i64} {
  func.func @_mm_bias_act_kernel(%arg0: i32, %arg1: memref<32x96xbf16, #tpu.memory_space<vmem>>, %arg2: memref<96x512xbf16, #tpu.memory_space<vmem>>, %arg3: memref<32x1xf32, #tpu.memory_space<vmem>>, %arg4: memref<1x1xf32, #tpu.memory_space<smem>>, %arg5: memref<32x512xbf16, #tpu.memory_space<vmem>>) attributes {dimension_semantics = [#tpu.dimension_semantics<parallel>], iteration_bounds = array<i64: 1>, scalar_prefetch = 0 : i64, scratch_operands = 0 : i64, tpu.core_type = #tpu.core_type<tc>, window_params = [{pipeline_mode = #tpu.pipeline_mode<synchronous>, transform_indices = @transform_0, window_bounds = array<i64: 32, 96>}, {transform_indices = @transform_1, window_bounds = array<i64: 96, 512>}, {pipeline_mode = #tpu.pipeline_mode<synchronous>, transform_indices = @transform_2, window_bounds = array<i64: 32, 1>}, {transform_indices = @transform_3, window_bounds = array<i64: 1, 1>}, {transform_indices = @transform_4, window_bounds = array<i64: 32, 512>}]} {
    %c0 = arith.constant 0 : index
    %c0_0 = arith.constant 0 : index
    %0 = vector.load %arg1[%c0, %c0_0] : memref<32x96xbf16, #tpu.memory_space<vmem>>, vector<32x96xbf16>
    %c0_1 = arith.constant 0 : index
    %c0_2 = arith.constant 0 : index
    %1 = vector.load %arg2[%c0_1, %c0_2] : memref<96x512xbf16, #tpu.memory_space<vmem>>, vector<96x512xbf16>
    %cst = arith.constant dense<0.000000e+00> : vector<32x512xf32>
    %2 = tpu.matmul %0, %1, %cst {dimension_numbers = #tpu.dot_dimension_numbers<[1], [0], [0], [1], [0, 0, 1, 1], [], []>} : vector<32x96xbf16>, vector<96x512xbf16>, vector<32x512xf32> -> vector<32x512xf32>
    %c0_3 = arith.constant 0 : index
    %c0_4 = arith.constant 0 : index
    %3 = vector.load %arg3[%c0_3, %c0_4] : memref<32x1xf32, #tpu.memory_space<vmem>>, vector<32x1xf32>
    %4 = vector.broadcast %3 : vector<32x1xf32> to vector<32x512xf32>
    %5 = arith.addf %2, %4 : vector<32x512xf32>
    %c0_5 = arith.constant 0 : index
    %c0_6 = arith.constant 0 : index
    %6 = memref.load %arg4[%c0_5, %c0_6] : memref<1x1xf32, #tpu.memory_space<smem>>
    %cst_7 = arith.constant 0.000000e+00 : f32
    %7 = vector.broadcast %cst_7 : f32 to vector<32x512xf32>
    %8 = arith.cmpf oge, %5, %7 : vector<32x512xf32>
    %9 = vector.broadcast %6 : f32 to vector<32x512xf32>
    %10 = arith.mulf %9, %5 : vector<32x512xf32>
    %11 = arith.select %8, %5, %10 : vector<32x512xi1>, vector<32x512xf32>
    %12 = arith.truncf %11 : vector<32x512xf32> to vector<32x512xbf16>
    %c0_8 = arith.constant 0 : index
    %c0_9 = arith.constant 0 : index
    %13 = vector.load %arg5[%c0_8, %c0_9] : memref<32x512xbf16, #tpu.memory_space<vmem>>, vector<32x512xbf16>
    tpu.vector_store %arg5[%c0_8, %c0_9], %12 {strides = array<i32>} : memref<32x512xbf16, #tpu.memory_space<vmem>>, vector<32x512xbf16>,
    return
  }
  func.func @transform_0(%arg0: i32) -> (i32, i32) {
    %c0_i32 = arith.constant 0 : i32
    %c0_i32_0 = arith.constant 0 : i32
    %c0_i32_1 = arith.constant 0 : i32
    return %c0_i32, %c0_i32_0 : i32, i32
  }
  func.func @transform_1(%arg0: i32) -> (i32, i32) {
    %c0_i32 = arith.constant 0 : i32
    %c0_i32_0 = arith.constant 0 : i32
    return %c0_i32, %arg0 : i32, i32
  }
  func.func @transform_2(%arg0: i32) -> (i32, i32) {
    %c0_i32 = arith.constant 0 : i32
    %c0_i32_0 = arith.constant 0 : i32
    %c0_i32_1 = arith.constant 0 : i32
    return %c0_i32, %c0_i32_0 : i32, i32
  }
  func.func @transform_3(%arg0: i32) -> (i32, i32) {
    %c0_i32 = arith.constant 0 : i32
    %c0_i32_0 = arith.constant 0 : i32
    %c0_i32_1 = arith.constant 0 : i32
    return %c0_i32, %c0_i32_0 : i32, i32
  }
  func.func @transform_4(%arg0: i32) -> (i32, i32) {
    %c0_i32 = arith.constant 0 : i32
    %c0_i32_0 = arith.constant 0 : i32
    return %c0_i32, %arg0 : i32, i32
  }
}

module attributes {stable_mosaic.version = 11 : i64} {
  func.func @_mm_bias_act_kernel(%arg0: i32, %arg1: memref<32x96xbf16, #tpu.memory_space<vmem>>, %arg2: memref<96x128xbf16, #tpu.memory_space<vmem>>, %arg3: memref<32x1xf32, #tpu.memory_space<vmem>>, %arg4: memref<1x1xf32, #tpu.memory_space<smem>>, %arg5: memref<32x128xbf16, #tpu.memory_space<vmem>>) attributes {dimension_semantics = [#tpu.dimension_semantics<parallel>], iteration_bounds = array<i64: 1>, scalar_prefetch = 0 : i64, scratch_operands = 0 : i64, tpu.core_type = #tpu.core_type<tc>, window_params = [{pipeline_mode = #tpu.pipeline_mode<synchronous>, transform_indices = @transform_0, window_bounds = array<i64: 32, 96>}, {transform_indices = @transform_1, window_bounds = array<i64: 96, 128>}, {pipeline_mode = #tpu.pipeline_mode<synchronous>, transform_indices = @transform_2, window_bounds = array<i64: 32, 1>}, {transform_indices = @transform_3, window_bounds = array<i64: 1, 1>}, {transform_indices = @transform_4, window_bounds = array<i64: 32, 128>}]} {
    %c0 = arith.constant 0 : index
    %c0_0 = arith.constant 0 : index
    %0 = vector.load %arg1[%c0, %c0_0] : memref<32x96xbf16, #tpu.memory_space<vmem>>, vector<32x96xbf16>
    %c0_1 = arith.constant 0 : index
    %c0_2 = arith.constant 0 : index
    %1 = vector.load %arg2[%c0_1, %c0_2] : memref<96x128xbf16, #tpu.memory_space<vmem>>, vector<96x128xbf16>
    %cst = arith.constant dense<0.000000e+00> : vector<32x128xf32>
    %2 = tpu.matmul %0, %1, %cst {dimension_numbers = #tpu.dot_dimension_numbers<[1], [0], [0], [1], [0, 0, 1, 1], [], []>} : vector<32x96xbf16>, vector<96x128xbf16>, vector<32x128xf32> -> vector<32x128xf32>
    %c0_3 = arith.constant 0 : index
    %c0_4 = arith.constant 0 : index
    %3 = vector.load %arg3[%c0_3, %c0_4] : memref<32x1xf32, #tpu.memory_space<vmem>>, vector<32x1xf32>
    %4 = vector.broadcast %3 : vector<32x1xf32> to vector<32x128xf32>
    %5 = arith.addf %2, %4 : vector<32x128xf32>
    %c0_5 = arith.constant 0 : index
    %c0_6 = arith.constant 0 : index
    %6 = memref.load %arg4[%c0_5, %c0_6] : memref<1x1xf32, #tpu.memory_space<smem>>
    %cst_7 = arith.constant 0.000000e+00 : f32
    %7 = vector.broadcast %cst_7 : f32 to vector<32x128xf32>
    %8 = arith.cmpf oge, %5, %7 : vector<32x128xf32>
    %9 = vector.broadcast %6 : f32 to vector<32x128xf32>
    %10 = arith.mulf %9, %5 : vector<32x128xf32>
    %11 = arith.select %8, %5, %10 : vector<32x128xi1>, vector<32x128xf32>
    %12 = arith.truncf %11 : vector<32x128xf32> to vector<32x128xbf16>
    %c0_8 = arith.constant 0 : index
    %c0_9 = arith.constant 0 : index
    %13 = vector.load %arg5[%c0_8, %c0_9] : memref<32x128xbf16, #tpu.memory_space<vmem>>, vector<32x128xbf16>
    tpu.vector_store %arg5[%c0_8, %c0_9], %12 {strides = array<i32>} : memref<32x128xbf16, #tpu.memory_space<vmem>>, vector<32x128xbf16>,
    return
  }
  func.func @transform_0(%arg0: i32) -> (i32, i32) {
    %c0_i32 = arith.constant 0 : i32
    %c0_i32_0 = arith.constant 0 : i32
    %c0_i32_1 = arith.constant 0 : i32
    return %c0_i32, %c0_i32_0 : i32, i32
  }
  func.func @transform_1(%arg0: i32) -> (i32, i32) {
    %c0_i32 = arith.constant 0 : i32
    %c0_i32_0 = arith.constant 0 : i32
    return %c0_i32, %arg0 : i32, i32
  }
  func.func @transform_2(%arg0: i32) -> (i32, i32) {
    %c0_i32 = arith.constant 0 : i32
    %c0_i32_0 = arith.constant 0 : i32
    %c0_i32_1 = arith.constant 0 : i32
    return %c0_i32, %c0_i32_0 : i32, i32
  }
  func.func @transform_3(%arg0: i32) -> (i32, i32) {
    %c0_i32 = arith.constant 0 : i32
    %c0_i32_0 = arith.constant 0 : i32
    %c0_i32_1 = arith.constant 0 : i32
    return %c0_i32, %c0_i32_0 : i32, i32
  }
  func.func @transform_4(%arg0: i32) -> (i32, i32) {
    %c0_i32 = arith.constant 0 : i32
    %c0_i32_0 = arith.constant 0 : i32
    return %c0_i32, %arg0 : i32, i32
  }
}

module attributes {stable_mosaic.version = 11 : i64} {
  func.func @_mm_bias_act_kernel(%arg0: i32, %arg1: memref<32x128xbf16, #tpu.memory_space<vmem>>, %arg2: memref<128x512xbf16, #tpu.memory_space<vmem>>, %arg3: memref<32x1xf32, #tpu.memory_space<vmem>>, %arg4: memref<1x1xf32, #tpu.memory_space<smem>>, %arg5: memref<32x512xbf16, #tpu.memory_space<vmem>>) attributes {dimension_semantics = [#tpu.dimension_semantics<parallel>], iteration_bounds = array<i64: 1>, scalar_prefetch = 0 : i64, scratch_operands = 0 : i64, tpu.core_type = #tpu.core_type<tc>, window_params = [{pipeline_mode = #tpu.pipeline_mode<synchronous>, transform_indices = @transform_0, window_bounds = array<i64: 32, 128>}, {transform_indices = @transform_1, window_bounds = array<i64: 128, 512>}, {pipeline_mode = #tpu.pipeline_mode<synchronous>, transform_indices = @transform_2, window_bounds = array<i64: 32, 1>}, {transform_indices = @transform_3, window_bounds = array<i64: 1, 1>}, {transform_indices = @transform_4, window_bounds = array<i64: 32, 512>}]} {
    %c0 = arith.constant 0 : index
    %c0_0 = arith.constant 0 : index
    %0 = vector.load %arg1[%c0, %c0_0] : memref<32x128xbf16, #tpu.memory_space<vmem>>, vector<32x128xbf16>
    %c0_1 = arith.constant 0 : index
    %c0_2 = arith.constant 0 : index
    %1 = vector.load %arg2[%c0_1, %c0_2] : memref<128x512xbf16, #tpu.memory_space<vmem>>, vector<128x512xbf16>
    %cst = arith.constant dense<0.000000e+00> : vector<32x512xf32>
    %2 = tpu.matmul %0, %1, %cst {dimension_numbers = #tpu.dot_dimension_numbers<[1], [0], [0], [1], [0, 0, 1, 1], [], []>} : vector<32x128xbf16>, vector<128x512xbf16>, vector<32x512xf32> -> vector<32x512xf32>
    %c0_3 = arith.constant 0 : index
    %c0_4 = arith.constant 0 : index
    %3 = vector.load %arg3[%c0_3, %c0_4] : memref<32x1xf32, #tpu.memory_space<vmem>>, vector<32x1xf32>
    %4 = vector.broadcast %3 : vector<32x1xf32> to vector<32x512xf32>
    %5 = arith.addf %2, %4 : vector<32x512xf32>
    %c0_5 = arith.constant 0 : index
    %c0_6 = arith.constant 0 : index
    %6 = memref.load %arg4[%c0_5, %c0_6] : memref<1x1xf32, #tpu.memory_space<smem>>
    %cst_7 = arith.constant 0.000000e+00 : f32
    %7 = vector.broadcast %cst_7 : f32 to vector<32x512xf32>
    %8 = arith.cmpf oge, %5, %7 : vector<32x512xf32>
    %9 = vector.broadcast %6 : f32 to vector<32x512xf32>
    %10 = arith.mulf %9, %5 : vector<32x512xf32>
    %11 = arith.select %8, %5, %10 : vector<32x512xi1>, vector<32x512xf32>
    %12 = arith.truncf %11 : vector<32x512xf32> to vector<32x512xbf16>
    %c0_8 = arith.constant 0 : index
    %c0_9 = arith.constant 0 : index
    %13 = vector.load %arg5[%c0_8, %c0_9] : memref<32x512xbf16, #tpu.memory_space<vmem>>, vector<32x512xbf16>
    tpu.vector_store %arg5[%c0_8, %c0_9], %12 {strides = array<i32>} : memref<32x512xbf16, #tpu.memory_space<vmem>>, vector<32x512xbf16>,
    return
  }
  func.func @transform_0(%arg0: i32) -> (i32, i32) {
    %c0_i32 = arith.constant 0 : i32
    %c0_i32_0 = arith.constant 0 : i32
    %c0_i32_1 = arith.constant 0 : i32
    return %c0_i32, %c0_i32_0 : i32, i32
  }
  func.func @transform_1(%arg0: i32) -> (i32, i32) {
    %c0_i32 = arith.constant 0 : i32
    %c0_i32_0 = arith.constant 0 : i32
    return %c0_i32, %arg0 : i32, i32
  }
  func.func @transform_2(%arg0: i32) -> (i32, i32) {
    %c0_i32 = arith.constant 0 : i32
    %c0_i32_0 = arith.constant 0 : i32
    %c0_i32_1 = arith.constant 0 : i32
    return %c0_i32, %c0_i32_0 : i32, i32
  }
  func.func @transform_3(%arg0: i32) -> (i32, i32) {
    %c0_i32 = arith.constant 0 : i32
    %c0_i32_0 = arith.constant 0 : i32
    %c0_i32_1 = arith.constant 0 : i32
    return %c0_i32, %c0_i32_0 : i32, i32
  }
  func.func @transform_4(%arg0: i32) -> (i32, i32) {
    %c0_i32 = arith.constant 0 : i32
    %c0_i32_0 = arith.constant 0 : i32
    return %c0_i32, %arg0 : i32, i32
  }
}

module attributes {stable_mosaic.version = 11 : i64} {
  func.func @_mm_bias_act_kernel(%arg0: i32, %arg1: memref<32x128xbf16, #tpu.memory_space<vmem>>, %arg2: memref<128x128xbf16, #tpu.memory_space<vmem>>, %arg3: memref<32x1xf32, #tpu.memory_space<vmem>>, %arg4: memref<1x1xf32, #tpu.memory_space<smem>>, %arg5: memref<32x128xbf16, #tpu.memory_space<vmem>>) attributes {dimension_semantics = [#tpu.dimension_semantics<parallel>], iteration_bounds = array<i64: 1>, scalar_prefetch = 0 : i64, scratch_operands = 0 : i64, tpu.core_type = #tpu.core_type<tc>, window_params = [{pipeline_mode = #tpu.pipeline_mode<synchronous>, transform_indices = @transform_0, window_bounds = array<i64: 32, 128>}, {transform_indices = @transform_1, window_bounds = array<i64: 128, 128>}, {pipeline_mode = #tpu.pipeline_mode<synchronous>, transform_indices = @transform_2, window_bounds = array<i64: 32, 1>}, {transform_indices = @transform_3, window_bounds = array<i64: 1, 1>}, {transform_indices = @transform_4, window_bounds = array<i64: 32, 128>}]} {
    %c0 = arith.constant 0 : index
    %c0_0 = arith.constant 0 : index
    %0 = vector.load %arg1[%c0, %c0_0] : memref<32x128xbf16, #tpu.memory_space<vmem>>, vector<32x128xbf16>
    %c0_1 = arith.constant 0 : index
    %c0_2 = arith.constant 0 : index
    %1 = vector.load %arg2[%c0_1, %c0_2] : memref<128x128xbf16, #tpu.memory_space<vmem>>, vector<128x128xbf16>
    %cst = arith.constant dense<0.000000e+00> : vector<32x128xf32>
    %2 = tpu.matmul %0, %1, %cst {dimension_numbers = #tpu.dot_dimension_numbers<[1], [0], [0], [1], [0, 0, 1, 1], [], []>} : vector<32x128xbf16>, vector<128x128xbf16>, vector<32x128xf32> -> vector<32x128xf32>
    %c0_3 = arith.constant 0 : index
    %c0_4 = arith.constant 0 : index
    %3 = vector.load %arg3[%c0_3, %c0_4] : memref<32x1xf32, #tpu.memory_space<vmem>>, vector<32x1xf32>
    %4 = vector.broadcast %3 : vector<32x1xf32> to vector<32x128xf32>
    %5 = arith.addf %2, %4 : vector<32x128xf32>
    %c0_5 = arith.constant 0 : index
    %c0_6 = arith.constant 0 : index
    %6 = memref.load %arg4[%c0_5, %c0_6] : memref<1x1xf32, #tpu.memory_space<smem>>
    %cst_7 = arith.constant 0.000000e+00 : f32
    %7 = vector.broadcast %cst_7 : f32 to vector<32x128xf32>
    %8 = arith.cmpf oge, %5, %7 : vector<32x128xf32>
    %9 = vector.broadcast %6 : f32 to vector<32x128xf32>
    %10 = arith.mulf %9, %5 : vector<32x128xf32>
    %11 = arith.select %8, %5, %10 : vector<32x128xi1>, vector<32x128xf32>
    %12 = arith.truncf %11 : vector<32x128xf32> to vector<32x128xbf16>
    %c0_8 = arith.constant 0 : index
    %c0_9 = arith.constant 0 : index
    %13 = vector.load %arg5[%c0_8, %c0_9] : memref<32x128xbf16, #tpu.memory_space<vmem>>, vector<32x128xbf16>
    tpu.vector_store %arg5[%c0_8, %c0_9], %12 {strides = array<i32>} : memref<32x128xbf16, #tpu.memory_space<vmem>>, vector<32x128xbf16>,
    return
  }
  func.func @transform_0(%arg0: i32) -> (i32, i32) {
    %c0_i32 = arith.constant 0 : i32
    %c0_i32_0 = arith.constant 0 : i32
    %c0_i32_1 = arith.constant 0 : i32
    return %c0_i32, %c0_i32_0 : i32, i32
  }
  func.func @transform_1(%arg0: i32) -> (i32, i32) {
    %c0_i32 = arith.constant 0 : i32
    %c0_i32_0 = arith.constant 0 : i32
    return %c0_i32, %arg0 : i32, i32
  }
  func.func @transform_2(%arg0: i32) -> (i32, i32) {
    %c0_i32 = arith.constant 0 : i32
    %c0_i32_0 = arith.constant 0 : i32
    %c0_i32_1 = arith.constant 0 : i32
    return %c0_i32, %c0_i32_0 : i32, i32
  }
  func.func @transform_3(%arg0: i32) -> (i32, i32) {
    %c0_i32 = arith.constant 0 : i32
    %c0_i32_0 = arith.constant 0 : i32
    %c0_i32_1 = arith.constant 0 : i32
    return %c0_i32, %c0_i32_0 : i32, i32
  }
  func.func @transform_4(%arg0: i32) -> (i32, i32) {
    %c0_i32 = arith.constant 0 : i32
    %c0_i32_0 = arith.constant 0 : i32
    return %c0_i32, %arg0 : i32, i32
  }
}

module attributes {stable_mosaic.version = 11 : i64} {
  func.func @_mm_bias_act_kernel(%arg0: i32, %arg1: memref<32x160xbf16, #tpu.memory_space<vmem>>, %arg2: memref<160x512xbf16, #tpu.memory_space<vmem>>, %arg3: memref<32x1xf32, #tpu.memory_space<vmem>>, %arg4: memref<1x1xf32, #tpu.memory_space<smem>>, %arg5: memref<32x512xbf16, #tpu.memory_space<vmem>>) attributes {dimension_semantics = [#tpu.dimension_semantics<parallel>], iteration_bounds = array<i64: 1>, scalar_prefetch = 0 : i64, scratch_operands = 0 : i64, tpu.core_type = #tpu.core_type<tc>, window_params = [{pipeline_mode = #tpu.pipeline_mode<synchronous>, transform_indices = @transform_0, window_bounds = array<i64: 32, 160>}, {transform_indices = @transform_1, window_bounds = array<i64: 160, 512>}, {pipeline_mode = #tpu.pipeline_mode<synchronous>, transform_indices = @transform_2, window_bounds = array<i64: 32, 1>}, {transform_indices = @transform_3, window_bounds = array<i64: 1, 1>}, {transform_indices = @transform_4, window_bounds = array<i64: 32, 512>}]} {
    %c0 = arith.constant 0 : index
    %c0_0 = arith.constant 0 : index
    %0 = vector.load %arg1[%c0, %c0_0] : memref<32x160xbf16, #tpu.memory_space<vmem>>, vector<32x160xbf16>
    %c0_1 = arith.constant 0 : index
    %c0_2 = arith.constant 0 : index
    %1 = vector.load %arg2[%c0_1, %c0_2] : memref<160x512xbf16, #tpu.memory_space<vmem>>, vector<160x512xbf16>
    %cst = arith.constant dense<0.000000e+00> : vector<32x512xf32>
    %2 = tpu.matmul %0, %1, %cst {dimension_numbers = #tpu.dot_dimension_numbers<[1], [0], [0], [1], [0, 0, 1, 1], [], []>} : vector<32x160xbf16>, vector<160x512xbf16>, vector<32x512xf32> -> vector<32x512xf32>
    %c0_3 = arith.constant 0 : index
    %c0_4 = arith.constant 0 : index
    %3 = vector.load %arg3[%c0_3, %c0_4] : memref<32x1xf32, #tpu.memory_space<vmem>>, vector<32x1xf32>
    %4 = vector.broadcast %3 : vector<32x1xf32> to vector<32x512xf32>
    %5 = arith.addf %2, %4 : vector<32x512xf32>
    %c0_5 = arith.constant 0 : index
    %c0_6 = arith.constant 0 : index
    %6 = memref.load %arg4[%c0_5, %c0_6] : memref<1x1xf32, #tpu.memory_space<smem>>
    %cst_7 = arith.constant 0.000000e+00 : f32
    %7 = vector.broadcast %cst_7 : f32 to vector<32x512xf32>
    %8 = arith.cmpf oge, %5, %7 : vector<32x512xf32>
    %9 = vector.broadcast %6 : f32 to vector<32x512xf32>
    %10 = arith.mulf %9, %5 : vector<32x512xf32>
    %11 = arith.select %8, %5, %10 : vector<32x512xi1>, vector<32x512xf32>
    %12 = arith.truncf %11 : vector<32x512xf32> to vector<32x512xbf16>
    %c0_8 = arith.constant 0 : index
    %c0_9 = arith.constant 0 : index
    %13 = vector.load %arg5[%c0_8, %c0_9] : memref<32x512xbf16, #tpu.memory_space<vmem>>, vector<32x512xbf16>
    tpu.vector_store %arg5[%c0_8, %c0_9], %12 {strides = array<i32>} : memref<32x512xbf16, #tpu.memory_space<vmem>>, vector<32x512xbf16>,
    return
  }
  func.func @transform_0(%arg0: i32) -> (i32, i32) {
    %c0_i32 = arith.constant 0 : i32
    %c0_i32_0 = arith.constant 0 : i32
    %c0_i32_1 = arith.constant 0 : i32
    return %c0_i32, %c0_i32_0 : i32, i32
  }
  func.func @transform_1(%arg0: i32) -> (i32, i32) {
    %c0_i32 = arith.constant 0 : i32
    %c0_i32_0 = arith.constant 0 : i32
    return %c0_i32, %arg0 : i32, i32
  }
  func.func @transform_2(%arg0: i32) -> (i32, i32) {
    %c0_i32 = arith.constant 0 : i32
    %c0_i32_0 = arith.constant 0 : i32
    %c0_i32_1 = arith.constant 0 : i32
    return %c0_i32, %c0_i32_0 : i32, i32
  }
  func.func @transform_3(%arg0: i32) -> (i32, i32) {
    %c0_i32 = arith.constant 0 : i32
    %c0_i32_0 = arith.constant 0 : i32
    %c0_i32_1 = arith.constant 0 : i32
    return %c0_i32, %c0_i32_0 : i32, i32
  }
  func.func @transform_4(%arg0: i32) -> (i32, i32) {
    %c0_i32 = arith.constant 0 : i32
    %c0_i32_0 = arith.constant 0 : i32
    return %c0_i32, %arg0 : i32, i32
  }
}

module attributes {stable_mosaic.version = 11 : i64} {
  func.func @_mm_bias_act_kernel(%arg0: i32, %arg1: memref<32x160xbf16, #tpu.memory_space<vmem>>, %arg2: memref<160x128xbf16, #tpu.memory_space<vmem>>, %arg3: memref<32x1xf32, #tpu.memory_space<vmem>>, %arg4: memref<1x1xf32, #tpu.memory_space<smem>>, %arg5: memref<32x128xbf16, #tpu.memory_space<vmem>>) attributes {dimension_semantics = [#tpu.dimension_semantics<parallel>], iteration_bounds = array<i64: 1>, scalar_prefetch = 0 : i64, scratch_operands = 0 : i64, tpu.core_type = #tpu.core_type<tc>, window_params = [{pipeline_mode = #tpu.pipeline_mode<synchronous>, transform_indices = @transform_0, window_bounds = array<i64: 32, 160>}, {transform_indices = @transform_1, window_bounds = array<i64: 160, 128>}, {pipeline_mode = #tpu.pipeline_mode<synchronous>, transform_indices = @transform_2, window_bounds = array<i64: 32, 1>}, {transform_indices = @transform_3, window_bounds = array<i64: 1, 1>}, {transform_indices = @transform_4, window_bounds = array<i64: 32, 128>}]} {
    %c0 = arith.constant 0 : index
    %c0_0 = arith.constant 0 : index
    %0 = vector.load %arg1[%c0, %c0_0] : memref<32x160xbf16, #tpu.memory_space<vmem>>, vector<32x160xbf16>
    %c0_1 = arith.constant 0 : index
    %c0_2 = arith.constant 0 : index
    %1 = vector.load %arg2[%c0_1, %c0_2] : memref<160x128xbf16, #tpu.memory_space<vmem>>, vector<160x128xbf16>
    %cst = arith.constant dense<0.000000e+00> : vector<32x128xf32>
    %2 = tpu.matmul %0, %1, %cst {dimension_numbers = #tpu.dot_dimension_numbers<[1], [0], [0], [1], [0, 0, 1, 1], [], []>} : vector<32x160xbf16>, vector<160x128xbf16>, vector<32x128xf32> -> vector<32x128xf32>
    %c0_3 = arith.constant 0 : index
    %c0_4 = arith.constant 0 : index
    %3 = vector.load %arg3[%c0_3, %c0_4] : memref<32x1xf32, #tpu.memory_space<vmem>>, vector<32x1xf32>
    %4 = vector.broadcast %3 : vector<32x1xf32> to vector<32x128xf32>
    %5 = arith.addf %2, %4 : vector<32x128xf32>
    %c0_5 = arith.constant 0 : index
    %c0_6 = arith.constant 0 : index
    %6 = memref.load %arg4[%c0_5, %c0_6] : memref<1x1xf32, #tpu.memory_space<smem>>
    %cst_7 = arith.constant 0.000000e+00 : f32
    %7 = vector.broadcast %cst_7 : f32 to vector<32x128xf32>
    %8 = arith.cmpf oge, %5, %7 : vector<32x128xf32>
    %9 = vector.broadcast %6 : f32 to vector<32x128xf32>
    %10 = arith.mulf %9, %5 : vector<32x128xf32>
    %11 = arith.select %8, %5, %10 : vector<32x128xi1>, vector<32x128xf32>
    %12 = arith.truncf %11 : vector<32x128xf32> to vector<32x128xbf16>
    %c0_8 = arith.constant 0 : index
    %c0_9 = arith.constant 0 : index
    %13 = vector.load %arg5[%c0_8, %c0_9] : memref<32x128xbf16, #tpu.memory_space<vmem>>, vector<32x128xbf16>
    tpu.vector_store %arg5[%c0_8, %c0_9], %12 {strides = array<i32>} : memref<32x128xbf16, #tpu.memory_space<vmem>>, vector<32x128xbf16>,
    return
  }
  func.func @transform_0(%arg0: i32) -> (i32, i32) {
    %c0_i32 = arith.constant 0 : i32
    %c0_i32_0 = arith.constant 0 : i32
    %c0_i32_1 = arith.constant 0 : i32
    return %c0_i32, %c0_i32_0 : i32, i32
  }
  func.func @transform_1(%arg0: i32) -> (i32, i32) {
    %c0_i32 = arith.constant 0 : i32
    %c0_i32_0 = arith.constant 0 : i32
    return %c0_i32, %arg0 : i32, i32
  }
  func.func @transform_2(%arg0: i32) -> (i32, i32) {
    %c0_i32 = arith.constant 0 : i32
    %c0_i32_0 = arith.constant 0 : i32
    %c0_i32_1 = arith.constant 0 : i32
    return %c0_i32, %c0_i32_0 : i32, i32
  }
  func.func @transform_3(%arg0: i32) -> (i32, i32) {
    %c0_i32 = arith.constant 0 : i32
    %c0_i32_0 = arith.constant 0 : i32
    %c0_i32_1 = arith.constant 0 : i32
    return %c0_i32, %c0_i32_0 : i32, i32
  }
  func.func @transform_4(%arg0: i32) -> (i32, i32) {
    %c0_i32 = arith.constant 0 : i32
    %c0_i32_0 = arith.constant 0 : i32
    return %c0_i32, %arg0 : i32, i32
  }
}

module attributes {stable_mosaic.version = 11 : i64} {
  func.func @_mm_bias_act_kernel(%arg0: i32, %arg1: memref<32x192xbf16, #tpu.memory_space<vmem>>, %arg2: memref<192x512xbf16, #tpu.memory_space<vmem>>, %arg3: memref<32x1xf32, #tpu.memory_space<vmem>>, %arg4: memref<1x1xf32, #tpu.memory_space<smem>>, %arg5: memref<32x512xbf16, #tpu.memory_space<vmem>>) attributes {dimension_semantics = [#tpu.dimension_semantics<parallel>], iteration_bounds = array<i64: 1>, scalar_prefetch = 0 : i64, scratch_operands = 0 : i64, tpu.core_type = #tpu.core_type<tc>, window_params = [{pipeline_mode = #tpu.pipeline_mode<synchronous>, transform_indices = @transform_0, window_bounds = array<i64: 32, 192>}, {transform_indices = @transform_1, window_bounds = array<i64: 192, 512>}, {pipeline_mode = #tpu.pipeline_mode<synchronous>, transform_indices = @transform_2, window_bounds = array<i64: 32, 1>}, {transform_indices = @transform_3, window_bounds = array<i64: 1, 1>}, {transform_indices = @transform_4, window_bounds = array<i64: 32, 512>}]} {
    %c0 = arith.constant 0 : index
    %c0_0 = arith.constant 0 : index
    %0 = vector.load %arg1[%c0, %c0_0] : memref<32x192xbf16, #tpu.memory_space<vmem>>, vector<32x192xbf16>
    %c0_1 = arith.constant 0 : index
    %c0_2 = arith.constant 0 : index
    %1 = vector.load %arg2[%c0_1, %c0_2] : memref<192x512xbf16, #tpu.memory_space<vmem>>, vector<192x512xbf16>
    %cst = arith.constant dense<0.000000e+00> : vector<32x512xf32>
    %2 = tpu.matmul %0, %1, %cst {dimension_numbers = #tpu.dot_dimension_numbers<[1], [0], [0], [1], [0, 0, 1, 1], [], []>} : vector<32x192xbf16>, vector<192x512xbf16>, vector<32x512xf32> -> vector<32x512xf32>
    %c0_3 = arith.constant 0 : index
    %c0_4 = arith.constant 0 : index
    %3 = vector.load %arg3[%c0_3, %c0_4] : memref<32x1xf32, #tpu.memory_space<vmem>>, vector<32x1xf32>
    %4 = vector.broadcast %3 : vector<32x1xf32> to vector<32x512xf32>
    %5 = arith.addf %2, %4 : vector<32x512xf32>
    %c0_5 = arith.constant 0 : index
    %c0_6 = arith.constant 0 : index
    %6 = memref.load %arg4[%c0_5, %c0_6] : memref<1x1xf32, #tpu.memory_space<smem>>
    %cst_7 = arith.constant 0.000000e+00 : f32
    %7 = vector.broadcast %cst_7 : f32 to vector<32x512xf32>
    %8 = arith.cmpf oge, %5, %7 : vector<32x512xf32>
    %9 = vector.broadcast %6 : f32 to vector<32x512xf32>
    %10 = arith.mulf %9, %5 : vector<32x512xf32>
    %11 = arith.select %8, %5, %10 : vector<32x512xi1>, vector<32x512xf32>
    %12 = arith.truncf %11 : vector<32x512xf32> to vector<32x512xbf16>
    %c0_8 = arith.constant 0 : index
    %c0_9 = arith.constant 0 : index
    %13 = vector.load %arg5[%c0_8, %c0_9] : memref<32x512xbf16, #tpu.memory_space<vmem>>, vector<32x512xbf16>
    tpu.vector_store %arg5[%c0_8, %c0_9], %12 {strides = array<i32>} : memref<32x512xbf16, #tpu.memory_space<vmem>>, vector<32x512xbf16>,
    return
  }
  func.func @transform_0(%arg0: i32) -> (i32, i32) {
    %c0_i32 = arith.constant 0 : i32
    %c0_i32_0 = arith.constant 0 : i32
    %c0_i32_1 = arith.constant 0 : i32
    return %c0_i32, %c0_i32_0 : i32, i32
  }
  func.func @transform_1(%arg0: i32) -> (i32, i32) {
    %c0_i32 = arith.constant 0 : i32
    %c0_i32_0 = arith.constant 0 : i32
    return %c0_i32, %arg0 : i32, i32
  }
  func.func @transform_2(%arg0: i32) -> (i32, i32) {
    %c0_i32 = arith.constant 0 : i32
    %c0_i32_0 = arith.constant 0 : i32
    %c0_i32_1 = arith.constant 0 : i32
    return %c0_i32, %c0_i32_0 : i32, i32
  }
  func.func @transform_3(%arg0: i32) -> (i32, i32) {
    %c0_i32 = arith.constant 0 : i32
    %c0_i32_0 = arith.constant 0 : i32
    %c0_i32_1 = arith.constant 0 : i32
    return %c0_i32, %c0_i32_0 : i32, i32
  }
  func.func @transform_4(%arg0: i32) -> (i32, i32) {
    %c0_i32 = arith.constant 0 : i32
    %c0_i32_0 = arith.constant 0 : i32
    return %c0_i32, %arg0 : i32, i32
  }
}

module attributes {stable_mosaic.version = 11 : i64} {
  func.func @_mm_bias_act_kernel(%arg0: i32, %arg1: memref<32x192xbf16, #tpu.memory_space<vmem>>, %arg2: memref<192x128xbf16, #tpu.memory_space<vmem>>, %arg3: memref<32x1xf32, #tpu.memory_space<vmem>>, %arg4: memref<1x1xf32, #tpu.memory_space<smem>>, %arg5: memref<32x128xbf16, #tpu.memory_space<vmem>>) attributes {dimension_semantics = [#tpu.dimension_semantics<parallel>], iteration_bounds = array<i64: 1>, scalar_prefetch = 0 : i64, scratch_operands = 0 : i64, tpu.core_type = #tpu.core_type<tc>, window_params = [{pipeline_mode = #tpu.pipeline_mode<synchronous>, transform_indices = @transform_0, window_bounds = array<i64: 32, 192>}, {transform_indices = @transform_1, window_bounds = array<i64: 192, 128>}, {pipeline_mode = #tpu.pipeline_mode<synchronous>, transform_indices = @transform_2, window_bounds = array<i64: 32, 1>}, {transform_indices = @transform_3, window_bounds = array<i64: 1, 1>}, {transform_indices = @transform_4, window_bounds = array<i64: 32, 128>}]} {
    %c0 = arith.constant 0 : index
    %c0_0 = arith.constant 0 : index
    %0 = vector.load %arg1[%c0, %c0_0] : memref<32x192xbf16, #tpu.memory_space<vmem>>, vector<32x192xbf16>
    %c0_1 = arith.constant 0 : index
    %c0_2 = arith.constant 0 : index
    %1 = vector.load %arg2[%c0_1, %c0_2] : memref<192x128xbf16, #tpu.memory_space<vmem>>, vector<192x128xbf16>
    %cst = arith.constant dense<0.000000e+00> : vector<32x128xf32>
    %2 = tpu.matmul %0, %1, %cst {dimension_numbers = #tpu.dot_dimension_numbers<[1], [0], [0], [1], [0, 0, 1, 1], [], []>} : vector<32x192xbf16>, vector<192x128xbf16>, vector<32x128xf32> -> vector<32x128xf32>
    %c0_3 = arith.constant 0 : index
    %c0_4 = arith.constant 0 : index
    %3 = vector.load %arg3[%c0_3, %c0_4] : memref<32x1xf32, #tpu.memory_space<vmem>>, vector<32x1xf32>
    %4 = vector.broadcast %3 : vector<32x1xf32> to vector<32x128xf32>
    %5 = arith.addf %2, %4 : vector<32x128xf32>
    %c0_5 = arith.constant 0 : index
    %c0_6 = arith.constant 0 : index
    %6 = memref.load %arg4[%c0_5, %c0_6] : memref<1x1xf32, #tpu.memory_space<smem>>
    %cst_7 = arith.constant 0.000000e+00 : f32
    %7 = vector.broadcast %cst_7 : f32 to vector<32x128xf32>
    %8 = arith.cmpf oge, %5, %7 : vector<32x128xf32>
    %9 = vector.broadcast %6 : f32 to vector<32x128xf32>
    %10 = arith.mulf %9, %5 : vector<32x128xf32>
    %11 = arith.select %8, %5, %10 : vector<32x128xi1>, vector<32x128xf32>
    %12 = arith.truncf %11 : vector<32x128xf32> to vector<32x128xbf16>
    %c0_8 = arith.constant 0 : index
    %c0_9 = arith.constant 0 : index
    %13 = vector.load %arg5[%c0_8, %c0_9] : memref<32x128xbf16, #tpu.memory_space<vmem>>, vector<32x128xbf16>
    tpu.vector_store %arg5[%c0_8, %c0_9], %12 {strides = array<i32>} : memref<32x128xbf16, #tpu.memory_space<vmem>>, vector<32x128xbf16>,
    return
  }
  func.func @transform_0(%arg0: i32) -> (i32, i32) {
    %c0_i32 = arith.constant 0 : i32
    %c0_i32_0 = arith.constant 0 : i32
    %c0_i32_1 = arith.constant 0 : i32
    return %c0_i32, %c0_i32_0 : i32, i32
  }
  func.func @transform_1(%arg0: i32) -> (i32, i32) {
    %c0_i32 = arith.constant 0 : i32
    %c0_i32_0 = arith.constant 0 : i32
    return %c0_i32, %arg0 : i32, i32
  }
  func.func @transform_2(%arg0: i32) -> (i32, i32) {
    %c0_i32 = arith.constant 0 : i32
    %c0_i32_0 = arith.constant 0 : i32
    %c0_i32_1 = arith.constant 0 : i32
    return %c0_i32, %c0_i32_0 : i32, i32
  }
  func.func @transform_3(%arg0: i32) -> (i32, i32) {
    %c0_i32 = arith.constant 0 : i32
    %c0_i32_0 = arith.constant 0 : i32
    %c0_i32_1 = arith.constant 0 : i32
    return %c0_i32, %c0_i32_0 : i32, i32
  }
  func.func @transform_4(%arg0: i32) -> (i32, i32) {
    %c0_i32 = arith.constant 0 : i32
    %c0_i32_0 = arith.constant 0 : i32
    return %c0_i32, %arg0 : i32, i32
  }
}

module attributes {stable_mosaic.version = 11 : i64} {
  func.func @_mm_bias_act_kernel(%arg0: i32, %arg1: memref<3x2016xbf16, #tpu.memory_space<vmem>>, %arg2: memref<2016x512xbf16, #tpu.memory_space<vmem>>, %arg3: memref<3x1xf32, #tpu.memory_space<vmem>>, %arg4: memref<1x1xf32, #tpu.memory_space<smem>>, %arg5: memref<3x512xbf16, #tpu.memory_space<vmem>>) attributes {dimension_semantics = [#tpu.dimension_semantics<parallel>], iteration_bounds = array<i64: 1>, scalar_prefetch = 0 : i64, scratch_operands = 0 : i64, tpu.core_type = #tpu.core_type<tc>, window_params = [{pipeline_mode = #tpu.pipeline_mode<synchronous>, transform_indices = @transform_0, window_bounds = array<i64: 3, 2016>}, {transform_indices = @transform_1, window_bounds = array<i64: 2016, 512>}, {pipeline_mode = #tpu.pipeline_mode<synchronous>, transform_indices = @transform_2, window_bounds = array<i64: 3, 1>}, {transform_indices = @transform_3, window_bounds = array<i64: 1, 1>}, {transform_indices = @transform_4, window_bounds = array<i64: 3, 512>}]} {
    %c0 = arith.constant 0 : index
    %c0_0 = arith.constant 0 : index
    %0 = vector.load %arg1[%c0, %c0_0] : memref<3x2016xbf16, #tpu.memory_space<vmem>>, vector<3x2016xbf16>
    %c0_1 = arith.constant 0 : index
    %c0_2 = arith.constant 0 : index
    %1 = vector.load %arg2[%c0_1, %c0_2] : memref<2016x512xbf16, #tpu.memory_space<vmem>>, vector<2016x512xbf16>
    %cst = arith.constant dense<0.000000e+00> : vector<3x512xf32>
    %2 = tpu.matmul %0, %1, %cst {dimension_numbers = #tpu.dot_dimension_numbers<[1], [0], [0], [1], [0, 0, 1, 1], [], []>} : vector<3x2016xbf16>, vector<2016x512xbf16>, vector<3x512xf32> -> vector<3x512xf32>
    %c0_3 = arith.constant 0 : index
    %c0_4 = arith.constant 0 : index
    %3 = vector.load %arg3[%c0_3, %c0_4] : memref<3x1xf32, #tpu.memory_space<vmem>>, vector<3x1xf32>
    %4 = vector.broadcast %3 : vector<3x1xf32> to vector<3x512xf32>
    %5 = arith.addf %2, %4 : vector<3x512xf32>
    %6 = arith.truncf %5 : vector<3x512xf32> to vector<3x512xbf16>
    %c0_5 = arith.constant 0 : index
    %c0_6 = arith.constant 0 : index
    %7 = vector.load %arg5[%c0_5, %c0_6] : memref<3x512xbf16, #tpu.memory_space<vmem>>, vector<3x512xbf16>
    tpu.vector_store %arg5[%c0_5, %c0_6], %6 {strides = array<i32>} : memref<3x512xbf16, #tpu.memory_space<vmem>>, vector<3x512xbf16>,
    return
  }
  func.func @transform_0(%arg0: i32) -> (i32, i32) {
    %c0_i32 = arith.constant 0 : i32
    %c0_i32_0 = arith.constant 0 : i32
    %c0_i32_1 = arith.constant 0 : i32
    return %c0_i32, %c0_i32_0 : i32, i32
  }
  func.func @transform_1(%arg0: i32) -> (i32, i32) {
    %c0_i32 = arith.constant 0 : i32
    %c0_i32_0 = arith.constant 0 : i32
    return %c0_i32, %arg0 : i32, i32
  }
  func.func @transform_2(%arg0: i32) -> (i32, i32) {
    %c0_i32 = arith.constant 0 : i32
    %c0_i32_0 = arith.constant 0 : i32
    %c0_i32_1 = arith.constant 0 : i32
    return %c0_i32, %c0_i32_0 : i32, i32
  }
  func.func @transform_3(%arg0: i32) -> (i32, i32) {
    %c0_i32 = arith.constant 0 : i32
    %c0_i32_0 = arith.constant 0 : i32
    %c0_i32_1 = arith.constant 0 : i32
    return %c0_i32, %c0_i32_0 : i32, i32
  }
  func.func @transform_4(%arg0: i32) -> (i32, i32) {
    %c0_i32 = arith.constant 0 : i32
    %c0_i32_0 = arith.constant 0 : i32
    return %c0_i32, %arg0 : i32, i32
  }
}

</mosaic_0001>

<bundles_post_ra>
// kernel: net7_forward.52
= control target key start
LH: loop header
LB: loop body
LE: loop exit
PB: predicated region body
PF: predicated region fallthrough
CT: control target
= control target key end

     0   :  { %vm123_vm0 = vcmask 1044480   ;;  %vm124_vm1 = vcmask 1045504   ;;  %vm110_vm2 = vcmask 220160   ;;  %v346_v1 = vmov 65535   ;;  %s436_s1 = inlined_call_operand.vmem [shape: bf16[27,128], index: 1, kind: input, shape index: {}]   ;;  %s437_s0 = inlined_call_operand.vmem [shape: bf16[64,27], index: 0, kind: input, shape index: {}]   ;;  %s438_s2 = inlined_call_operand.vmem [shape: f32[64,1], index: 2, kind: input, shape index: {}]   ;;  %s439_s3 = inlined_call_operand.<no memory space> [shape: f32[1,1], index: 3, kind: input, shape index: {}]   ;;  %s440_s4 = inlined_call_operand.vmem [shape: bf16[64,128], index: 4, kind: output, shape index: {}]  }
   0x1   :  { %v340_v0 = vld [vmem:[%s436_s1] sm:$0xff]   ;;  %v125_v2 = vsel %vm123_vm0, 4294967295, %v346_v1  ;;  %v341_v3 = vld [vmem:[%s436_s1 + $0x8] sm:$0x3f]   ;;  %v343_v7 = vld [vmem:[%s437_s0 + $0x10] sm:$0xff]   ;;  %v347_v8 = vmov 0   ;;  %v204_v27 = vstv %s439_s3 }
   0x2   :  { %320 = vmatprep.subr.bf16.mxu0 %v340_v0  ;;  %332 = vmatprep.subr.bf16.mxu1 %v340_v0  ;;  %v126_v4 = vsel %vm124_vm1, %v125_v2, 0  ;;  %v342_v5 = vld [vmem:[%s437_s0] sm:$0xff]   ;;  %v344_v9 = vld [vmem:[%s437_s0 + $0x8] sm:$0xff]   ;;  %v345_v10 = vld [vmem:[%s437_s0 + $0x18] sm:$0xff]  }
   0x3   :  { %321 = vmatpush3.bf16.msra.mxu0 %v340_v0  ;;  %334 = vmatpush3.bf16.msra.mxu1 %v340_v0  ;;  %v128_v6 = vand.u32 %v341_v3, %v126_v4  ;;  %v33_v11 = vld [vmem:[%s438_s2 + $0x10] sm:$0xff]  ;;  %v31_v12 = vld [vmem:[%s438_s2] sm:$0xff]  ;;  %v34_v13 = vld [vmem:[%s438_s2 + $0x18] sm:$0xff] }
   0x4   :  { %324 = vmatprep.mubr.msk.bf16.mxu0 %vm110_vm2, %v342_v5  ;;  %339 = vset.pattern.permute.xlu1 %v347_v8  ;;  %v32_v14 = vld [vmem:[%s438_s2 + $0x8] sm:$0xff]  ;;  %v35_v16 = vld [vmem:[%s438_s2 + $0x20] sm:$0xff]  ;;  %v38_v17 = vld [vmem:[%s438_s2 + $0x38] sm:$0xff] }
   0x5   :  { %322 = vmatprep.subr.bf16.mxu0 %v128_v6  ;;  %333 = vmatprep.subr.bf16.mxu1 %v128_v6  ;;  %v36_v15 = vld [vmem:[%s438_s2 + $0x28] sm:$0xff]  ;;  %v37_v18 = vld [vmem:[%s438_s2 + $0x30] sm:$0xff] }
   0x6   :  { %328 = vmatprep.mubr.msk.bf16.mxu1 %vm110_vm2, %v343_v7  ;;  %338 = vset.pattern.permute.xlu0 %v347_v8 }
   0x7   :  { %323 = vmatpush3.bf16.msra.mxu0 %v128_v6  ;;  %335 = vmatpush3.bf16.msra.mxu1 %v128_v6 }
   0x8   :  { %51 = vperm.xlu1 %339, %v33_v11   ;;  %41 = vperm.xlu0 %338, %v31_v12  }
   0xa   :  { %325 = vmatmul.mubr.msk.bf16.vlgmr.msra.gmra.mrb[0].mxu0 %vm110_vm2, %v344_v9  ;;  %329 = vmatmul.mubr.msk.bf16.vlgmr.msra.gmra.mrb[0].mxu1 %vm110_vm2, %v345_v10 }
   0xc   :  { %56 = vperm.xlu1 %339, %v34_v13   ;;  %46 = vperm.xlu0 %338, %v32_v14  }
  0x10   :  { %66 = vperm.xlu1 %339, %v36_v15   ;;  %61 = vperm.xlu0 %338, %v35_v16  }
  0x14   :  { %76 = vperm.xlu1 %339, %v38_v17   ;;  %71 = vperm.xlu0 %338, %v37_v18  }
  0x87   :  { %v42_v19 = vpop.permute.xlu0 %41  ;;  %v52_v20 = vpop.permute.xlu1 %51 }
  0x8b   :  { %v47_v21 = vpop.permute.xlu0 %46  ;;  %v57_v22 = vpop.permute.xlu1 %56 }
  0x8f   :  { %v62_v23 = vpop.permute.xlu0 %61  ;;  %v67_v24 = vpop.permute.xlu1 %66 }
  0x93   :  { %v72_v25 = vpop.permute.xlu0 %71  ;;  %v77_v41 = vpop.permute.xlu1 %76 }
  0xdd   :  { %v326_v26 = vpop.f32.mrb[0].mxu0  ;;  %v330_v28 = vpop.f32.mrb[0].mxu1 }
  0xde   :  { %v173_v29 = vadd.f32 %v326_v26, %v52_v20  ;;  %v189_v30 = vadd.f32 %v330_v28, %v72_v25  ;;  %v164_v31 = vpop.f32.mrb[1].mxu0  ;;  %v180_v32 = vpop.f32.mrb[1].mxu1 }
  0xdf   :  { %v165_v33 = vadd.f32 %v164_v31, %v42_v19  ;;  %v181_v34 = vadd.f32 %v180_v32, %v62_v23  ;;  %v327_v35 = vpop.f32.mrb[2].mxu0  ;;  %v331_v36 = vpop.f32.mrb[2].mxu1 }
  0xe0   :  { %vm198_vm3 = vcmp.ge.f32.partialorder %v173_v29, 0.0  ;;  %v207_v37 = vmul.f32 %v204_v27, %v173_v29  ;;  %vm202_vm4 = vcmp.ge.f32.partialorder %v189_v30, 0.0  ;;  %v211_v38 = vmul.f32 %v204_v27, %v189_v30  ;;  %v167_v39 = vpop.f32.mrb[3].mxu0  ;;  %v183_v40 = vpop.f32.mrb[3].mxu1 }
  0xe1   :  { %vm196_vm5 = vcmp.ge.f32.partialorder %v165_v33, 0.0  ;;  %v205_v42 = vmul.f32 %v204_v27, %v165_v33  ;;  %vm200_vm6 = vcmp.ge.f32.partialorder %v181_v34, 0.0  ;;  %v209_v43 = vmul.f32 %v204_v27, %v181_v34 }
  0xe2   :  { %v176_v44 = vadd.f32 %v327_v35, %v57_v22  ;;  %v192_v45 = vadd.f32 %v331_v36, %v77_v41  ;;  %v215_v46 = vsel %vm198_vm3, %v173_v29, %v207_v37  ;;  %v219_v47 = vsel %vm202_vm4, %v189_v30, %v211_v38 }
  0xe3   :  { %v168_v48 = vadd.f32 %v167_v39, %v47_v21  ;;  %v184_v49 = vadd.f32 %v183_v40, %v67_v24  ;;  %v213_v54 = vsel %vm196_vm5, %v165_v33, %v205_v42  ;;  %v217_v55 = vsel %vm200_vm6, %v181_v34, %v209_v43 }
  0xe4   :  { %vm199_vm7 = vcmp.ge.f32.partialorder %v176_v44, 0.0  ;;  %v208_v50 = vmul.f32 %v204_v27, %v176_v44  ;;  %vm203_vm8 = vcmp.ge.f32.partialorder %v192_v45, 0.0  ;;  %v212_v51 = vmul.f32 %v204_v27, %v192_v45 }
  0xe5   :  { %vm197_vm9 = vcmp.ge.f32.partialorder %v168_v48, 0.0  ;;  %v206_v52 = vmul.f32 %v204_v27, %v168_v48  ;;  %vm201_vm10 = vcmp.ge.f32.partialorder %v184_v49, 0.0  ;;  %v210_v53 = vmul.f32 %v204_v27, %v184_v49 }
  0xe6   :  { %v216_v56 = vsel %vm199_vm7, %v176_v44, %v208_v50  ;;  %v220_v57 = vsel %vm203_vm8, %v192_v45, %v212_v51 }
  0xe7   :  { %v299_v58 = vpack.c.bf16 %v216_v56, %v215_v46  ;;  %v309_v59 = vpack.c.bf16 %v220_v57, %v219_v47  ;;  %v214_v60 = vsel %vm197_vm9, %v168_v48, %v206_v52  ;;  %v218_v61 = vsel %vm201_vm10, %v184_v49, %v210_v53 }
  0xe8   :  { %v294_v62 = vpack.c.bf16 %v214_v60, %v213_v54  ;;  %v304_v63 = vpack.c.bf16 %v218_v61, %v217_v55 }
  0xe9   :  { %311 = vst [vmem:[%s440_s4 + $0x8] sm:$0xff] %v299_v58   ;;  %313 = vst [vmem:[%s440_s4 + $0x18] sm:$0xff] %v309_v59  }
  0xea   :  { %295 = vst [vmem:[%s440_s4] sm:$0xff] %v294_v62   ;;  %312 = vst [vmem:[%s440_s4 + $0x10] sm:$0xff] %v304_v63  }

// kernel: net7_forward.53
= control target key start
LH: loop header
LB: loop body
LE: loop exit
PB: predicated region body
PF: predicated region fallthrough
CT: control target
= control target key end

     0   :  { %10 = vsyncpa [#allocation4], 0  ;;  %s279_s15 = smov [#allocation3]   ;;  %s355_s0 = inlined_call_operand.hbm [shape: bf16[32,64], index: 0, kind: input, shape index: {}]   ;;  %s356_s1 = inlined_call_operand.vmem [shape: bf16[64,128], index: 1, kind: input, shape index: {}]   ;;  %s357_s2 = inlined_call_operand.vmem [shape: f32[32,1], index: 2, kind: input, shape index: {}]   ;;  %s358_s3 = inlined_call_operand.<no memory space> [shape: f32[1,1], index: 3, kind: input, shape index: {}]   ;;  %s359_s4 = inlined_call_operand.vmem [shape: bf16[32,128], index: 4, kind: output, shape index: {}]  }
   0x1   :  { %s16_s16 = sshll.u32 %s279_s15, 4  ;;  %s255_s19 = scalar_lea.hbm %s355_s0, 256  ;;  %s17_s16 = int_to_ptr.vmem [resolvable:$true] %s16_s16 }
   0x2   :  { %p256_p0 = scmp.ne.s32.totalorder %s355_s0, %s255_s19  ;;  %p259_p1 = scmp.lt.u32.totalorder %s255_s19, %s355_s0 }
   0x4   :  { %p261_p2 = pnand %p259_p1, %p256_p0 }
   0x6   :  { %264 = shalt.err (!%p261_p2)
}
   0x7   :  { %s265_s24 = scalar_lea.vmem %s17_s16, 256  ;;  %p270_p4 = scmp.lt.s32.totalorder %s17_s16, %s17_s16 }
   0x8   :  { %p266_p3 = scmp.ne.s32.totalorder %s17_s16, %s265_s24  ;;  %p271_p5 = scmp.lt.s32.totalorder %s265_s24, %s265_s24 }
   0xa   :  { %p272_p6 = por %p271_p5, %p270_p4 }
   0xc   :  { %p273_p7 = pnand %p272_p6, %p266_p3 }
   0xe   :  { %276 = shalt.err (!%p273_p7)
}
   0xf   :  { %s280_s25 = smov 64   ;;  %s281_s26 = smov 4  }
  0x10   :  { %22 = dma.hbm_to_vmem [thread:$0]  %s355_s0, 256, %s17_s16, [#allocation4], %s280_s25, %s280_s25, %s281_s26  }
  0x11   :  { %277 = dma.done.wait [#allocation4], 256  }
  0x12   :  { %278 = vsyncadd [#allocation4], 4294967040  ;;  %v282_v0 = vmov 0   ;;  %v249_v1 = vld [vmem:[%s356_s1] sm:$0xff]   ;;  %v250_v2 = vld [vmem:[%s356_s1 + $0x8] sm:$0xff]   ;;  %vm103_vm0 = vcmask 523264   ;;  %v164_v14 = vstv %s358_s3 }
  0x13   :  { %248 = vset.pattern.permute.xlu1 %v282_v0  ;;  %247 = vset.pattern.permute.xlu0 %v282_v0  ;;  %v251_v3 = vld [vmem:[%s356_s1 + $0x10] sm:$0xff]   ;;  %v253_v4 = vld [vmem:[#allocation3] sm:$0xff]   ;;  %v252_v7 = vld [vmem:[%s356_s1 + $0x18] sm:$0xff]  }
  0x14   :  { %231 = vmatprep.subr.bf16.mxu0 %v249_v1  ;;  %239 = vmatprep.mubr.msk.bf16.mxu0 %vm103_vm0, %v253_v4  ;;  %v47_v5 = vld [vmem:[%s357_s2 + $0x10] sm:$0xff]  ;;  %v45_v6 = vld [vmem:[%s357_s2] sm:$0xff]  ;;  %v48_v8 = vld [vmem:[%s357_s2 + $0x18] sm:$0xff] }
  0x15   :  { %232 = vmatpush3.bf16.msra.mxu0 %v249_v1  ;;  %61 = vperm.xlu1 %248, %v47_v5   ;;  %v46_v9 = vld [vmem:[%s357_s2 + $0x8] sm:$0xff] }
  0x16   :  { %233 = vmatprep.subr.bf16.mxu0 %v250_v2  ;;  %51 = vperm.xlu0 %247, %v45_v6   ;;  %v254_v10 = vld [vmem:[#allocation3 + $0x8] sm:$0xff]  }
  0x19   :  { %234 = vmatpush3.bf16.msra.mxu0 %v250_v2  ;;  %66 = vperm.xlu1 %248, %v48_v8  }
  0x1a   :  { %235 = vmatprep.subr.bf16.mxu0 %v251_v3  ;;  %56 = vperm.xlu0 %247, %v46_v9  }
  0x1d   :  { %236 = vmatpush3.bf16.msra.mxu0 %v251_v3 }
  0x1e   :  { %237 = vmatprep.subr.bf16.mxu0 %v252_v7 }
  0x21   :  { %238 = vmatpush3.bf16.msra.mxu0 %v252_v7 }
  0x24   :  { %240 = vmatmul.mubr.msk.bf16.vlgmr.msra.gmra.mrb[0].mxu0 %vm103_vm0, %v254_v10 }
  0x94   :  { %v62_v11 = vpop.permute.xlu1 %61 }
  0x95   :  { %v52_v12 = vpop.permute.xlu0 %51 }
  0x98   :  { %v67_v17 = vpop.permute.xlu1 %66 }
  0x99   :  { %v57_v20 = vpop.permute.xlu0 %56 }
  0xf7   :  { %v241_v13 = vpop.f32.mrb[0].mxu0 }
  0xf8   :  { %v153_v15 = vadd.f32 %v241_v13, %v62_v11  ;;  %v144_v16 = vpop.f32.mrb[1].mxu0 }
  0xf9   :  { %v145_v18 = vadd.f32 %v144_v16, %v52_v12  ;;  %v242_v19 = vpop.f32.mrb[2].mxu0 }
  0xfa   :  { %v167_v21 = vmul.f32 %v164_v14, %v153_v15  ;;  %v156_v22 = vadd.f32 %v242_v19, %v67_v17  ;;  %v147_v23 = vpop.f32.mrb[3].mxu0  ;;  %vm162_vm1 = vcmp.ge.f32.partialorder %v153_v15, 0.0 }
  0xfb   :  { %v165_v24 = vmul.f32 %v164_v14, %v145_v18  ;;  %v148_v25 = vadd.f32 %v147_v23, %v57_v20  ;;  %vm160_vm2 = vcmp.ge.f32.partialorder %v145_v18, 0.0 }
  0xfc   :  { %vm163_vm3 = vcmp.ge.f32.partialorder %v156_v22, 0.0  ;;  %v168_v26 = vmul.f32 %v164_v14, %v156_v22  ;;  %v171_v28 = vsel %vm162_vm1, %v153_v15, %v167_v21 }
  0xfd   :  { %vm161_vm4 = vcmp.ge.f32.partialorder %v148_v25, 0.0  ;;  %v166_v27 = vmul.f32 %v164_v14, %v148_v25  ;;  %v169_v30 = vsel %vm160_vm2, %v145_v18, %v165_v24 }
  0xfe   :  { %v172_v29 = vsel %vm163_vm3, %v156_v22, %v168_v26 }
  0xff   :  { %v222_v31 = vpack.c.bf16 %v172_v29, %v171_v28  ;;  %v170_v32 = vsel %vm161_vm4, %v148_v25, %v166_v27 }
 0x100   :  { %v217_v33 = vpack.c.bf16 %v170_v32, %v169_v30 }
 0x101   :  { %224 = vst [vmem:[%s359_s4 + $0x8] sm:$0xff] %v222_v31  }
 0x102   :  { %218 = vst [vmem:[%s359_s4] sm:$0xff] %v217_v33  }
 0x103   :  { %197 = vsyncpa [#allocation4], 1 }

// kernel: net7_forward.54
= control target key start
LH: loop header
LB: loop body
LE: loop exit
PB: predicated region body
PF: predicated region fallthrough
CT: control target
= control target key end

     0   :  { %v1056_v1 = vmov 0   ;;  %vm411_vm0 = vcmask 261120   ;;  %s1346_s1 = inlined_call_operand.vmem [shape: bf16[288,128], index: 1, kind: input, shape index: {}]   ;;  %s1347_s0 = inlined_call_operand.vmem [shape: bf16[128,288], index: 0, kind: input, shape index: {}]   ;;  %s1348_s2 = inlined_call_operand.vmem [shape: f32[128,1], index: 2, kind: input, shape index: {}]   ;;  %s1349_s3 = inlined_call_operand.<no memory space> [shape: f32[1,1], index: 3, kind: input, shape index: {}]   ;;  %s1350_s4 = inlined_call_operand.vmem [shape: bf16[128,128], index: 4, kind: output, shape index: {}]  }
   0x1   :  { %v1006_v0 = vld [vmem:[%s1346_s1 + $0x40] sm:$0xff]   ;;  %1005 = vset.pattern.permute.xlu1 %v1056_v1  ;;  %1004 = vset.pattern.permute.xlu0 %v1056_v1  ;;  %v1008_v3 = vld [vmem:[%s1346_s1 + $0x48] sm:$0xff]   ;;  %v1010_v5 = vld [vmem:[%s1346_s1 + $0x50] sm:$0xff]  }
   0x2   :  { %v1007_v2 = vld [vmem:[%s1346_s1] sm:$0xff]   ;;  %893 = vmatprep.subr.bf16.mxu0 %v1006_v0  ;;  %987 = vmatprep.subr.bf16.mxu1 %v1006_v0  ;;  %v1009_v4 = vld [vmem:[%s1346_s1 + $0x8] sm:$0xff]   ;;  %v1011_v6 = vld [vmem:[%s1346_s1 + $0x10] sm:$0xff]  }
   0x3   :  { %894 = vmatpush3.bf16.msra.mxu0 %v1007_v2  ;;  %995 = vmatpush3.bf16.msra.mxu1 %v1007_v2  ;;  %v1012_v7 = vld [vmem:[%s1346_s1 + $0x58] sm:$0xff]   ;;  %v1014_v9 = vld [vmem:[%s1346_s1 + $0x60] sm:$0xff]   ;;  %v1016_v11 = vld [vmem:[%s1346_s1 + $0x68] sm:$0xff]  }
   0x4   :  { %895 = vmatprep.subr.bf16.mxu0 %v1008_v3  ;;  %988 = vmatprep.subr.bf16.mxu1 %v1008_v3  ;;  %v1013_v8 = vld [vmem:[%s1346_s1 + $0x18] sm:$0xff]   ;;  %v1015_v10 = vld [vmem:[%s1346_s1 + $0x20] sm:$0xff]   ;;  %v1017_v14 = vld [vmem:[%s1346_s1 + $0x28] sm:$0xff]  }
   0x5   :  { %v1024_v12 = vld [vmem:[%s1347_s0 + $0x4] ss:$12 sps:$4 sm:$0xff]   ;;  %v1027_v13 = vld [vmem:[%s1347_s0 + $0x94] ss:$12 sps:$4 sm:$0xff]   ;;  %v1020_v17 = vld [vmem:[%s1346_s1 + $0x78] sm:$0xff]  }
   0x6   :  { %v1018_v15 = vld [vmem:[%s1346_s1 + $0x70] sm:$0xff]   ;;  %468 = vmatprep.mubr.bf16.mxu0 %v1024_v12  ;;  %516 = vmatprep.mubr.bf16.mxu1 %v1027_v13  ;;  %v1021_v18 = vld [vmem:[%s1346_s1 + $0x38] sm:$0xff]   ;;  %v1022_v19 = vld [vmem:[%s1347_s0] ss:$12 sps:$4 sm:$0xff]  }
   0x7   :  { %896 = vmatpush3.bf16.msra.mxu0 %v1009_v4  ;;  %996 = vmatpush3.bf16.msra.mxu1 %v1009_v4  ;;  %v1019_v16 = vld [vmem:[%s1346_s1 + $0x30] sm:$0xff]   ;;  %v1028_v20 = vld [vmem:[%s1346_s1 + $0x80] sm:$0xff]   ;;  %v1029_v22 = vld [vmem:[%s1347_s0 + $0x1c] ss:$12 sps:$4 sm:$0xff]  }
   0x8   :  { %897 = vmatprep.subr.bf16.mxu0 %v1010_v5  ;;  %989 = vmatprep.subr.bf16.mxu1 %v1010_v5  ;;  %v1025_v21 = vld [vmem:[%s1347_s0 + $0x90] ss:$12 sps:$4 sm:$0xff]   ;;  %v1031_v23 = vld [vmem:[%s1347_s0 + $0xac] ss:$12 sps:$4 sm:$0xff]   ;;  %v87_v26 = vld [vmem:[%s1348_s2] sm:$0xff] }
   0x9   :  { %v1035_v24 = vld [vmem:[%s1346_s1 + $0x88] sm:$0xff]   ;;  %v89_v25 = vld [vmem:[%s1348_s2 + $0x10] sm:$0xff]  ;;  %v1033_v27 = vld [vmem:[%s1347_s0 + $0x18] ss:$12 sps:$4 sm:$0xff]   ;;  %105 = vperm.xlu0 %1004, %v87_v26  }
   0xa   :  { %115 = vperm.xlu1 %1005, %v89_v25   ;;  %v1034_v28 = vld [vmem:[%s1347_s0 + $0xa8] ss:$12 sps:$4 sm:$0xff]   ;;  %v90_v29 = vld [vmem:[%s1348_s2 + $0x18] sm:$0xff]  ;;  %v91_v34 = vld [vmem:[%s1348_s2 + $0x20] sm:$0xff] }
   0xb   :  { %898 = vmatpush3.bf16.msra.mxu0 %v1011_v6  ;;  %997 = vmatpush3.bf16.msra.mxu1 %v1011_v6  ;;  %v1036_v30 = vld [vmem:[%s1347_s0 + $0x34] ss:$12 sps:$4 sm:$0xff]   ;;  %v88_v32 = vld [vmem:[%s1348_s2 + $0x8] sm:$0xff]  ;;  %v1039_v35 = vld [vmem:[%s1347_s0 + $0x30] ss:$12 sps:$4 sm:$0xff]  }
   0xc   :  { %899 = vmatprep.subr.bf16.mxu0 %v1012_v7  ;;  %990 = vmatprep.subr.bf16.mxu1 %v1012_v7  ;;  %v1038_v31 = vld [vmem:[%s1347_s0 + $0x8] ss:$12 sps:$4 sm:$0xff]   ;;  %v1040_v36 = vld [vmem:[%s1347_s0 + $0x20] ss:$12 sps:$4 sm:$0xff]   ;;  %v94_v37 = vld [vmem:[%s1348_s2 + $0x38] sm:$0xff] }
   0xd   :  { %v92_v33 = vld [vmem:[%s1348_s2 + $0x28] sm:$0xff]  ;;  %110 = vperm.xlu0 %1004, %v88_v32   ;;  %v1043_v39 = vld [vmem:[%s1347_s0 + $0x38] ss:$12 sps:$4 sm:$0xff]   ;;  %v93_v40 = vld [vmem:[%s1348_s2 + $0x30] sm:$0xff]  ;;  %v1287_v32 = vstv %s1349_s3 }
   0xe   :  { %120 = vperm.xlu1 %1005, %v90_v29   ;;  %v1041_v38 = vld [vmem:[%s1347_s0 + $0x4c] ss:$12 sps:$4 sm:$0xff]   ;;  %v95_v42 = vld [vmem:[%s1348_s2 + $0x40] sm:$0xff]  ;;  %v1044_v43 = vld [vmem:[%s1347_s0 + $0x48] ss:$12 sps:$4 sm:$0xff]  }
   0xf   :  { %900 = vmatpush3.bf16.msra.mxu0 %v1013_v8  ;;  %998 = vmatpush3.bf16.msra.mxu1 %v1013_v8  ;;  %v96_v41 = vld [vmem:[%s1348_s2 + $0x48] sm:$0xff]  ;;  %v1045_v44 = vld [vmem:[%s1347_s0 + $0x50] ss:$12 sps:$4 sm:$0xff]   ;;  %v99_v50 = vld [vmem:[%s1348_s2 + $0x60] sm:$0xff] }
  0x10   :  { %901 = vmatprep.subr.bf16.mxu0 %v1014_v9  ;;  %991 = vmatprep.subr.bf16.mxu1 %v1014_v9  ;;  %v98_v45 = vld [vmem:[%s1348_s2 + $0x58] sm:$0xff]  ;;  %v1046_v46 = vld [vmem:[%s1347_s0 + $0x64] ss:$12 sps:$4 sm:$0xff]   ;;  %v1048_v47 = vld [vmem:[%s1347_s0 + $0x68] ss:$12 sps:$4 sm:$0xff]  }
  0x11   :  { %125 = vperm.xlu0 %1004, %v91_v34   ;;  %v97_v48 = vld [vmem:[%s1348_s2 + $0x50] sm:$0xff]  ;;  %v100_v49 = vld [vmem:[%s1348_s2 + $0x68] sm:$0xff]  ;;  %v102_v53 = vld [vmem:[%s1348_s2 + $0x78] sm:$0xff] }
  0x12   :  { %130 = vperm.xlu1 %1005, %v92_v33   ;;  %v1049_v51 = vld [vmem:[%s1347_s0 + $0x60] ss:$12 sps:$4 sm:$0xff]   ;;  %v1051_v54 = vld [vmem:[%s1347_s0 + $0x7c] ss:$12 sps:$4 sm:$0xff]   ;;  %v1053_v55 = vld [vmem:[%s1347_s0 + $0x98] ss:$12 sps:$4 sm:$0xff]  }
  0x13   :  { %902 = vmatpush3.bf16.msra.mxu0 %v1015_v10  ;;  %999 = vmatpush3.bf16.msra.mxu1 %v1015_v10  ;;  %v1050_v52 = vld [vmem:[%s1347_s0 + $0x80] ss:$12 sps:$4 sm:$0xff]   ;;  %v101_v56 = vld [vmem:[%s1348_s2 + $0x70] sm:$0xff]  ;;  %v1054_v57 = vld [vmem:[%s1347_s0 + $0x78] ss:$12 sps:$4 sm:$0xff]  }
  0x14   :  { %903 = vmatprep.subr.bf16.mxu0 %v1016_v11  ;;  %992 = vmatprep.subr.bf16.mxu1 %v1016_v11  ;;  %v1055_v58 = vld [vmem:[%s1347_s0 + $0xb0] ss:$12 sps:$4 sm:$0xff]  }
  0x15   :  { %135 = vperm.xlu0 %1004, %v93_v40  }
  0x16   :  { %140 = vperm.xlu1 %1005, %v94_v37  }
  0x17   :  { %904 = vmatpush3.bf16.msra.mxu0 %v1017_v14  ;;  %1000 = vmatpush3.bf16.msra.mxu1 %v1017_v14 }
  0x18   :  { %905 = vmatprep.subr.bf16.mxu0 %v1018_v15  ;;  %993 = vmatprep.subr.bf16.mxu1 %v1018_v15 }
  0x19   :  { %145 = vperm.xlu0 %1004, %v95_v42  }
  0x1a   :  { %150 = vperm.xlu1 %1005, %v96_v41  }
  0x1b   :  { %906 = vmatpush3.bf16.msra.mxu0 %v1019_v16  ;;  %1001 = vmatpush3.bf16.msra.mxu1 %v1019_v16 }
  0x1c   :  { %907 = vmatprep.subr.bf16.mxu0 %v1020_v17  ;;  %994 = vmatprep.subr.bf16.mxu1 %v1020_v17 }
  0x1d   :  { %155 = vperm.xlu0 %1004, %v97_v48  }
  0x1e   :  { %160 = vperm.xlu1 %1005, %v98_v45  }
  0x1f   :  { %908 = vmatpush3.bf16.msra.mxu0 %v1021_v18  ;;  %1002 = vmatpush3.bf16.msra.mxu1 %v1021_v18 }
  0x20   :  { %967 = vmatprep.subr.bf16.mxu1 %v1028_v20 }
  0x21   :  { %165 = vperm.xlu0 %1004, %v99_v50  }
  0x22   :  { %469 = vmatmul.mubr.bf16.vlgmr.msra.gmra.mrb[0].mxu0 %v1022_v19  ;;  %517 = vmatmul.mubr.bf16.vlgmr.msra.gmra.mrb[0].mxu1 %v1025_v21 }
  0x23   :  { %968 = vmatpush3.bf16.msra.mxu1 %v1028_v20  ;;  %476 = vmatprep.mubr.bf16.mxu0 %v1029_v22 }
  0x24   :  { %524 = vmatprep.mubr.bf16.mxu1 %v1031_v23  ;;  %969 = vmatprep.subr.bf16.mxu1 %v1035_v24 }
  0x25   :  { %170 = vperm.xlu1 %1005, %v100_v49   ;;  %175 = vperm.xlu0 %1004, %v101_v56  }
  0x27   :  { %970 = vmatpush3.bf16.msra.mxu1 %v1035_v24 }
  0x29   :  { %180 = vperm.xlu1 %1005, %v102_v53  }
  0x2a   :  { %477 = vmatmul.mubr.bf16.gmra.mrb[4].mxu0 %v1033_v27  ;;  %525 = vmatmul.mubr.bf16.gmra.mrb[4].mxu1 %v1034_v28 }
  0x2b   :  { %484 = vmatprep.mubr.bf16.mxu0 %v1036_v30  ;;  %971 = vmatprep.mubr.msk.bf16.mxu1 %vm411_vm0, %v1038_v31 }
  0x32   :  { %485 = vmatmul.mubr.bf16.gmra.mrb[8].mxu0 %v1039_v35  ;;  %972 = vmatmul.mubr.msk.bf16.vlgmr.msra.gmra.mrb[8].mxu1 %vm411_vm0, %v1040_v36 }
  0x33   :  { %492 = vmatprep.mubr.bf16.mxu0 %v1041_v38  ;;  %975 = vmatprep.mubr.msk.bf16.mxu1 %vm411_vm0, %v1043_v39 }
  0x3a   :  { %493 = vmatmul.mubr.bf16.gmra.mrb[12].mxu0 %v1044_v43  ;;  %976 = vmatmul.mubr.msk.bf16.gmra.mrb[12].mxu1 %vm411_vm0, %v1045_v44 }
  0x3b   :  { %500 = vmatprep.mubr.bf16.mxu0 %v1046_v46  ;;  %979 = vmatprep.mubr.msk.bf16.mxu1 %vm411_vm0, %v1048_v47 }
  0x42   :  { %501 = vmatmul.mubr.bf16.gmra.mrb[16].mxu0 %v1049_v51  ;;  %980 = vmatmul.mubr.msk.bf16.gmra.mrb[16].mxu1 %vm411_vm0, %v1050_v52 }
  0x43   :  { %508 = vmatprep.mubr.bf16.mxu0 %v1051_v54  ;;  %983 = vmatprep.mubr.msk.bf16.mxu1 %vm411_vm0, %v1053_v55 }
  0x4a   :  { %509 = vmatmul.mubr.bf16.gmra.mrb[20].mxu0 %v1054_v57  ;;  %984 = vmatmul.mubr.msk.bf16.gmra.mrb[20].mxu1 %vm411_vm0, %v1055_v58 }
  0x88   :  { %v106_v60 = vpop.permute.xlu0 %105 }
  0x89   :  { %v116_v59 = vpop.permute.xlu1 %115 }
  0x8c   :  { %v111_v62 = vpop.permute.xlu0 %110 }
  0x8d   :  { %v121_v61 = vpop.permute.xlu1 %120 }
  0x90   :  { %v1266_v0 = vpop.permute.xlu0 %125 }
  0x91   :  { %v1264_v63 = vpop.permute.xlu1 %130 }
  0x94   :  { %v1274_v14 = vpop.permute.xlu0 %135 }
  0x95   :  { %v1272_v13 = vpop.permute.xlu1 %140 }
  0x98   :  { %v1282_v28 = vpop.permute.xlu0 %145 }
  0x99   :  { %v1280_v27 = vpop.permute.xlu1 %150 }
  0x9c   :  { %v1295_v53 = vpop.permute.xlu0 %155 }
  0x9d   :  { %v1293_v52 = vpop.permute.xlu1 %160 }
  0xf5   :  { %v909_v1 = vpop.f32.mrb[0].mxu0  ;;  %v945_v2 = vpop.f32.mrb[0].mxu1 }
  0xf6   :  { %v910_v3 = vpop.f32.mrb[1].mxu0  ;;  %v946_v4 = vpop.f32.mrb[1].mxu1 }
  0xf7   :  { %v911_v5 = vadd.f32 %v910_v3, %v909_v1  ;;  %v912_v6 = vpop.f32.mrb[2].mxu0  ;;  %v1268_v7 = vadd.f32 %v946_v4, %v945_v2  ;;  %v948_v8 = vpop.f32.mrb[2].mxu1 }
  0xf8   :  { %v913_v9 = vpop.f32.mrb[3].mxu0  ;;  %v949_v10 = vpop.f32.mrb[3].mxu1 }
  0xf9   :  { %v914_v11 = vadd.f32 %v913_v9, %v912_v6  ;;  %v1270_v12 = vadd.f32 %v949_v10, %v948_v8  ;;  %v471_v33 = vadd.f32 %v911_v5, %v106_v60 }
  0xfb   :  { %v474_v42 = vadd.f32 %v914_v11, %v111_v62 }
  0xfd   :  { %v915_v15 = vpop.f32.mrb[4].mxu0  ;;  %v951_v16 = vpop.f32.mrb[4].mxu1 }
  0xfe   :  { %v916_v17 = vpop.f32.mrb[5].mxu0  ;;  %v952_v18 = vpop.f32.mrb[5].mxu1 }
  0xff   :  { %v917_v19 = vadd.f32 %v916_v17, %v915_v15  ;;  %v918_v20 = vpop.f32.mrb[6].mxu0  ;;  %v1276_v21 = vadd.f32 %v952_v18, %v951_v16  ;;  %v954_v22 = vpop.f32.mrb[6].mxu1 }
 0x100   :  { %v919_v23 = vpop.f32.mrb[7].mxu0  ;;  %v955_v24 = vpop.f32.mrb[7].mxu1 }
 0x101   :  { %v920_v25 = vadd.f32 %v919_v23, %v918_v20  ;;  %v1278_v26 = vadd.f32 %v955_v24, %v954_v22  ;;  %v479_v29 = vadd.f32 %v917_v19, %v116_v59  ;;  %v171_v19 = vpop.permute.xlu1 %170  ;;  %v166_v20 = vpop.permute.xlu0 %165 }
 0x103   :  { %v482_v37 = vadd.f32 %v920_v25, %v121_v61 }
 0x105   :  { %v921_v30 = vpop.f32.mrb[8].mxu0  ;;  %v973_v31 = vpop.f32.mrb[8].mxu1 }
 0x106   :  { %v576_v34 = vadd.f32 %v973_v31, %v479_v29  ;;  %v922_v35 = vpop.f32.mrb[9].mxu0  ;;  %v567_v36 = vpop.f32.mrb[9].mxu1 }
 0x107   :  { %v923_v38 = vadd.f32 %v922_v35, %v921_v30  ;;  %v568_v39 = vadd.f32 %v567_v36, %v471_v33  ;;  %v924_v40 = vpop.f32.mrb[10].mxu0  ;;  %v974_v41 = vpop.f32.mrb[10].mxu1 }
 0x108   :  { %v650_v43 = vmul.f32 %v1287_v32, %v576_v34  ;;  %v579_v44 = vadd.f32 %v974_v41, %v482_v37  ;;  %v925_v45 = vpop.f32.mrb[11].mxu0  ;;  %v570_v46 = vpop.f32.mrb[11].mxu1  ;;  %vm633_vm1 = vcmp.ge.f32.partialorder %v576_v34, 0.0 }
 0x109   :  { %v648_v47 = vmul.f32 %v1287_v32, %v568_v39  ;;  %v926_v48 = vadd.f32 %v925_v45, %v924_v40  ;;  %v571_v49 = vadd.f32 %v570_v46, %v474_v42  ;;  %vm631_vm2 = vcmp.ge.f32.partialorder %v568_v39, 0.0  ;;  %v181_v45 = vpop.permute.xlu1 %180 }
 0x10a   :  { %vm634_vm3 = vcmp.ge.f32.partialorder %v579_v44, 0.0  ;;  %v651_v50 = vmul.f32 %v1287_v32, %v579_v44  ;;  %v666_v54 = vsel %vm633_vm1, %v576_v34, %v650_v43  ;;  %v487_v61 = vadd.f32 %v923_v38, %v1266_v0 }
 0x10b   :  { %vm632_vm4 = vcmp.ge.f32.partialorder %v571_v49, 0.0  ;;  %v649_v51 = vmul.f32 %v1287_v32, %v571_v49  ;;  %v664_v56 = vsel %vm631_vm2, %v568_v39, %v648_v47  ;;  %v490_v9 = vadd.f32 %v926_v48, %v1264_v63  ;;  %v176_v39 = vpop.permute.xlu0 %175 }
 0x10c   :  { %v667_v55 = vsel %vm634_vm3, %v579_v44, %v651_v50  ;;  %v527_v47 = vadd.f32 %v1276_v21, %v176_v39 }
 0x10d   :  { %v854_v57 = vpack.c.bf16 %v667_v55, %v666_v54  ;;  %v665_v58 = vsel %vm632_vm4, %v571_v49, %v649_v51  ;;  %v927_v59 = vpop.f32.mrb[12].mxu0  ;;  %v977_v60 = vpop.f32.mrb[12].mxu1  ;;  %v519_v49 = vadd.f32 %v1268_v7, %v166_v20  ;;  %v530_v55 = vadd.f32 %v1278_v26, %v181_v45 }
 0x10e   :  { %v849_v62 = vpack.c.bf16 %v665_v58, %v664_v56  ;;  %v928_v1 = vpop.f32.mrb[13].mxu0  ;;  %v583_v2 = vpop.f32.mrb[13].mxu1  ;;  %v522_v7 = vadd.f32 %v1270_v12, %v171_v19 }
 0x10f   :  { %886 = vst [vmem:[%s1350_s4 + $0x8] sm:$0xff] %v854_v57   ;;  %v929_v3 = vadd.f32 %v928_v1, %v927_v59  ;;  %v584_v4 = vadd.f32 %v583_v2, %v487_v61  ;;  %v930_v5 = vpop.f32.mrb[14].mxu0  ;;  %v978_v6 = vpop.f32.mrb[14].mxu1 }
 0x110   :  { %850 = vst [vmem:[%s1350_s4] sm:$0xff] %v849_v62   ;;  %v931_v8 = vpop.f32.mrb[15].mxu0  ;;  %v586_v10 = vpop.f32.mrb[15].mxu1 }
 0x111   :  { %v495_v0 = vadd.f32 %v929_v3, %v1274_v14  ;;  %v932_v11 = vadd.f32 %v931_v8, %v930_v5  ;;  %v652_v15 = vmul.f32 %v1287_v32, %v584_v4  ;;  %v587_v16 = vadd.f32 %v586_v10, %v490_v9 }
 0x112   :  { %vm635_vm5 = vcmp.ge.f32.partialorder %v584_v4, 0.0 }
 0x113   :  { %v592_v17 = vadd.f32 %v977_v60, %v495_v0  ;;  %v498_v18 = vadd.f32 %v932_v11, %v1272_v13  ;;  %vm636_vm6 = vcmp.ge.f32.partialorder %v587_v16, 0.0  ;;  %v653_v22 = vmul.f32 %v1287_v32, %v587_v16 }
 0x114   :  { %v668_v14 = vsel %vm635_vm5, %v584_v4, %v652_v15 }
 0x115   :  { %v654_v23 = vmul.f32 %v1287_v32, %v592_v17  ;;  %v595_v24 = vadd.f32 %v978_v6, %v498_v18  ;;  %v933_v63 = vpop.f32.mrb[16].mxu0  ;;  %v981_v25 = vpop.f32.mrb[16].mxu1  ;;  %vm637_vm7 = vcmp.ge.f32.partialorder %v592_v17, 0.0  ;;  %v669_v29 = vsel %vm636_vm6, %v587_v16, %v653_v22 }
 0x116   :  { %v934_v30 = vpop.f32.mrb[17].mxu0  ;;  %v599_v31 = vpop.f32.mrb[17].mxu1  ;;  %v859_v34 = vpack.c.bf16 %v669_v29, %v668_v14 }
 0x117   :  { %vm638_vm8 = vcmp.ge.f32.partialorder %v595_v24, 0.0  ;;  %v655_v33 = vmul.f32 %v1287_v32, %v595_v24  ;;  %v936_v13 = vpop.f32.mrb[18].mxu0  ;;  %v982_v35 = vpop.f32.mrb[18].mxu1  ;;  %v935_v36 = vadd.f32 %v934_v30, %v933_v63  ;;  %v670_v40 = vsel %vm637_vm7, %v592_v17, %v654_v23 }
 0x118   :  { %v937_v37 = vpop.f32.mrb[19].mxu0  ;;  %v602_v38 = vpop.f32.mrb[19].mxu1  ;;  %887 = vst [vmem:[%s1350_s4 + $0x10] sm:$0xff] %v859_v34  }
 0x119   :  { %v671_v41 = vsel %vm638_vm8, %v595_v24, %v655_v33  ;;  %v938_v42 = vadd.f32 %v937_v37, %v936_v13  ;;  %v503_v44 = vadd.f32 %v935_v36, %v1282_v28 }
 0x11a   :  { %v864_v43 = vpack.c.bf16 %v671_v41, %v670_v40 }
 0x11b   :  { %v506_v46 = vadd.f32 %v938_v42, %v1280_v27  ;;  %v600_v48 = vadd.f32 %v599_v31, %v503_v44 }
 0x11c   :  { %888 = vst [vmem:[%s1350_s4 + $0x18] sm:$0xff] %v864_v43  }
 0x11d   :  { %v603_v50 = vadd.f32 %v602_v38, %v506_v46  ;;  %v939_v51 = vpop.f32.mrb[20].mxu0  ;;  %v985_v54 = vpop.f32.mrb[20].mxu1  ;;  %vm639_vm9 = vcmp.ge.f32.partialorder %v600_v48, 0.0  ;;  %v656_v28 = vmul.f32 %v1287_v32, %v600_v48 }
 0x11e   :  { %v624_v56 = vadd.f32 %v985_v54, %v527_v47  ;;  %v940_v57 = vpop.f32.mrb[21].mxu0  ;;  %v615_v27 = vpop.f32.mrb[21].mxu1 }
 0x11f   :  { %vm640_vm10 = vcmp.ge.f32.partialorder %v603_v50, 0.0  ;;  %v657_v21 = vmul.f32 %v1287_v32, %v603_v50  ;;  %v941_v58 = vadd.f32 %v940_v57, %v939_v51  ;;  %v616_v59 = vadd.f32 %v615_v27, %v519_v49  ;;  %v942_v60 = vpop.f32.mrb[22].mxu0  ;;  %v986_v61 = vpop.f32.mrb[22].mxu1 }
 0x120   :  { %v662_v62 = vmul.f32 %v1287_v32, %v624_v56  ;;  %v627_v1 = vadd.f32 %v986_v61, %v530_v55  ;;  %v943_v2 = vpop.f32.mrb[23].mxu0  ;;  %v618_v26 = vpop.f32.mrb[23].mxu1  ;;  %v672_v3 = vsel %vm639_vm9, %v600_v48, %v656_v28  ;;  %vm645_vm11 = vcmp.ge.f32.partialorder %v624_v56, 0.0 }
 0x121   :  { %v673_v4 = vsel %vm640_vm10, %v603_v50, %v657_v21  ;;  %v511_v5 = vadd.f32 %v941_v58, %v1295_v53  ;;  %v944_v10 = vadd.f32 %v943_v2, %v942_v60  ;;  %v619_v0 = vadd.f32 %v618_v26, %v522_v7 }
 0x122   :  { %v869_v6 = vpack.c.bf16 %v673_v4, %v672_v3  ;;  %vm646_vm12 = vcmp.ge.f32.partialorder %v627_v1, 0.0  ;;  %v663_v8 = vmul.f32 %v1287_v32, %v627_v1  ;;  %v678_v12 = vsel %vm645_vm11, %v624_v56, %v662_v62 }
 0x123   :  { %v608_v9 = vadd.f32 %v981_v25, %v511_v5  ;;  %v660_v11 = vmul.f32 %v1287_v32, %v616_v59  ;;  %vm643_vm13 = vcmp.ge.f32.partialorder %v616_v59, 0.0  ;;  %v514_v17 = vadd.f32 %v944_v10, %v1293_v52 }
 0x124   :  { %889 = vst [vmem:[%s1350_s4 + $0x20] sm:$0xff] %v869_v6   ;;  %v679_v15 = vsel %vm646_vm12, %v627_v1, %v663_v8  ;;  %vm644_vm14 = vcmp.ge.f32.partialorder %v619_v0, 0.0  ;;  %v661_v53 = vmul.f32 %v1287_v32, %v619_v0 }
 0x125   :  { %v884_v16 = vpack.c.bf16 %v679_v15, %v678_v12  ;;  %v658_v18 = vmul.f32 %v1287_v32, %v608_v9  ;;  %v611_v19 = vadd.f32 %v982_v35, %v514_v17  ;;  %vm641_vm15 = vcmp.ge.f32.partialorder %v608_v9, 0.0 }
 0x126   :  { %v676_v20 = vsel %vm643_vm13, %v616_v59, %v660_v11  ;;  %v677_v22 = vsel %vm644_vm14, %v619_v0, %v661_v53 }
 0x127   :  { %892 = vst [vmem:[%s1350_s4 + $0x38] sm:$0xff] %v884_v16   ;;  %vm642_vm0 = vcmp.ge.f32.partialorder %v611_v19, 0.0  ;;  %v659_v23 = vmul.f32 %v1287_v32, %v611_v19  ;;  %v879_v24 = vpack.c.bf16 %v677_v22, %v676_v20  ;;  %v674_v63 = vsel %vm641_vm15, %v608_v9, %v658_v18 }
 0x129   :  { %v675_v25 = vsel %vm642_vm0, %v611_v19, %v659_v23  ;;  %891 = vst [vmem:[%s1350_s4 + $0x30] sm:$0xff] %v879_v24  }
 0x12a   :  { %v874_v52 = vpack.c.bf16 %v675_v25, %v674_v63 }
 0x12c   :  { %890 = vst [vmem:[%s1350_s4 + $0x28] sm:$0xff] %v874_v52  }

// kernel: sub.13
= control target key start
LH: loop header
LB: loop body
LE: loop exit
PB: predicated region body
PF: predicated region fallthrough
CT: control target
= control target key end

     0   :  { %v286_v24 = vmov 0.0   ;;  %s414_s0 = inlined_call_operand.vmem [shape: bf16[32,2,8,8], index: 0, kind: input, shape index: {}]   ;;  %s415_s1 = inlined_call_operand.vmem [shape: bf16[32,2,8,8], index: 1, kind: input, shape index: {}]   ;;  %s416_s2 = inlined_call_operand.vmem [shape: bf16[32,2,8,8], index: 2, kind: output, shape index: {}]  }
   0x1   :  { %v3_v0 = vld [vmem:[%s414_s0] sm:$0xff]   ;;  %v249_v8 = vld [vmem:[%s414_s0 + $0x8] sm:$0xff]   ;;  %v261_v29 = vld [vmem:[%s414_s0 + $0x10] sm:$0xff]  }
   0x2   :  { %v6_v1 = vld [vmem:[%s415_s1] sm:$0xff]   ;;  %v4_v3 = vunpack.c.l.bf16 %v3_v0  ;;  %v32_v7 = vunpack.c.h.bf16 %v3_v0  ;;  %v250_v9 = vld [vmem:[%s415_s1 + $0x8] sm:$0xff]   ;;  %v62_v17 = vunpack.c.l.bf16 %v249_v8  ;;  %v92_v27 = vunpack.c.h.bf16 %v249_v8  ;;  %v262_v30 = vld [vmem:[%s415_s1 + $0x10] sm:$0xff]  }
   0x3   :  { %v240_v2 = vld [vmem:[%s414_s0 + $0x20] sm:$0xff]   ;;  %v7_v4 = vunpack.c.l.bf16 %v6_v1  ;;  %v36_v11 = vunpack.c.h.bf16 %v6_v1  ;;  %v252_v14 = vld [vmem:[%s414_s0 + $0x28] sm:$0xff]   ;;  %v66_v18 = vunpack.c.l.bf16 %v250_v9  ;;  %v96_v28 = vunpack.c.h.bf16 %v250_v9  ;;  %v264_v31 = vld [vmem:[%s414_s0 + $0x30] sm:$0xff]  }
   0x4   :  { %v17_v5 = vunpack.c.l.bf16 %v240_v2  ;;  %v241_v6 = vld [vmem:[%s415_s1 + $0x20] sm:$0xff]   ;;  %v47_v12 = vunpack.c.h.bf16 %v240_v2  ;;  %v253_v15 = vld [vmem:[%s415_s1 + $0x28] sm:$0xff]   ;;  %v77_v19 = vunpack.c.l.bf16 %v252_v14  ;;  %v265_v36 = vld [vmem:[%s415_s1 + $0x30] sm:$0xff]   ;;  %v107_v39 = vunpack.c.h.bf16 %v252_v14 }
   0x5   :  { %v21_v10 = vunpack.c.l.bf16 %v241_v6  ;;  %v51_v13 = vunpack.c.h.bf16 %v241_v6  ;;  %v11_v16 = vsub.f32 %v4_v3, %v7_v4  ;;  %v40_v21 = vsub.f32 %v32_v7, %v36_v11  ;;  %v273_v45 = vld [vmem:[%s414_s0 + $0x18] sm:$0xff]  }
   0x6   :  { %v81_v23 = vunpack.c.l.bf16 %v253_v15  ;;  %v70_v26 = vsub.f32 %v62_v17, %v66_v18  ;;  %v100_v38 = vsub.f32 %v92_v27, %v96_v28  ;;  %v111_v40 = vunpack.c.h.bf16 %v253_v15  ;;  %v274_v46 = vld [vmem:[%s415_s1 + $0x18] sm:$0xff]  }
   0x7   :  { %v25_v20 = vsub.f32 %v17_v5, %v21_v10  ;;  %v55_v22 = vsub.f32 %v47_v12, %v51_v13  ;;  %v13_v25 = vpack.c.bf16 %v286_v24, %v11_v16  ;;  %v43_v33 = vpack.c.bf16 %v286_v24, %v40_v21  ;;  %v276_v51 = vld [vmem:[%s414_s0 + $0x38] sm:$0xff]  }
   0x8   :  { %v85_v35 = vsub.f32 %v77_v19, %v81_v23  ;;  %v73_v37 = vpack.c.bf16 %v286_v24, %v70_v26  ;;  %v122_v42 = vunpack.c.l.bf16 %v261_v29  ;;  %v126_v43 = vunpack.c.l.bf16 %v262_v30  ;;  %v277_v56 = vld [vmem:[%s415_s1 + $0x38] sm:$0xff]  }
   0x9   :  { %v28_v32 = vpack.c.bf16 %v286_v24, %v25_v20  ;;  %v58_v34 = vpack.c.bf16 %v286_v24, %v55_v22  ;;  %14 = vst [vmem:[%s416_s2] sm:$0xf] %v13_v25  ;;  %245 = vst [vmem:[%s416_s2 + $0x4] sm:$0xf] %v43_v33  ;;  %v137_v44 = vunpack.c.l.bf16 %v264_v31  ;;  %v103_v47 = vpack.c.bf16 %v286_v24, %v100_v38 }
   0xa   :  { %v88_v41 = vpack.c.bf16 %v286_v24, %v85_v35  ;;  %251 = vst [vmem:[%s416_s2 + $0x8] sm:$0xf] %v73_v37  ;;  %v115_v48 = vsub.f32 %v107_v39, %v111_v40  ;;  %v141_v49 = vunpack.c.l.bf16 %v265_v36  ;;  %v152_v50 = vunpack.c.h.bf16 %v261_v29 }
   0xb   :  { %242 = vst [vmem:[%s416_s2 + $0x20] sm:$0xf] %v28_v32  ;;  %248 = vst [vmem:[%s416_s2 + $0x24] sm:$0xf] %v58_v34  ;;  %v130_v52 = vsub.f32 %v122_v42, %v126_v43  ;;  %v156_v53 = vunpack.c.h.bf16 %v262_v30  ;;  %v167_v54 = vunpack.c.h.bf16 %v264_v31  ;;  %v171_v55 = vunpack.c.h.bf16 %v265_v36 }
   0xc   :  { %254 = vst [vmem:[%s416_s2 + $0x28] sm:$0xf] %v88_v41  ;;  %257 = vst [vmem:[%s416_s2 + $0xc] sm:$0xf] %v103_v47  ;;  %v118_v57 = vpack.c.bf16 %v286_v24, %v115_v48  ;;  %v145_v58 = vsub.f32 %v137_v44, %v141_v49  ;;  %v182_v59 = vunpack.c.l.bf16 %v273_v45  ;;  %v186_v60 = vunpack.c.l.bf16 %v274_v46 }
   0xd   :  { %v133_v61 = vpack.c.bf16 %v286_v24, %v130_v52  ;;  %v160_v62 = vsub.f32 %v152_v50, %v156_v53  ;;  %v175_v63 = vsub.f32 %v167_v54, %v171_v55  ;;  %v197_v0 = vunpack.c.l.bf16 %v276_v51 }
   0xe   :  { %260 = vst [vmem:[%s416_s2 + $0x2c] sm:$0xf] %v118_v57  ;;  %v148_v1 = vpack.c.bf16 %v286_v24, %v145_v58  ;;  %v190_v2 = vsub.f32 %v182_v59, %v186_v60  ;;  %v201_v3 = vunpack.c.l.bf16 %v277_v56  ;;  %v212_v4 = vunpack.c.h.bf16 %v273_v45 }
   0xf   :  { %263 = vst [vmem:[%s416_s2 + $0x10] sm:$0xf] %v133_v61  ;;  %v163_v5 = vpack.c.bf16 %v286_v24, %v160_v62  ;;  %v178_v6 = vpack.c.bf16 %v286_v24, %v175_v63  ;;  %v216_v7 = vunpack.c.h.bf16 %v274_v46  ;;  %v227_v8 = vunpack.c.h.bf16 %v276_v51 }
  0x10   :  { %266 = vst [vmem:[%s416_s2 + $0x30] sm:$0xf] %v148_v1  ;;  %v193_v9 = vpack.c.bf16 %v286_v24, %v190_v2  ;;  %v205_v10 = vsub.f32 %v197_v0, %v201_v3  ;;  %v231_v11 = vunpack.c.h.bf16 %v277_v56 }
  0x11   :  { %269 = vst [vmem:[%s416_s2 + $0x14] sm:$0xf] %v163_v5  ;;  %272 = vst [vmem:[%s416_s2 + $0x34] sm:$0xf] %v178_v6  ;;  %v220_v12 = vsub.f32 %v212_v4, %v216_v7 }
  0x12   :  { %275 = vst [vmem:[%s416_s2 + $0x18] sm:$0xf] %v193_v9  ;;  %v208_v13 = vpack.c.bf16 %v286_v24, %v205_v10  ;;  %v235_v14 = vsub.f32 %v227_v8, %v231_v11 }
  0x13   :  { %v223_v15 = vpack.c.bf16 %v286_v24, %v220_v12 }
  0x14   :  { %278 = vst [vmem:[%s416_s2 + $0x38] sm:$0xf] %v208_v13  ;;  %v238_v16 = vpack.c.bf16 %v286_v24, %v235_v14 }
  0x15   :  { %281 = vst [vmem:[%s416_s2 + $0x1c] sm:$0xf] %v223_v15 }
  0x16   :  { %284 = vst [vmem:[%s416_s2 + $0x3c] sm:$0xf] %v238_v16 }

// kernel: net7_forward.55
= control target key start
LH: loop header
LB: loop body
LE: loop exit
PB: predicated region body
PF: predicated region fallthrough
CT: control target
= control target key end

     0   :  { %v1366_v1 = vmov 0   ;;  %s1683_s1 = inlined_call_operand.vmem [shape: bf16[1152,128], index: 1, kind: input, shape index: {}]   ;;  %s1684_s0 = inlined_call_operand.vmem [shape: bf16[32,1152], index: 0, kind: input, shape index: {}]   ;;  %s1685_s2 = inlined_call_operand.vmem [shape: f32[32,1], index: 2, kind: input, shape index: {}]   ;;  %s1686_s3 = inlined_call_operand.<no memory space> [shape: f32[1,1], index: 3, kind: input, shape index: {}]   ;;  %s1687_s4 = inlined_call_operand.vmem [shape: bf16[32,128], index: 4, kind: output, shape index: {}]  }
   0x1   :  { %v1268_v0 = vld [vmem:[%s1683_s1 + $0x40] sm:$0xff]   ;;  %1266 = vset.pattern.permute.xlu0 %v1366_v1  ;;  %1267 = vset.pattern.permute.xlu1 %v1366_v1  ;;  %v1272_v5 = vld [vmem:[%s1683_s1 + $0x48] sm:$0xff]   ;;  %v1276_v9 = vld [vmem:[%s1683_s1 + $0x50] sm:$0xff]  }
   0x2   :  { %v1269_v2 = vld [vmem:[%s1683_s1] sm:$0xff]   ;;  %1123 = vmatprep.subr.bf16.mxu0 %v1268_v0  ;;  %v1273_v6 = vld [vmem:[%s1683_s1 + $0x8] sm:$0xff]   ;;  %v1277_v10 = vld [vmem:[%s1683_s1 + $0x10] sm:$0xff]  }
   0x3   :  { %v1270_v3 = vld [vmem:[%s1683_s1 + $0xc0] sm:$0xff]   ;;  %1124 = vmatpush3.bf16.msra.mxu0 %v1269_v2  ;;  %v1274_v7 = vld [vmem:[%s1683_s1 + $0xc8] sm:$0xff]   ;;  %v1278_v11 = vld [vmem:[%s1683_s1 + $0xd0] sm:$0xff]  }
   0x4   :  { %v1271_v4 = vld [vmem:[%s1683_s1 + $0x80] sm:$0xff]   ;;  %1151 = vmatprep.subr.bf16.mxu1 %v1270_v3  ;;  %1125 = vmatprep.subr.bf16.mxu0 %v1272_v5  ;;  %v1275_v8 = vld [vmem:[%s1683_s1 + $0x88] sm:$0xff]   ;;  %v1279_v12 = vld [vmem:[%s1683_s1 + $0x90] sm:$0xff]  }
   0x5   :  { %1152 = vmatpush3.bf16.msra.mxu1 %v1271_v4  ;;  %v1280_v13 = vld [vmem:[%s1683_s1 + $0x58] sm:$0xff]   ;;  %v1284_v17 = vld [vmem:[%s1683_s1 + $0x60] sm:$0xff]   ;;  %v1288_v21 = vld [vmem:[%s1683_s1 + $0x68] sm:$0xff]  }
   0x6   :  { %1153 = vmatprep.subr.bf16.mxu1 %v1274_v7  ;;  %v1281_v14 = vld [vmem:[%s1683_s1 + $0x18] sm:$0xff]   ;;  %v1285_v18 = vld [vmem:[%s1683_s1 + $0x20] sm:$0xff]   ;;  %v1289_v22 = vld [vmem:[%s1683_s1 + $0x28] sm:$0xff]  }
   0x7   :  { %1126 = vmatpush3.bf16.msra.mxu0 %v1273_v6  ;;  %v1282_v15 = vld [vmem:[%s1683_s1 + $0xd8] sm:$0xff]   ;;  %v1286_v19 = vld [vmem:[%s1683_s1 + $0xe0] sm:$0xff]   ;;  %v1290_v23 = vld [vmem:[%s1683_s1 + $0xe8] sm:$0xff]  }
   0x8   :  { %1127 = vmatprep.subr.bf16.mxu0 %v1276_v9  ;;  %v1283_v16 = vld [vmem:[%s1683_s1 + $0x98] sm:$0xff]   ;;  %v1287_v20 = vld [vmem:[%s1683_s1 + $0xa0] sm:$0xff]   ;;  %v1291_v24 = vld [vmem:[%s1683_s1 + $0xa8] sm:$0xff]  }
   0x9   :  { %1154 = vmatpush3.bf16.msra.mxu1 %v1275_v8  ;;  %v1292_v25 = vld [vmem:[%s1683_s1 + $0x70] sm:$0xff]   ;;  %v1296_v29 = vld [vmem:[%s1683_s1 + $0x78] sm:$0xff]   ;;  %v1299_v32 = vld [vmem:[%s1684_s0] ss:$36 sps:$4 sm:$0xff]  }
   0xa   :  { %1155 = vmatprep.subr.bf16.mxu1 %v1278_v11  ;;  %v1293_v26 = vld [vmem:[%s1683_s1 + $0x30] sm:$0xff]   ;;  %v1297_v30 = vld [vmem:[%s1683_s1 + $0x38] sm:$0xff]   ;;  %v1301_v33 = vld [vmem:[%s1684_s0 + $0x4] ss:$36 sps:$4 sm:$0xff]  }
   0xb   :  { %1128 = vmatpush3.bf16.msra.mxu0 %v1277_v10  ;;  %v1294_v27 = vld [vmem:[%s1683_s1 + $0xf0] sm:$0xff]   ;;  %v1298_v31 = vld [vmem:[%s1683_s1 + $0xf8] sm:$0xff]   ;;  %763 = vmatprep.mubr.bf16.mxu0 %v1301_v33  ;;  %v1303_v35 = vld [vmem:[%s1683_s1 + $0x140] sm:$0xff]  }
   0xc   :  { %1129 = vmatprep.subr.bf16.mxu0 %v1280_v13  ;;  %v1295_v28 = vld [vmem:[%s1683_s1 + $0xb0] sm:$0xff]   ;;  %v1302_v34 = vld [vmem:[%s1683_s1 + $0xb8] sm:$0xff]   ;;  %v1304_v36 = vld [vmem:[%s1684_s0 + $0x8] ss:$36 sps:$4 sm:$0xff]  }
   0xd   :  { %1156 = vmatpush3.bf16.msra.mxu1 %v1279_v12  ;;  %v1306_v37 = vld [vmem:[%s1684_s0 + $0xc] ss:$36 sps:$4 sm:$0xff]   ;;  %v1307_v38 = vld [vmem:[%s1683_s1 + $0x100] sm:$0xff]   ;;  %v1318_v49 = vld [vmem:[%s1683_s1 + $0x158] sm:$0xff]  }
   0xe   :  { %1157 = vmatprep.subr.bf16.mxu1 %v1282_v15  ;;  %812 = vmatprep.mubr.bf16.mxu1 %v1306_v37  ;;  %v1308_v39 = vld [vmem:[%s1683_s1 + $0x1c0] sm:$0xff]   ;;  %v1310_v41 = vld [vmem:[%s1683_s1 + $0x148] sm:$0xff]   ;;  %v1314_v45 = vld [vmem:[%s1683_s1 + $0x150] sm:$0xff]  }
   0xf   :  { %1130 = vmatpush3.bf16.msra.mxu0 %v1281_v14  ;;  %v1309_v40 = vld [vmem:[%s1683_s1 + $0x180] sm:$0xff]   ;;  %v1311_v42 = vld [vmem:[%s1683_s1 + $0x108] sm:$0xff]   ;;  %v1315_v46 = vld [vmem:[%s1683_s1 + $0x110] sm:$0xff]  }
  0x10   :  { %1131 = vmatprep.subr.bf16.mxu0 %v1284_v17  ;;  %v1312_v43 = vld [vmem:[%s1683_s1 + $0x1c8] sm:$0xff]   ;;  %v1316_v47 = vld [vmem:[%s1683_s1 + $0x1d0] sm:$0xff]   ;;  %v1319_v50 = vld [vmem:[%s1683_s1 + $0x118] sm:$0xff]  }
  0x11   :  { %1158 = vmatpush3.bf16.msra.mxu1 %v1283_v16  ;;  %v1313_v44 = vld [vmem:[%s1683_s1 + $0x188] sm:$0xff]   ;;  %v1317_v48 = vld [vmem:[%s1683_s1 + $0x190] sm:$0xff]   ;;  %v1320_v51 = vld [vmem:[%s1683_s1 + $0x1d8] sm:$0xff]  }
  0x12   :  { %1159 = vmatprep.subr.bf16.mxu1 %v1286_v19  ;;  %v1321_v52 = vld [vmem:[%s1683_s1 + $0x198] sm:$0xff]   ;;  %v1322_v53 = vld [vmem:[%s1683_s1 + $0x160] sm:$0xff]   ;;  %v1326_v57 = vld [vmem:[%s1683_s1 + $0x168] sm:$0xff]  }
  0x13   :  { %1132 = vmatpush3.bf16.msra.mxu0 %v1285_v18  ;;  %v1323_v54 = vld [vmem:[%s1683_s1 + $0x120] sm:$0xff]   ;;  %v1327_v58 = vld [vmem:[%s1684_s0 + $0x4c] ss:$36 sps:$4 sm:$0xff]   ;;  %v1332_v62 = vld [vmem:[%s1684_s0 + $0x54] ss:$36 sps:$4 sm:$0xff]  }
  0x14   :  { %1133 = vmatprep.subr.bf16.mxu0 %v1288_v21  ;;  %v1324_v55 = vld [vmem:[%s1683_s1 + $0x1e0] sm:$0xff]   ;;  %v1329_v59 = vld [vmem:[%s1683_s1 + $0x128] sm:$0xff]   ;;  %v1335_v0 = vld [vmem:[%s1684_s0 + $0x50] ss:$36 sps:$4 sm:$0xff]  }
  0x15   :  { %1160 = vmatpush3.bf16.msra.mxu1 %v1287_v20  ;;  %v1325_v56 = vld [vmem:[%s1683_s1 + $0x1a0] sm:$0xff]   ;;  %v1330_v60 = vld [vmem:[%s1684_s0 + $0x48] ss:$36 sps:$4 sm:$0xff]   ;;  %v1336_v1 = vld [vmem:[%s1683_s1 + $0x170] sm:$0xff]  }
  0x16   :  { %1161 = vmatprep.subr.bf16.mxu1 %v1290_v23  ;;  %v1331_v61 = vld [vmem:[%s1683_s1 + $0x1e8] sm:$0xff]   ;;  %v1337_v2 = vld [vmem:[%s1683_s1 + $0x130] sm:$0xff]   ;;  %v1340_v5 = vld [vmem:[%s1683_s1 + $0x178] sm:$0xff]  }
  0x17   :  { %1134 = vmatpush3.bf16.msra.mxu0 %v1289_v22  ;;  %v1334_v63 = vld [vmem:[%s1683_s1 + $0x1a8] sm:$0xff]   ;;  %v1338_v3 = vld [vmem:[%s1683_s1 + $0x1f0] sm:$0xff]   ;;  %v1341_v6 = vld [vmem:[%s1683_s1 + $0x138] sm:$0xff]  }
  0x18   :  { %1135 = vmatprep.subr.bf16.mxu0 %v1292_v25  ;;  %v1339_v4 = vld [vmem:[%s1683_s1 + $0x1b0] sm:$0xff]   ;;  %v1342_v7 = vld [vmem:[%s1683_s1 + $0x1f8] sm:$0xff]   ;;  %v1347_v11 = vld [vmem:[%s1683_s1 + $0x200] sm:$0xff]  }
  0x19   :  { %1162 = vmatpush3.bf16.msra.mxu1 %v1291_v24  ;;  %v1343_v8 = vld [vmem:[%s1684_s0 + $0x10] ss:$36 sps:$4 sm:$0xff]   ;;  %v1346_v10 = vld [vmem:[%s1683_s1 + $0x1b8] sm:$0xff]   ;;  %v1351_v14 = vld [vmem:[%s1683_s1 + $0x208] sm:$0xff]  }
  0x1a   :  { %1163 = vmatprep.subr.bf16.mxu1 %v1294_v27  ;;  %v1345_v9 = vld [vmem:[%s1684_s0 + $0x14] ss:$36 sps:$4 sm:$0xff]   ;;  %v1350_v13 = vld [vmem:[%s1684_s0 + $0x1c] ss:$36 sps:$4 sm:$0xff]   ;;  %v1356_v18 = vld [vmem:[%s1684_s0 + $0x64] ss:$36 sps:$4 sm:$0xff]  }
  0x1b   :  { %1136 = vmatpush3.bf16.msra.mxu0 %v1293_v26  ;;  %v1348_v12 = vld [vmem:[%s1684_s0 + $0x18] ss:$36 sps:$4 sm:$0xff]   ;;  %v1355_v17 = vld [vmem:[%s1683_s1 + $0x210] sm:$0xff]   ;;  %v1358_v19 = vld [vmem:[%s1684_s0 + $0x60] ss:$36 sps:$4 sm:$0xff]  }
  0x1c   :  { %1137 = vmatprep.subr.bf16.mxu0 %v1296_v29  ;;  %v1352_v15 = vld [vmem:[%s1684_s0 + $0x5c] ss:$36 sps:$4 sm:$0xff]   ;;  %v185_v24 = vld [vmem:[%s1685_s2 + $0x10] sm:$0xff]  ;;  %v184_v25 = vld [vmem:[%s1685_s2 + $0x8] sm:$0xff] }
  0x1d   :  { %1164 = vmatpush3.bf16.msra.mxu1 %v1295_v28  ;;  %v1354_v16 = vld [vmem:[%s1684_s0 + $0x58] ss:$36 sps:$4 sm:$0xff]   ;;  %v1360_v21 = vld [vmem:[%s1683_s1 + $0x220] sm:$0xff]   ;;  %199 = vperm.xlu1 %1267, %v185_v24   ;;  %v1361_v26 = vld [vmem:[%s1683_s1 + $0x228] sm:$0xff]  }
  0x1e   :  { %1165 = vmatprep.subr.bf16.mxu1 %v1298_v31  ;;  %v1359_v20 = vld [vmem:[%s1683_s1 + $0x218] sm:$0xff]   ;;  %v1364_v22 = vld [vmem:[%s1684_s0 + $0x20] ss:$36 sps:$4 sm:$0xff]   ;;  %v1362_v28 = vld [vmem:[%s1683_s1 + $0x230] sm:$0xff]  }
  0x1f   :  { %1138 = vmatpush3.bf16.msra.mxu0 %v1297_v30  ;;  %v183_v23 = vld [vmem:[%s1685_s2] sm:$0xff]  ;;  %v186_v27 = vld [vmem:[%s1685_s2 + $0x18] sm:$0xff]  ;;  %v1365_v30 = vld [vmem:[%s1684_s0 + $0x68] ss:$36 sps:$4 sm:$0xff]  }
  0x20   :  { %1179 = vmatprep.subr.bf16.mxu0 %v1303_v35  ;;  %189 = vperm.xlu0 %1266, %v183_v23   ;;  %v1363_v29 = vld [vmem:[%s1683_s1 + $0x238] sm:$0xff]  }
  0x21   :  { %1166 = vmatpush3.bf16.msra.mxu1 %v1302_v34  ;;  %204 = vperm.xlu1 %1267, %v186_v27  }
  0x22   :  { %764 = vmatmul.mubr.bf16.vlgmr.msra.gmra.mrb[0].mxu0 %v1299_v32  ;;  %1207 = vmatprep.subr.bf16.mxu1 %v1308_v39 }
  0x23   :  { %1180 = vmatpush3.bf16.msra.mxu0 %v1307_v38  ;;  %771 = vmatprep.mubr.bf16.mxu0 %v1327_v58 }
  0x24   :  { %813 = vmatmul.mubr.bf16.vlgmr.msra.gmra.mrb[0].mxu1 %v1304_v36  ;;  %1181 = vmatprep.subr.bf16.mxu0 %v1310_v41 }
  0x25   :  { %1208 = vmatpush3.bf16.msra.mxu1 %v1309_v40  ;;  %820 = vmatprep.mubr.bf16.mxu1 %v1332_v62 }
  0x26   :  { %1209 = vmatprep.subr.bf16.mxu1 %v1312_v43  ;;  %194 = vperm.xlu0 %1266, %v184_v25  }
  0x27   :  { %1182 = vmatpush3.bf16.msra.mxu0 %v1311_v42 }
  0x28   :  { %1183 = vmatprep.subr.bf16.mxu0 %v1314_v45 }
  0x29   :  { %1210 = vmatpush3.bf16.msra.mxu1 %v1313_v44 }
  0x2a   :  { %1211 = vmatprep.subr.bf16.mxu1 %v1316_v47  ;;  %772 = vmatmul.mubr.bf16.gmra.mrb[4].mxu0 %v1330_v60 }
  0x2b   :  { %1184 = vmatpush3.bf16.msra.mxu0 %v1315_v46  ;;  %861 = vmatprep.mubr.bf16.mxu0 %v1345_v9 }
  0x2c   :  { %1185 = vmatprep.subr.bf16.mxu0 %v1318_v49  ;;  %821 = vmatmul.mubr.bf16.gmra.mrb[4].mxu1 %v1335_v0 }
  0x2d   :  { %1212 = vmatpush3.bf16.msra.mxu1 %v1317_v48  ;;  %910 = vmatprep.mubr.bf16.mxu1 %v1350_v13 }
  0x2e   :  { %1213 = vmatprep.subr.bf16.mxu1 %v1320_v51 }
  0x2f   :  { %1186 = vmatpush3.bf16.msra.mxu0 %v1319_v50 }
  0x30   :  { %1187 = vmatprep.subr.bf16.mxu0 %v1322_v53 }
  0x31   :  { %1214 = vmatpush3.bf16.msra.mxu1 %v1321_v52 }
  0x32   :  { %1215 = vmatprep.subr.bf16.mxu1 %v1324_v55 }
  0x33   :  { %1188 = vmatpush3.bf16.msra.mxu0 %v1323_v54 }
  0x34   :  { %1189 = vmatprep.subr.bf16.mxu0 %v1326_v57 }
  0x35   :  { %1216 = vmatpush3.bf16.msra.mxu1 %v1325_v56 }
  0x36   :  { %1217 = vmatprep.subr.bf16.mxu1 %v1331_v61 }
  0x37   :  { %1190 = vmatpush3.bf16.msra.mxu0 %v1329_v59 }
  0x38   :  { %1191 = vmatprep.subr.bf16.mxu0 %v1336_v1 }
  0x39   :  { %1218 = vmatpush3.bf16.msra.mxu1 %v1334_v63 }
  0x3a   :  { %1219 = vmatprep.subr.bf16.mxu1 %v1338_v3 }
  0x3b   :  { %1192 = vmatpush3.bf16.msra.mxu0 %v1337_v2 }
  0x3c   :  { %1193 = vmatprep.subr.bf16.mxu0 %v1340_v5 }
  0x3d   :  { %1220 = vmatpush3.bf16.msra.mxu1 %v1339_v4 }
  0x3e   :  { %1221 = vmatprep.subr.bf16.mxu1 %v1342_v7 }
  0x3f   :  { %1194 = vmatpush3.bf16.msra.mxu0 %v1341_v6 }
  0x40   :  { %1245 = vmatprep.subr.bf16.mxu0 %v1347_v11 }
  0x41   :  { %1222 = vmatpush3.bf16.msra.mxu1 %v1346_v10 }
  0x42   :  { %862 = vmatmul.mubr.bf16.vlgmr.msra.gmra.mrb[8].mxu0 %v1343_v8 }
  0x43   :  { %1246 = vmatpush3.bf16.msra.mxu0 %v1347_v11  ;;  %869 = vmatprep.mubr.bf16.mxu0 %v1352_v15 }
  0x44   :  { %911 = vmatmul.mubr.bf16.vlgmr.msra.gmra.mrb[8].mxu1 %v1348_v12  ;;  %1247 = vmatprep.subr.bf16.mxu0 %v1351_v14 }
  0x45   :  { %918 = vmatprep.mubr.bf16.mxu1 %v1356_v18 }
  0x47   :  { %1248 = vmatpush3.bf16.msra.mxu0 %v1351_v14 }
  0x48   :  { %1249 = vmatprep.subr.bf16.mxu0 %v1355_v17 }
  0x4a   :  { %870 = vmatmul.mubr.bf16.gmra.mrb[12].mxu0 %v1354_v16 }
  0x4b   :  { %1250 = vmatpush3.bf16.msra.mxu0 %v1355_v17  ;;  %1261 = vmatprep.mubr.bf16.mxu0 %v1364_v22 }
  0x4c   :  { %919 = vmatmul.mubr.bf16.gmra.mrb[12].mxu1 %v1358_v19  ;;  %1251 = vmatprep.subr.bf16.mxu0 %v1359_v20 }
  0x4f   :  { %1252 = vmatpush3.bf16.msra.mxu0 %v1359_v20 }
  0x50   :  { %1253 = vmatprep.subr.bf16.mxu0 %v1360_v21 }
  0x53   :  { %1254 = vmatpush3.bf16.msra.mxu0 %v1360_v21 }
  0x54   :  { %1255 = vmatprep.subr.bf16.mxu0 %v1361_v26 }
  0x57   :  { %1256 = vmatpush3.bf16.msra.mxu0 %v1361_v26 }
  0x58   :  { %1257 = vmatprep.subr.bf16.mxu0 %v1362_v28 }
  0x5b   :  { %1258 = vmatpush3.bf16.msra.mxu0 %v1362_v28 }
  0x5c   :  { %1259 = vmatprep.subr.bf16.mxu0 %v1363_v29 }
  0x5f   :  { %1260 = vmatpush3.bf16.msra.mxu0 %v1363_v29 }
  0x62   :  { %1262 = vmatmul.mubr.bf16.vlgmr.msra.gmra.mrb[16].mxu0 %v1365_v30 }
  0x9c   :  { %v200_v49 = vpop.permute.xlu1 %199 }
  0x9f   :  { %v190_v31 = vpop.permute.xlu0 %189 }
  0xa0   :  { %v205_v54 = vpop.permute.xlu1 %204 }
  0xa5   :  { %v195_v36 = vpop.permute.xlu0 %194 }
  0xf5   :  { %v1139_v32 = vpop.f32.mrb[0].mxu0 }
  0xf6   :  { %v1140_v33 = vpop.f32.mrb[1].mxu0 }
  0xf7   :  { %v1141_v34 = vadd.f32 %v1140_v33, %v1139_v32  ;;  %v1142_v35 = vpop.f32.mrb[2].mxu0  ;;  %v1167_v37 = vpop.f32.mrb[0].mxu1 }
  0xf8   :  { %v1143_v38 = vpop.f32.mrb[3].mxu0  ;;  %v1168_v41 = vpop.f32.mrb[1].mxu1 }
  0xf9   :  { %v766_v39 = vadd.f32 %v1141_v34, %v190_v31  ;;  %v1144_v40 = vadd.f32 %v1143_v38, %v1142_v35  ;;  %v1169_v42 = vadd.f32 %v1168_v41, %v1167_v37  ;;  %v1170_v43 = vpop.f32.mrb[2].mxu1 }
  0xfa   :  { %v1171_v45 = vpop.f32.mrb[3].mxu1 }
  0xfb   :  { %v769_v44 = vadd.f32 %v1144_v40, %v195_v36  ;;  %v815_v46 = vadd.f32 %v1169_v42, %v766_v39  ;;  %v1172_v47 = vadd.f32 %v1171_v45, %v1170_v43  ;;  %v981_v36 = vstv %s1686_s3 }
  0xfd   :  { %v818_v48 = vadd.f32 %v1172_v47, %v769_v44  ;;  %v1145_v50 = vpop.f32.mrb[4].mxu0 }
  0xfe   :  { %v1146_v51 = vpop.f32.mrb[5].mxu0 }
  0xff   :  { %v1147_v52 = vadd.f32 %v1146_v51, %v1145_v50  ;;  %v1148_v53 = vpop.f32.mrb[6].mxu0  ;;  %v1173_v55 = vpop.f32.mrb[4].mxu1 }
 0x100   :  { %v1149_v56 = vpop.f32.mrb[7].mxu0  ;;  %v1174_v59 = vpop.f32.mrb[5].mxu1 }
 0x101   :  { %v774_v57 = vadd.f32 %v1147_v52, %v200_v49  ;;  %v1150_v58 = vadd.f32 %v1149_v56, %v1148_v53  ;;  %v1175_v60 = vadd.f32 %v1174_v59, %v1173_v55  ;;  %v1176_v61 = vpop.f32.mrb[6].mxu1 }
 0x102   :  { %v1177_v63 = vpop.f32.mrb[7].mxu1 }
 0x103   :  { %v777_v62 = vadd.f32 %v1150_v58, %v205_v54  ;;  %v823_v0 = vadd.f32 %v1175_v60, %v774_v57  ;;  %v1178_v1 = vadd.f32 %v1177_v63, %v1176_v61 }
 0x105   :  { %v826_v2 = vadd.f32 %v1178_v1, %v777_v62 }
 0x115   :  { %v1195_v3 = vpop.f32.mrb[8].mxu0 }
 0x116   :  { %v1196_v4 = vpop.f32.mrb[9].mxu0 }
 0x117   :  { %v1197_v5 = vadd.f32 %v1196_v4, %v1195_v3  ;;  %v1198_v6 = vpop.f32.mrb[10].mxu0  ;;  %v1223_v7 = vpop.f32.mrb[8].mxu1 }
 0x118   :  { %v1199_v8 = vpop.f32.mrb[11].mxu0  ;;  %v1224_v11 = vpop.f32.mrb[9].mxu1 }
 0x119   :  { %v864_v9 = vadd.f32 %v1197_v5, %v815_v46  ;;  %v1200_v10 = vadd.f32 %v1199_v8, %v1198_v6  ;;  %v1225_v12 = vadd.f32 %v1224_v11, %v1223_v7  ;;  %v1226_v13 = vpop.f32.mrb[10].mxu1 }
 0x11a   :  { %v1227_v15 = vpop.f32.mrb[11].mxu1 }
 0x11b   :  { %v867_v14 = vadd.f32 %v1200_v10, %v818_v48  ;;  %v1228_v16 = vadd.f32 %v1227_v15, %v1226_v13  ;;  %v913_v17 = vadd.f32 %v1225_v12, %v864_v9 }
 0x11d   :  { %v1201_v18 = vpop.f32.mrb[12].mxu0  ;;  %v916_v20 = vadd.f32 %v1228_v16, %v867_v14 }
 0x11e   :  { %v1202_v19 = vpop.f32.mrb[13].mxu0 }
 0x11f   :  { %v1203_v21 = vadd.f32 %v1202_v19, %v1201_v18  ;;  %v1204_v22 = vpop.f32.mrb[14].mxu0  ;;  %v1229_v23 = vpop.f32.mrb[12].mxu1 }
 0x120   :  { %v1205_v24 = vpop.f32.mrb[15].mxu0  ;;  %v1230_v27 = vpop.f32.mrb[13].mxu1 }
 0x121   :  { %v872_v25 = vadd.f32 %v1203_v21, %v823_v0  ;;  %v1206_v26 = vadd.f32 %v1205_v24, %v1204_v22  ;;  %v1231_v28 = vadd.f32 %v1230_v27, %v1229_v23  ;;  %v1232_v29 = vpop.f32.mrb[14].mxu1 }
 0x122   :  { %v1233_v31 = vpop.f32.mrb[15].mxu1 }
 0x123   :  { %v875_v30 = vadd.f32 %v1206_v26, %v826_v2  ;;  %v1234_v32 = vadd.f32 %v1233_v31, %v1232_v29  ;;  %v921_v33 = vadd.f32 %v1231_v28, %v872_v25 }
 0x125   :  { %v924_v34 = vadd.f32 %v1234_v32, %v875_v30 }
 0x135   :  { %v1263_v35 = vpop.f32.mrb[16].mxu0 }
 0x136   :  { %v970_v37 = vadd.f32 %v1263_v35, %v921_v33  ;;  %v961_v38 = vpop.f32.mrb[17].mxu0 }
 0x137   :  { %v962_v39 = vadd.f32 %v961_v38, %v913_v17  ;;  %v1264_v40 = vpop.f32.mrb[18].mxu0 }
 0x138   :  { %v984_v41 = vmul.f32 %v981_v36, %v970_v37  ;;  %v973_v42 = vadd.f32 %v1264_v40, %v924_v34  ;;  %v964_v43 = vpop.f32.mrb[19].mxu0  ;;  %vm979_vm0 = vcmp.ge.f32.partialorder %v970_v37, 0.0 }
 0x139   :  { %v982_v44 = vmul.f32 %v981_v36, %v962_v39  ;;  %v965_v45 = vadd.f32 %v964_v43, %v916_v20  ;;  %vm977_vm1 = vcmp.ge.f32.partialorder %v962_v39, 0.0 }
 0x13a   :  { %vm980_vm2 = vcmp.ge.f32.partialorder %v973_v42, 0.0  ;;  %v985_v46 = vmul.f32 %v981_v36, %v973_v42  ;;  %v988_v48 = vsel %vm979_vm0, %v970_v37, %v984_v41 }
 0x13b   :  { %vm978_vm3 = vcmp.ge.f32.partialorder %v965_v45, 0.0  ;;  %v983_v47 = vmul.f32 %v981_v36, %v965_v45  ;;  %v986_v50 = vsel %vm977_vm1, %v962_v39, %v982_v44 }
 0x13c   :  { %v989_v49 = vsel %vm980_vm2, %v973_v42, %v985_v46 }
 0x13d   :  { %v1120_v51 = vpack.c.bf16 %v989_v49, %v988_v48  ;;  %v987_v52 = vsel %vm978_vm3, %v965_v45, %v983_v47 }
 0x13e   :  { %v1115_v53 = vpack.c.bf16 %v987_v52, %v986_v50 }
 0x13f   :  { %1122 = vst [vmem:[%s1687_s4 + $0x8] sm:$0xff] %v1120_v51  }
 0x140   :  { %1116 = vst [vmem:[%s1687_s4] sm:$0xff] %v1115_v53  }

// kernel: sub.14
= control target key start
LH: loop header
LB: loop body
LE: loop exit
PB: predicated region body
PF: predicated region fallthrough
CT: control target
= control target key end

     0   :  { %v1877_v31 = vmov 0.0   ;;  %s1874_s0 = inlined_call_operand.vmem [shape: bf16[32,2,16,16], index: 0, kind: input, shape index: {}]   ;;  %s1875_s1 = inlined_call_operand.vmem [shape: bf16[32,2,16,16], index: 1, kind: input, shape index: {}]   ;;  %s1876_s2 = inlined_call_operand.vmem [shape: bf16[32,2,16,16], index: 2, kind: output, shape index: {}]  }
   0x1   :  { %v1169_v0 = vld [vmem:[%s1874_s0] sm:$0xff]   ;;  %v1192_v7 = vld [vmem:[%s1874_s0 + $0x8] sm:$0xff]   ;;  %v1216_v15 = vld [vmem:[%s1874_s0 + $0x10] sm:$0xff]  }
   0x2   :  { %v1174_v1 = vld [vmem:[%s1875_s1] sm:$0xff]   ;;  %v4_v3 = vunpack.c.l.bf16 %v1169_v0  ;;  %v1197_v8 = vld [vmem:[%s1875_s1 + $0x8] sm:$0xff]   ;;  %v32_v11 = vunpack.c.l.bf16 %v1192_v7  ;;  %v62_v20 = vunpack.c.l.bf16 %v1216_v15  ;;  %v1225_v21 = vld [vmem:[%s1875_s1 + $0x10] sm:$0xff]   ;;  %v1899_v0 = vunpack.c.h.bf16 %v1169_v0 }
   0x3   :  { %v1179_v2 = vld [vmem:[%s1874_s0 + $0x80] sm:$0xff]   ;;  %v7_v4 = vunpack.c.l.bf16 %v1174_v1  ;;  %v36_v12 = vunpack.c.l.bf16 %v1197_v8  ;;  %v1206_v13 = vld [vmem:[%s1874_s0 + $0x88] sm:$0xff]   ;;  %v1230_v22 = vld [vmem:[%s1874_s0 + $0x90] sm:$0xff]   ;;  %v66_v26 = vunpack.c.l.bf16 %v1225_v21  ;;  %v1898_v1 = vunpack.c.h.bf16 %v1174_v1 }
   0x4   :  { %v17_v5 = vunpack.c.l.bf16 %v1179_v2  ;;  %v1187_v6 = vld [vmem:[%s1875_s1 + $0x80] sm:$0xff]   ;;  %v1211_v14 = vld [vmem:[%s1875_s1 + $0x88] sm:$0xff]   ;;  %v47_v18 = vunpack.c.l.bf16 %v1206_v13  ;;  %v1235_v23 = vld [vmem:[%s1875_s1 + $0x90] sm:$0xff]   ;;  %v77_v27 = vunpack.c.l.bf16 %v1230_v22  ;;  %v497_v2 = vunpack.c.h.bf16 %v1179_v2 }
   0x5   :  { %v21_v10 = vunpack.c.l.bf16 %v1187_v6  ;;  %v11_v17 = vsub.f32 %v4_v3, %v7_v4  ;;  %v51_v19 = vunpack.c.l.bf16 %v1211_v14  ;;  %v40_v25 = vsub.f32 %v32_v11, %v36_v12  ;;  %v1242_v28 = vld [vmem:[%s1874_s0 + $0x18] sm:$0xff]   ;;  %v1265_v37 = vld [vmem:[%s1874_s0 + $0x20] sm:$0xff]   ;;  %v1294_v49 = vld [vmem:[%s1874_s0 + $0x28] sm:$0xff]  }
   0x6   :  { %v1247_v29 = vld [vmem:[%s1875_s1 + $0x18] sm:$0xff]   ;;  %v81_v34 = vunpack.c.l.bf16 %v1235_v23  ;;  %v92_v35 = vunpack.c.l.bf16 %v1242_v28  ;;  %v1270_v38 = vld [vmem:[%s1875_s1 + $0x20] sm:$0xff]   ;;  %v70_v41 = vsub.f32 %v62_v20, %v66_v26  ;;  %v1299_v50 = vld [vmem:[%s1875_s1 + $0x28] sm:$0xff]   ;;  %v122_v53 = vunpack.c.l.bf16 %v1265_v37 }
   0x7   :  { %v25_v24 = vsub.f32 %v17_v5, %v21_v10  ;;  %v1252_v30 = vld [vmem:[%s1874_s0 + $0x98] sm:$0xff]   ;;  %v13_v32 = vpack.c.bf16 %v1877_v31, %v11_v17  ;;  %v55_v33 = vsub.f32 %v47_v18, %v51_v19  ;;  %v43_v40 = vpack.c.bf16 %v1877_v31, %v40_v25  ;;  %v1278_v43 = vld [vmem:[%s1874_s0 + $0xa0] sm:$0xff]   ;;  %v1313_v55 = vld [vmem:[%s1874_s0 + $0xa8] sm:$0xff]  }
   0x8   :  { %v1260_v36 = vld [vmem:[%s1875_s1 + $0x98] sm:$0xff]   ;;  %v96_v42 = vunpack.c.l.bf16 %v1247_v29  ;;  %v1283_v44 = vld [vmem:[%s1875_s1 + $0xa0] sm:$0xff]   ;;  %v85_v46 = vsub.f32 %v77_v27, %v81_v34  ;;  %v107_v47 = vunpack.c.l.bf16 %v1252_v30  ;;  %v73_v51 = vpack.c.bf16 %v1877_v31, %v70_v41  ;;  %v1318_v56 = vld [vmem:[%s1875_s1 + $0xa8] sm:$0xff]  }
   0x9   :  { %v28_v39 = vpack.c.bf16 %v1877_v31, %v25_v24  ;;  %14 = vst [vmem:[%s1876_s2] sm:$0xf] %v13_v32  ;;  %v58_v45 = vpack.c.bf16 %v1877_v31, %v55_v33  ;;  %v111_v48 = vunpack.c.l.bf16 %v1260_v36  ;;  %965 = vst [vmem:[%s1876_s2 + $0x8] sm:$0xf] %v43_v40  ;;  %v126_v54 = vunpack.c.l.bf16 %v1270_v38  ;;  %v1329_v61 = vld [vmem:[%s1874_s0 + $0x30] sm:$0xff]   ;;  %v1361_v20 = vld [vmem:[%s1874_s0 + $0x38] sm:$0xff]  }
   0xa   :  { %v100_v52 = vsub.f32 %v92_v35, %v96_v42  ;;  %v88_v57 = vpack.c.bf16 %v1877_v31, %v85_v46  ;;  %v137_v59 = vunpack.c.l.bf16 %v1278_v43  ;;  %v141_v60 = vunpack.c.l.bf16 %v1283_v44  ;;  %v1334_v62 = vld [vmem:[%s1875_s1 + $0x30] sm:$0xff]   ;;  %971 = vst [vmem:[%s1876_s2 + $0x10] sm:$0xf] %v73_v51  ;;  %v1366_v24 = vld [vmem:[%s1875_s1 + $0x38] sm:$0xff]   ;;  %v1393_v42 = vld [vmem:[%s1874_s0 + $0x40] sm:$0xff]  }
   0xb   :  { %962 = vst [vmem:[%s1876_s2 + $0x80] sm:$0xf] %v28_v39  ;;  %968 = vst [vmem:[%s1876_s2 + $0x88] sm:$0xf] %v58_v45  ;;  %v115_v58 = vsub.f32 %v107_v47, %v111_v48  ;;  %v130_v3 = vsub.f32 %v122_v53, %v126_v54  ;;  %v152_v4 = vunpack.c.l.bf16 %v1294_v49  ;;  %v156_v5 = vunpack.c.l.bf16 %v1299_v50  ;;  %v1345_v10 = vld [vmem:[%s1874_s0 + $0xb0] sm:$0xff]   ;;  %v1377_v33 = vld [vmem:[%s1874_s0 + $0xb8] sm:$0xff]  }
   0xc   :  { %v103_v63 = vpack.c.bf16 %v1877_v31, %v100_v52  ;;  %v1350_v11 = vld [vmem:[%s1875_s1 + $0xb0] sm:$0xff]   ;;  %974 = vst [vmem:[%s1876_s2 + $0x90] sm:$0xf] %v88_v57  ;;  %v145_v17 = vsub.f32 %v137_v59, %v141_v60  ;;  %v167_v18 = vunpack.c.l.bf16 %v1313_v55  ;;  %v171_v19 = vunpack.c.l.bf16 %v1318_v56  ;;  %v1382_v34 = vld [vmem:[%s1875_s1 + $0xb8] sm:$0xff]   ;;  %v1398_v45 = vld [vmem:[%s1875_s1 + $0x40] sm:$0xff]  }
   0xd   :  { %v118_v12 = vpack.c.bf16 %v1877_v31, %v115_v58  ;;  %v133_v25 = vpack.c.bf16 %v1877_v31, %v130_v3  ;;  %v160_v26 = vsub.f32 %v152_v4, %v156_v5  ;;  %v182_v27 = vunpack.c.l.bf16 %v1329_v61  ;;  %v1409_v52 = vld [vmem:[%s1874_s0 + $0xc0] sm:$0xff]   ;;  %v1425_v60 = vld [vmem:[%s1874_s0 + $0x48] sm:$0xff]  }
   0xe   :  { %977 = vst [vmem:[%s1876_s2 + $0x18] sm:$0xf] %v103_v63  ;;  %v186_v32 = vunpack.c.l.bf16 %v1334_v62  ;;  %v148_v35 = vpack.c.bf16 %v1877_v31, %v145_v17  ;;  %v175_v39 = vsub.f32 %v167_v18, %v171_v19  ;;  %v197_v40 = vunpack.c.l.bf16 %v1345_v10  ;;  %v1414_v53 = vld [vmem:[%s1875_s1 + $0xc0] sm:$0xff]   ;;  %v1430_v63 = vld [vmem:[%s1875_s1 + $0x48] sm:$0xff]  }
   0xf   :  { %980 = vst [vmem:[%s1876_s2 + $0x98] sm:$0xf] %v118_v12  ;;  %v201_v41 = vunpack.c.l.bf16 %v1350_v11  ;;  %983 = vst [vmem:[%s1876_s2 + $0x20] sm:$0xf] %v133_v25  ;;  %v163_v46 = vpack.c.bf16 %v1877_v31, %v160_v26  ;;  %v212_v48 = vunpack.c.l.bf16 %v1361_v20  ;;  %v216_v51 = vunpack.c.l.bf16 %v1366_v24  ;;  %v1441_v17 = vld [vmem:[%s1874_s0 + $0xc8] sm:$0xff]  }
  0x10   :  { %v190_v47 = vsub.f32 %v182_v27, %v186_v32  ;;  %986 = vst [vmem:[%s1876_s2 + $0xa0] sm:$0xf] %v148_v35  ;;  %v178_v54 = vpack.c.bf16 %v1877_v31, %v175_v39  ;;  %v227_v58 = vunpack.c.l.bf16 %v1377_v33  ;;  %v231_v59 = vunpack.c.l.bf16 %v1382_v34  ;;  %v1446_v18 = vld [vmem:[%s1875_s1 + $0xc8] sm:$0xff]   ;;  %v1457_v32 = vld [vmem:[%s1874_s0 + $0x50] sm:$0xff]  }
  0x11   :  { %v205_v57 = vsub.f32 %v197_v40, %v201_v41  ;;  %989 = vst [vmem:[%s1876_s2 + $0x28] sm:$0xf] %v163_v46  ;;  %v220_v4 = vsub.f32 %v212_v48, %v216_v51  ;;  %v242_v5 = vunpack.c.l.bf16 %v1393_v42  ;;  %v246_v12 = vunpack.c.l.bf16 %v1398_v45  ;;  %v1462_v35 = vld [vmem:[%s1875_s1 + $0x50] sm:$0xff]   ;;  %v1558_v9 = vld [vmem:[%s1875_s1 + $0x68] sm:$0xff]  }
  0x12   :  { %v193_v3 = vpack.c.bf16 %v1877_v31, %v190_v47  ;;  %992 = vst [vmem:[%s1876_s2 + $0xa8] sm:$0xf] %v178_v54  ;;  %v235_v25 = vsub.f32 %v227_v58, %v231_v59  ;;  %v257_v26 = vunpack.c.l.bf16 %v1409_v52  ;;  %v261_v27 = vunpack.c.l.bf16 %v1414_v53  ;;  %v1473_v47 = vld [vmem:[%s1874_s0 + $0xd0] sm:$0xff]   ;;  %v1489_v59 = vld [vmem:[%s1874_s0 + $0x58] sm:$0xff]   ;;  %1892 = vst [vmem:[#allocation5_spill] sm:$0xff] %v1558_v9 }
  0x13   :  { %v208_v19 = vpack.c.bf16 %v1877_v31, %v205_v57  ;;  %v223_v39 = vpack.c.bf16 %v1877_v31, %v220_v4  ;;  %v250_v40 = vsub.f32 %v242_v5, %v246_v12  ;;  %v272_v41 = vunpack.c.l.bf16 %v1425_v60  ;;  %v1478_v48 = vld [vmem:[%s1875_s1 + $0xd0] sm:$0xff]   ;;  %v1569_v16 = vld [vmem:[%s1874_s0 + $0xe8] sm:$0xff]  }
  0x14   :  { %995 = vst [vmem:[%s1876_s2 + $0x30] sm:$0xf] %v193_v3  ;;  %v276_v46 = vunpack.c.l.bf16 %v1430_v63  ;;  %v238_v51 = vpack.c.bf16 %v1877_v31, %v235_v25  ;;  %v265_v54 = vsub.f32 %v257_v26, %v261_v27  ;;  %v287_v57 = vunpack.c.l.bf16 %v1441_v17  ;;  %v1494_v3 = vld [vmem:[%s1875_s1 + $0x58] sm:$0xff]   ;;  %1893 = vst [vmem:[#allocation6_spill] sm:$0xff] %v1569_v16 }
  0x15   :  { %998 = vst [vmem:[%s1876_s2 + $0xb0] sm:$0xf] %v208_v19  ;;  %v291_v58 = vunpack.c.l.bf16 %v1446_v18  ;;  %1001 = vst [vmem:[%s1876_s2 + $0x38] sm:$0xf] %v223_v39  ;;  %v253_v4 = vpack.c.bf16 %v1877_v31, %v250_v40  ;;  %v302_v12 = vunpack.c.l.bf16 %v1457_v32  ;;  %v306_v19 = vunpack.c.l.bf16 %v1462_v35  ;;  %v1505_v25 = vld [vmem:[%s1874_s0 + $0xd8] sm:$0xff]  }
  0x16   :  { %v280_v5 = vsub.f32 %v272_v41, %v276_v46  ;;  %v1510_v26 = vld [vmem:[%s1875_s1 + $0xd8] sm:$0xff]   ;;  %1004 = vst [vmem:[%s1876_s2 + $0xb8] sm:$0xf] %v238_v51  ;;  %v268_v27 = vpack.c.bf16 %v1877_v31, %v265_v54  ;;  %v317_v40 = vunpack.c.l.bf16 %v1473_v47  ;;  %v321_v41 = vunpack.c.l.bf16 %v1478_v48  ;;  %v1521_v46 = vld [vmem:[%s1874_s0 + $0x60] sm:$0xff]  }
  0x17   :  { %v295_v39 = vsub.f32 %v287_v57, %v291_v58  ;;  %v1526_v51 = vld [vmem:[%s1875_s1 + $0x60] sm:$0xff]   ;;  %1007 = vst [vmem:[%s1876_s2 + $0x40] sm:$0xf] %v253_v4  ;;  %v310_v57 = vsub.f32 %v302_v12, %v306_v19  ;;  %v332_v58 = vunpack.c.l.bf16 %v1489_v59  ;;  %v336_v4 = vunpack.c.l.bf16 %v1494_v3 }
  0x18   :  { %1888 = vst [vmem:[#allocation1_spill] sm:$0xff] %v1526_v51  ;;  %v283_v54 = vpack.c.bf16 %v1877_v31, %v280_v5  ;;  %v1537_v5 = vld [vmem:[%s1874_s0 + $0xe0] sm:$0xff]   ;;  %1010 = vst [vmem:[%s1876_s2 + $0xc0] sm:$0xf] %v268_v27  ;;  %v325_v27 = vsub.f32 %v317_v40, %v321_v41  ;;  %v351_v40 = vunpack.c.l.bf16 %v1510_v26  ;;  %v1553_v41 = vld [vmem:[%s1874_s0 + $0x68] sm:$0xff]   ;;  %v501_v6 = vunpack.c.h.bf16 %v1187_v6 }
  0x19   :  { %1889 = vst [vmem:[#allocation2_spill] sm:$0xff] %v1537_v5  ;;  %v1542_v12 = vld [vmem:[%s1875_s1 + $0xe0] sm:$0xff]   ;;  %v298_v19 = vpack.c.bf16 %v1877_v31, %v295_v39  ;;  %v347_v39 = vunpack.c.l.bf16 %v1505_v25  ;;  %1891 = vst [vmem:[#allocation4_spill] sm:$0xff] %v1553_v41  ;;  %v512_v7 = vunpack.c.h.bf16 %v1192_v7  ;;  %v516_v8 = vunpack.c.h.bf16 %v1197_v8 }
  0x1a   :  { %1890 = vst [vmem:[#allocation3_spill] sm:$0xff] %v1542_v12  ;;  %1013 = vst [vmem:[%s1876_s2 + $0x48] sm:$0xf] %v283_v54  ;;  %v313_v54 = vpack.c.bf16 %v1877_v31, %v310_v57  ;;  %v340_v57 = vsub.f32 %v332_v58, %v336_v4  ;;  %v362_v58 = vunpack.c.l.bf16 %v1521_v46  ;;  %v366_v4 = vunpack.c.l.bf16 %v1526_v51  ;;  %v1574_v31 = vld [vmem:[%s1875_s1 + $0xe8] sm:$0xff]   ;;  %v1590_v51 = vld [vmem:[%s1875_s1 + $0x70] sm:$0xff]  }
  0x1b   :  { %1894 = vst [vmem:[#allocation7_spill] sm:$0xff] %v1574_v31  ;;  %1016 = vst [vmem:[%s1876_s2 + $0xc8] sm:$0xf] %v298_v19  ;;  %v1895_v19 = vmov 0.0   ;;  %v355_v39 = vsub.f32 %v347_v39, %v351_v40  ;;  %v377_v40 = vunpack.c.l.bf16 %v1537_v5  ;;  %v381_v12 = vunpack.c.l.bf16 %v1542_v12  ;;  %v1585_v5 = vld [vmem:[%s1874_s0 + $0x70] sm:$0xff]  }
  0x1c   :  { %v328_v27 = vpack.c.bf16 %v1895_v19, %v325_v27  ;;  %1896 = vst [vmem:[#allocation8_spill] sm:$0xff] %v1585_v5  ;;  %1897 = vst [vmem:[#allocation9_spill] sm:$0xff] %v1590_v51  ;;  %v527_v13 = vunpack.c.h.bf16 %v1206_v13  ;;  %v531_v14 = vunpack.c.h.bf16 %v1211_v14  ;;  %v542_v15 = vunpack.c.h.bf16 %v1216_v15 }
  0x1d   :  { %1019 = vst [vmem:[%s1876_s2 + $0x50] sm:$0xf] %v313_v54  ;;  %v343_v54 = vpack.c.bf16 %v1895_v19, %v340_v57  ;;  %v370_v57 = vsub.f32 %v362_v58, %v366_v4  ;;  %v392_v58 = vunpack.c.l.bf16 %v1553_v41  ;;  %v396_v4 = vunpack.c.l.bf16 %v1558_v9  ;;  %v1601_v9 = vld [vmem:[%s1874_s0 + $0xf0] sm:$0xff]  }
  0x1e   :  { %v1606_v41 = vld [vmem:[%s1875_s1 + $0xf0] sm:$0xff]   ;;  %1022 = vst [vmem:[%s1876_s2 + $0xd0] sm:$0xf] %v328_v27  ;;  %v358_v27 = vpack.c.bf16 %v1895_v19, %v355_v39  ;;  %v385_v12 = vsub.f32 %v377_v40, %v381_v12  ;;  %v407_v39 = vunpack.c.l.bf16 %v1569_v16  ;;  %v411_v40 = vunpack.c.l.bf16 %v1574_v31  ;;  %v1617_v31 = vld [vmem:[%s1874_s0 + $0x78] sm:$0xff]  }
  0x1f   :  { %v1622_v16 = vld [vmem:[%s1875_s1 + $0x78] sm:$0xff]   ;;  %1025 = vst [vmem:[%s1876_s2 + $0x58] sm:$0xf] %v343_v54  ;;  %v373_v54 = vpack.c.bf16 %v1895_v19, %v370_v57  ;;  %v400_v57 = vsub.f32 %v392_v58, %v396_v4  ;;  %v422_v58 = vunpack.c.l.bf16 %v1585_v5  ;;  %v426_v4 = vunpack.c.l.bf16 %v1590_v51 }
  0x20   :  { %v1633_v51 = vld [vmem:[%s1874_s0 + $0xf8] sm:$0xff]   ;;  %1028 = vst [vmem:[%s1876_s2 + $0xd8] sm:$0xf] %v358_v27  ;;  %v388_v27 = vpack.c.bf16 %v1895_v19, %v385_v12  ;;  %v415_v12 = vsub.f32 %v407_v39, %v411_v40  ;;  %v437_v39 = vunpack.c.l.bf16 %v1601_v9  ;;  %v441_v40 = vunpack.c.l.bf16 %v1606_v41 }
  0x21   :  { %v1638_v5 = vld [vmem:[%s1875_s1 + $0xf8] sm:$0xff]   ;;  %1031 = vst [vmem:[%s1876_s2 + $0x60] sm:$0xf] %v373_v54  ;;  %v403_v54 = vpack.c.bf16 %v1895_v19, %v400_v57  ;;  %v430_v57 = vsub.f32 %v422_v58, %v426_v4  ;;  %v452_v58 = vunpack.c.l.bf16 %v1617_v31  ;;  %v456_v4 = vunpack.c.l.bf16 %v1622_v16 }
  0x22   :  { %1034 = vst [vmem:[%s1876_s2 + $0xe0] sm:$0xf] %v388_v27  ;;  %v418_v27 = vpack.c.bf16 %v1895_v19, %v415_v12  ;;  %v445_v12 = vsub.f32 %v437_v39, %v441_v40  ;;  %v467_v39 = vunpack.c.l.bf16 %v1633_v51  ;;  %v471_v40 = vunpack.c.l.bf16 %v1638_v5 }
  0x23   :  { %1037 = vst [vmem:[%s1876_s2 + $0x68] sm:$0xf] %v403_v54  ;;  %v433_v54 = vpack.c.bf16 %v1895_v19, %v430_v57  ;;  %v460_v57 = vsub.f32 %v452_v58, %v456_v4  ;;  %v490_v58 = vsub.f32 %v1899_v0, %v1898_v1  ;;  %v546_v21 = vunpack.c.h.bf16 %v1225_v21 }
  0x24   :  { %1040 = vst [vmem:[%s1876_s2 + $0xe8] sm:$0xf] %v418_v27  ;;  %v448_v4 = vpack.c.bf16 %v1895_v19, %v445_v12  ;;  %v475_v27 = vsub.f32 %v467_v39, %v471_v40  ;;  %v557_v22 = vunpack.c.h.bf16 %v1230_v22  ;;  %v561_v23 = vunpack.c.h.bf16 %v1235_v23 }
  0x25   :  { %1043 = vst [vmem:[%s1876_s2 + $0x70] sm:$0xf] %v433_v54  ;;  %v463_v12 = vpack.c.bf16 %v1895_v19, %v460_v57  ;;  %v493_v39 = vpack.c.bf16 %v1895_v19, %v490_v58  ;;  %v505_v54 = vsub.f32 %v497_v2, %v501_v6  ;;  %v520_v57 = vsub.f32 %v512_v7, %v516_v8 }
  0x26   :  { %1046 = vst [vmem:[%s1876_s2 + $0xf0] sm:$0xf] %v448_v4  ;;  %v478_v40 = vpack.c.bf16 %v1895_v19, %v475_v27  ;;  %v535_v0 = vsub.f32 %v527_v13, %v531_v14  ;;  %v572_v28 = vunpack.c.h.bf16 %v1242_v28  ;;  %v576_v29 = vunpack.c.h.bf16 %v1247_v29 }
  0x27   :  { %1049 = vst [vmem:[%s1876_s2 + $0x78] sm:$0xf] %v463_v12  ;;  %1055 = vst [vmem:[%s1876_s2 + $0x4] sm:$0xf] %v493_v39  ;;  %v508_v1 = vpack.c.bf16 %v1895_v19, %v505_v54  ;;  %v523_v58 = vpack.c.bf16 %v1895_v19, %v520_v57  ;;  %v550_v2 = vsub.f32 %v542_v15, %v546_v21  ;;  %v587_v30 = vunpack.c.h.bf16 %v1252_v30 }
  0x28   :  { %1052 = vst [vmem:[%s1876_s2 + $0xf8] sm:$0xf] %v478_v40  ;;  %v565_v4 = vsub.f32 %v557_v22, %v561_v23  ;;  %v538_v27 = vpack.c.bf16 %v1895_v19, %v535_v0  ;;  %v580_v6 = vsub.f32 %v572_v28, %v576_v29  ;;  %v591_v36 = vunpack.c.h.bf16 %v1260_v36 }
  0x29   :  { %1058 = vst [vmem:[%s1876_s2 + $0x84] sm:$0xf] %v508_v1  ;;  %v602_v37 = vunpack.c.h.bf16 %v1265_v37  ;;  %1061 = vst [vmem:[%s1876_s2 + $0xc] sm:$0xf] %v523_v58  ;;  %v553_v7 = vpack.c.bf16 %v1895_v19, %v550_v2  ;;  %v606_v38 = vunpack.c.h.bf16 %v1270_v38  ;;  %v617_v43 = vunpack.c.h.bf16 %v1278_v43 }
  0x2a   :  { %v568_v12 = vpack.c.bf16 %v1895_v19, %v565_v4  ;;  %1064 = vst [vmem:[%s1876_s2 + $0x8c] sm:$0xf] %v538_v27  ;;  %v583_v39 = vpack.c.bf16 %v1895_v19, %v580_v6  ;;  %v595_v8 = vsub.f32 %v587_v30, %v591_v36  ;;  %v621_v44 = vunpack.c.h.bf16 %v1283_v44 }
  0x2b   :  { %v632_v49 = vunpack.c.h.bf16 %v1294_v49  ;;  %1067 = vst [vmem:[%s1876_s2 + $0x14] sm:$0xf] %v553_v7  ;;  %v610_v13 = vsub.f32 %v602_v37, %v606_v38  ;;  %v636_v50 = vunpack.c.h.bf16 %v1299_v50  ;;  %v647_v55 = vunpack.c.h.bf16 %v1313_v55 }
  0x2c   :  { %1070 = vst [vmem:[%s1876_s2 + $0x94] sm:$0xf] %v568_v12  ;;  %v651_v56 = vunpack.c.h.bf16 %v1318_v56  ;;  %1073 = vst [vmem:[%s1876_s2 + $0x1c] sm:$0xf] %v583_v39  ;;  %v598_v40 = vpack.c.bf16 %v1895_v19, %v595_v8  ;;  %v625_v54 = vsub.f32 %v617_v43, %v621_v44  ;;  %v662_v61 = vunpack.c.h.bf16 %v1329_v61  ;;  %v1900_v44 = vld [vmem:[#allocation1_spill] sm:$0xff] }
  0x2d   :  { %v666_v62 = vunpack.c.h.bf16 %v1334_v62  ;;  %v613_v14 = vpack.c.bf16 %v1895_v19, %v610_v13  ;;  %v640_v15 = vsub.f32 %v632_v49, %v636_v50  ;;  %v677_v10 = vunpack.c.h.bf16 %v1345_v10 }
  0x2e   :  { %v655_v57 = vsub.f32 %v647_v55, %v651_v56  ;;  %1076 = vst [vmem:[%s1876_s2 + $0x9c] sm:$0xf] %v598_v40  ;;  %v628_v21 = vpack.c.bf16 %v1895_v19, %v625_v54  ;;  %v681_v11 = vunpack.c.h.bf16 %v1350_v11  ;;  %v692_v20 = vunpack.c.h.bf16 %v1361_v20  ;;  %v1901_v56 = vld [vmem:[#allocation2_spill] sm:$0xff] }
  0x2f   :  { %v670_v22 = vsub.f32 %v662_v61, %v666_v62  ;;  %1079 = vst [vmem:[%s1876_s2 + $0x24] sm:$0xf] %v613_v14  ;;  %v643_v23 = vpack.c.bf16 %v1895_v19, %v640_v15  ;;  %v696_v24 = vunpack.c.h.bf16 %v1366_v24  ;;  %v707_v33 = vunpack.c.h.bf16 %v1377_v33  ;;  %v1902_v62 = vld [vmem:[#allocation3_spill] sm:$0xff]  ;;  %v1903_v15 = vld [vmem:[#allocation4_spill] sm:$0xff] }
  0x30   :  { %v658_v1 = vpack.c.bf16 %v1895_v19, %v655_v57  ;;  %1082 = vst [vmem:[%s1876_s2 + $0xa4] sm:$0xf] %v628_v21  ;;  %v685_v28 = vsub.f32 %v677_v10, %v681_v11  ;;  %v711_v34 = vunpack.c.h.bf16 %v1382_v34  ;;  %v722_v42 = vunpack.c.h.bf16 %v1393_v42 }
  0x31   :  { %v673_v0 = vpack.c.bf16 %v1895_v19, %v670_v22  ;;  %1085 = vst [vmem:[%s1876_s2 + $0x2c] sm:$0xf] %v643_v23  ;;  %v700_v29 = vsub.f32 %v692_v20, %v696_v24  ;;  %v726_v45 = vunpack.c.h.bf16 %v1398_v45  ;;  %v737_v52 = vunpack.c.h.bf16 %v1409_v52  ;;  %v1904_v22 = vld [vmem:[#allocation5_spill] sm:$0xff]  ;;  %v1905_v20 = vld [vmem:[#allocation6_spill] sm:$0xff] }
  0x32   :  { %1088 = vst [vmem:[%s1876_s2 + $0xac] sm:$0xf] %v658_v1  ;;  %v741_v53 = vunpack.c.h.bf16 %v1414_v53  ;;  %v688_v58 = vpack.c.bf16 %v1895_v19, %v685_v28  ;;  %v715_v2 = vsub.f32 %v707_v33, %v711_v34  ;;  %v752_v60 = vunpack.c.h.bf16 %v1425_v60  ;;  %v1906_v33 = vld [vmem:[#allocation7_spill] sm:$0xff]  ;;  %v1907_v28 = vld [vmem:[#allocation8_spill] sm:$0xff] }
  0x33   :  { %1091 = vst [vmem:[%s1876_s2 + $0x34] sm:$0xf] %v673_v0  ;;  %v756_v63 = vunpack.c.h.bf16 %v1430_v63  ;;  %v703_v4 = vpack.c.bf16 %v1895_v19, %v700_v29  ;;  %v730_v30 = vsub.f32 %v722_v42, %v726_v45  ;;  %v767_v17 = vunpack.c.h.bf16 %v1441_v17  ;;  %v1908_v29 = vld [vmem:[#allocation9_spill] sm:$0xff] }
  0x34   :  { %v745_v27 = vsub.f32 %v737_v52, %v741_v53  ;;  %1094 = vst [vmem:[%s1876_s2 + $0xb4] sm:$0xf] %v688_v58  ;;  %v718_v6 = vpack.c.bf16 %v1895_v19, %v715_v2  ;;  %v771_v18 = vunpack.c.h.bf16 %v1446_v18  ;;  %v782_v32 = vunpack.c.h.bf16 %v1457_v32 }
  0x35   :  { %v760_v36 = vsub.f32 %v752_v60, %v756_v63  ;;  %1097 = vst [vmem:[%s1876_s2 + $0x3c] sm:$0xf] %v703_v4  ;;  %v733_v37 = vpack.c.bf16 %v1895_v19, %v730_v30  ;;  %v786_v35 = vunpack.c.h.bf16 %v1462_v35  ;;  %v797_v47 = vunpack.c.h.bf16 %v1473_v47 }
  0x36   :  { %v748_v7 = vpack.c.bf16 %v1895_v19, %v745_v27  ;;  %1100 = vst [vmem:[%s1876_s2 + $0xbc] sm:$0xf] %v718_v6  ;;  %v775_v38 = vsub.f32 %v767_v17, %v771_v18  ;;  %v801_v48 = vunpack.c.h.bf16 %v1478_v48  ;;  %v812_v59 = vunpack.c.h.bf16 %v1489_v59 }
  0x37   :  { %v763_v12 = vpack.c.bf16 %v1895_v19, %v760_v36  ;;  %1103 = vst [vmem:[%s1876_s2 + $0x44] sm:$0xf] %v733_v37  ;;  %v790_v43 = vsub.f32 %v782_v32, %v786_v35  ;;  %v816_v3 = vunpack.c.h.bf16 %v1494_v3  ;;  %v827_v25 = vunpack.c.h.bf16 %v1505_v25 }
  0x38   :  { %1106 = vst [vmem:[%s1876_s2 + $0xc4] sm:$0xf] %v748_v7  ;;  %v831_v26 = vunpack.c.h.bf16 %v1510_v26  ;;  %v778_v39 = vpack.c.bf16 %v1895_v19, %v775_v38  ;;  %v805_v8 = vsub.f32 %v797_v47, %v801_v48  ;;  %v842_v46 = vunpack.c.h.bf16 %v1521_v46 }
  0x39   :  { %1109 = vst [vmem:[%s1876_s2 + $0x4c] sm:$0xf] %v763_v12  ;;  %v846_v49 = vunpack.c.h.bf16 %v1900_v44  ;;  %v793_v13 = vpack.c.bf16 %v1895_v19, %v790_v43  ;;  %v820_v50 = vsub.f32 %v812_v59, %v816_v3  ;;  %v857_v40 = vunpack.c.h.bf16 %v1901_v56 }
  0x3a   :  { %v835_v55 = vsub.f32 %v827_v25, %v831_v26  ;;  %1112 = vst [vmem:[%s1876_s2 + $0xcc] sm:$0xf] %v778_v39  ;;  %v808_v54 = vpack.c.bf16 %v1895_v19, %v805_v8  ;;  %v861_v14 = vunpack.c.h.bf16 %v1902_v62  ;;  %v872_v57 = vunpack.c.h.bf16 %v1903_v15 }
  0x3b   :  { %v850_v61 = vsub.f32 %v842_v46, %v846_v49  ;;  %1115 = vst [vmem:[%s1876_s2 + $0x54] sm:$0xf] %v793_v13  ;;  %v823_v10 = vpack.c.bf16 %v1895_v19, %v820_v50  ;;  %v876_v11 = vunpack.c.h.bf16 %v1904_v22  ;;  %v887_v23 = vunpack.c.h.bf16 %v1905_v20 }
  0x3c   :  { %v838_v21 = vpack.c.bf16 %v1895_v19, %v835_v55  ;;  %1118 = vst [vmem:[%s1876_s2 + $0xd4] sm:$0xf] %v808_v54  ;;  %v865_v24 = vsub.f32 %v857_v40, %v861_v14  ;;  %v891_v0 = vunpack.c.h.bf16 %v1906_v33  ;;  %v902_v34 = vunpack.c.h.bf16 %v1907_v28 }
  0x3d   :  { %v853_v1 = vpack.c.bf16 %v1895_v19, %v850_v61  ;;  %1121 = vst [vmem:[%s1876_s2 + $0x5c] sm:$0xf] %v823_v10  ;;  %v880_v42 = vsub.f32 %v872_v57, %v876_v11  ;;  %v906_v45 = vunpack.c.h.bf16 %v1908_v29  ;;  %v917_v9 = vunpack.c.h.bf16 %v1601_v9 }
  0x3e   :  { %1124 = vst [vmem:[%s1876_s2 + $0xdc] sm:$0xf] %v838_v21  ;;  %v921_v41 = vunpack.c.h.bf16 %v1606_v41  ;;  %v868_v52 = vpack.c.bf16 %v1895_v19, %v865_v24  ;;  %v895_v53 = vsub.f32 %v887_v23, %v891_v0  ;;  %v932_v31 = vunpack.c.h.bf16 %v1617_v31 }
  0x3f   :  { %1127 = vst [vmem:[%s1876_s2 + $0x64] sm:$0xf] %v853_v1  ;;  %v936_v16 = vunpack.c.h.bf16 %v1622_v16  ;;  %v883_v58 = vpack.c.bf16 %v1895_v19, %v880_v42  ;;  %v910_v2 = vsub.f32 %v902_v34, %v906_v45  ;;  %v947_v51 = vunpack.c.h.bf16 %v1633_v51 }
  0x40   :  { %v925_v60 = vsub.f32 %v917_v9, %v921_v41  ;;  %1130 = vst [vmem:[%s1876_s2 + $0xe4] sm:$0xf] %v868_v52  ;;  %v898_v63 = vpack.c.bf16 %v1895_v19, %v895_v53  ;;  %v951_v5 = vunpack.c.h.bf16 %v1638_v5 }
  0x41   :  { %v940_v4 = vsub.f32 %v932_v31, %v936_v16  ;;  %1133 = vst [vmem:[%s1876_s2 + $0x6c] sm:$0xf] %v883_v58  ;;  %v913_v30 = vpack.c.bf16 %v1895_v19, %v910_v2 }
  0x42   :  { %v928_v27 = vpack.c.bf16 %v1895_v19, %v925_v60  ;;  %1136 = vst [vmem:[%s1876_s2 + $0xec] sm:$0xf] %v898_v63  ;;  %v955_v6 = vsub.f32 %v947_v51, %v951_v5 }
  0x43   :  { %v943_v17 = vpack.c.bf16 %v1895_v19, %v940_v4  ;;  %1139 = vst [vmem:[%s1876_s2 + $0x74] sm:$0xf] %v913_v30 }
  0x44   :  { %1142 = vst [vmem:[%s1876_s2 + $0xf4] sm:$0xf] %v928_v27  ;;  %v958_v19 = vpack.c.bf16 %v1895_v19, %v955_v6 }
  0x45   :  { %1145 = vst [vmem:[%s1876_s2 + $0x7c] sm:$0xf] %v943_v17 }
  0x46   :  { %1148 = vst [vmem:[%s1876_s2 + $0xfc] sm:$0xf] %v958_v19 }

// kernel: net7_forward.56
= control target key start
LH: loop header
LB: loop body
LE: loop exit
PB: predicated region body
PF: predicated region fallthrough
CT: control target
= control target key end

     0   :  { %v1146_v1 = vmov 0   ;;  %vm414_vm0 = vcmask 261120   ;;  %s1470_s1 = inlined_call_operand.vmem [shape: bf16[288,128], index: 1, kind: input, shape index: {}]   ;;  %s1471_s0 = inlined_call_operand.vmem [shape: bf16[128,288], index: 0, kind: input, shape index: {}]   ;;  %s1472_s2 = inlined_call_operand.vmem [shape: f32[128,1], index: 2, kind: input, shape index: {}]   ;;  %s1473_s4 = inlined_call_operand.vmem [shape: bf16[128,128], index: 4, kind: input, shape index: {}]   ;;  %s1474_s3 = inlined_call_operand.<no memory space> [shape: f32[1,1], index: 3, kind: input, shape index: {}]   ;;  %s1475_s5 = inlined_call_operand.vmem [shape: bf16[128,128], index: 5, kind: output, shape index: {}]  }
   0x1   :  { %v1096_v0 = vld [vmem:[%s1470_s1 + $0x40] sm:$0xff]   ;;  %1095 = vset.pattern.permute.xlu1 %v1146_v1  ;;  %1094 = vset.pattern.permute.xlu0 %v1146_v1  ;;  %v1098_v3 = vld [vmem:[%s1470_s1 + $0x48] sm:$0xff]   ;;  %v1100_v5 = vld [vmem:[%s1470_s1 + $0x50] sm:$0xff]  }
   0x2   :  { %v1097_v2 = vld [vmem:[%s1470_s1] sm:$0xff]   ;;  %983 = vmatprep.subr.bf16.mxu0 %v1096_v0  ;;  %1077 = vmatprep.subr.bf16.mxu1 %v1096_v0  ;;  %v1099_v4 = vld [vmem:[%s1470_s1 + $0x8] sm:$0xff]   ;;  %v1101_v6 = vld [vmem:[%s1470_s1 + $0x10] sm:$0xff]  }
   0x3   :  { %984 = vmatpush3.bf16.msra.mxu0 %v1097_v2  ;;  %1085 = vmatpush3.bf16.msra.mxu1 %v1097_v2  ;;  %v1102_v7 = vld [vmem:[%s1470_s1 + $0x58] sm:$0xff]   ;;  %v1104_v9 = vld [vmem:[%s1470_s1 + $0x60] sm:$0xff]   ;;  %v1106_v11 = vld [vmem:[%s1470_s1 + $0x68] sm:$0xff]  }
   0x4   :  { %985 = vmatprep.subr.bf16.mxu0 %v1098_v3  ;;  %1078 = vmatprep.subr.bf16.mxu1 %v1098_v3  ;;  %v1103_v8 = vld [vmem:[%s1470_s1 + $0x18] sm:$0xff]   ;;  %v1105_v10 = vld [vmem:[%s1470_s1 + $0x20] sm:$0xff]   ;;  %v1107_v14 = vld [vmem:[%s1470_s1 + $0x28] sm:$0xff]  }
   0x5   :  { %v1114_v12 = vld [vmem:[%s1471_s0 + $0x4] ss:$12 sps:$4 sm:$0xff]   ;;  %v1117_v13 = vld [vmem:[%s1471_s0 + $0x94] ss:$12 sps:$4 sm:$0xff]   ;;  %v1110_v17 = vld [vmem:[%s1470_s1 + $0x78] sm:$0xff]  }
   0x6   :  { %v1108_v15 = vld [vmem:[%s1470_s1 + $0x70] sm:$0xff]   ;;  %471 = vmatprep.mubr.bf16.mxu0 %v1114_v12  ;;  %519 = vmatprep.mubr.bf16.mxu1 %v1117_v13  ;;  %v1111_v18 = vld [vmem:[%s1470_s1 + $0x38] sm:$0xff]   ;;  %v1112_v19 = vld [vmem:[%s1471_s0] ss:$12 sps:$4 sm:$0xff]  }
   0x7   :  { %986 = vmatpush3.bf16.msra.mxu0 %v1099_v4  ;;  %1086 = vmatpush3.bf16.msra.mxu1 %v1099_v4  ;;  %v1109_v16 = vld [vmem:[%s1470_s1 + $0x30] sm:$0xff]   ;;  %v1118_v20 = vld [vmem:[%s1470_s1 + $0x80] sm:$0xff]   ;;  %v1119_v22 = vld [vmem:[%s1471_s0 + $0x1c] ss:$12 sps:$4 sm:$0xff]  }
   0x8   :  { %987 = vmatprep.subr.bf16.mxu0 %v1100_v5  ;;  %1079 = vmatprep.subr.bf16.mxu1 %v1100_v5  ;;  %v1115_v21 = vld [vmem:[%s1471_s0 + $0x90] ss:$12 sps:$4 sm:$0xff]   ;;  %v1121_v23 = vld [vmem:[%s1471_s0 + $0xac] ss:$12 sps:$4 sm:$0xff]   ;;  %v90_v26 = vld [vmem:[%s1472_s2] sm:$0xff] }
   0x9   :  { %v1125_v24 = vld [vmem:[%s1470_s1 + $0x88] sm:$0xff]   ;;  %v92_v25 = vld [vmem:[%s1472_s2 + $0x10] sm:$0xff]  ;;  %v1123_v27 = vld [vmem:[%s1471_s0 + $0x18] ss:$12 sps:$4 sm:$0xff]   ;;  %108 = vperm.xlu0 %1094, %v90_v26  }
   0xa   :  { %118 = vperm.xlu1 %1095, %v92_v25   ;;  %v1124_v28 = vld [vmem:[%s1471_s0 + $0xa8] ss:$12 sps:$4 sm:$0xff]   ;;  %v93_v29 = vld [vmem:[%s1472_s2 + $0x18] sm:$0xff]  ;;  %v94_v34 = vld [vmem:[%s1472_s2 + $0x20] sm:$0xff] }
   0xb   :  { %988 = vmatpush3.bf16.msra.mxu0 %v1101_v6  ;;  %1087 = vmatpush3.bf16.msra.mxu1 %v1101_v6  ;;  %v1126_v30 = vld [vmem:[%s1471_s0 + $0x34] ss:$12 sps:$4 sm:$0xff]   ;;  %v91_v32 = vld [vmem:[%s1472_s2 + $0x8] sm:$0xff]  ;;  %v1129_v35 = vld [vmem:[%s1471_s0 + $0x30] ss:$12 sps:$4 sm:$0xff]  }
   0xc   :  { %989 = vmatprep.subr.bf16.mxu0 %v1102_v7  ;;  %1080 = vmatprep.subr.bf16.mxu1 %v1102_v7  ;;  %v1128_v31 = vld [vmem:[%s1471_s0 + $0x8] ss:$12 sps:$4 sm:$0xff]   ;;  %v1130_v36 = vld [vmem:[%s1471_s0 + $0x20] ss:$12 sps:$4 sm:$0xff]   ;;  %v97_v37 = vld [vmem:[%s1472_s2 + $0x38] sm:$0xff] }
   0xd   :  { %v95_v33 = vld [vmem:[%s1472_s2 + $0x28] sm:$0xff]  ;;  %113 = vperm.xlu0 %1094, %v91_v32   ;;  %v1133_v39 = vld [vmem:[%s1471_s0 + $0x38] ss:$12 sps:$4 sm:$0xff]   ;;  %v96_v40 = vld [vmem:[%s1472_s2 + $0x30] sm:$0xff] }
   0xe   :  { %123 = vperm.xlu1 %1095, %v93_v29   ;;  %v1131_v38 = vld [vmem:[%s1471_s0 + $0x4c] ss:$12 sps:$4 sm:$0xff]   ;;  %v98_v42 = vld [vmem:[%s1472_s2 + $0x40] sm:$0xff]  ;;  %v1134_v43 = vld [vmem:[%s1471_s0 + $0x48] ss:$12 sps:$4 sm:$0xff]  }
   0xf   :  { %990 = vmatpush3.bf16.msra.mxu0 %v1103_v8  ;;  %1088 = vmatpush3.bf16.msra.mxu1 %v1103_v8  ;;  %v99_v41 = vld [vmem:[%s1472_s2 + $0x48] sm:$0xff]  ;;  %v1135_v44 = vld [vmem:[%s1471_s0 + $0x50] ss:$12 sps:$4 sm:$0xff]   ;;  %v102_v50 = vld [vmem:[%s1472_s2 + $0x60] sm:$0xff] }
  0x10   :  { %991 = vmatprep.subr.bf16.mxu0 %v1104_v9  ;;  %1081 = vmatprep.subr.bf16.mxu1 %v1104_v9  ;;  %v101_v45 = vld [vmem:[%s1472_s2 + $0x58] sm:$0xff]  ;;  %v1136_v46 = vld [vmem:[%s1471_s0 + $0x64] ss:$12 sps:$4 sm:$0xff]   ;;  %v1138_v47 = vld [vmem:[%s1471_s0 + $0x68] ss:$12 sps:$4 sm:$0xff]  }
  0x11   :  { %128 = vperm.xlu0 %1094, %v94_v34   ;;  %v100_v48 = vld [vmem:[%s1472_s2 + $0x50] sm:$0xff]  ;;  %v103_v49 = vld [vmem:[%s1472_s2 + $0x68] sm:$0xff]  ;;  %v105_v53 = vld [vmem:[%s1472_s2 + $0x78] sm:$0xff]  ;;  %v1388_v34 = vstv %s1474_s3 }
  0x12   :  { %133 = vperm.xlu1 %1095, %v95_v33   ;;  %v1139_v51 = vld [vmem:[%s1471_s0 + $0x60] ss:$12 sps:$4 sm:$0xff]   ;;  %v1141_v54 = vld [vmem:[%s1471_s0 + $0x7c] ss:$12 sps:$4 sm:$0xff]   ;;  %v1143_v55 = vld [vmem:[%s1471_s0 + $0x98] ss:$12 sps:$4 sm:$0xff]  }
  0x13   :  { %992 = vmatpush3.bf16.msra.mxu0 %v1105_v10  ;;  %1089 = vmatpush3.bf16.msra.mxu1 %v1105_v10  ;;  %v1140_v52 = vld [vmem:[%s1471_s0 + $0x80] ss:$12 sps:$4 sm:$0xff]   ;;  %v104_v56 = vld [vmem:[%s1472_s2 + $0x70] sm:$0xff]  ;;  %v1144_v57 = vld [vmem:[%s1471_s0 + $0x78] ss:$12 sps:$4 sm:$0xff]  }
  0x14   :  { %993 = vmatprep.subr.bf16.mxu0 %v1106_v11  ;;  %1082 = vmatprep.subr.bf16.mxu1 %v1106_v11  ;;  %v1145_v58 = vld [vmem:[%s1471_s0 + $0xb0] ss:$12 sps:$4 sm:$0xff]  }
  0x15   :  { %138 = vperm.xlu0 %1094, %v96_v40  }
  0x16   :  { %143 = vperm.xlu1 %1095, %v97_v37  }
  0x17   :  { %994 = vmatpush3.bf16.msra.mxu0 %v1107_v14  ;;  %1090 = vmatpush3.bf16.msra.mxu1 %v1107_v14 }
  0x18   :  { %995 = vmatprep.subr.bf16.mxu0 %v1108_v15  ;;  %1083 = vmatprep.subr.bf16.mxu1 %v1108_v15 }
  0x19   :  { %148 = vperm.xlu0 %1094, %v98_v42  }
  0x1a   :  { %153 = vperm.xlu1 %1095, %v99_v41  }
  0x1b   :  { %996 = vmatpush3.bf16.msra.mxu0 %v1109_v16  ;;  %1091 = vmatpush3.bf16.msra.mxu1 %v1109_v16 }
  0x1c   :  { %997 = vmatprep.subr.bf16.mxu0 %v1110_v17  ;;  %1084 = vmatprep.subr.bf16.mxu1 %v1110_v17 }
  0x1d   :  { %158 = vperm.xlu0 %1094, %v100_v48  }
  0x1e   :  { %163 = vperm.xlu1 %1095, %v101_v45  }
  0x1f   :  { %998 = vmatpush3.bf16.msra.mxu0 %v1111_v18  ;;  %1092 = vmatpush3.bf16.msra.mxu1 %v1111_v18 }
  0x20   :  { %1057 = vmatprep.subr.bf16.mxu1 %v1118_v20 }
  0x21   :  { %168 = vperm.xlu0 %1094, %v102_v50  }
  0x22   :  { %472 = vmatmul.mubr.bf16.vlgmr.msra.gmra.mrb[0].mxu0 %v1112_v19  ;;  %520 = vmatmul.mubr.bf16.vlgmr.msra.gmra.mrb[0].mxu1 %v1115_v21 }
  0x23   :  { %1058 = vmatpush3.bf16.msra.mxu1 %v1118_v20  ;;  %479 = vmatprep.mubr.bf16.mxu0 %v1119_v22 }
  0x24   :  { %527 = vmatprep.mubr.bf16.mxu1 %v1121_v23  ;;  %1059 = vmatprep.subr.bf16.mxu1 %v1125_v24 }
  0x25   :  { %173 = vperm.xlu1 %1095, %v103_v49   ;;  %178 = vperm.xlu0 %1094, %v104_v56  }
  0x27   :  { %1060 = vmatpush3.bf16.msra.mxu1 %v1125_v24 }
  0x29   :  { %183 = vperm.xlu1 %1095, %v105_v53  }
  0x2a   :  { %480 = vmatmul.mubr.bf16.gmra.mrb[4].mxu0 %v1123_v27  ;;  %528 = vmatmul.mubr.bf16.gmra.mrb[4].mxu1 %v1124_v28  ;;  %v969_v27 = vld [vmem:[%s1473_s4 + $0x8] sm:$0xff]  }
  0x2b   :  { %487 = vmatprep.mubr.bf16.mxu0 %v1126_v30  ;;  %1061 = vmatprep.mubr.msk.bf16.mxu1 %vm414_vm0, %v1128_v31  ;;  %v898_v31 = vld [vmem:[%s1473_s4] sm:$0xff]   ;;  %v903_v37 = vunpack.c.l.bf16 %v969_v27  ;;  %v904_v49 = vunpack.c.h.bf16 %v969_v27 }
  0x32   :  { %488 = vmatmul.mubr.bf16.gmra.mrb[8].mxu0 %v1129_v35  ;;  %1062 = vmatmul.mubr.msk.bf16.vlgmr.msra.gmra.mrb[8].mxu1 %vm414_vm0, %v1130_v36 }
  0x33   :  { %495 = vmatprep.mubr.bf16.mxu0 %v1131_v38  ;;  %1065 = vmatprep.mubr.msk.bf16.mxu1 %vm414_vm0, %v1133_v39 }
  0x3a   :  { %496 = vmatmul.mubr.bf16.gmra.mrb[12].mxu0 %v1134_v43  ;;  %1066 = vmatmul.mubr.msk.bf16.gmra.mrb[12].mxu1 %vm414_vm0, %v1135_v44  ;;  %v899_v43 = vunpack.c.l.bf16 %v898_v31 }
  0x3b   :  { %503 = vmatprep.mubr.bf16.mxu0 %v1136_v46  ;;  %1069 = vmatprep.mubr.msk.bf16.mxu1 %vm414_vm0, %v1138_v47 }
  0x42   :  { %504 = vmatmul.mubr.bf16.gmra.mrb[16].mxu0 %v1139_v51  ;;  %1070 = vmatmul.mubr.msk.bf16.gmra.mrb[16].mxu1 %vm414_vm0, %v1140_v52 }
  0x43   :  { %511 = vmatprep.mubr.bf16.mxu0 %v1141_v54  ;;  %1073 = vmatprep.mubr.msk.bf16.mxu1 %vm414_vm0, %v1143_v55 }
  0x4a   :  { %512 = vmatmul.mubr.bf16.gmra.mrb[20].mxu0 %v1144_v57  ;;  %1074 = vmatmul.mubr.msk.bf16.gmra.mrb[20].mxu1 %vm414_vm0, %v1145_v58  ;;  %v900_v57 = vunpack.c.h.bf16 %v898_v31 }
  0x88   :  { %v109_v60 = vpop.permute.xlu0 %108 }
  0x89   :  { %v119_v59 = vpop.permute.xlu1 %118 }
  0x8c   :  { %v114_v62 = vpop.permute.xlu0 %113 }
  0x8d   :  { %v124_v61 = vpop.permute.xlu1 %123 }
  0x90   :  { %v1361_v0 = vpop.permute.xlu0 %128 }
  0x91   :  { %v1359_v63 = vpop.permute.xlu1 %133 }
  0x94   :  { %v1369_v14 = vpop.permute.xlu0 %138 }
  0x95   :  { %v1367_v13 = vpop.permute.xlu1 %143 }
  0x98   :  { %v1380_v29 = vpop.permute.xlu0 %148 }
  0x99   :  { %v1378_v28 = vpop.permute.xlu1 %153 }
  0xf5   :  { %v999_v1 = vpop.f32.mrb[0].mxu0  ;;  %v1035_v2 = vpop.f32.mrb[0].mxu1 }
  0xf6   :  { %v1000_v3 = vpop.f32.mrb[1].mxu0  ;;  %v1036_v4 = vpop.f32.mrb[1].mxu1 }
  0xf7   :  { %v1001_v5 = vadd.f32 %v1000_v3, %v999_v1  ;;  %v1002_v6 = vpop.f32.mrb[2].mxu0  ;;  %v1363_v7 = vadd.f32 %v1036_v4, %v1035_v2  ;;  %v1038_v8 = vpop.f32.mrb[2].mxu1 }
  0xf8   :  { %v1003_v9 = vpop.f32.mrb[3].mxu0  ;;  %v1039_v10 = vpop.f32.mrb[3].mxu1 }
  0xf9   :  { %v1004_v11 = vadd.f32 %v1003_v9, %v1002_v6  ;;  %v1365_v12 = vadd.f32 %v1039_v10, %v1038_v8  ;;  %v474_v35 = vadd.f32 %v1001_v5, %v109_v60  ;;  %v1394_v60 = vpop.permute.xlu1 %163 }
  0xfb   :  { %v477_v46 = vadd.f32 %v1004_v11, %v114_v62 }
  0xfd   :  { %v1005_v15 = vpop.f32.mrb[4].mxu0  ;;  %v1041_v16 = vpop.f32.mrb[4].mxu1 }
  0xfe   :  { %v1006_v17 = vpop.f32.mrb[5].mxu0  ;;  %v1042_v18 = vpop.f32.mrb[5].mxu1 }
  0xff   :  { %v1007_v19 = vadd.f32 %v1006_v17, %v1005_v15  ;;  %v1008_v20 = vpop.f32.mrb[6].mxu0  ;;  %v1371_v21 = vadd.f32 %v1042_v18, %v1041_v16  ;;  %v1044_v22 = vpop.f32.mrb[6].mxu1  ;;  %v970_v18 = vld [vmem:[%s1473_s4 + $0x10] sm:$0xff]  }
 0x100   :  { %v1009_v23 = vpop.f32.mrb[7].mxu0  ;;  %v1045_v24 = vpop.f32.mrb[7].mxu1  ;;  %v907_v31 = vunpack.c.l.bf16 %v970_v18 }
 0x101   :  { %v1010_v25 = vadd.f32 %v1009_v23, %v1008_v20  ;;  %v1373_v26 = vadd.f32 %v1045_v24, %v1044_v22  ;;  %v482_v30 = vadd.f32 %v1007_v19, %v119_v59 }
 0x103   :  { %v485_v40 = vadd.f32 %v1010_v25, %v124_v61  ;;  %v1396_v61 = vpop.permute.xlu0 %158 }
 0x105   :  { %v1011_v32 = vpop.f32.mrb[8].mxu0  ;;  %v1063_v33 = vpop.f32.mrb[8].mxu1 }
 0x106   :  { %v579_v36 = vadd.f32 %v1063_v33, %v482_v30  ;;  %v1012_v38 = vpop.f32.mrb[9].mxu0  ;;  %v570_v39 = vpop.f32.mrb[9].mxu1 }
 0x107   :  { %v1013_v41 = vadd.f32 %v1012_v38, %v1011_v32  ;;  %v571_v42 = vadd.f32 %v570_v39, %v474_v35  ;;  %v1014_v44 = vpop.f32.mrb[10].mxu0  ;;  %v1064_v45 = vpop.f32.mrb[10].mxu1 }
 0x108   :  { %vm636_vm1 = vcmp.ge.f32.partialorder %v579_v36, 0.0  ;;  %v653_v47 = vmul.f32 %v1388_v34, %v579_v36  ;;  %v582_v48 = vadd.f32 %v1064_v45, %v485_v40  ;;  %v1015_v50 = vpop.f32.mrb[11].mxu0  ;;  %v573_v51 = vpop.f32.mrb[11].mxu1 }
 0x109   :  { %vm634_vm2 = vcmp.ge.f32.partialorder %v571_v42, 0.0  ;;  %v651_v52 = vmul.f32 %v1388_v34, %v571_v42  ;;  %v1016_v53 = vadd.f32 %v1015_v50, %v1014_v44  ;;  %v574_v54 = vadd.f32 %v573_v51, %v477_v46  ;;  %v169_v38 = vpop.permute.xlu0 %168 }
 0x10a   :  { %v669_v55 = vsel %vm636_vm1, %v579_v36, %v653_v47  ;;  %vm637_vm3 = vcmp.ge.f32.partialorder %v582_v48, 0.0  ;;  %v654_v56 = vmul.f32 %v1388_v34, %v582_v48  ;;  %v490_v6 = vadd.f32 %v1013_v41, %v1361_v0 }
 0x10b   :  { %v667_v58 = vsel %vm634_vm2, %v571_v42, %v651_v52  ;;  %vm635_vm4 = vcmp.ge.f32.partialorder %v574_v54, 0.0  ;;  %v652_v59 = vmul.f32 %v1388_v34, %v574_v54  ;;  %v717_v1 = vadd.f32 %v903_v37, %v669_v55  ;;  %v972_v55 = vld [vmem:[%s1473_s4 + $0x20] sm:$0xff]  }
 0x10c   :  { %v670_v62 = vsel %vm637_vm3, %v582_v48, %v654_v56  ;;  %v715_v8 = vadd.f32 %v899_v43, %v667_v58  ;;  %v493_v24 = vadd.f32 %v1016_v53, %v1359_v63  ;;  %v971_v63 = vld [vmem:[%s1473_s4 + $0x18] sm:$0xff]   ;;  %v908_v37 = vunpack.c.h.bf16 %v970_v18 }
 0x10d   :  { %v718_v2 = vadd.f32 %v904_v49, %v670_v62  ;;  %v668_v3 = vsel %vm635_vm4, %v574_v54, %v652_v59  ;;  %v1017_v4 = vpop.f32.mrb[12].mxu0  ;;  %v1067_v5 = vpop.f32.mrb[12].mxu1  ;;  %v911_v44 = vunpack.c.l.bf16 %v971_v63  ;;  %v912_v46 = vunpack.c.h.bf16 %v971_v63 }
 0x10e   :  { %v716_v9 = vadd.f32 %v900_v57, %v668_v3  ;;  %v1018_v10 = vpop.f32.mrb[13].mxu0  ;;  %v586_v11 = vpop.f32.mrb[13].mxu1 }
 0x10f   :  { %v937_v15 = vpack.c.bf16 %v718_v2, %v717_v1  ;;  %v1019_v16 = vadd.f32 %v1018_v10, %v1017_v4  ;;  %v587_v17 = vadd.f32 %v586_v11, %v490_v6  ;;  %v1020_v19 = vpop.f32.mrb[14].mxu0  ;;  %v1068_v20 = vpop.f32.mrb[14].mxu1  ;;  %v975_v2 = vld [vmem:[%s1473_s4 + $0x38] sm:$0xff]   ;;  %v916_v10 = vunpack.c.h.bf16 %v972_v55 }
 0x110   :  { %v932_v22 = vpack.c.bf16 %v716_v9, %v715_v8  ;;  %v1021_v23 = vpop.f32.mrb[15].mxu0  ;;  %v589_v25 = vpop.f32.mrb[15].mxu1  ;;  %v915_v8 = vunpack.c.l.bf16 %v972_v55 }
 0x111   :  { %976 = vst [vmem:[%s1475_s5 + $0x8] sm:$0xff] %v937_v15   ;;  %v498_v0 = vadd.f32 %v1019_v16, %v1369_v14  ;;  %vm638_vm5 = vcmp.ge.f32.partialorder %v587_v17, 0.0  ;;  %v655_v27 = vmul.f32 %v1388_v34, %v587_v17  ;;  %v1022_v30 = vadd.f32 %v1021_v23, %v1020_v19  ;;  %v174_v14 = vpop.permute.xlu1 %173  ;;  %v179_v58 = vpop.permute.xlu0 %178 }
 0x112   :  { %933 = vst [vmem:[%s1475_s5] sm:$0xff] %v932_v22   ;;  %v590_v32 = vadd.f32 %v589_v25, %v493_v24  ;;  %v530_v11 = vadd.f32 %v1371_v21, %v179_v58  ;;  %v525_v18 = vadd.f32 %v1365_v12, %v174_v14  ;;  %v522_v19 = vadd.f32 %v1363_v7, %v169_v38  ;;  %v974_v38 = vld [vmem:[%s1473_s4 + $0x30] sm:$0xff]  }
 0x113   :  { %v595_v33 = vadd.f32 %v1067_v5, %v498_v0  ;;  %v671_v35 = vsel %vm638_vm5, %v587_v17, %v655_v27  ;;  %v501_v36 = vadd.f32 %v1022_v30, %v1367_v13  ;;  %v927_v17 = vunpack.c.l.bf16 %v975_v2 }
 0x114   :  { %vm639_vm6 = vcmp.ge.f32.partialorder %v590_v32, 0.0  ;;  %v656_v39 = vmul.f32 %v1388_v34, %v590_v32  ;;  %v719_v45 = vadd.f32 %v907_v31, %v671_v35  ;;  %v928_v23 = vunpack.c.h.bf16 %v975_v2 }
 0x115   :  { %vm640_vm7 = vcmp.ge.f32.partialorder %v595_v33, 0.0  ;;  %v657_v40 = vmul.f32 %v1388_v34, %v595_v33  ;;  %v598_v41 = vadd.f32 %v1068_v20, %v501_v36  ;;  %v1023_v42 = vpop.f32.mrb[16].mxu0  ;;  %v1417_v43 = vpop.f32.mrb[16].mxu1 }
 0x116   :  { %v672_v47 = vsel %vm639_vm6, %v590_v32, %v656_v39  ;;  %v1024_v48 = vpop.f32.mrb[17].mxu0  ;;  %v602_v49 = vpop.f32.mrb[17].mxu1 }
 0x117   :  { %v673_v13 = vsel %vm640_vm7, %v595_v33, %v657_v40  ;;  %vm641_vm8 = vcmp.ge.f32.partialorder %v598_v41, 0.0  ;;  %v658_v50 = vmul.f32 %v1388_v34, %v598_v41  ;;  %v720_v51 = vadd.f32 %v908_v37, %v672_v47  ;;  %v1026_v52 = vpop.f32.mrb[18].mxu0  ;;  %v1420_v53 = vpop.f32.mrb[18].mxu1 }
 0x118   :  { %v1025_v54 = vadd.f32 %v1024_v48, %v1023_v42  ;;  %v1027_v56 = vpop.f32.mrb[19].mxu0  ;;  %v605_v57 = vpop.f32.mrb[19].mxu1  ;;  %v721_v3 = vadd.f32 %v911_v44, %v673_v13  ;;  %v923_v47 = vunpack.c.l.bf16 %v974_v38 }
 0x119   :  { %v674_v59 = vsel %vm641_vm8, %v598_v41, %v658_v50  ;;  %v942_v62 = vpack.c.bf16 %v720_v51, %v719_v45  ;;  %v1028_v1 = vadd.f32 %v1027_v56, %v1026_v52  ;;  %v184_v6 = vpop.permute.xlu1 %183 }
 0x11a   :  { %v722_v4 = vadd.f32 %v912_v46, %v674_v59  ;;  %v506_v5 = vadd.f32 %v1025_v54, %v1380_v29  ;;  %v533_v24 = vadd.f32 %v1373_v26, %v184_v6 }
 0x11b   :  { %977 = vst [vmem:[%s1475_s5 + $0x10] sm:$0xff] %v942_v62   ;;  %v509_v9 = vadd.f32 %v1028_v1, %v1378_v28 }
 0x11c   :  { %v947_v15 = vpack.c.bf16 %v722_v4, %v721_v3  ;;  %v603_v16 = vadd.f32 %v602_v49, %v506_v5  ;;  %v924_v49 = vunpack.c.h.bf16 %v974_v38 }
 0x11d   :  { %v606_v20 = vadd.f32 %v605_v57, %v509_v9  ;;  %v1029_v29 = vpop.f32.mrb[20].mxu0  ;;  %v1075_v22 = vpop.f32.mrb[20].mxu1 }
 0x11e   :  { %978 = vst [vmem:[%s1475_s5 + $0x18] sm:$0xff] %v947_v15   ;;  %vm642_vm9 = vcmp.ge.f32.partialorder %v603_v16, 0.0  ;;  %v659_v21 = vmul.f32 %v1388_v34, %v603_v16  ;;  %v627_v28 = vadd.f32 %v1075_v22, %v530_v11  ;;  %v1030_v25 = vpop.f32.mrb[21].mxu0  ;;  %v618_v0 = vpop.f32.mrb[21].mxu1 }
 0x11f   :  { %vm643_vm10 = vcmp.ge.f32.partialorder %v606_v20, 0.0  ;;  %v660_v12 = vmul.f32 %v1388_v34, %v606_v20  ;;  %v1031_v7 = vadd.f32 %v1030_v25, %v1029_v29  ;;  %v619_v27 = vadd.f32 %v618_v0, %v522_v19  ;;  %v1032_v30 = vpop.f32.mrb[22].mxu0  ;;  %v1076_v31 = vpop.f32.mrb[22].mxu1 }
 0x120   :  { %v675_v32 = vsel %vm642_vm9, %v603_v16, %v659_v21  ;;  %vm648_vm11 = vcmp.ge.f32.partialorder %v627_v28, 0.0  ;;  %v665_v26 = vmul.f32 %v1388_v34, %v627_v28  ;;  %v630_v33 = vadd.f32 %v1076_v31, %v533_v24  ;;  %v1033_v63 = vpop.f32.mrb[23].mxu0  ;;  %v621_v35 = vpop.f32.mrb[23].mxu1 }
 0x121   :  { %v723_v36 = vadd.f32 %v915_v8, %v675_v32  ;;  %v676_v37 = vsel %vm643_vm10, %v606_v20, %v660_v12  ;;  %v514_v14 = vadd.f32 %v1031_v7, %v1396_v61  ;;  %vm646_vm12 = vcmp.ge.f32.partialorder %v619_v27, 0.0 }
 0x122   :  { %v724_v39 = vadd.f32 %v916_v10, %v676_v37  ;;  %v681_v40 = vsel %vm648_vm11, %v627_v28, %v665_v26  ;;  %v663_v41 = vmul.f32 %v1388_v34, %v619_v27  ;;  %vm649_vm13 = vcmp.ge.f32.partialorder %v630_v33, 0.0 }
 0x123   :  { %v611_v42 = vadd.f32 %v1417_v43, %v514_v14  ;;  %v666_v44 = vmul.f32 %v1388_v34, %v630_v33  ;;  %v1034_v45 = vadd.f32 %v1033_v63, %v1032_v30  ;;  %v622_v48 = vadd.f32 %v621_v35, %v525_v18  ;;  %v973_v43 = vld [vmem:[%s1473_s4 + $0x28] sm:$0xff]  }
 0x124   :  { %v952_v46 = vpack.c.bf16 %v724_v39, %v723_v36  ;;  %v729_v61 = vadd.f32 %v927_v17, %v681_v40  ;;  %v679_v50 = vsel %vm646_vm12, %v619_v27, %v663_v41  ;;  %v919_v59 = vunpack.c.l.bf16 %v973_v43 }
 0x125   :  { %v661_v13 = vmul.f32 %v1388_v34, %v611_v42  ;;  %v682_v51 = vsel %vm649_vm13, %v630_v33, %v666_v44  ;;  %v517_v54 = vadd.f32 %v1034_v45, %v1394_v60  ;;  %vm647_vm14 = vcmp.ge.f32.partialorder %v622_v48, 0.0 }
 0x126   :  { %979 = vst [vmem:[%s1475_s5 + $0x20] sm:$0xff] %v952_v46   ;;  %v730_v52 = vadd.f32 %v928_v23, %v682_v51  ;;  %v664_v55 = vmul.f32 %v1388_v34, %v622_v48  ;;  %vm644_vm15 = vcmp.ge.f32.partialorder %v611_v42, 0.0  ;;  %v727_v62 = vadd.f32 %v923_v47, %v679_v50 }
 0x127   :  { %v614_v57 = vadd.f32 %v1420_v53, %v517_v54  ;;  %v920_v1 = vunpack.c.h.bf16 %v973_v43  ;;  %v677_v3 = vsel %vm644_vm15, %v611_v42, %v661_v13 }
 0x128   :  { %v967_v56 = vpack.c.bf16 %v730_v52, %v729_v61  ;;  %v680_v58 = vsel %vm647_vm14, %v622_v48, %v664_v55  ;;  %v725_v6 = vadd.f32 %v919_v59, %v677_v3 }
 0x129   :  { %v728_v2 = vadd.f32 %v924_v49, %v680_v58  ;;  %vm645_vm0 = vcmp.ge.f32.partialorder %v614_v57, 0.0  ;;  %v662_v60 = vmul.f32 %v1388_v34, %v614_v57 }
 0x12a   :  { %982 = vst [vmem:[%s1475_s5 + $0x38] sm:$0xff] %v967_v56  }
 0x12b   :  { %v962_v4 = vpack.c.bf16 %v728_v2, %v727_v62  ;;  %v678_v5 = vsel %vm645_vm0, %v614_v57, %v662_v60 }
 0x12c   :  { %v726_v8 = vadd.f32 %v920_v1, %v678_v5 }
 0x12d   :  { %981 = vst [vmem:[%s1475_s5 + $0x30] sm:$0xff] %v962_v4  }
 0x12e   :  { %v957_v53 = vpack.c.bf16 %v726_v8, %v725_v6 }
 0x130   :  { %980 = vst [vmem:[%s1475_s5 + $0x28] sm:$0xff] %v957_v53  }

// kernel: net7_forward.59
= control target key start
LH: loop header
LB: loop body
LE: loop exit
PB: predicated region body
PF: predicated region fallthrough
CT: control target
= control target key end

     0   :  { %v1390_v1 = vmov 0   ;;  %s1718_s1 = inlined_call_operand.vmem [shape: bf16[1152,128], index: 1, kind: input, shape index: {}]   ;;  %s1719_s0 = inlined_call_operand.vmem [shape: bf16[32,1152], index: 0, kind: input, shape index: {}]   ;;  %s1720_s2 = inlined_call_operand.vmem [shape: f32[32,1], index: 2, kind: input, shape index: {}]   ;;  %s1721_s4 = inlined_call_operand.vmem [shape: bf16[32,128], index: 4, kind: input, shape index: {}]   ;;  %s1722_s3 = inlined_call_operand.<no memory space> [shape: f32[1,1], index: 3, kind: input, shape index: {}]   ;;  %s1723_s5 = inlined_call_operand.vmem [shape: bf16[32,128], index: 5, kind: output, shape index: {}]  }
   0x1   :  { %v1292_v0 = vld [vmem:[%s1718_s1 + $0x40] sm:$0xff]   ;;  %1290 = vset.pattern.permute.xlu0 %v1390_v1  ;;  %1291 = vset.pattern.permute.xlu1 %v1390_v1  ;;  %v1296_v5 = vld [vmem:[%s1718_s1 + $0x48] sm:$0xff]   ;;  %v1300_v9 = vld [vmem:[%s1718_s1 + $0x50] sm:$0xff]  }
   0x2   :  { %v1293_v2 = vld [vmem:[%s1718_s1] sm:$0xff]   ;;  %1147 = vmatprep.subr.bf16.mxu0 %v1292_v0  ;;  %v1297_v6 = vld [vmem:[%s1718_s1 + $0x8] sm:$0xff]   ;;  %v1301_v10 = vld [vmem:[%s1718_s1 + $0x10] sm:$0xff]  }
   0x3   :  { %v1294_v3 = vld [vmem:[%s1718_s1 + $0xc0] sm:$0xff]   ;;  %1148 = vmatpush3.bf16.msra.mxu0 %v1293_v2  ;;  %v1298_v7 = vld [vmem:[%s1718_s1 + $0xc8] sm:$0xff]   ;;  %v1302_v11 = vld [vmem:[%s1718_s1 + $0xd0] sm:$0xff]  }
   0x4   :  { %v1295_v4 = vld [vmem:[%s1718_s1 + $0x80] sm:$0xff]   ;;  %1175 = vmatprep.subr.bf16.mxu1 %v1294_v3  ;;  %1149 = vmatprep.subr.bf16.mxu0 %v1296_v5  ;;  %v1299_v8 = vld [vmem:[%s1718_s1 + $0x88] sm:$0xff]   ;;  %v1303_v12 = vld [vmem:[%s1718_s1 + $0x90] sm:$0xff]  }
   0x5   :  { %1176 = vmatpush3.bf16.msra.mxu1 %v1295_v4  ;;  %v1304_v13 = vld [vmem:[%s1718_s1 + $0x58] sm:$0xff]   ;;  %v1308_v17 = vld [vmem:[%s1718_s1 + $0x60] sm:$0xff]   ;;  %v1312_v21 = vld [vmem:[%s1718_s1 + $0x68] sm:$0xff]  }
   0x6   :  { %1177 = vmatprep.subr.bf16.mxu1 %v1298_v7  ;;  %v1305_v14 = vld [vmem:[%s1718_s1 + $0x18] sm:$0xff]   ;;  %v1309_v18 = vld [vmem:[%s1718_s1 + $0x20] sm:$0xff]   ;;  %v1313_v22 = vld [vmem:[%s1718_s1 + $0x28] sm:$0xff]  }
   0x7   :  { %1150 = vmatpush3.bf16.msra.mxu0 %v1297_v6  ;;  %v1306_v15 = vld [vmem:[%s1718_s1 + $0xd8] sm:$0xff]   ;;  %v1310_v19 = vld [vmem:[%s1718_s1 + $0xe0] sm:$0xff]   ;;  %v1314_v23 = vld [vmem:[%s1718_s1 + $0xe8] sm:$0xff]  }
   0x8   :  { %1151 = vmatprep.subr.bf16.mxu0 %v1300_v9  ;;  %v1307_v16 = vld [vmem:[%s1718_s1 + $0x98] sm:$0xff]   ;;  %v1311_v20 = vld [vmem:[%s1718_s1 + $0xa0] sm:$0xff]   ;;  %v1315_v24 = vld [vmem:[%s1718_s1 + $0xa8] sm:$0xff]  }
   0x9   :  { %1178 = vmatpush3.bf16.msra.mxu1 %v1299_v8  ;;  %v1316_v25 = vld [vmem:[%s1718_s1 + $0x70] sm:$0xff]   ;;  %v1320_v29 = vld [vmem:[%s1718_s1 + $0x78] sm:$0xff]   ;;  %v1323_v32 = vld [vmem:[%s1719_s0] ss:$36 sps:$4 sm:$0xff]  }
   0xa   :  { %1179 = vmatprep.subr.bf16.mxu1 %v1302_v11  ;;  %v1317_v26 = vld [vmem:[%s1718_s1 + $0x30] sm:$0xff]   ;;  %v1321_v30 = vld [vmem:[%s1718_s1 + $0x38] sm:$0xff]   ;;  %v1325_v33 = vld [vmem:[%s1719_s0 + $0x4] ss:$36 sps:$4 sm:$0xff]  }
   0xb   :  { %1152 = vmatpush3.bf16.msra.mxu0 %v1301_v10  ;;  %v1318_v27 = vld [vmem:[%s1718_s1 + $0xf0] sm:$0xff]   ;;  %v1322_v31 = vld [vmem:[%s1718_s1 + $0xf8] sm:$0xff]   ;;  %766 = vmatprep.mubr.bf16.mxu0 %v1325_v33  ;;  %v1327_v35 = vld [vmem:[%s1718_s1 + $0x140] sm:$0xff]  }
   0xc   :  { %1153 = vmatprep.subr.bf16.mxu0 %v1304_v13  ;;  %v1319_v28 = vld [vmem:[%s1718_s1 + $0xb0] sm:$0xff]   ;;  %v1326_v34 = vld [vmem:[%s1718_s1 + $0xb8] sm:$0xff]   ;;  %v1328_v36 = vld [vmem:[%s1719_s0 + $0x8] ss:$36 sps:$4 sm:$0xff]  }
   0xd   :  { %1180 = vmatpush3.bf16.msra.mxu1 %v1303_v12  ;;  %v1330_v37 = vld [vmem:[%s1719_s0 + $0xc] ss:$36 sps:$4 sm:$0xff]   ;;  %v1331_v38 = vld [vmem:[%s1718_s1 + $0x100] sm:$0xff]   ;;  %v1342_v49 = vld [vmem:[%s1718_s1 + $0x158] sm:$0xff]  }
   0xe   :  { %1181 = vmatprep.subr.bf16.mxu1 %v1306_v15  ;;  %815 = vmatprep.mubr.bf16.mxu1 %v1330_v37  ;;  %v1332_v39 = vld [vmem:[%s1718_s1 + $0x1c0] sm:$0xff]   ;;  %v1334_v41 = vld [vmem:[%s1718_s1 + $0x148] sm:$0xff]   ;;  %v1338_v45 = vld [vmem:[%s1718_s1 + $0x150] sm:$0xff]  }
   0xf   :  { %1154 = vmatpush3.bf16.msra.mxu0 %v1305_v14  ;;  %v1333_v40 = vld [vmem:[%s1718_s1 + $0x180] sm:$0xff]   ;;  %v1335_v42 = vld [vmem:[%s1718_s1 + $0x108] sm:$0xff]   ;;  %v1339_v46 = vld [vmem:[%s1718_s1 + $0x110] sm:$0xff]  }
  0x10   :  { %1155 = vmatprep.subr.bf16.mxu0 %v1308_v17  ;;  %v1336_v43 = vld [vmem:[%s1718_s1 + $0x1c8] sm:$0xff]   ;;  %v1340_v47 = vld [vmem:[%s1718_s1 + $0x1d0] sm:$0xff]   ;;  %v1343_v50 = vld [vmem:[%s1718_s1 + $0x118] sm:$0xff]  }
  0x11   :  { %1182 = vmatpush3.bf16.msra.mxu1 %v1307_v16  ;;  %v1337_v44 = vld [vmem:[%s1718_s1 + $0x188] sm:$0xff]   ;;  %v1341_v48 = vld [vmem:[%s1718_s1 + $0x190] sm:$0xff]   ;;  %v1344_v51 = vld [vmem:[%s1718_s1 + $0x1d8] sm:$0xff]  }
  0x12   :  { %1183 = vmatprep.subr.bf16.mxu1 %v1310_v19  ;;  %v1345_v52 = vld [vmem:[%s1718_s1 + $0x198] sm:$0xff]   ;;  %v1346_v53 = vld [vmem:[%s1718_s1 + $0x160] sm:$0xff]   ;;  %v1350_v57 = vld [vmem:[%s1718_s1 + $0x168] sm:$0xff]  }
  0x13   :  { %1156 = vmatpush3.bf16.msra.mxu0 %v1309_v18  ;;  %v1347_v54 = vld [vmem:[%s1718_s1 + $0x120] sm:$0xff]   ;;  %v1351_v58 = vld [vmem:[%s1719_s0 + $0x4c] ss:$36 sps:$4 sm:$0xff]   ;;  %v1356_v62 = vld [vmem:[%s1719_s0 + $0x54] ss:$36 sps:$4 sm:$0xff]  }
  0x14   :  { %1157 = vmatprep.subr.bf16.mxu0 %v1312_v21  ;;  %v1348_v55 = vld [vmem:[%s1718_s1 + $0x1e0] sm:$0xff]   ;;  %v1353_v59 = vld [vmem:[%s1718_s1 + $0x128] sm:$0xff]   ;;  %v1359_v0 = vld [vmem:[%s1719_s0 + $0x50] ss:$36 sps:$4 sm:$0xff]  }
  0x15   :  { %1184 = vmatpush3.bf16.msra.mxu1 %v1311_v20  ;;  %v1349_v56 = vld [vmem:[%s1718_s1 + $0x1a0] sm:$0xff]   ;;  %v1354_v60 = vld [vmem:[%s1719_s0 + $0x48] ss:$36 sps:$4 sm:$0xff]   ;;  %v1360_v1 = vld [vmem:[%s1718_s1 + $0x170] sm:$0xff]  }
  0x16   :  { %1185 = vmatprep.subr.bf16.mxu1 %v1314_v23  ;;  %v1355_v61 = vld [vmem:[%s1718_s1 + $0x1e8] sm:$0xff]   ;;  %v1361_v2 = vld [vmem:[%s1718_s1 + $0x130] sm:$0xff]   ;;  %v1364_v5 = vld [vmem:[%s1718_s1 + $0x178] sm:$0xff]  }
  0x17   :  { %1158 = vmatpush3.bf16.msra.mxu0 %v1313_v22  ;;  %v1358_v63 = vld [vmem:[%s1718_s1 + $0x1a8] sm:$0xff]   ;;  %v1362_v3 = vld [vmem:[%s1718_s1 + $0x1f0] sm:$0xff]   ;;  %v1365_v6 = vld [vmem:[%s1718_s1 + $0x138] sm:$0xff]  }
  0x18   :  { %1159 = vmatprep.subr.bf16.mxu0 %v1316_v25  ;;  %v1363_v4 = vld [vmem:[%s1718_s1 + $0x1b0] sm:$0xff]   ;;  %v1366_v7 = vld [vmem:[%s1718_s1 + $0x1f8] sm:$0xff]   ;;  %v1371_v11 = vld [vmem:[%s1718_s1 + $0x200] sm:$0xff]  }
  0x19   :  { %1186 = vmatpush3.bf16.msra.mxu1 %v1315_v24  ;;  %v1367_v8 = vld [vmem:[%s1719_s0 + $0x10] ss:$36 sps:$4 sm:$0xff]   ;;  %v1370_v10 = vld [vmem:[%s1718_s1 + $0x1b8] sm:$0xff]   ;;  %v1375_v14 = vld [vmem:[%s1718_s1 + $0x208] sm:$0xff]  }
  0x1a   :  { %1187 = vmatprep.subr.bf16.mxu1 %v1318_v27  ;;  %v1369_v9 = vld [vmem:[%s1719_s0 + $0x14] ss:$36 sps:$4 sm:$0xff]   ;;  %v1374_v13 = vld [vmem:[%s1719_s0 + $0x1c] ss:$36 sps:$4 sm:$0xff]   ;;  %v1380_v18 = vld [vmem:[%s1719_s0 + $0x64] ss:$36 sps:$4 sm:$0xff]  }
  0x1b   :  { %1160 = vmatpush3.bf16.msra.mxu0 %v1317_v26  ;;  %v1372_v12 = vld [vmem:[%s1719_s0 + $0x18] ss:$36 sps:$4 sm:$0xff]   ;;  %v1379_v17 = vld [vmem:[%s1718_s1 + $0x210] sm:$0xff]   ;;  %v1382_v19 = vld [vmem:[%s1719_s0 + $0x60] ss:$36 sps:$4 sm:$0xff]  }
  0x1c   :  { %1161 = vmatprep.subr.bf16.mxu0 %v1320_v29  ;;  %v1376_v15 = vld [vmem:[%s1719_s0 + $0x5c] ss:$36 sps:$4 sm:$0xff]   ;;  %v188_v24 = vld [vmem:[%s1720_s2 + $0x10] sm:$0xff]  ;;  %v187_v25 = vld [vmem:[%s1720_s2 + $0x8] sm:$0xff] }
  0x1d   :  { %1188 = vmatpush3.bf16.msra.mxu1 %v1319_v28  ;;  %v1378_v16 = vld [vmem:[%s1719_s0 + $0x58] ss:$36 sps:$4 sm:$0xff]   ;;  %v1384_v21 = vld [vmem:[%s1718_s1 + $0x220] sm:$0xff]   ;;  %202 = vperm.xlu1 %1291, %v188_v24   ;;  %v1385_v26 = vld [vmem:[%s1718_s1 + $0x228] sm:$0xff]  }
  0x1e   :  { %1189 = vmatprep.subr.bf16.mxu1 %v1322_v31  ;;  %v1383_v20 = vld [vmem:[%s1718_s1 + $0x218] sm:$0xff]   ;;  %v1388_v22 = vld [vmem:[%s1719_s0 + $0x20] ss:$36 sps:$4 sm:$0xff]   ;;  %v1386_v28 = vld [vmem:[%s1718_s1 + $0x230] sm:$0xff]  }
  0x1f   :  { %1162 = vmatpush3.bf16.msra.mxu0 %v1321_v30  ;;  %v186_v23 = vld [vmem:[%s1720_s2] sm:$0xff]  ;;  %v189_v27 = vld [vmem:[%s1720_s2 + $0x18] sm:$0xff]  ;;  %v1389_v30 = vld [vmem:[%s1719_s0 + $0x68] ss:$36 sps:$4 sm:$0xff]  }
  0x20   :  { %1203 = vmatprep.subr.bf16.mxu0 %v1327_v35  ;;  %192 = vperm.xlu0 %1290, %v186_v23   ;;  %v1387_v29 = vld [vmem:[%s1718_s1 + $0x238] sm:$0xff]  }
  0x21   :  { %1190 = vmatpush3.bf16.msra.mxu1 %v1326_v34  ;;  %207 = vperm.xlu1 %1291, %v189_v27  }
  0x22   :  { %767 = vmatmul.mubr.bf16.vlgmr.msra.gmra.mrb[0].mxu0 %v1323_v32  ;;  %1231 = vmatprep.subr.bf16.mxu1 %v1332_v39 }
  0x23   :  { %1204 = vmatpush3.bf16.msra.mxu0 %v1331_v38  ;;  %774 = vmatprep.mubr.bf16.mxu0 %v1351_v58 }
  0x24   :  { %816 = vmatmul.mubr.bf16.vlgmr.msra.gmra.mrb[0].mxu1 %v1328_v36  ;;  %1205 = vmatprep.subr.bf16.mxu0 %v1334_v41 }
  0x25   :  { %1232 = vmatpush3.bf16.msra.mxu1 %v1333_v40  ;;  %823 = vmatprep.mubr.bf16.mxu1 %v1356_v62 }
  0x26   :  { %1233 = vmatprep.subr.bf16.mxu1 %v1336_v43  ;;  %197 = vperm.xlu0 %1290, %v187_v25  }
  0x27   :  { %1206 = vmatpush3.bf16.msra.mxu0 %v1335_v42 }
  0x28   :  { %1207 = vmatprep.subr.bf16.mxu0 %v1338_v45 }
  0x29   :  { %1234 = vmatpush3.bf16.msra.mxu1 %v1337_v44 }
  0x2a   :  { %1235 = vmatprep.subr.bf16.mxu1 %v1340_v47  ;;  %775 = vmatmul.mubr.bf16.gmra.mrb[4].mxu0 %v1354_v60 }
  0x2b   :  { %1208 = vmatpush3.bf16.msra.mxu0 %v1339_v46  ;;  %864 = vmatprep.mubr.bf16.mxu0 %v1369_v9 }
  0x2c   :  { %1209 = vmatprep.subr.bf16.mxu0 %v1342_v49  ;;  %824 = vmatmul.mubr.bf16.gmra.mrb[4].mxu1 %v1359_v0 }
  0x2d   :  { %1236 = vmatpush3.bf16.msra.mxu1 %v1341_v48  ;;  %913 = vmatprep.mubr.bf16.mxu1 %v1374_v13 }
  0x2e   :  { %1237 = vmatprep.subr.bf16.mxu1 %v1344_v51 }
  0x2f   :  { %1210 = vmatpush3.bf16.msra.mxu0 %v1343_v50 }
  0x30   :  { %1211 = vmatprep.subr.bf16.mxu0 %v1346_v53 }
  0x31   :  { %1238 = vmatpush3.bf16.msra.mxu1 %v1345_v52 }
  0x32   :  { %1239 = vmatprep.subr.bf16.mxu1 %v1348_v55 }
  0x33   :  { %1212 = vmatpush3.bf16.msra.mxu0 %v1347_v54 }
  0x34   :  { %1213 = vmatprep.subr.bf16.mxu0 %v1350_v57 }
  0x35   :  { %1240 = vmatpush3.bf16.msra.mxu1 %v1349_v56 }
  0x36   :  { %1241 = vmatprep.subr.bf16.mxu1 %v1355_v61 }
  0x37   :  { %1214 = vmatpush3.bf16.msra.mxu0 %v1353_v59 }
  0x38   :  { %1215 = vmatprep.subr.bf16.mxu0 %v1360_v1 }
  0x39   :  { %1242 = vmatpush3.bf16.msra.mxu1 %v1358_v63 }
  0x3a   :  { %1243 = vmatprep.subr.bf16.mxu1 %v1362_v3 }
  0x3b   :  { %1216 = vmatpush3.bf16.msra.mxu0 %v1361_v2 }
  0x3c   :  { %1217 = vmatprep.subr.bf16.mxu0 %v1364_v5 }
  0x3d   :  { %1244 = vmatpush3.bf16.msra.mxu1 %v1363_v4 }
  0x3e   :  { %1245 = vmatprep.subr.bf16.mxu1 %v1366_v7 }
  0x3f   :  { %1218 = vmatpush3.bf16.msra.mxu0 %v1365_v6 }
  0x40   :  { %1269 = vmatprep.subr.bf16.mxu0 %v1371_v11 }
  0x41   :  { %1246 = vmatpush3.bf16.msra.mxu1 %v1370_v10 }
  0x42   :  { %865 = vmatmul.mubr.bf16.vlgmr.msra.gmra.mrb[8].mxu0 %v1367_v8 }
  0x43   :  { %1270 = vmatpush3.bf16.msra.mxu0 %v1371_v11  ;;  %872 = vmatprep.mubr.bf16.mxu0 %v1376_v15 }
  0x44   :  { %914 = vmatmul.mubr.bf16.vlgmr.msra.gmra.mrb[8].mxu1 %v1372_v12  ;;  %1271 = vmatprep.subr.bf16.mxu0 %v1375_v14 }
  0x45   :  { %921 = vmatprep.mubr.bf16.mxu1 %v1380_v18 }
  0x47   :  { %1272 = vmatpush3.bf16.msra.mxu0 %v1375_v14 }
  0x48   :  { %1273 = vmatprep.subr.bf16.mxu0 %v1379_v17 }
  0x4a   :  { %873 = vmatmul.mubr.bf16.gmra.mrb[12].mxu0 %v1378_v16 }
  0x4b   :  { %1274 = vmatpush3.bf16.msra.mxu0 %v1379_v17  ;;  %1285 = vmatprep.mubr.bf16.mxu0 %v1388_v22 }
  0x4c   :  { %922 = vmatmul.mubr.bf16.gmra.mrb[12].mxu1 %v1382_v19  ;;  %1275 = vmatprep.subr.bf16.mxu0 %v1383_v20 }
  0x4f   :  { %1276 = vmatpush3.bf16.msra.mxu0 %v1383_v20 }
  0x50   :  { %1277 = vmatprep.subr.bf16.mxu0 %v1384_v21 }
  0x53   :  { %1278 = vmatpush3.bf16.msra.mxu0 %v1384_v21 }
  0x54   :  { %1279 = vmatprep.subr.bf16.mxu0 %v1385_v26 }
  0x57   :  { %1280 = vmatpush3.bf16.msra.mxu0 %v1385_v26 }
  0x58   :  { %1281 = vmatprep.subr.bf16.mxu0 %v1386_v28 }
  0x5b   :  { %1282 = vmatpush3.bf16.msra.mxu0 %v1386_v28 }
  0x5c   :  { %1283 = vmatprep.subr.bf16.mxu0 %v1387_v29 }
  0x5f   :  { %1284 = vmatpush3.bf16.msra.mxu0 %v1387_v29 }
  0x62   :  { %1286 = vmatmul.mubr.bf16.vlgmr.msra.gmra.mrb[16].mxu0 %v1389_v30 }
  0x9c   :  { %v203_v49 = vpop.permute.xlu1 %202 }
  0x9f   :  { %v193_v31 = vpop.permute.xlu0 %192 }
  0xa0   :  { %v208_v54 = vpop.permute.xlu1 %207 }
  0xa5   :  { %v198_v36 = vpop.permute.xlu0 %197 }
  0xf5   :  { %v1163_v32 = vpop.f32.mrb[0].mxu0 }
  0xf6   :  { %v1164_v33 = vpop.f32.mrb[1].mxu0 }
  0xf7   :  { %v1165_v34 = vadd.f32 %v1164_v33, %v1163_v32  ;;  %v1166_v35 = vpop.f32.mrb[2].mxu0  ;;  %v1191_v37 = vpop.f32.mrb[0].mxu1 }
  0xf8   :  { %v1167_v38 = vpop.f32.mrb[3].mxu0  ;;  %v1192_v41 = vpop.f32.mrb[1].mxu1 }
  0xf9   :  { %v769_v39 = vadd.f32 %v1165_v34, %v193_v31  ;;  %v1168_v40 = vadd.f32 %v1167_v38, %v1166_v35  ;;  %v1193_v42 = vadd.f32 %v1192_v41, %v1191_v37  ;;  %v1194_v43 = vpop.f32.mrb[2].mxu1  ;;  %v1145_v35 = vld [vmem:[%s1721_s4 + $0x8] sm:$0xff]   ;;  %v984_v37 = vstv %s1722_s3  ;;  %v1128_v38 = vld [vmem:[%s1721_s4] sm:$0xff]  }
  0xfa   :  { %v1195_v45 = vpop.f32.mrb[3].mxu1  ;;  %v1133_v41 = vunpack.c.l.bf16 %v1145_v35 }
  0xfb   :  { %v772_v44 = vadd.f32 %v1168_v40, %v198_v36  ;;  %v818_v46 = vadd.f32 %v1193_v42, %v769_v39  ;;  %v1196_v47 = vadd.f32 %v1195_v45, %v1194_v43  ;;  %v1129_v45 = vunpack.c.l.bf16 %v1128_v38 }
  0xfd   :  { %v821_v48 = vadd.f32 %v1196_v47, %v772_v44  ;;  %v1169_v50 = vpop.f32.mrb[4].mxu0 }
  0xfe   :  { %v1170_v51 = vpop.f32.mrb[5].mxu0 }
  0xff   :  { %v1171_v52 = vadd.f32 %v1170_v51, %v1169_v50  ;;  %v1172_v53 = vpop.f32.mrb[6].mxu0  ;;  %v1197_v55 = vpop.f32.mrb[4].mxu1 }
 0x100   :  { %v1173_v56 = vpop.f32.mrb[7].mxu0  ;;  %v1198_v59 = vpop.f32.mrb[5].mxu1 }
 0x101   :  { %v777_v57 = vadd.f32 %v1171_v52, %v203_v49  ;;  %v1174_v58 = vadd.f32 %v1173_v56, %v1172_v53  ;;  %v1199_v60 = vadd.f32 %v1198_v59, %v1197_v55  ;;  %v1200_v61 = vpop.f32.mrb[6].mxu1  ;;  %v1134_v49 = vunpack.c.h.bf16 %v1145_v35 }
 0x102   :  { %v1201_v63 = vpop.f32.mrb[7].mxu1  ;;  %v1130_v53 = vunpack.c.h.bf16 %v1128_v38 }
 0x103   :  { %v780_v62 = vadd.f32 %v1174_v58, %v208_v54  ;;  %v826_v0 = vadd.f32 %v1199_v60, %v777_v57  ;;  %v1202_v1 = vadd.f32 %v1201_v63, %v1200_v61 }
 0x105   :  { %v829_v2 = vadd.f32 %v1202_v1, %v780_v62 }
 0x115   :  { %v1219_v3 = vpop.f32.mrb[8].mxu0 }
 0x116   :  { %v1220_v4 = vpop.f32.mrb[9].mxu0 }
 0x117   :  { %v1221_v5 = vadd.f32 %v1220_v4, %v1219_v3  ;;  %v1222_v6 = vpop.f32.mrb[10].mxu0  ;;  %v1247_v7 = vpop.f32.mrb[8].mxu1 }
 0x118   :  { %v1223_v8 = vpop.f32.mrb[11].mxu0  ;;  %v1248_v11 = vpop.f32.mrb[9].mxu1 }
 0x119   :  { %v867_v9 = vadd.f32 %v1221_v5, %v818_v46  ;;  %v1224_v10 = vadd.f32 %v1223_v8, %v1222_v6  ;;  %v1249_v12 = vadd.f32 %v1248_v11, %v1247_v7  ;;  %v1250_v13 = vpop.f32.mrb[10].mxu1 }
 0x11a   :  { %v1251_v15 = vpop.f32.mrb[11].mxu1 }
 0x11b   :  { %v870_v14 = vadd.f32 %v1224_v10, %v821_v48  ;;  %v1252_v16 = vadd.f32 %v1251_v15, %v1250_v13  ;;  %v916_v17 = vadd.f32 %v1249_v12, %v867_v9 }
 0x11d   :  { %v1225_v18 = vpop.f32.mrb[12].mxu0  ;;  %v919_v20 = vadd.f32 %v1252_v16, %v870_v14 }
 0x11e   :  { %v1226_v19 = vpop.f32.mrb[13].mxu0 }
 0x11f   :  { %v1227_v21 = vadd.f32 %v1226_v19, %v1225_v18  ;;  %v1228_v22 = vpop.f32.mrb[14].mxu0  ;;  %v1253_v23 = vpop.f32.mrb[12].mxu1 }
 0x120   :  { %v1229_v24 = vpop.f32.mrb[15].mxu0  ;;  %v1254_v27 = vpop.f32.mrb[13].mxu1 }
 0x121   :  { %v875_v25 = vadd.f32 %v1227_v21, %v826_v0  ;;  %v1230_v26 = vadd.f32 %v1229_v24, %v1228_v22  ;;  %v1255_v28 = vadd.f32 %v1254_v27, %v1253_v23  ;;  %v1256_v29 = vpop.f32.mrb[14].mxu1 }
 0x122   :  { %v1257_v31 = vpop.f32.mrb[15].mxu1 }
 0x123   :  { %v878_v30 = vadd.f32 %v1230_v26, %v829_v2  ;;  %v1258_v32 = vadd.f32 %v1257_v31, %v1256_v29  ;;  %v924_v33 = vadd.f32 %v1255_v28, %v875_v25 }
 0x125   :  { %v927_v34 = vadd.f32 %v1258_v32, %v878_v30 }
 0x135   :  { %v1287_v36 = vpop.f32.mrb[16].mxu0 }
 0x136   :  { %v973_v39 = vadd.f32 %v1287_v36, %v924_v33  ;;  %v964_v40 = vpop.f32.mrb[17].mxu0 }
 0x137   :  { %v965_v42 = vadd.f32 %v964_v40, %v916_v17  ;;  %v1288_v43 = vpop.f32.mrb[18].mxu0 }
 0x138   :  { %vm982_vm0 = vcmp.ge.f32.partialorder %v973_v39, 0.0  ;;  %v987_v44 = vmul.f32 %v984_v37, %v973_v39  ;;  %v976_v46 = vadd.f32 %v1288_v43, %v927_v34  ;;  %v967_v47 = vpop.f32.mrb[19].mxu0 }
 0x139   :  { %vm980_vm1 = vcmp.ge.f32.partialorder %v965_v42, 0.0  ;;  %v985_v48 = vmul.f32 %v984_v37, %v965_v42  ;;  %v968_v50 = vadd.f32 %v967_v47, %v919_v20 }
 0x13a   :  { %v991_v51 = vsel %vm982_vm0, %v973_v39, %v987_v44  ;;  %vm983_vm2 = vcmp.ge.f32.partialorder %v976_v46, 0.0  ;;  %v988_v52 = vmul.f32 %v984_v37, %v976_v46 }
 0x13b   :  { %v989_v54 = vsel %vm980_vm1, %v965_v42, %v985_v48  ;;  %vm981_vm3 = vcmp.ge.f32.partialorder %v968_v50, 0.0  ;;  %v986_v55 = vmul.f32 %v984_v37, %v968_v50  ;;  %v1003_v57 = vadd.f32 %v1133_v41, %v991_v51 }
 0x13c   :  { %v992_v56 = vsel %vm983_vm2, %v976_v46, %v988_v52  ;;  %v1001_v60 = vadd.f32 %v1129_v45, %v989_v54 }
 0x13d   :  { %v1004_v58 = vadd.f32 %v1134_v49, %v992_v56  ;;  %v990_v59 = vsel %vm981_vm3, %v968_v50, %v986_v55 }
 0x13e   :  { %v1002_v61 = vadd.f32 %v1130_v53, %v990_v59 }
 0x13f   :  { %v1143_v62 = vpack.c.bf16 %v1004_v58, %v1003_v57 }
 0x140   :  { %v1138_v63 = vpack.c.bf16 %v1002_v61, %v1001_v60 }
 0x141   :  { %1146 = vst [vmem:[%s1723_s5 + $0x8] sm:$0xff] %v1143_v62  }
 0x142   :  { %1139 = vst [vmem:[%s1723_s5] sm:$0xff] %v1138_v63  }

// kernel: net7_forward.63
= control target key start
LH: loop header
LB: loop body
LE: loop exit
PB: predicated region body
PF: predicated region fallthrough
CT: control target
= control target key end

     0   :  { %v443_v1 = vmov 0   ;;  %vm153_vm0 = vcmask 523264   ;;  %s580_s1 = inlined_call_operand.vmem [shape: bf16[64,512], index: 1, kind: input, shape index: {}]   ;;  %s581_s0 = inlined_call_operand.vmem [shape: bf16[32,64], index: 0, kind: input, shape index: {}]   ;;  %s582_s2 = inlined_call_operand.vmem [shape: f32[32,1], index: 2, kind: input, shape index: {}]   ;;  %s583_s3 = inlined_call_operand.<no memory space> [shape: f32[1,1], index: 3, kind: input, shape index: {}]   ;;  %s584_s4 = inlined_call_operand.vmem [shape: bf16[32,512], index: 4, kind: output, shape index: {}]  }
   0x1   :  { %v417_v0 = vld [vmem:[%s580_s1 + $0x4] ss:$16 sps:$4 sm:$0xff]   ;;  %192 = vmatprep.mubr.bf16.mxu0 %v443_v1  ;;  %245 = vmatprep.mubr.bf16.mxu1 %v443_v1  ;;  %v419_v2 = vld [vmem:[%s580_s1 + $0xc] ss:$16 sps:$4 sm:$0xff]   ;;  %v421_v3 = vld [vmem:[%s580_s1] ss:$16 sps:$4 sm:$0xff]   ;;  %v538_v26 = vstv %s583_s3 }
   0x2   :  { %415 = vset.pattern.permute.xlu0 %v443_v1  ;;  %416 = vset.pattern.permute.xlu1 %v443_v1  ;;  %v422_v4 = vld [vmem:[%s580_s1 + $0x8] ss:$16 sps:$4 sm:$0xff]   ;;  %v423_v5 = vld [vmem:[%s580_s1 + $0x24] ss:$16 sps:$4 sm:$0xff]   ;;  %v425_v6 = vld [vmem:[%s580_s1 + $0x2c] ss:$16 sps:$4 sm:$0xff]  }
   0x3   :  { %160 = vmatprep.subr.bf16.mxu0 %v417_v0  ;;  %213 = vmatprep.subr.bf16.mxu1 %v419_v2  ;;  %v427_v7 = vld [vmem:[%s580_s1 + $0x20] ss:$16 sps:$4 sm:$0xff]   ;;  %v428_v8 = vld [vmem:[%s580_s1 + $0x28] ss:$16 sps:$4 sm:$0xff]   ;;  %v429_v9 = vld [vmem:[%s580_s1 + $0x44] ss:$16 sps:$4 sm:$0xff]  }
   0x4   :  { %161 = vmatpush1.bf16.msra.mxu0 %v421_v3  ;;  %214 = vmatpush1.bf16.msra.mxu1 %v422_v4  ;;  %v431_v10 = vld [vmem:[%s580_s1 + $0x4c] ss:$16 sps:$4 sm:$0xff]   ;;  %v433_v11 = vld [vmem:[%s580_s1 + $0x40] ss:$16 sps:$4 sm:$0xff]   ;;  %v434_v12 = vld [vmem:[%s580_s1 + $0x48] ss:$16 sps:$4 sm:$0xff]  }
   0x5   :  { %162 = vmatprep.subr.bf16.mxu0 %v423_v5  ;;  %215 = vmatprep.subr.bf16.mxu1 %v425_v6  ;;  %v435_v13 = vld [vmem:[%s580_s1 + $0x64] ss:$16 sps:$4 sm:$0xff]   ;;  %v437_v14 = vld [vmem:[%s580_s1 + $0x6c] ss:$16 sps:$4 sm:$0xff]   ;;  %v439_v15 = vld [vmem:[%s580_s1 + $0x60] ss:$16 sps:$4 sm:$0xff]  }
   0x6   :  { %v440_v16 = vld [vmem:[%s580_s1 + $0x68] ss:$16 sps:$4 sm:$0xff]   ;;  %v39_v17 = vld [vmem:[%s582_s2] sm:$0xff]  ;;  %v41_v18 = vld [vmem:[%s582_s2 + $0x10] sm:$0xff] }
   0x7   :  { %45 = vperm.xlu0 %415, %v39_v17   ;;  %55 = vperm.xlu1 %416, %v41_v18   ;;  %v441_v19 = vld [vmem:[%s581_s0] sm:$0xff]   ;;  %v40_v20 = vld [vmem:[%s582_s2 + $0x8] sm:$0xff]  ;;  %v42_v21 = vld [vmem:[%s582_s2 + $0x18] sm:$0xff] }
   0x8   :  { %163 = vmatpush1.bf16.msra.mxu0 %v427_v7  ;;  %216 = vmatpush1.bf16.msra.mxu1 %v428_v8  ;;  %v442_v22 = vld [vmem:[%s581_s0 + $0x8] sm:$0xff]  }
   0x9   :  { %164 = vmatprep.subr.bf16.mxu0 %v429_v9  ;;  %217 = vmatprep.subr.bf16.mxu1 %v431_v10 }
   0xb   :  { %50 = vperm.xlu0 %415, %v40_v20   ;;  %60 = vperm.xlu1 %416, %v42_v21  }
   0xc   :  { %165 = vmatpush1.bf16.msra.mxu0 %v433_v11  ;;  %218 = vmatpush1.bf16.msra.mxu1 %v434_v12 }
   0xd   :  { %166 = vmatprep.subr.bf16.mxu0 %v435_v13  ;;  %219 = vmatprep.subr.bf16.mxu1 %v437_v14 }
  0x10   :  { %167 = vmatpush1.bf16.msra.mxu0 %v439_v15  ;;  %220 = vmatpush1.bf16.msra.mxu1 %v440_v16 }
  0x13   :  { %394 = vmatmul.mubr.msk.bf16.vlgmr.msra.gmra.mrb[0].mxu0 %vm153_vm0, %v441_v19  ;;  %396 = vmatmul.mubr.msk.bf16.vlgmr.msra.gmra.mrb[0].mxu1 %vm153_vm0, %v441_v19 }
  0x14   :  { %202 = vmatprep.mubr.bf16.mxu0 %v443_v1  ;;  %255 = vmatprep.mubr.bf16.mxu1 %v443_v1 }
  0x1b   :  { %395 = vmatmul.mubr.msk.bf16.gmra.mrb[4].mxu0 %vm153_vm0, %v442_v22  ;;  %397 = vmatmul.mubr.msk.bf16.gmra.mrb[4].mxu1 %vm153_vm0, %v442_v22 }
  0x86   :  { %v46_v23 = vpop.permute.xlu0 %45  ;;  %v56_v48 = vpop.permute.xlu1 %55 }
  0x8a   :  { %v51_v24 = vpop.permute.xlu0 %50  ;;  %v61_v11 = vpop.permute.xlu1 %60 }
  0xe6   :  { %v194_v25 = vpop.f32.mrb[0].mxu0  ;;  %v247_v27 = vpop.f32.mrb[0].mxu1 }
  0xe7   :  { %v195_v28 = vadd.f32 %v194_v25, %v46_v23  ;;  %v248_v29 = vadd.f32 %v247_v27, %v46_v23  ;;  %v196_v30 = vpop.f32.mrb[1].mxu0  ;;  %v249_v31 = vpop.f32.mrb[1].mxu1 }
  0xe8   :  { %v197_v32 = vadd.f32 %v196_v30, %v46_v23  ;;  %v250_v33 = vadd.f32 %v249_v31, %v46_v23  ;;  %v198_v34 = vpop.f32.mrb[2].mxu0  ;;  %v251_v35 = vpop.f32.mrb[2].mxu1 }
  0xe9   :  { %vm267_vm1 = vcmp.ge.f32.partialorder %v195_v28, 0.0  ;;  %v284_v36 = vmul.f32 %v538_v26, %v195_v28  ;;  %vm269_vm2 = vcmp.ge.f32.partialorder %v248_v29, 0.0  ;;  %v286_v37 = vmul.f32 %v538_v26, %v248_v29  ;;  %v200_v38 = vpop.f32.mrb[3].mxu0  ;;  %v253_v39 = vpop.f32.mrb[3].mxu1 }
  0xea   :  { %vm268_vm3 = vcmp.ge.f32.partialorder %v197_v32, 0.0  ;;  %v285_v40 = vmul.f32 %v538_v26, %v197_v32  ;;  %vm270_vm4 = vcmp.ge.f32.partialorder %v250_v33, 0.0  ;;  %v287_v41 = vmul.f32 %v538_v26, %v250_v33 }
  0xeb   :  { %v300_v42 = vsel %vm267_vm1, %v195_v28, %v284_v36  ;;  %v302_v43 = vsel %vm269_vm2, %v248_v29, %v286_v37  ;;  %v199_v44 = vadd.f32 %v198_v34, %v51_v24  ;;  %v252_v45 = vadd.f32 %v251_v35, %v51_v24 }
  0xec   :  { %v301_v46 = vsel %vm268_vm3, %v197_v32, %v285_v40  ;;  %v303_v47 = vsel %vm270_vm4, %v250_v33, %v287_v41  ;;  %v201_v49 = vadd.f32 %v200_v38, %v51_v24  ;;  %v254_v50 = vadd.f32 %v253_v39, %v51_v24 }
  0xed   :  { %v406_v51 = vpack.c.bf16 %v301_v46, %v300_v42  ;;  %v407_v52 = vpack.c.bf16 %v303_v47, %v302_v43  ;;  %vm271_vm5 = vcmp.ge.f32.partialorder %v199_v44, 0.0  ;;  %v288_v53 = vmul.f32 %v538_v26, %v199_v44 }
  0xee   :  { %vm273_vm6 = vcmp.ge.f32.partialorder %v252_v45, 0.0  ;;  %v290_v54 = vmul.f32 %v538_v26, %v252_v45  ;;  %vm272_vm7 = vcmp.ge.f32.partialorder %v201_v49, 0.0  ;;  %v289_v55 = vmul.f32 %v538_v26, %v201_v49  ;;  %v204_v56 = vpop.f32.mrb[4].mxu0  ;;  %v257_v57 = vpop.f32.mrb[4].mxu1 }
  0xef   :  { %364 = vst [vmem:[%s584_s4] sm:$0xff] %v406_v51  ;;  %365 = vst [vmem:[%s584_s4 + $0x8] sm:$0xff] %v407_v52  ;;  %v304_v58 = vsel %vm271_vm5, %v199_v44, %v288_v53  ;;  %vm274_vm8 = vcmp.ge.f32.partialorder %v254_v50, 0.0  ;;  %v291_v59 = vmul.f32 %v538_v26, %v254_v50  ;;  %v205_v60 = vadd.f32 %v204_v56, %v56_v48  ;;  %v206_v61 = vpop.f32.mrb[5].mxu0  ;;  %v259_v62 = vpop.f32.mrb[5].mxu1 }
  0xf0   :  { %v306_v63 = vsel %vm273_vm6, %v252_v45, %v290_v54  ;;  %v305_v0 = vsel %vm272_vm7, %v201_v49, %v289_v55  ;;  %v258_v1 = vadd.f32 %v257_v57, %v56_v48  ;;  %v207_v2 = vadd.f32 %v206_v61, %v56_v48  ;;  %v208_v3 = vpop.f32.mrb[6].mxu0  ;;  %v261_v4 = vpop.f32.mrb[6].mxu1 }
  0xf1   :  { %v408_v5 = vpack.c.bf16 %v305_v0, %v304_v58  ;;  %v307_v6 = vsel %vm274_vm8, %v254_v50, %v291_v59  ;;  %vm275_vm9 = vcmp.ge.f32.partialorder %v205_v60, 0.0  ;;  %v292_v7 = vmul.f32 %v538_v26, %v205_v60  ;;  %v210_v8 = vpop.f32.mrb[7].mxu0  ;;  %v263_v9 = vpop.f32.mrb[7].mxu1 }
  0xf2   :  { %v409_v10 = vpack.c.bf16 %v307_v6, %v306_v63  ;;  %vm277_vm10 = vcmp.ge.f32.partialorder %v258_v1, 0.0  ;;  %v294_v12 = vmul.f32 %v538_v26, %v258_v1  ;;  %vm276_vm11 = vcmp.ge.f32.partialorder %v207_v2, 0.0 }
  0xf3   :  { %366 = vst [vmem:[%s584_s4 + $0x10] sm:$0xff] %v408_v5  ;;  %v308_v13 = vsel %vm275_vm9, %v205_v60, %v292_v7  ;;  %v293_v14 = vmul.f32 %v538_v26, %v207_v2  ;;  %v260_v15 = vadd.f32 %v259_v62, %v56_v48  ;;  %v209_v16 = vadd.f32 %v208_v3, %v61_v11 }
  0xf4   :  { %367 = vst [vmem:[%s584_s4 + $0x18] sm:$0xff] %v409_v10  ;;  %v310_v17 = vsel %vm277_vm10, %v258_v1, %v294_v12  ;;  %v262_v18 = vadd.f32 %v261_v4, %v61_v11  ;;  %v211_v19 = vadd.f32 %v210_v8, %v61_v11  ;;  %v264_v20 = vadd.f32 %v263_v9, %v61_v11 }
  0xf5   :  { %v309_v21 = vsel %vm276_vm11, %v207_v2, %v293_v14  ;;  %vm278_vm12 = vcmp.ge.f32.partialorder %v260_v15, 0.0  ;;  %v295_v22 = vmul.f32 %v538_v26, %v260_v15  ;;  %vm279_vm13 = vcmp.ge.f32.partialorder %v209_v16, 0.0 }
  0xf6   :  { %v410_v23 = vpack.c.bf16 %v309_v21, %v308_v13  ;;  %v296_v24 = vmul.f32 %v538_v26, %v209_v16  ;;  %vm281_vm14 = vcmp.ge.f32.partialorder %v262_v18, 0.0  ;;  %v298_v25 = vmul.f32 %v538_v26, %v262_v18 }
  0xf7   :  { %v311_v27 = vsel %vm278_vm12, %v260_v15, %v295_v22  ;;  %vm280_vm15 = vcmp.ge.f32.partialorder %v211_v19, 0.0  ;;  %v297_v28 = vmul.f32 %v538_v26, %v211_v19  ;;  %vm282_vm0 = vcmp.ge.f32.partialorder %v264_v20, 0.0 }
  0xf8   :  { %368 = vst [vmem:[%s584_s4 + $0x20] sm:$0xff] %v410_v23  ;;  %v411_v29 = vpack.c.bf16 %v311_v27, %v310_v17  ;;  %v312_v30 = vsel %vm279_vm13, %v209_v16, %v296_v24  ;;  %v314_v31 = vsel %vm281_vm14, %v262_v18, %v298_v25  ;;  %v299_v32 = vmul.f32 %v538_v26, %v264_v20 }
  0xf9   :  { %v313_v33 = vsel %vm280_vm15, %v211_v19, %v297_v28 }
  0xfa   :  { %369 = vst [vmem:[%s584_s4 + $0x28] sm:$0xff] %v411_v29  ;;  %v412_v34 = vpack.c.bf16 %v313_v33, %v312_v30  ;;  %v315_v35 = vsel %vm282_vm0, %v264_v20, %v299_v32 }
  0xfb   :  { %v413_v36 = vpack.c.bf16 %v315_v35, %v314_v31 }
  0xfc   :  { %370 = vst [vmem:[%s584_s4 + $0x30] sm:$0xff] %v412_v34 }
  0xfd   :  { %371 = vst [vmem:[%s584_s4 + $0x38] sm:$0xff] %v413_v36 }

// kernel: net7_forward.67
= control target key start
LH: loop header
LB: loop body
LE: loop exit
PB: predicated region body
PF: predicated region fallthrough
CT: control target
= control target key end

     0   :  { %v237_v1 = vmov 0   ;;  %vm89_vm0 = vcmask 523264   ;;  %s304_s1 = inlined_call_operand.vmem [shape: bf16[64,128], index: 1, kind: input, shape index: {}]   ;;  %s305_s0 = inlined_call_operand.vmem [shape: bf16[32,64], index: 0, kind: input, shape index: {}]   ;;  %s306_s2 = inlined_call_operand.vmem [shape: f32[32,1], index: 2, kind: input, shape index: {}]   ;;  %s307_s3 = inlined_call_operand.<no memory space> [shape: f32[1,1], index: 3, kind: input, shape index: {}]   ;;  %s308_s4 = inlined_call_operand.vmem [shape: bf16[32,128], index: 4, kind: output, shape index: {}]  }
   0x1   :  { %v231_v0 = vld [vmem:[%s304_s1] sm:$0xff]   ;;  %230 = vset.pattern.permute.xlu1 %v237_v1  ;;  %229 = vset.pattern.permute.xlu0 %v237_v1  ;;  %v232_v2 = vld [vmem:[%s304_s1 + $0x8] sm:$0xff]   ;;  %v233_v3 = vld [vmem:[%s304_s1 + $0x10] sm:$0xff]   ;;  %v150_v14 = vstv %s307_s3 }
   0x2   :  { %216 = vmatprep.subr.bf16.mxu0 %v231_v0  ;;  %v235_v4 = vld [vmem:[%s305_s0] sm:$0xff]   ;;  %v33_v5 = vld [vmem:[%s306_s2 + $0x10] sm:$0xff]  ;;  %v234_v7 = vld [vmem:[%s304_s1 + $0x18] sm:$0xff]  }
   0x3   :  { %217 = vmatpush3.bf16.msra.mxu0 %v231_v0  ;;  %224 = vmatprep.mubr.msk.bf16.mxu0 %vm89_vm0, %v235_v4  ;;  %v31_v6 = vld [vmem:[%s306_s2] sm:$0xff]  ;;  %v34_v8 = vld [vmem:[%s306_s2 + $0x18] sm:$0xff]  ;;  %v32_v9 = vld [vmem:[%s306_s2 + $0x8] sm:$0xff] }
   0x4   :  { %218 = vmatprep.subr.bf16.mxu0 %v232_v2  ;;  %47 = vperm.xlu1 %230, %v33_v5   ;;  %v236_v10 = vld [vmem:[%s305_s0 + $0x8] sm:$0xff]  }
   0x5   :  { %37 = vperm.xlu0 %229, %v31_v6  }
   0x7   :  { %219 = vmatpush3.bf16.msra.mxu0 %v232_v2 }
   0x8   :  { %220 = vmatprep.subr.bf16.mxu0 %v233_v3  ;;  %52 = vperm.xlu1 %230, %v34_v8  }
   0x9   :  { %42 = vperm.xlu0 %229, %v32_v9  }
   0xb   :  { %221 = vmatpush3.bf16.msra.mxu0 %v233_v3 }
   0xc   :  { %222 = vmatprep.subr.bf16.mxu0 %v234_v7 }
   0xf   :  { %223 = vmatpush3.bf16.msra.mxu0 %v234_v7 }
  0x12   :  { %225 = vmatmul.mubr.msk.bf16.vlgmr.msra.gmra.mrb[0].mxu0 %vm89_vm0, %v236_v10 }
  0x83   :  { %v48_v11 = vpop.permute.xlu1 %47 }
  0x84   :  { %v38_v12 = vpop.permute.xlu0 %37 }
  0x87   :  { %v53_v17 = vpop.permute.xlu1 %52 }
  0x88   :  { %v43_v20 = vpop.permute.xlu0 %42 }
  0xe5   :  { %v226_v13 = vpop.f32.mrb[0].mxu0 }
  0xe6   :  { %v139_v15 = vadd.f32 %v226_v13, %v48_v11  ;;  %v130_v16 = vpop.f32.mrb[1].mxu0 }
  0xe7   :  { %v131_v18 = vadd.f32 %v130_v16, %v38_v12  ;;  %v227_v19 = vpop.f32.mrb[2].mxu0 }
  0xe8   :  { %v153_v21 = vmul.f32 %v150_v14, %v139_v15  ;;  %v142_v22 = vadd.f32 %v227_v19, %v53_v17  ;;  %v133_v23 = vpop.f32.mrb[3].mxu0  ;;  %vm148_vm1 = vcmp.ge.f32.partialorder %v139_v15, 0.0 }
  0xe9   :  { %v151_v24 = vmul.f32 %v150_v14, %v131_v18  ;;  %v134_v25 = vadd.f32 %v133_v23, %v43_v20  ;;  %vm146_vm2 = vcmp.ge.f32.partialorder %v131_v18, 0.0 }
  0xea   :  { %vm149_vm3 = vcmp.ge.f32.partialorder %v142_v22, 0.0  ;;  %v154_v26 = vmul.f32 %v150_v14, %v142_v22  ;;  %v157_v28 = vsel %vm148_vm1, %v139_v15, %v153_v21 }
  0xeb   :  { %vm147_vm4 = vcmp.ge.f32.partialorder %v134_v25, 0.0  ;;  %v152_v27 = vmul.f32 %v150_v14, %v134_v25  ;;  %v155_v30 = vsel %vm146_vm2, %v131_v18, %v151_v24 }
  0xec   :  { %v158_v29 = vsel %vm149_vm3, %v142_v22, %v154_v26 }
  0xed   :  { %v207_v31 = vpack.c.bf16 %v158_v29, %v157_v28  ;;  %v156_v32 = vsel %vm147_vm4, %v134_v25, %v152_v27 }
  0xee   :  { %v202_v33 = vpack.c.bf16 %v156_v32, %v155_v30 }
  0xef   :  { %209 = vst [vmem:[%s308_s4 + $0x8] sm:$0xff] %v207_v31  }
  0xf0   :  { %203 = vst [vmem:[%s308_s4] sm:$0xff] %v202_v33  }

// kernel: net7_forward.71
= control target key start
LH: loop header
LB: loop body
LE: loop exit
PB: predicated region body
PF: predicated region fallthrough
CT: control target
= control target key end

     0   :  { %v511_v1 = vmov 0   ;;  %vm201_vm0 = vcmask 785408   ;;  %s678_s1 = inlined_call_operand.vmem [shape: bf16[96,512], index: 1, kind: input, shape index: {}]   ;;  %s679_s0 = inlined_call_operand.vmem [shape: bf16[32,96], index: 0, kind: input, shape index: {}]   ;;  %s680_s2 = inlined_call_operand.vmem [shape: f32[32,1], index: 2, kind: input, shape index: {}]   ;;  %s681_s3 = inlined_call_operand.<no memory space> [shape: f32[1,1], index: 3, kind: input, shape index: {}]   ;;  %s682_s4 = inlined_call_operand.vmem [shape: bf16[32,512], index: 4, kind: output, shape index: {}]  }
   0x1   :  { %v473_v0 = vld [vmem:[%s678_s1 + $0x4] ss:$16 sps:$4 sm:$0xff]   ;;  %240 = vmatprep.mubr.bf16.mxu0 %v511_v1  ;;  %293 = vmatprep.mubr.bf16.mxu1 %v511_v1  ;;  %v475_v2 = vld [vmem:[%s678_s1 + $0xc] ss:$16 sps:$4 sm:$0xff]   ;;  %v477_v3 = vld [vmem:[%s678_s1] ss:$16 sps:$4 sm:$0xff]   ;;  %v636_v34 = vstv %s681_s3 }
   0x2   :  { %471 = vset.pattern.permute.xlu0 %v511_v1  ;;  %472 = vset.pattern.permute.xlu1 %v511_v1  ;;  %v478_v4 = vld [vmem:[%s678_s1 + $0x8] ss:$16 sps:$4 sm:$0xff]   ;;  %v479_v5 = vld [vmem:[%s678_s1 + $0x24] ss:$16 sps:$4 sm:$0xff]   ;;  %v481_v6 = vld [vmem:[%s678_s1 + $0x2c] ss:$16 sps:$4 sm:$0xff]  }
   0x3   :  { %208 = vmatprep.subr.bf16.mxu0 %v473_v0  ;;  %261 = vmatprep.subr.bf16.mxu1 %v475_v2  ;;  %v483_v7 = vld [vmem:[%s678_s1 + $0x20] ss:$16 sps:$4 sm:$0xff]   ;;  %v484_v8 = vld [vmem:[%s678_s1 + $0x28] ss:$16 sps:$4 sm:$0xff]   ;;  %v485_v9 = vld [vmem:[%s678_s1 + $0x44] ss:$16 sps:$4 sm:$0xff]  }
   0x4   :  { %209 = vmatpush1.bf16.msra.mxu0 %v477_v3  ;;  %262 = vmatpush1.bf16.msra.mxu1 %v478_v4  ;;  %v487_v10 = vld [vmem:[%s678_s1 + $0x4c] ss:$16 sps:$4 sm:$0xff]   ;;  %v489_v11 = vld [vmem:[%s678_s1 + $0x40] ss:$16 sps:$4 sm:$0xff]   ;;  %v490_v12 = vld [vmem:[%s678_s1 + $0x48] ss:$16 sps:$4 sm:$0xff]  }
   0x5   :  { %210 = vmatprep.subr.bf16.mxu0 %v479_v5  ;;  %263 = vmatprep.subr.bf16.mxu1 %v481_v6  ;;  %v491_v13 = vld [vmem:[%s678_s1 + $0x64] ss:$16 sps:$4 sm:$0xff]   ;;  %v493_v14 = vld [vmem:[%s678_s1 + $0x6c] ss:$16 sps:$4 sm:$0xff]   ;;  %v495_v15 = vld [vmem:[%s678_s1 + $0x60] ss:$16 sps:$4 sm:$0xff]  }
   0x6   :  { %v496_v16 = vld [vmem:[%s678_s1 + $0x68] ss:$16 sps:$4 sm:$0xff]   ;;  %v497_v17 = vld [vmem:[%s678_s1 + $0x84] ss:$16 sps:$4 sm:$0xff]   ;;  %v499_v18 = vld [vmem:[%s678_s1 + $0x8c] ss:$16 sps:$4 sm:$0xff]  }
   0x7   :  { %v501_v19 = vld [vmem:[%s678_s1 + $0x80] ss:$16 sps:$4 sm:$0xff]   ;;  %v502_v20 = vld [vmem:[%s678_s1 + $0x88] ss:$16 sps:$4 sm:$0xff]   ;;  %v503_v21 = vld [vmem:[%s678_s1 + $0xa4] ss:$16 sps:$4 sm:$0xff]  }
   0x8   :  { %211 = vmatpush1.bf16.msra.mxu0 %v483_v7  ;;  %264 = vmatpush1.bf16.msra.mxu1 %v484_v8  ;;  %v505_v22 = vld [vmem:[%s678_s1 + $0xac] ss:$16 sps:$4 sm:$0xff]   ;;  %v47_v23 = vld [vmem:[%s680_s2] sm:$0xff]  ;;  %v49_v24 = vld [vmem:[%s680_s2 + $0x10] sm:$0xff] }
   0x9   :  { %212 = vmatprep.subr.bf16.mxu0 %v485_v9  ;;  %265 = vmatprep.subr.bf16.mxu1 %v487_v10  ;;  %v507_v25 = vld [vmem:[%s678_s1 + $0xa0] ss:$16 sps:$4 sm:$0xff]   ;;  %v508_v26 = vld [vmem:[%s678_s1 + $0xa8] ss:$16 sps:$4 sm:$0xff]  }
   0xa   :  { %53 = vperm.xlu0 %471, %v47_v23   ;;  %63 = vperm.xlu1 %472, %v49_v24   ;;  %v48_v27 = vld [vmem:[%s680_s2 + $0x8] sm:$0xff]  ;;  %v50_v28 = vld [vmem:[%s680_s2 + $0x18] sm:$0xff]  ;;  %v509_v29 = vld [vmem:[%s679_s0] sm:$0xff]  }
   0xb   :  { %v510_v30 = vld [vmem:[%s679_s0 + $0x8] sm:$0xff]  }
   0xc   :  { %213 = vmatpush1.bf16.msra.mxu0 %v489_v11  ;;  %266 = vmatpush1.bf16.msra.mxu1 %v490_v12 }
   0xd   :  { %214 = vmatprep.subr.bf16.mxu0 %v491_v13  ;;  %267 = vmatprep.subr.bf16.mxu1 %v493_v14 }
   0xe   :  { %58 = vperm.xlu0 %471, %v48_v27   ;;  %68 = vperm.xlu1 %472, %v50_v28  }
  0x10   :  { %215 = vmatpush1.bf16.msra.mxu0 %v495_v15  ;;  %268 = vmatpush1.bf16.msra.mxu1 %v496_v16 }
  0x11   :  { %216 = vmatprep.subr.bf16.mxu0 %v497_v17  ;;  %269 = vmatprep.subr.bf16.mxu1 %v499_v18 }
  0x14   :  { %217 = vmatpush1.bf16.msra.mxu0 %v501_v19  ;;  %270 = vmatpush1.bf16.msra.mxu1 %v502_v20 }
  0x15   :  { %218 = vmatprep.subr.bf16.mxu0 %v503_v21  ;;  %271 = vmatprep.subr.bf16.mxu1 %v505_v22 }
  0x18   :  { %219 = vmatpush1.bf16.msra.mxu0 %v507_v25  ;;  %272 = vmatpush1.bf16.msra.mxu1 %v508_v26 }
  0x1b   :  { %450 = vmatmul.mubr.msk.bf16.vlgmr.msra.gmra.mrb[0].mxu0 %vm201_vm0, %v509_v29  ;;  %452 = vmatmul.mubr.msk.bf16.vlgmr.msra.gmra.mrb[0].mxu1 %vm201_vm0, %v509_v29 }
  0x1c   :  { %250 = vmatprep.mubr.bf16.mxu0 %v511_v1  ;;  %303 = vmatprep.mubr.bf16.mxu1 %v511_v1 }
  0x23   :  { %451 = vmatmul.mubr.msk.bf16.gmra.mrb[4].mxu0 %vm201_vm0, %v510_v30  ;;  %453 = vmatmul.mubr.msk.bf16.gmra.mrb[4].mxu1 %vm201_vm0, %v510_v30 }
  0x89   :  { %v54_v31 = vpop.permute.xlu0 %53  ;;  %v64_v56 = vpop.permute.xlu1 %63 }
  0x8d   :  { %v59_v32 = vpop.permute.xlu0 %58  ;;  %v69_v19 = vpop.permute.xlu1 %68 }
  0xee   :  { %v242_v33 = vpop.f32.mrb[0].mxu0  ;;  %v295_v35 = vpop.f32.mrb[0].mxu1 }
  0xef   :  { %v243_v36 = vadd.f32 %v242_v33, %v54_v31  ;;  %v296_v37 = vadd.f32 %v295_v35, %v54_v31  ;;  %v244_v38 = vpop.f32.mrb[1].mxu0  ;;  %v297_v39 = vpop.f32.mrb[1].mxu1 }
  0xf0   :  { %v245_v40 = vadd.f32 %v244_v38, %v54_v31  ;;  %v298_v41 = vadd.f32 %v297_v39, %v54_v31  ;;  %v246_v42 = vpop.f32.mrb[2].mxu0  ;;  %v299_v43 = vpop.f32.mrb[2].mxu1 }
  0xf1   :  { %vm315_vm1 = vcmp.ge.f32.partialorder %v243_v36, 0.0  ;;  %v332_v44 = vmul.f32 %v636_v34, %v243_v36  ;;  %vm317_vm2 = vcmp.ge.f32.partialorder %v296_v37, 0.0  ;;  %v334_v45 = vmul.f32 %v636_v34, %v296_v37  ;;  %v248_v46 = vpop.f32.mrb[3].mxu0  ;;  %v301_v47 = vpop.f32.mrb[3].mxu1 }
  0xf2   :  { %vm316_vm3 = vcmp.ge.f32.partialorder %v245_v40, 0.0  ;;  %v333_v48 = vmul.f32 %v636_v34, %v245_v40  ;;  %vm318_vm4 = vcmp.ge.f32.partialorder %v298_v41, 0.0  ;;  %v335_v49 = vmul.f32 %v636_v34, %v298_v41 }
  0xf3   :  { %v348_v50 = vsel %vm315_vm1, %v243_v36, %v332_v44  ;;  %v350_v51 = vsel %vm317_vm2, %v296_v37, %v334_v45  ;;  %v247_v52 = vadd.f32 %v246_v42, %v59_v32  ;;  %v300_v53 = vadd.f32 %v299_v43, %v59_v32 }
  0xf4   :  { %v349_v54 = vsel %vm316_vm3, %v245_v40, %v333_v48  ;;  %v351_v55 = vsel %vm318_vm4, %v298_v41, %v335_v49  ;;  %v249_v57 = vadd.f32 %v248_v46, %v59_v32  ;;  %v302_v58 = vadd.f32 %v301_v47, %v59_v32 }
  0xf5   :  { %v462_v59 = vpack.c.bf16 %v349_v54, %v348_v50  ;;  %v463_v60 = vpack.c.bf16 %v351_v55, %v350_v51  ;;  %vm319_vm5 = vcmp.ge.f32.partialorder %v247_v52, 0.0  ;;  %v336_v61 = vmul.f32 %v636_v34, %v247_v52 }
  0xf6   :  { %vm321_vm6 = vcmp.ge.f32.partialorder %v300_v53, 0.0  ;;  %v338_v62 = vmul.f32 %v636_v34, %v300_v53  ;;  %vm320_vm7 = vcmp.ge.f32.partialorder %v249_v57, 0.0  ;;  %v337_v63 = vmul.f32 %v636_v34, %v249_v57  ;;  %v252_v0 = vpop.f32.mrb[4].mxu0  ;;  %v305_v1 = vpop.f32.mrb[4].mxu1 }
  0xf7   :  { %412 = vst [vmem:[%s682_s4] sm:$0xff] %v462_v59  ;;  %413 = vst [vmem:[%s682_s4 + $0x8] sm:$0xff] %v463_v60  ;;  %v352_v2 = vsel %vm319_vm5, %v247_v52, %v336_v61  ;;  %vm322_vm8 = vcmp.ge.f32.partialorder %v302_v58, 0.0  ;;  %v339_v3 = vmul.f32 %v636_v34, %v302_v58  ;;  %v253_v4 = vadd.f32 %v252_v0, %v64_v56  ;;  %v254_v5 = vpop.f32.mrb[5].mxu0  ;;  %v307_v6 = vpop.f32.mrb[5].mxu1 }
  0xf8   :  { %v354_v7 = vsel %vm321_vm6, %v300_v53, %v338_v62  ;;  %v353_v8 = vsel %vm320_vm7, %v249_v57, %v337_v63  ;;  %v306_v9 = vadd.f32 %v305_v1, %v64_v56  ;;  %v255_v10 = vadd.f32 %v254_v5, %v64_v56  ;;  %v256_v11 = vpop.f32.mrb[6].mxu0  ;;  %v309_v12 = vpop.f32.mrb[6].mxu1 }
  0xf9   :  { %v464_v13 = vpack.c.bf16 %v353_v8, %v352_v2  ;;  %v355_v14 = vsel %vm322_vm8, %v302_v58, %v339_v3  ;;  %vm323_vm9 = vcmp.ge.f32.partialorder %v253_v4, 0.0  ;;  %v340_v15 = vmul.f32 %v636_v34, %v253_v4  ;;  %v258_v16 = vpop.f32.mrb[7].mxu0  ;;  %v311_v17 = vpop.f32.mrb[7].mxu1 }
  0xfa   :  { %v465_v18 = vpack.c.bf16 %v355_v14, %v354_v7  ;;  %vm325_vm10 = vcmp.ge.f32.partialorder %v306_v9, 0.0  ;;  %v342_v20 = vmul.f32 %v636_v34, %v306_v9  ;;  %vm324_vm11 = vcmp.ge.f32.partialorder %v255_v10, 0.0 }
  0xfb   :  { %414 = vst [vmem:[%s682_s4 + $0x10] sm:$0xff] %v464_v13  ;;  %v356_v21 = vsel %vm323_vm9, %v253_v4, %v340_v15  ;;  %v341_v22 = vmul.f32 %v636_v34, %v255_v10  ;;  %v308_v23 = vadd.f32 %v307_v6, %v64_v56  ;;  %v257_v24 = vadd.f32 %v256_v11, %v69_v19 }
  0xfc   :  { %415 = vst [vmem:[%s682_s4 + $0x18] sm:$0xff] %v465_v18  ;;  %v358_v25 = vsel %vm325_vm10, %v306_v9, %v342_v20  ;;  %v310_v26 = vadd.f32 %v309_v12, %v69_v19  ;;  %v259_v27 = vadd.f32 %v258_v16, %v69_v19  ;;  %v312_v28 = vadd.f32 %v311_v17, %v69_v19 }
  0xfd   :  { %v357_v29 = vsel %vm324_vm11, %v255_v10, %v341_v22  ;;  %vm326_vm12 = vcmp.ge.f32.partialorder %v308_v23, 0.0  ;;  %v343_v30 = vmul.f32 %v636_v34, %v308_v23  ;;  %vm327_vm13 = vcmp.ge.f32.partialorder %v257_v24, 0.0 }
  0xfe   :  { %v466_v31 = vpack.c.bf16 %v357_v29, %v356_v21  ;;  %v344_v32 = vmul.f32 %v636_v34, %v257_v24  ;;  %vm329_vm14 = vcmp.ge.f32.partialorder %v310_v26, 0.0  ;;  %v346_v33 = vmul.f32 %v636_v34, %v310_v26 }
  0xff   :  { %v359_v35 = vsel %vm326_vm12, %v308_v23, %v343_v30  ;;  %vm328_vm15 = vcmp.ge.f32.partialorder %v259_v27, 0.0  ;;  %v345_v36 = vmul.f32 %v636_v34, %v259_v27  ;;  %vm330_vm0 = vcmp.ge.f32.partialorder %v312_v28, 0.0 }
 0x100   :  { %416 = vst [vmem:[%s682_s4 + $0x20] sm:$0xff] %v466_v31  ;;  %v467_v37 = vpack.c.bf16 %v359_v35, %v358_v25  ;;  %v360_v38 = vsel %vm327_vm13, %v257_v24, %v344_v32  ;;  %v362_v39 = vsel %vm329_vm14, %v310_v26, %v346_v33  ;;  %v347_v40 = vmul.f32 %v636_v34, %v312_v28 }
 0x101   :  { %v361_v41 = vsel %vm328_vm15, %v259_v27, %v345_v36 }
 0x102   :  { %417 = vst [vmem:[%s682_s4 + $0x28] sm:$0xff] %v467_v37  ;;  %v468_v42 = vpack.c.bf16 %v361_v41, %v360_v38  ;;  %v363_v43 = vsel %vm330_vm0, %v312_v28, %v347_v40 }
 0x103   :  { %v469_v44 = vpack.c.bf16 %v363_v43, %v362_v39 }
 0x104   :  { %418 = vst [vmem:[%s682_s4 + $0x30] sm:$0xff] %v468_v42 }
 0x105   :  { %419 = vst [vmem:[%s682_s4 + $0x38] sm:$0xff] %v469_v44 }

// kernel: net7_forward.75
= control target key start
LH: loop header
LB: loop body
LE: loop exit
PB: predicated region body
PF: predicated region fallthrough
CT: control target
= control target key end

     0   :  { %v263_v1 = vmov 0   ;;  %vm105_vm0 = vcmask 785408   ;;  %s336_s1 = inlined_call_operand.vmem [shape: bf16[96,128], index: 1, kind: input, shape index: {}]   ;;  %s337_s0 = inlined_call_operand.vmem [shape: bf16[32,96], index: 0, kind: input, shape index: {}]   ;;  %s338_s2 = inlined_call_operand.vmem [shape: f32[32,1], index: 2, kind: input, shape index: {}]   ;;  %s339_s3 = inlined_call_operand.<no memory space> [shape: f32[1,1], index: 3, kind: input, shape index: {}]   ;;  %s340_s4 = inlined_call_operand.vmem [shape: bf16[32,128], index: 4, kind: output, shape index: {}]  }
   0x1   :  { %v255_v0 = vld [vmem:[%s336_s1] sm:$0xff]   ;;  %254 = vset.pattern.permute.xlu1 %v263_v1  ;;  %253 = vset.pattern.permute.xlu0 %v263_v1  ;;  %v256_v2 = vld [vmem:[%s336_s1 + $0x8] sm:$0xff]   ;;  %v257_v3 = vld [vmem:[%s336_s1 + $0x10] sm:$0xff]   ;;  %v166_v16 = vstv %s339_s3 }
   0x2   :  { %236 = vmatprep.subr.bf16.mxu0 %v255_v0  ;;  %v261_v4 = vld [vmem:[%s337_s0] sm:$0xff]   ;;  %v258_v5 = vld [vmem:[%s336_s1 + $0x18] sm:$0xff]   ;;  %v37_v6 = vld [vmem:[%s338_s2 + $0x10] sm:$0xff] }
   0x3   :  { %237 = vmatpush3.bf16.msra.mxu0 %v255_v0  ;;  %248 = vmatprep.mubr.msk.bf16.mxu0 %vm105_vm0, %v261_v4  ;;  %v35_v7 = vld [vmem:[%s338_s2] sm:$0xff]  ;;  %v38_v8 = vld [vmem:[%s338_s2 + $0x18] sm:$0xff]  ;;  %v36_v9 = vld [vmem:[%s338_s2 + $0x8] sm:$0xff] }
   0x4   :  { %238 = vmatprep.subr.bf16.mxu0 %v256_v2  ;;  %51 = vperm.xlu1 %254, %v37_v6   ;;  %v259_v10 = vld [vmem:[%s336_s1 + $0x20] sm:$0xff]   ;;  %v260_v11 = vld [vmem:[%s336_s1 + $0x28] sm:$0xff]  }
   0x5   :  { %41 = vperm.xlu0 %253, %v35_v7   ;;  %v262_v12 = vld [vmem:[%s337_s0 + $0x8] sm:$0xff]  }
   0x7   :  { %239 = vmatpush3.bf16.msra.mxu0 %v256_v2 }
   0x8   :  { %240 = vmatprep.subr.bf16.mxu0 %v257_v3  ;;  %56 = vperm.xlu1 %254, %v38_v8  }
   0x9   :  { %46 = vperm.xlu0 %253, %v36_v9  }
   0xb   :  { %241 = vmatpush3.bf16.msra.mxu0 %v257_v3 }
   0xc   :  { %242 = vmatprep.subr.bf16.mxu0 %v258_v5 }
   0xf   :  { %243 = vmatpush3.bf16.msra.mxu0 %v258_v5 }
  0x10   :  { %244 = vmatprep.subr.bf16.mxu0 %v259_v10 }
  0x13   :  { %245 = vmatpush3.bf16.msra.mxu0 %v259_v10 }
  0x14   :  { %246 = vmatprep.subr.bf16.mxu0 %v260_v11 }
  0x17   :  { %247 = vmatpush3.bf16.msra.mxu0 %v260_v11 }
  0x1a   :  { %249 = vmatmul.mubr.msk.bf16.vlgmr.msra.gmra.mrb[0].mxu0 %vm105_vm0, %v262_v12 }
  0x83   :  { %v52_v13 = vpop.permute.xlu1 %51 }
  0x84   :  { %v42_v14 = vpop.permute.xlu0 %41 }
  0x87   :  { %v57_v19 = vpop.permute.xlu1 %56 }
  0x88   :  { %v47_v22 = vpop.permute.xlu0 %46 }
  0xed   :  { %v250_v15 = vpop.f32.mrb[0].mxu0 }
  0xee   :  { %v155_v17 = vadd.f32 %v250_v15, %v52_v13  ;;  %v146_v18 = vpop.f32.mrb[1].mxu0 }
  0xef   :  { %v147_v20 = vadd.f32 %v146_v18, %v42_v14  ;;  %v251_v21 = vpop.f32.mrb[2].mxu0 }
  0xf0   :  { %v169_v23 = vmul.f32 %v166_v16, %v155_v17  ;;  %v158_v24 = vadd.f32 %v251_v21, %v57_v19  ;;  %v149_v25 = vpop.f32.mrb[3].mxu0  ;;  %vm164_vm1 = vcmp.ge.f32.partialorder %v155_v17, 0.0 }
  0xf1   :  { %v167_v26 = vmul.f32 %v166_v16, %v147_v20  ;;  %v150_v27 = vadd.f32 %v149_v25, %v47_v22  ;;  %vm162_vm2 = vcmp.ge.f32.partialorder %v147_v20, 0.0 }
  0xf2   :  { %vm165_vm3 = vcmp.ge.f32.partialorder %v158_v24, 0.0  ;;  %v170_v28 = vmul.f32 %v166_v16, %v158_v24  ;;  %v173_v30 = vsel %vm164_vm1, %v155_v17, %v169_v23 }
  0xf3   :  { %vm163_vm4 = vcmp.ge.f32.partialorder %v150_v27, 0.0  ;;  %v168_v29 = vmul.f32 %v166_v16, %v150_v27  ;;  %v171_v32 = vsel %vm162_vm2, %v147_v20, %v167_v26 }
  0xf4   :  { %v174_v31 = vsel %vm165_vm3, %v158_v24, %v170_v28 }
  0xf5   :  { %v225_v33 = vpack.c.bf16 %v174_v31, %v173_v30  ;;  %v172_v34 = vsel %vm163_vm4, %v150_v27, %v168_v29 }
  0xf6   :  { %v220_v35 = vpack.c.bf16 %v172_v34, %v171_v32 }
  0xf7   :  { %227 = vst [vmem:[%s340_s4 + $0x8] sm:$0xff] %v225_v33  }
  0xf8   :  { %221 = vst [vmem:[%s340_s4] sm:$0xff] %v220_v35  }

// kernel: net7_forward.79
= control target key start
LH: loop header
LB: loop body
LE: loop exit
PB: predicated region body
PF: predicated region fallthrough
CT: control target
= control target key end

     0   :  { %v570_v1 = vmov 0   ;;  %s761_s1 = inlined_call_operand.vmem [shape: bf16[128,512], index: 1, kind: input, shape index: {}]   ;;  %s762_s0 = inlined_call_operand.vmem [shape: bf16[32,128], index: 0, kind: input, shape index: {}]   ;;  %s763_s2 = inlined_call_operand.vmem [shape: f32[32,1], index: 2, kind: input, shape index: {}]   ;;  %s764_s3 = inlined_call_operand.<no memory space> [shape: f32[1,1], index: 3, kind: input, shape index: {}]   ;;  %s765_s4 = inlined_call_operand.vmem [shape: bf16[32,512], index: 4, kind: output, shape index: {}]  }
   0x1   :  { %v520_v0 = vld [vmem:[%s761_s1 + $0x4] ss:$16 sps:$4 sm:$0xff]   ;;  %283 = vmatprep.mubr.bf16.mxu0 %v570_v1  ;;  %336 = vmatprep.mubr.bf16.mxu1 %v570_v1  ;;  %v522_v2 = vld [vmem:[%s761_s1 + $0xc] ss:$16 sps:$4 sm:$0xff]   ;;  %v524_v3 = vld [vmem:[%s761_s1] ss:$16 sps:$4 sm:$0xff]   ;;  %v719_v42 = vstv %s764_s3 }
   0x2   :  { %518 = vset.pattern.permute.xlu0 %v570_v1  ;;  %519 = vset.pattern.permute.xlu1 %v570_v1  ;;  %v525_v4 = vld [vmem:[%s761_s1 + $0x8] ss:$16 sps:$4 sm:$0xff]   ;;  %v526_v5 = vld [vmem:[%s761_s1 + $0x24] ss:$16 sps:$4 sm:$0xff]   ;;  %v528_v6 = vld [vmem:[%s761_s1 + $0x2c] ss:$16 sps:$4 sm:$0xff]  }
   0x3   :  { %251 = vmatprep.subr.bf16.mxu0 %v520_v0  ;;  %304 = vmatprep.subr.bf16.mxu1 %v522_v2  ;;  %v530_v7 = vld [vmem:[%s761_s1 + $0x20] ss:$16 sps:$4 sm:$0xff]   ;;  %v531_v8 = vld [vmem:[%s761_s1 + $0x28] ss:$16 sps:$4 sm:$0xff]   ;;  %v532_v9 = vld [vmem:[%s761_s1 + $0x44] ss:$16 sps:$4 sm:$0xff]  }
   0x4   :  { %252 = vmatpush1.bf16.msra.mxu0 %v524_v3  ;;  %305 = vmatpush1.bf16.msra.mxu1 %v525_v4  ;;  %v534_v10 = vld [vmem:[%s761_s1 + $0x4c] ss:$16 sps:$4 sm:$0xff]   ;;  %v536_v11 = vld [vmem:[%s761_s1 + $0x40] ss:$16 sps:$4 sm:$0xff]   ;;  %v537_v12 = vld [vmem:[%s761_s1 + $0x48] ss:$16 sps:$4 sm:$0xff]  }
   0x5   :  { %253 = vmatprep.subr.bf16.mxu0 %v526_v5  ;;  %306 = vmatprep.subr.bf16.mxu1 %v528_v6  ;;  %v538_v13 = vld [vmem:[%s761_s1 + $0x64] ss:$16 sps:$4 sm:$0xff]   ;;  %v540_v14 = vld [vmem:[%s761_s1 + $0x6c] ss:$16 sps:$4 sm:$0xff]   ;;  %v542_v15 = vld [vmem:[%s761_s1 + $0x60] ss:$16 sps:$4 sm:$0xff]  }
   0x6   :  { %v543_v16 = vld [vmem:[%s761_s1 + $0x68] ss:$16 sps:$4 sm:$0xff]   ;;  %v544_v17 = vld [vmem:[%s761_s1 + $0x84] ss:$16 sps:$4 sm:$0xff]   ;;  %v546_v18 = vld [vmem:[%s761_s1 + $0x8c] ss:$16 sps:$4 sm:$0xff]  }
   0x7   :  { %v548_v19 = vld [vmem:[%s761_s1 + $0x80] ss:$16 sps:$4 sm:$0xff]   ;;  %v549_v20 = vld [vmem:[%s761_s1 + $0x88] ss:$16 sps:$4 sm:$0xff]   ;;  %v550_v21 = vld [vmem:[%s761_s1 + $0xa4] ss:$16 sps:$4 sm:$0xff]  }
   0x8   :  { %254 = vmatpush1.bf16.msra.mxu0 %v530_v7  ;;  %307 = vmatpush1.bf16.msra.mxu1 %v531_v8  ;;  %v552_v22 = vld [vmem:[%s761_s1 + $0xac] ss:$16 sps:$4 sm:$0xff]   ;;  %v554_v23 = vld [vmem:[%s761_s1 + $0xa0] ss:$16 sps:$4 sm:$0xff]   ;;  %v555_v24 = vld [vmem:[%s761_s1 + $0xa8] ss:$16 sps:$4 sm:$0xff]  }
   0x9   :  { %255 = vmatprep.subr.bf16.mxu0 %v532_v9  ;;  %308 = vmatprep.subr.bf16.mxu1 %v534_v10  ;;  %v556_v25 = vld [vmem:[%s761_s1 + $0xc4] ss:$16 sps:$4 sm:$0xff]   ;;  %v558_v26 = vld [vmem:[%s761_s1 + $0xcc] ss:$16 sps:$4 sm:$0xff]   ;;  %v560_v28 = vld [vmem:[%s761_s1 + $0xc0] ss:$16 sps:$4 sm:$0xff]  }
   0xa   :  { %v55_v27 = vld [vmem:[%s763_s2] sm:$0xff]  ;;  %v561_v29 = vld [vmem:[%s761_s1 + $0xc8] ss:$16 sps:$4 sm:$0xff]   ;;  %v57_v30 = vld [vmem:[%s763_s2 + $0x10] sm:$0xff] }
   0xb   :  { %v562_v31 = vld [vmem:[%s761_s1 + $0xe4] ss:$16 sps:$4 sm:$0xff]   ;;  %v564_v32 = vld [vmem:[%s761_s1 + $0xec] ss:$16 sps:$4 sm:$0xff]   ;;  %61 = vperm.xlu0 %518, %v55_v27   ;;  %71 = vperm.xlu1 %519, %v57_v30   ;;  %v566_v35 = vld [vmem:[%s761_s1 + $0xe0] ss:$16 sps:$4 sm:$0xff]  }
   0xc   :  { %256 = vmatpush1.bf16.msra.mxu0 %v536_v11  ;;  %309 = vmatpush1.bf16.msra.mxu1 %v537_v12  ;;  %v56_v33 = vld [vmem:[%s763_s2 + $0x8] sm:$0xff]  ;;  %v58_v34 = vld [vmem:[%s763_s2 + $0x18] sm:$0xff]  ;;  %v568_v37 = vld [vmem:[%s762_s0] sm:$0xff]  }
   0xd   :  { %257 = vmatprep.subr.bf16.mxu0 %v538_v13  ;;  %310 = vmatprep.subr.bf16.mxu1 %v540_v14  ;;  %v567_v36 = vld [vmem:[%s761_s1 + $0xe8] ss:$16 sps:$4 sm:$0xff]  }
   0xe   :  { %v569_v38 = vld [vmem:[%s762_s0 + $0x8] sm:$0xff]  }
   0xf   :  { %66 = vperm.xlu0 %518, %v56_v33   ;;  %76 = vperm.xlu1 %519, %v58_v34  }
  0x10   :  { %258 = vmatpush1.bf16.msra.mxu0 %v542_v15  ;;  %311 = vmatpush1.bf16.msra.mxu1 %v543_v16 }
  0x11   :  { %259 = vmatprep.subr.bf16.mxu0 %v544_v17  ;;  %312 = vmatprep.subr.bf16.mxu1 %v546_v18 }
  0x14   :  { %260 = vmatpush1.bf16.msra.mxu0 %v548_v19  ;;  %313 = vmatpush1.bf16.msra.mxu1 %v549_v20 }
  0x15   :  { %261 = vmatprep.subr.bf16.mxu0 %v550_v21  ;;  %314 = vmatprep.subr.bf16.mxu1 %v552_v22 }
  0x18   :  { %262 = vmatpush1.bf16.msra.mxu0 %v554_v23  ;;  %315 = vmatpush1.bf16.msra.mxu1 %v555_v24 }
  0x19   :  { %263 = vmatprep.subr.bf16.mxu0 %v556_v25  ;;  %316 = vmatprep.subr.bf16.mxu1 %v558_v26 }
  0x1c   :  { %264 = vmatpush1.bf16.msra.mxu0 %v560_v28  ;;  %317 = vmatpush1.bf16.msra.mxu1 %v561_v29 }
  0x1d   :  { %265 = vmatprep.subr.bf16.mxu0 %v562_v31  ;;  %318 = vmatprep.subr.bf16.mxu1 %v564_v32 }
  0x20   :  { %266 = vmatpush1.bf16.msra.mxu0 %v566_v35  ;;  %319 = vmatpush1.bf16.msra.mxu1 %v567_v36 }
  0x23   :  { %284 = vmatmul.mubr.bf16.vlgmr.msra.gmra.mrb[0].mxu0 %v568_v37  ;;  %337 = vmatmul.mubr.bf16.vlgmr.msra.gmra.mrb[0].mxu1 %v568_v37 }
  0x24   :  { %293 = vmatprep.mubr.bf16.mxu0 %v570_v1  ;;  %346 = vmatprep.mubr.bf16.mxu1 %v570_v1 }
  0x2b   :  { %294 = vmatmul.mubr.bf16.gmra.mrb[4].mxu0 %v569_v38  ;;  %347 = vmatmul.mubr.bf16.gmra.mrb[4].mxu1 %v569_v38 }
  0x8a   :  { %v62_v39 = vpop.permute.xlu0 %61  ;;  %v72_v0 = vpop.permute.xlu1 %71 }
  0x8e   :  { %v67_v40 = vpop.permute.xlu0 %66  ;;  %v77_v27 = vpop.permute.xlu1 %76 }
  0xf6   :  { %v285_v41 = vpop.f32.mrb[0].mxu0  ;;  %v338_v43 = vpop.f32.mrb[0].mxu1 }
  0xf7   :  { %v286_v44 = vadd.f32 %v285_v41, %v62_v39  ;;  %v339_v45 = vadd.f32 %v338_v43, %v62_v39  ;;  %v287_v46 = vpop.f32.mrb[1].mxu0  ;;  %v340_v47 = vpop.f32.mrb[1].mxu1 }
  0xf8   :  { %v288_v48 = vadd.f32 %v287_v46, %v62_v39  ;;  %v341_v49 = vadd.f32 %v340_v47, %v62_v39  ;;  %v289_v50 = vpop.f32.mrb[2].mxu0  ;;  %v342_v51 = vpop.f32.mrb[2].mxu1 }
  0xf9   :  { %vm358_vm0 = vcmp.ge.f32.partialorder %v286_v44, 0.0  ;;  %v375_v52 = vmul.f32 %v719_v42, %v286_v44  ;;  %vm360_vm1 = vcmp.ge.f32.partialorder %v339_v45, 0.0  ;;  %v377_v53 = vmul.f32 %v719_v42, %v339_v45  ;;  %v291_v54 = vpop.f32.mrb[3].mxu0  ;;  %v344_v55 = vpop.f32.mrb[3].mxu1 }
  0xfa   :  { %vm359_vm2 = vcmp.ge.f32.partialorder %v288_v48, 0.0  ;;  %v376_v56 = vmul.f32 %v719_v42, %v288_v48  ;;  %vm361_vm3 = vcmp.ge.f32.partialorder %v341_v49, 0.0  ;;  %v378_v57 = vmul.f32 %v719_v42, %v341_v49 }
  0xfb   :  { %v391_v58 = vsel %vm358_vm0, %v286_v44, %v375_v52  ;;  %v393_v59 = vsel %vm360_vm1, %v339_v45, %v377_v53  ;;  %v290_v60 = vadd.f32 %v289_v50, %v67_v40  ;;  %v343_v61 = vadd.f32 %v342_v51, %v67_v40 }
  0xfc   :  { %v392_v62 = vsel %vm359_vm2, %v288_v48, %v376_v56  ;;  %v394_v63 = vsel %vm361_vm3, %v341_v49, %v378_v57  ;;  %v292_v1 = vadd.f32 %v291_v54, %v67_v40  ;;  %v345_v2 = vadd.f32 %v344_v55, %v67_v40 }
  0xfd   :  { %v509_v3 = vpack.c.bf16 %v392_v62, %v391_v58  ;;  %v510_v4 = vpack.c.bf16 %v394_v63, %v393_v59  ;;  %vm362_vm4 = vcmp.ge.f32.partialorder %v290_v60, 0.0  ;;  %v379_v5 = vmul.f32 %v719_v42, %v290_v60 }
  0xfe   :  { %vm364_vm5 = vcmp.ge.f32.partialorder %v343_v61, 0.0  ;;  %v381_v6 = vmul.f32 %v719_v42, %v343_v61  ;;  %vm363_vm6 = vcmp.ge.f32.partialorder %v292_v1, 0.0  ;;  %v380_v7 = vmul.f32 %v719_v42, %v292_v1  ;;  %v295_v8 = vpop.f32.mrb[4].mxu0  ;;  %v348_v9 = vpop.f32.mrb[4].mxu1 }
  0xff   :  { %455 = vst [vmem:[%s765_s4] sm:$0xff] %v509_v3  ;;  %456 = vst [vmem:[%s765_s4 + $0x8] sm:$0xff] %v510_v4  ;;  %v395_v10 = vsel %vm362_vm4, %v290_v60, %v379_v5  ;;  %vm365_vm7 = vcmp.ge.f32.partialorder %v345_v2, 0.0  ;;  %v382_v11 = vmul.f32 %v719_v42, %v345_v2  ;;  %v296_v12 = vadd.f32 %v295_v8, %v72_v0  ;;  %v297_v13 = vpop.f32.mrb[5].mxu0  ;;  %v350_v14 = vpop.f32.mrb[5].mxu1 }
 0x100   :  { %v397_v15 = vsel %vm364_vm5, %v343_v61, %v381_v6  ;;  %v396_v16 = vsel %vm363_vm6, %v292_v1, %v380_v7  ;;  %v349_v17 = vadd.f32 %v348_v9, %v72_v0  ;;  %v298_v18 = vadd.f32 %v297_v13, %v72_v0  ;;  %v299_v19 = vpop.f32.mrb[6].mxu0  ;;  %v352_v20 = vpop.f32.mrb[6].mxu1 }
 0x101   :  { %v511_v21 = vpack.c.bf16 %v396_v16, %v395_v10  ;;  %v398_v22 = vsel %vm365_vm7, %v345_v2, %v382_v11  ;;  %vm366_vm8 = vcmp.ge.f32.partialorder %v296_v12, 0.0  ;;  %v383_v23 = vmul.f32 %v719_v42, %v296_v12  ;;  %v301_v24 = vpop.f32.mrb[7].mxu0  ;;  %v354_v25 = vpop.f32.mrb[7].mxu1 }
 0x102   :  { %v512_v26 = vpack.c.bf16 %v398_v22, %v397_v15  ;;  %vm368_vm9 = vcmp.ge.f32.partialorder %v349_v17, 0.0  ;;  %v385_v28 = vmul.f32 %v719_v42, %v349_v17  ;;  %vm367_vm10 = vcmp.ge.f32.partialorder %v298_v18, 0.0 }
 0x103   :  { %457 = vst [vmem:[%s765_s4 + $0x10] sm:$0xff] %v511_v21  ;;  %v399_v29 = vsel %vm366_vm8, %v296_v12, %v383_v23  ;;  %v384_v30 = vmul.f32 %v719_v42, %v298_v18  ;;  %v351_v31 = vadd.f32 %v350_v14, %v72_v0  ;;  %v300_v32 = vadd.f32 %v299_v19, %v77_v27 }
 0x104   :  { %458 = vst [vmem:[%s765_s4 + $0x18] sm:$0xff] %v512_v26  ;;  %v401_v33 = vsel %vm368_vm9, %v349_v17, %v385_v28  ;;  %v353_v34 = vadd.f32 %v352_v20, %v77_v27  ;;  %v302_v35 = vadd.f32 %v301_v24, %v77_v27  ;;  %v355_v36 = vadd.f32 %v354_v25, %v77_v27 }
 0x105   :  { %v400_v37 = vsel %vm367_vm10, %v298_v18, %v384_v30  ;;  %vm369_vm11 = vcmp.ge.f32.partialorder %v351_v31, 0.0  ;;  %v386_v38 = vmul.f32 %v719_v42, %v351_v31  ;;  %vm370_vm12 = vcmp.ge.f32.partialorder %v300_v32, 0.0 }
 0x106   :  { %v513_v39 = vpack.c.bf16 %v400_v37, %v399_v29  ;;  %v387_v40 = vmul.f32 %v719_v42, %v300_v32  ;;  %vm372_vm13 = vcmp.ge.f32.partialorder %v353_v34, 0.0  ;;  %v389_v41 = vmul.f32 %v719_v42, %v353_v34 }
 0x107   :  { %v402_v43 = vsel %vm369_vm11, %v351_v31, %v386_v38  ;;  %vm371_vm14 = vcmp.ge.f32.partialorder %v302_v35, 0.0  ;;  %v388_v44 = vmul.f32 %v719_v42, %v302_v35  ;;  %vm373_vm15 = vcmp.ge.f32.partialorder %v355_v36, 0.0 }
 0x108   :  { %459 = vst [vmem:[%s765_s4 + $0x20] sm:$0xff] %v513_v39  ;;  %v514_v45 = vpack.c.bf16 %v402_v43, %v401_v33  ;;  %v403_v46 = vsel %vm370_vm12, %v300_v32, %v387_v40  ;;  %v405_v47 = vsel %vm372_vm13, %v353_v34, %v389_v41  ;;  %v390_v48 = vmul.f32 %v719_v42, %v355_v36 }
 0x109   :  { %v404_v49 = vsel %vm371_vm14, %v302_v35, %v388_v44 }
 0x10a   :  { %460 = vst [vmem:[%s765_s4 + $0x28] sm:$0xff] %v514_v45  ;;  %v515_v50 = vpack.c.bf16 %v404_v49, %v403_v46  ;;  %v406_v51 = vsel %vm373_vm15, %v355_v36, %v390_v48 }
 0x10b   :  { %v516_v52 = vpack.c.bf16 %v406_v51, %v405_v47 }
 0x10c   :  { %461 = vst [vmem:[%s765_s4 + $0x30] sm:$0xff] %v515_v50 }
 0x10d   :  { %462 = vst [vmem:[%s765_s4 + $0x38] sm:$0xff] %v516_v52 }

// kernel: net7_forward.83
= control target key start
LH: loop header
LB: loop body
LE: loop exit
PB: predicated region body
PF: predicated region fallthrough
CT: control target
= control target key end

     0   :  { %v282_v1 = vmov 0   ;;  %s359_s1 = inlined_call_operand.vmem [shape: bf16[128,128], index: 1, kind: input, shape index: {}]   ;;  %s360_s0 = inlined_call_operand.vmem [shape: bf16[32,128], index: 0, kind: input, shape index: {}]   ;;  %s361_s2 = inlined_call_operand.vmem [shape: f32[32,1], index: 2, kind: input, shape index: {}]   ;;  %s362_s3 = inlined_call_operand.<no memory space> [shape: f32[1,1], index: 3, kind: input, shape index: {}]   ;;  %s363_s4 = inlined_call_operand.vmem [shape: bf16[32,128], index: 4, kind: output, shape index: {}]  }
   0x1   :  { %v272_v0 = vld [vmem:[%s359_s1] sm:$0xff]   ;;  %271 = vset.pattern.permute.xlu1 %v282_v1  ;;  %270 = vset.pattern.permute.xlu0 %v282_v1  ;;  %v273_v2 = vld [vmem:[%s359_s1 + $0x8] sm:$0xff]   ;;  %v274_v3 = vld [vmem:[%s359_s1 + $0x10] sm:$0xff]   ;;  %v177_v18 = vstv %s362_s3 }
   0x2   :  { %249 = vmatprep.subr.bf16.mxu0 %v272_v0  ;;  %v275_v4 = vld [vmem:[%s359_s1 + $0x18] sm:$0xff]   ;;  %v280_v5 = vld [vmem:[%s360_s0] sm:$0xff]   ;;  %v41_v6 = vld [vmem:[%s361_s2 + $0x10] sm:$0xff] }
   0x3   :  { %250 = vmatpush3.bf16.msra.mxu0 %v272_v0  ;;  %265 = vmatprep.mubr.bf16.mxu0 %v280_v5  ;;  %v39_v7 = vld [vmem:[%s361_s2] sm:$0xff]  ;;  %v42_v9 = vld [vmem:[%s361_s2 + $0x18] sm:$0xff]  ;;  %v40_v10 = vld [vmem:[%s361_s2 + $0x8] sm:$0xff] }
   0x4   :  { %251 = vmatprep.subr.bf16.mxu0 %v273_v2  ;;  %55 = vperm.xlu1 %271, %v41_v6   ;;  %v276_v8 = vld [vmem:[%s359_s1 + $0x20] sm:$0xff]   ;;  %v277_v11 = vld [vmem:[%s359_s1 + $0x28] sm:$0xff]   ;;  %v278_v12 = vld [vmem:[%s359_s1 + $0x30] sm:$0xff]  }
   0x5   :  { %45 = vperm.xlu0 %270, %v39_v7   ;;  %v279_v13 = vld [vmem:[%s359_s1 + $0x38] sm:$0xff]   ;;  %v281_v14 = vld [vmem:[%s360_s0 + $0x8] sm:$0xff]  }
   0x7   :  { %252 = vmatpush3.bf16.msra.mxu0 %v273_v2 }
   0x8   :  { %253 = vmatprep.subr.bf16.mxu0 %v274_v3  ;;  %60 = vperm.xlu1 %271, %v42_v9  }
   0x9   :  { %50 = vperm.xlu0 %270, %v40_v10  }
   0xb   :  { %254 = vmatpush3.bf16.msra.mxu0 %v274_v3 }
   0xc   :  { %255 = vmatprep.subr.bf16.mxu0 %v275_v4 }
   0xf   :  { %256 = vmatpush3.bf16.msra.mxu0 %v275_v4 }
  0x10   :  { %257 = vmatprep.subr.bf16.mxu0 %v276_v8 }
  0x13   :  { %258 = vmatpush3.bf16.msra.mxu0 %v276_v8 }
  0x14   :  { %259 = vmatprep.subr.bf16.mxu0 %v277_v11 }
  0x17   :  { %260 = vmatpush3.bf16.msra.mxu0 %v277_v11 }
  0x18   :  { %261 = vmatprep.subr.bf16.mxu0 %v278_v12 }
  0x1b   :  { %262 = vmatpush3.bf16.msra.mxu0 %v278_v12 }
  0x1c   :  { %263 = vmatprep.subr.bf16.mxu0 %v279_v13 }
  0x1f   :  { %264 = vmatpush3.bf16.msra.mxu0 %v279_v13 }
  0x22   :  { %266 = vmatmul.mubr.bf16.vlgmr.msra.gmra.mrb[0].mxu0 %v281_v14 }
  0x83   :  { %v56_v15 = vpop.permute.xlu1 %55 }
  0x84   :  { %v46_v16 = vpop.permute.xlu0 %45 }
  0x87   :  { %v61_v21 = vpop.permute.xlu1 %60 }
  0x88   :  { %v51_v24 = vpop.permute.xlu0 %50 }
  0xf5   :  { %v267_v17 = vpop.f32.mrb[0].mxu0 }
  0xf6   :  { %v166_v19 = vadd.f32 %v267_v17, %v56_v15  ;;  %v157_v20 = vpop.f32.mrb[1].mxu0 }
  0xf7   :  { %v158_v22 = vadd.f32 %v157_v20, %v46_v16  ;;  %v268_v23 = vpop.f32.mrb[2].mxu0 }
  0xf8   :  { %v180_v25 = vmul.f32 %v177_v18, %v166_v19  ;;  %v169_v26 = vadd.f32 %v268_v23, %v61_v21  ;;  %v160_v27 = vpop.f32.mrb[3].mxu0  ;;  %vm175_vm0 = vcmp.ge.f32.partialorder %v166_v19, 0.0 }
  0xf9   :  { %v178_v28 = vmul.f32 %v177_v18, %v158_v22  ;;  %v161_v29 = vadd.f32 %v160_v27, %v51_v24  ;;  %vm173_vm1 = vcmp.ge.f32.partialorder %v158_v22, 0.0 }
  0xfa   :  { %vm176_vm2 = vcmp.ge.f32.partialorder %v169_v26, 0.0  ;;  %v181_v30 = vmul.f32 %v177_v18, %v169_v26  ;;  %v184_v32 = vsel %vm175_vm0, %v166_v19, %v180_v25 }
  0xfb   :  { %vm174_vm3 = vcmp.ge.f32.partialorder %v161_v29, 0.0  ;;  %v179_v31 = vmul.f32 %v177_v18, %v161_v29  ;;  %v182_v34 = vsel %vm173_vm1, %v158_v22, %v178_v28 }
  0xfc   :  { %v185_v33 = vsel %vm176_vm2, %v169_v26, %v181_v30 }
  0xfd   :  { %v236_v35 = vpack.c.bf16 %v185_v33, %v184_v32  ;;  %v183_v36 = vsel %vm174_vm3, %v161_v29, %v179_v31 }
  0xfe   :  { %v231_v37 = vpack.c.bf16 %v183_v36, %v182_v34 }
  0xff   :  { %238 = vst [vmem:[%s363_s4 + $0x8] sm:$0xff] %v236_v35  }
 0x100   :  { %232 = vst [vmem:[%s363_s4] sm:$0xff] %v231_v37  }

// kernel: net7_forward.87
= control target key start
LH: loop header
LB: loop body
LE: loop exit
PB: predicated region body
PF: predicated region fallthrough
CT: control target
= control target key end

     0   :  { %v661_v1 = vmov 0   ;;  %vm305_vm0 = vcmask 261120   ;;  %s880_s1 = inlined_call_operand.vmem [shape: bf16[160,512], index: 1, kind: input, shape index: {}]   ;;  %s881_s0 = inlined_call_operand.vmem [shape: bf16[32,160], index: 0, kind: input, shape index: {}]   ;;  %s882_s2 = inlined_call_operand.vmem [shape: f32[32,1], index: 2, kind: input, shape index: {}]   ;;  %s883_s3 = inlined_call_operand.<no memory space> [shape: f32[1,1], index: 3, kind: input, shape index: {}]   ;;  %s884_s4 = inlined_call_operand.vmem [shape: bf16[32,512], index: 4, kind: output, shape index: {}]  }
   0x1   :  { %v595_v0 = vld [vmem:[%s880_s1 + $0x4] ss:$16 sps:$4 sm:$0xff]   ;;  %593 = vset.pattern.permute.xlu0 %v661_v1  ;;  %594 = vset.pattern.permute.xlu1 %v661_v1  ;;  %v597_v2 = vld [vmem:[%s880_s1 + $0xc] ss:$16 sps:$4 sm:$0xff]   ;;  %v599_v3 = vld [vmem:[%s880_s1] ss:$16 sps:$4 sm:$0xff]   ;;  %v838_v52 = vstv %s883_s3 }
   0x2   :  { %312 = vmatprep.subr.bf16.mxu0 %v595_v0  ;;  %v600_v4 = vld [vmem:[%s880_s1 + $0x8] ss:$16 sps:$4 sm:$0xff]   ;;  %365 = vmatprep.subr.bf16.mxu1 %v597_v2  ;;  %v601_v5 = vld [vmem:[%s880_s1 + $0x24] ss:$16 sps:$4 sm:$0xff]   ;;  %v603_v6 = vld [vmem:[%s880_s1 + $0x2c] ss:$16 sps:$4 sm:$0xff]  }
   0x3   :  { %313 = vmatpush1.bf16.msra.mxu0 %v599_v3  ;;  %366 = vmatpush1.bf16.msra.mxu1 %v600_v4  ;;  %v605_v7 = vld [vmem:[%s880_s1 + $0x20] ss:$16 sps:$4 sm:$0xff]   ;;  %v606_v8 = vld [vmem:[%s880_s1 + $0x28] ss:$16 sps:$4 sm:$0xff]   ;;  %v607_v9 = vld [vmem:[%s880_s1 + $0x44] ss:$16 sps:$4 sm:$0xff]  }
   0x4   :  { %314 = vmatprep.subr.bf16.mxu0 %v601_v5  ;;  %367 = vmatprep.subr.bf16.mxu1 %v603_v6  ;;  %v609_v10 = vld [vmem:[%s880_s1 + $0x4c] ss:$16 sps:$4 sm:$0xff]   ;;  %v611_v11 = vld [vmem:[%s880_s1 + $0x40] ss:$16 sps:$4 sm:$0xff]   ;;  %v612_v12 = vld [vmem:[%s880_s1 + $0x48] ss:$16 sps:$4 sm:$0xff]  }
   0x5   :  { %v613_v13 = vld [vmem:[%s880_s1 + $0x64] ss:$16 sps:$4 sm:$0xff]   ;;  %v615_v14 = vld [vmem:[%s880_s1 + $0x6c] ss:$16 sps:$4 sm:$0xff]   ;;  %v617_v15 = vld [vmem:[%s880_s1 + $0x60] ss:$16 sps:$4 sm:$0xff]  }
   0x6   :  { %v618_v16 = vld [vmem:[%s880_s1 + $0x68] ss:$16 sps:$4 sm:$0xff]   ;;  %v619_v17 = vld [vmem:[%s880_s1 + $0x84] ss:$16 sps:$4 sm:$0xff]   ;;  %v621_v18 = vld [vmem:[%s880_s1 + $0x8c] ss:$16 sps:$4 sm:$0xff]  }
   0x7   :  { %315 = vmatpush1.bf16.msra.mxu0 %v605_v7  ;;  %368 = vmatpush1.bf16.msra.mxu1 %v606_v8  ;;  %v623_v19 = vld [vmem:[%s880_s1 + $0x80] ss:$16 sps:$4 sm:$0xff]   ;;  %v624_v20 = vld [vmem:[%s880_s1 + $0x88] ss:$16 sps:$4 sm:$0xff]   ;;  %v625_v21 = vld [vmem:[%s880_s1 + $0xa4] ss:$16 sps:$4 sm:$0xff]  }
   0x8   :  { %316 = vmatprep.subr.bf16.mxu0 %v607_v9  ;;  %369 = vmatprep.subr.bf16.mxu1 %v609_v10  ;;  %v627_v22 = vld [vmem:[%s880_s1 + $0xac] ss:$16 sps:$4 sm:$0xff]   ;;  %v629_v23 = vld [vmem:[%s880_s1 + $0xa0] ss:$16 sps:$4 sm:$0xff]   ;;  %v630_v24 = vld [vmem:[%s880_s1 + $0xa8] ss:$16 sps:$4 sm:$0xff]  }
   0x9   :  { %v631_v25 = vld [vmem:[%s880_s1 + $0xc4] ss:$16 sps:$4 sm:$0xff]   ;;  %v633_v26 = vld [vmem:[%s880_s1 + $0xcc] ss:$16 sps:$4 sm:$0xff]   ;;  %v635_v27 = vld [vmem:[%s880_s1 + $0xc0] ss:$16 sps:$4 sm:$0xff]  }
   0xa   :  { %v636_v28 = vld [vmem:[%s880_s1 + $0xc8] ss:$16 sps:$4 sm:$0xff]   ;;  %v637_v29 = vld [vmem:[%s880_s1 + $0xe4] ss:$16 sps:$4 sm:$0xff]   ;;  %v639_v30 = vld [vmem:[%s880_s1 + $0xec] ss:$16 sps:$4 sm:$0xff]  }
   0xb   :  { %317 = vmatpush1.bf16.msra.mxu0 %v611_v11  ;;  %370 = vmatpush1.bf16.msra.mxu1 %v612_v12  ;;  %v641_v31 = vld [vmem:[%s880_s1 + $0xe0] ss:$16 sps:$4 sm:$0xff]   ;;  %v657_v32 = vld [vmem:[%s881_s0 + $0x4] ss:$8 sps:$4 sm:$0xff]   ;;  %v642_v33 = vld [vmem:[%s880_s1 + $0xe8] ss:$16 sps:$4 sm:$0xff]  }
   0xc   :  { %318 = vmatprep.subr.bf16.mxu0 %v613_v13  ;;  %371 = vmatprep.subr.bf16.mxu1 %v615_v14  ;;  %v643_v34 = vld [vmem:[%s880_s1 + $0x104] ss:$16 sps:$4 sm:$0xff]   ;;  %v645_v35 = vld [vmem:[%s880_s1 + $0x10c] ss:$16 sps:$4 sm:$0xff]   ;;  %v647_v38 = vld [vmem:[%s880_s1 + $0x100] ss:$16 sps:$4 sm:$0xff]  }
   0xd   :  { %v63_v36 = vld [vmem:[%s882_s2] sm:$0xff]  ;;  %572 = vmatprep.mubr.msk.bf16.mxu0 %vm305_vm0, %v657_v32  ;;  %574 = vmatprep.mubr.msk.bf16.mxu1 %vm305_vm0, %v657_v32  ;;  %v65_v37 = vld [vmem:[%s882_s2 + $0x10] sm:$0xff]  ;;  %v648_v39 = vld [vmem:[%s880_s1 + $0x108] ss:$16 sps:$4 sm:$0xff]  }
   0xe   :  { %69 = vperm.xlu0 %593, %v63_v36   ;;  %79 = vperm.xlu1 %594, %v65_v37   ;;  %v64_v40 = vld [vmem:[%s882_s2 + $0x8] sm:$0xff]  ;;  %v66_v41 = vld [vmem:[%s882_s2 + $0x18] sm:$0xff]  ;;  %v649_v42 = vld [vmem:[%s880_s1 + $0x124] ss:$16 sps:$4 sm:$0xff]  }
   0xf   :  { %319 = vmatpush1.bf16.msra.mxu0 %v617_v15  ;;  %372 = vmatpush1.bf16.msra.mxu1 %v618_v16  ;;  %v651_v43 = vld [vmem:[%s880_s1 + $0x12c] ss:$16 sps:$4 sm:$0xff]   ;;  %v653_v44 = vld [vmem:[%s880_s1 + $0x120] ss:$16 sps:$4 sm:$0xff]   ;;  %v654_v45 = vld [vmem:[%s880_s1 + $0x128] ss:$16 sps:$4 sm:$0xff]  }
  0x10   :  { %320 = vmatprep.subr.bf16.mxu0 %v619_v17  ;;  %373 = vmatprep.subr.bf16.mxu1 %v621_v18  ;;  %v655_v46 = vld [vmem:[%s881_s0] ss:$8 sps:$4 sm:$0xff]   ;;  %v658_v47 = vld [vmem:[%s881_s0 + $0x14] ss:$8 sps:$4 sm:$0xff]   ;;  %v660_v48 = vld [vmem:[%s881_s0 + $0x10] ss:$8 sps:$4 sm:$0xff]  }
  0x12   :  { %74 = vperm.xlu0 %593, %v64_v40   ;;  %84 = vperm.xlu1 %594, %v66_v41  }
  0x13   :  { %321 = vmatpush1.bf16.msra.mxu0 %v623_v19  ;;  %374 = vmatpush1.bf16.msra.mxu1 %v624_v20 }
  0x14   :  { %322 = vmatprep.subr.bf16.mxu0 %v625_v21  ;;  %375 = vmatprep.subr.bf16.mxu1 %v627_v22 }
  0x17   :  { %323 = vmatpush1.bf16.msra.mxu0 %v629_v23  ;;  %376 = vmatpush1.bf16.msra.mxu1 %v630_v24 }
  0x18   :  { %324 = vmatprep.subr.bf16.mxu0 %v631_v25  ;;  %377 = vmatprep.subr.bf16.mxu1 %v633_v26 }
  0x1b   :  { %325 = vmatpush1.bf16.msra.mxu0 %v635_v27  ;;  %378 = vmatpush1.bf16.msra.mxu1 %v636_v28 }
  0x1c   :  { %326 = vmatprep.subr.bf16.mxu0 %v637_v29  ;;  %379 = vmatprep.subr.bf16.mxu1 %v639_v30 }
  0x1f   :  { %327 = vmatpush1.bf16.msra.mxu0 %v641_v31  ;;  %380 = vmatpush1.bf16.msra.mxu1 %v642_v33 }
  0x20   :  { %328 = vmatprep.subr.bf16.mxu0 %v643_v34  ;;  %381 = vmatprep.subr.bf16.mxu1 %v645_v35 }
  0x23   :  { %329 = vmatpush1.bf16.msra.mxu0 %v647_v38  ;;  %382 = vmatpush1.bf16.msra.mxu1 %v648_v39 }
  0x24   :  { %330 = vmatprep.subr.bf16.mxu0 %v649_v42  ;;  %383 = vmatprep.subr.bf16.mxu1 %v651_v43 }
  0x27   :  { %331 = vmatpush1.bf16.msra.mxu0 %v653_v44  ;;  %384 = vmatpush1.bf16.msra.mxu1 %v654_v45 }
  0x2a   :  { %345 = vmatmul.mubr.bf16.vlgmr.msra.gmra.mrb[0].mxu0 %v655_v46  ;;  %398 = vmatmul.mubr.bf16.vlgmr.msra.gmra.mrb[0].mxu1 %v655_v46 }
  0x2b   :  { %573 = vmatprep.mubr.msk.bf16.mxu0 %vm305_vm0, %v658_v47  ;;  %575 = vmatprep.mubr.msk.bf16.mxu1 %vm305_vm0, %v658_v47 }
  0x32   :  { %355 = vmatmul.mubr.bf16.gmra.mrb[4].mxu0 %v660_v48  ;;  %408 = vmatmul.mubr.bf16.gmra.mrb[4].mxu1 %v660_v48 }
  0x8d   :  { %v70_v49 = vpop.permute.xlu0 %69  ;;  %v80_v10 = vpop.permute.xlu1 %79 }
  0x91   :  { %v75_v50 = vpop.permute.xlu0 %74  ;;  %v85_v37 = vpop.permute.xlu1 %84 }
  0xfd   :  { %v346_v51 = vpop.f32.mrb[0].mxu0  ;;  %v399_v53 = vpop.f32.mrb[0].mxu1 }
  0xfe   :  { %v347_v54 = vadd.f32 %v346_v51, %v70_v49  ;;  %v400_v55 = vadd.f32 %v399_v53, %v70_v49  ;;  %v348_v56 = vpop.f32.mrb[1].mxu0  ;;  %v401_v57 = vpop.f32.mrb[1].mxu1 }
  0xff   :  { %v349_v58 = vadd.f32 %v348_v56, %v70_v49  ;;  %v402_v59 = vadd.f32 %v401_v57, %v70_v49  ;;  %v350_v60 = vpop.f32.mrb[2].mxu0  ;;  %v403_v61 = vpop.f32.mrb[2].mxu1 }
 0x100   :  { %vm419_vm1 = vcmp.ge.f32.partialorder %v347_v54, 0.0  ;;  %v436_v62 = vmul.f32 %v838_v52, %v347_v54  ;;  %vm421_vm2 = vcmp.ge.f32.partialorder %v400_v55, 0.0  ;;  %v438_v63 = vmul.f32 %v838_v52, %v400_v55  ;;  %v352_v0 = vpop.f32.mrb[3].mxu0  ;;  %v405_v1 = vpop.f32.mrb[3].mxu1 }
 0x101   :  { %vm420_vm3 = vcmp.ge.f32.partialorder %v349_v58, 0.0  ;;  %v437_v2 = vmul.f32 %v838_v52, %v349_v58  ;;  %vm422_vm4 = vcmp.ge.f32.partialorder %v402_v59, 0.0  ;;  %v439_v3 = vmul.f32 %v838_v52, %v402_v59 }
 0x102   :  { %v452_v4 = vsel %vm419_vm1, %v347_v54, %v436_v62  ;;  %v454_v5 = vsel %vm421_vm2, %v400_v55, %v438_v63  ;;  %v351_v6 = vadd.f32 %v350_v60, %v75_v50  ;;  %v404_v7 = vadd.f32 %v403_v61, %v75_v50 }
 0x103   :  { %v453_v8 = vsel %vm420_vm3, %v349_v58, %v437_v2  ;;  %v455_v9 = vsel %vm422_vm4, %v402_v59, %v439_v3  ;;  %v353_v11 = vadd.f32 %v352_v0, %v75_v50  ;;  %v406_v12 = vadd.f32 %v405_v1, %v75_v50 }
 0x104   :  { %v584_v13 = vpack.c.bf16 %v453_v8, %v452_v4  ;;  %v585_v14 = vpack.c.bf16 %v455_v9, %v454_v5  ;;  %vm423_vm5 = vcmp.ge.f32.partialorder %v351_v6, 0.0  ;;  %v440_v15 = vmul.f32 %v838_v52, %v351_v6 }
 0x105   :  { %vm425_vm6 = vcmp.ge.f32.partialorder %v404_v7, 0.0  ;;  %v442_v16 = vmul.f32 %v838_v52, %v404_v7  ;;  %vm424_vm7 = vcmp.ge.f32.partialorder %v353_v11, 0.0  ;;  %v441_v17 = vmul.f32 %v838_v52, %v353_v11  ;;  %v356_v18 = vpop.f32.mrb[4].mxu0  ;;  %v409_v19 = vpop.f32.mrb[4].mxu1 }
 0x106   :  { %516 = vst [vmem:[%s884_s4] sm:$0xff] %v584_v13  ;;  %517 = vst [vmem:[%s884_s4 + $0x8] sm:$0xff] %v585_v14  ;;  %v456_v20 = vsel %vm423_vm5, %v351_v6, %v440_v15  ;;  %vm426_vm8 = vcmp.ge.f32.partialorder %v406_v12, 0.0  ;;  %v443_v21 = vmul.f32 %v838_v52, %v406_v12  ;;  %v357_v22 = vadd.f32 %v356_v18, %v80_v10  ;;  %v358_v23 = vpop.f32.mrb[5].mxu0  ;;  %v411_v24 = vpop.f32.mrb[5].mxu1 }
 0x107   :  { %v458_v25 = vsel %vm425_vm6, %v404_v7, %v442_v16  ;;  %v457_v26 = vsel %vm424_vm7, %v353_v11, %v441_v17  ;;  %v410_v27 = vadd.f32 %v409_v19, %v80_v10  ;;  %v359_v28 = vadd.f32 %v358_v23, %v80_v10  ;;  %v360_v29 = vpop.f32.mrb[6].mxu0  ;;  %v413_v30 = vpop.f32.mrb[6].mxu1 }
 0x108   :  { %v586_v31 = vpack.c.bf16 %v457_v26, %v456_v20  ;;  %v459_v32 = vsel %vm426_vm8, %v406_v12, %v443_v21  ;;  %vm427_vm9 = vcmp.ge.f32.partialorder %v357_v22, 0.0  ;;  %v444_v33 = vmul.f32 %v838_v52, %v357_v22  ;;  %v362_v34 = vpop.f32.mrb[7].mxu0  ;;  %v415_v35 = vpop.f32.mrb[7].mxu1 }
 0x109   :  { %v587_v36 = vpack.c.bf16 %v459_v32, %v458_v25  ;;  %vm429_vm10 = vcmp.ge.f32.partialorder %v410_v27, 0.0  ;;  %v446_v38 = vmul.f32 %v838_v52, %v410_v27  ;;  %vm428_vm11 = vcmp.ge.f32.partialorder %v359_v28, 0.0 }
 0x10a   :  { %518 = vst [vmem:[%s884_s4 + $0x10] sm:$0xff] %v586_v31  ;;  %v460_v39 = vsel %vm427_vm9, %v357_v22, %v444_v33  ;;  %v445_v40 = vmul.f32 %v838_v52, %v359_v28  ;;  %v412_v41 = vadd.f32 %v411_v24, %v80_v10  ;;  %v361_v42 = vadd.f32 %v360_v29, %v85_v37 }
 0x10b   :  { %519 = vst [vmem:[%s884_s4 + $0x18] sm:$0xff] %v587_v36  ;;  %v462_v43 = vsel %vm429_vm10, %v410_v27, %v446_v38  ;;  %v414_v44 = vadd.f32 %v413_v30, %v85_v37  ;;  %v363_v45 = vadd.f32 %v362_v34, %v85_v37  ;;  %v416_v46 = vadd.f32 %v415_v35, %v85_v37 }
 0x10c   :  { %v461_v47 = vsel %vm428_vm11, %v359_v28, %v445_v40  ;;  %vm430_vm12 = vcmp.ge.f32.partialorder %v412_v41, 0.0  ;;  %v447_v48 = vmul.f32 %v838_v52, %v412_v41  ;;  %vm431_vm13 = vcmp.ge.f32.partialorder %v361_v42, 0.0 }
 0x10d   :  { %v588_v49 = vpack.c.bf16 %v461_v47, %v460_v39  ;;  %v448_v50 = vmul.f32 %v838_v52, %v361_v42  ;;  %vm433_vm14 = vcmp.ge.f32.partialorder %v414_v44, 0.0  ;;  %v450_v51 = vmul.f32 %v838_v52, %v414_v44 }
 0x10e   :  { %v463_v53 = vsel %vm430_vm12, %v412_v41, %v447_v48  ;;  %vm432_vm15 = vcmp.ge.f32.partialorder %v363_v45, 0.0  ;;  %v449_v54 = vmul.f32 %v838_v52, %v363_v45  ;;  %vm434_vm0 = vcmp.ge.f32.partialorder %v416_v46, 0.0 }
 0x10f   :  { %520 = vst [vmem:[%s884_s4 + $0x20] sm:$0xff] %v588_v49  ;;  %v589_v55 = vpack.c.bf16 %v463_v53, %v462_v43  ;;  %v464_v56 = vsel %vm431_vm13, %v361_v42, %v448_v50  ;;  %v466_v57 = vsel %vm433_vm14, %v414_v44, %v450_v51  ;;  %v451_v58 = vmul.f32 %v838_v52, %v416_v46 }
 0x110   :  { %v465_v59 = vsel %vm432_vm15, %v363_v45, %v449_v54 }
 0x111   :  { %521 = vst [vmem:[%s884_s4 + $0x28] sm:$0xff] %v589_v55  ;;  %v590_v60 = vpack.c.bf16 %v465_v59, %v464_v56  ;;  %v467_v61 = vsel %vm434_vm0, %v416_v46, %v451_v58 }
 0x112   :  { %v591_v62 = vpack.c.bf16 %v467_v61, %v466_v57 }
 0x113   :  { %522 = vst [vmem:[%s884_s4 + $0x30] sm:$0xff] %v590_v60 }
 0x114   :  { %523 = vst [vmem:[%s884_s4 + $0x38] sm:$0xff] %v591_v62 }

// kernel: net7_forward.91
= control target key start
LH: loop header
LB: loop body
LE: loop exit
PB: predicated region body
PF: predicated region fallthrough
CT: control target
= control target key end

     0   :  { %v313_v0 = vmov 0   ;;  %vm145_vm0 = vcmask 261120   ;;  %s424_s1 = inlined_call_operand.vmem [shape: bf16[160,128], index: 1, kind: input, shape index: {}]   ;;  %s425_s0 = inlined_call_operand.vmem [shape: bf16[32,160], index: 0, kind: input, shape index: {}]   ;;  %s426_s2 = inlined_call_operand.vmem [shape: f32[32,1], index: 2, kind: input, shape index: {}]   ;;  %s427_s3 = inlined_call_operand.<no memory space> [shape: f32[1,1], index: 3, kind: input, shape index: {}]   ;;  %s428_s4 = inlined_call_operand.vmem [shape: bf16[32,128], index: 4, kind: output, shape index: {}]  }
   0x1   :  { %152 = vmatprep.subr.bf16.mxu0 %v313_v0  ;;  %274 = vmatprep.subr.bf16.mxu1 %v313_v0  ;;  %v297_v1 = vld [vmem:[%s424_s1] sm:$0xff]   ;;  %v298_v2 = vld [vmem:[%s424_s1 + $0x8] sm:$0xff]   ;;  %v299_v3 = vld [vmem:[%s424_s1 + $0x10] sm:$0xff]   ;;  %v206_v26 = vstv %s427_s3 }
   0x2   :  { %296 = vset.pattern.permute.xlu1 %v313_v0  ;;  %295 = vset.pattern.permute.xlu0 %v313_v0  ;;  %v300_v4 = vld [vmem:[%s424_s1 + $0x18] sm:$0xff]   ;;  %v309_v5 = vld [vmem:[%s425_s0 + $0x4] ss:$8 sps:$4 sm:$0xff]   ;;  %v45_v7 = vld [vmem:[%s426_s2 + $0x10] sm:$0xff] }
   0x3   :  { %153 = vmatpush1.bf16.msra.mxu0 %v297_v1  ;;  %284 = vmatpush1.bf16.msra.mxu1 %v297_v1  ;;  %v312_v6 = vld [vmem:[%s425_s0 + $0x14] ss:$8 sps:$4 sm:$0xff]   ;;  %v43_v8 = vld [vmem:[%s426_s2] sm:$0xff]  ;;  %v44_v11 = vld [vmem:[%s426_s2 + $0x8] sm:$0xff] }
   0x4   :  { %154 = vmatprep.subr.bf16.mxu0 %v313_v0  ;;  %275 = vmatprep.subr.bf16.mxu1 %v313_v0  ;;  %v301_v9 = vld [vmem:[%s424_s1 + $0x20] sm:$0xff]   ;;  %v46_v10 = vld [vmem:[%s426_s2 + $0x18] sm:$0xff]  ;;  %v302_v12 = vld [vmem:[%s424_s1 + $0x28] sm:$0xff]  }
   0x5   :  { %253 = vmatprep.mubr.msk.bf16.mxu0 %vm145_vm0, %v309_v5  ;;  %59 = vperm.xlu1 %296, %v45_v7   ;;  %v303_v13 = vld [vmem:[%s424_s1 + $0x30] sm:$0xff]   ;;  %v304_v14 = vld [vmem:[%s424_s1 + $0x38] sm:$0xff]   ;;  %v305_v15 = vld [vmem:[%s424_s1 + $0x40] sm:$0xff]  }
   0x6   :  { %254 = vmatprep.mubr.msk.bf16.mxu1 %vm145_vm0, %v312_v6  ;;  %49 = vperm.xlu0 %295, %v43_v8   ;;  %v306_v16 = vld [vmem:[%s424_s1 + $0x48] sm:$0xff]   ;;  %v310_v18 = vld [vmem:[%s425_s0 + $0x10] ss:$8 sps:$4 sm:$0xff]  }
   0x7   :  { %155 = vmatpush1.bf16.msra.mxu0 %v298_v2  ;;  %285 = vmatpush1.bf16.msra.mxu1 %v298_v2  ;;  %v307_v17 = vld [vmem:[%s425_s0] ss:$8 sps:$4 sm:$0xff]  }
   0x8   :  { %156 = vmatprep.subr.bf16.mxu0 %v313_v0  ;;  %276 = vmatprep.subr.bf16.mxu1 %v313_v0 }
   0x9   :  { %64 = vperm.xlu1 %296, %v46_v10  }
   0xa   :  { %54 = vperm.xlu0 %295, %v44_v11  }
   0xb   :  { %157 = vmatpush1.bf16.msra.mxu0 %v299_v3  ;;  %286 = vmatpush1.bf16.msra.mxu1 %v299_v3 }
   0xc   :  { %158 = vmatprep.subr.bf16.mxu0 %v313_v0  ;;  %277 = vmatprep.subr.bf16.mxu1 %v313_v0 }
   0xf   :  { %159 = vmatpush1.bf16.msra.mxu0 %v300_v4  ;;  %287 = vmatpush1.bf16.msra.mxu1 %v300_v4 }
  0x10   :  { %160 = vmatprep.subr.bf16.mxu0 %v313_v0  ;;  %278 = vmatprep.subr.bf16.mxu1 %v313_v0 }
  0x13   :  { %161 = vmatpush1.bf16.msra.mxu0 %v301_v9  ;;  %288 = vmatpush1.bf16.msra.mxu1 %v301_v9 }
  0x14   :  { %162 = vmatprep.subr.bf16.mxu0 %v313_v0  ;;  %279 = vmatprep.subr.bf16.mxu1 %v313_v0 }
  0x17   :  { %163 = vmatpush1.bf16.msra.mxu0 %v302_v12  ;;  %289 = vmatpush1.bf16.msra.mxu1 %v302_v12 }
  0x18   :  { %164 = vmatprep.subr.bf16.mxu0 %v313_v0  ;;  %280 = vmatprep.subr.bf16.mxu1 %v313_v0 }
  0x1b   :  { %165 = vmatpush1.bf16.msra.mxu0 %v303_v13  ;;  %290 = vmatpush1.bf16.msra.mxu1 %v303_v13 }
  0x1c   :  { %166 = vmatprep.subr.bf16.mxu0 %v313_v0  ;;  %281 = vmatprep.subr.bf16.mxu1 %v313_v0 }
  0x1f   :  { %167 = vmatpush1.bf16.msra.mxu0 %v304_v14  ;;  %291 = vmatpush1.bf16.msra.mxu1 %v304_v14 }
  0x20   :  { %168 = vmatprep.subr.bf16.mxu0 %v313_v0  ;;  %282 = vmatprep.subr.bf16.mxu1 %v313_v0 }
  0x23   :  { %169 = vmatpush1.bf16.msra.mxu0 %v305_v15  ;;  %292 = vmatpush1.bf16.msra.mxu1 %v305_v15 }
  0x24   :  { %170 = vmatprep.subr.bf16.mxu0 %v313_v0  ;;  %283 = vmatprep.subr.bf16.mxu1 %v313_v0 }
  0x27   :  { %171 = vmatpush1.bf16.msra.mxu0 %v306_v16  ;;  %293 = vmatpush1.bf16.msra.mxu1 %v306_v16 }
  0x2a   :  { %185 = vmatmul.mubr.bf16.vlgmr.msra.gmra.mrb[0].mxu0 %v307_v17  ;;  %193 = vmatmul.mubr.bf16.vlgmr.msra.gmra.mrb[0].mxu1 %v310_v18 }
  0x84   :  { %v60_v19 = vpop.permute.xlu1 %59 }
  0x85   :  { %v50_v20 = vpop.permute.xlu0 %49 }
  0x88   :  { %v65_v21 = vpop.permute.xlu1 %64 }
  0x89   :  { %v55_v22 = vpop.permute.xlu0 %54 }
  0xfd   :  { %v186_v23 = vpop.f32.mrb[0].mxu0  ;;  %v194_v24 = vpop.f32.mrb[0].mxu1 }
  0xfe   :  { %v187_v25 = vadd.f32 %v186_v23, %v50_v20  ;;  %v195_v27 = vadd.f32 %v194_v24, %v60_v19  ;;  %v188_v28 = vpop.f32.mrb[1].mxu0  ;;  %v196_v29 = vpop.f32.mrb[1].mxu1 }
  0xff   :  { %v189_v30 = vpop.f32.mrb[2].mxu0  ;;  %v197_v31 = vpop.f32.mrb[2].mxu1 }
 0x100   :  { %v191_v32 = vpop.f32.mrb[3].mxu0  ;;  %v199_v33 = vpop.f32.mrb[3].mxu1  ;;  %v207_v34 = vmul.f32 %v206_v26, %v187_v25  ;;  %v209_v35 = vmul.f32 %v206_v26, %v195_v27  ;;  %v190_v36 = vadd.f32 %v189_v30, %v55_v22  ;;  %v198_v37 = vadd.f32 %v197_v31, %v65_v21 }
 0x101   :  { %vm202_vm1 = vcmp.ge.f32.partialorder %v187_v25, 0.0  ;;  %vm204_vm2 = vcmp.ge.f32.partialorder %v195_v27, 0.0 }
 0x102   :  { %vm203_vm3 = vcmp.ge.f32.partialorder %v190_v36, 0.0  ;;  %v208_v38 = vmul.f32 %v206_v26, %v190_v36  ;;  %vm205_vm4 = vcmp.ge.f32.partialorder %v198_v37, 0.0  ;;  %v210_v39 = vmul.f32 %v206_v26, %v198_v37 }
 0x103   :  { %v211_v40 = vsel %vm202_vm1, %v187_v25, %v207_v34  ;;  %v213_v41 = vsel %vm204_vm2, %v195_v27, %v209_v35 }
 0x104   :  { %v212_v42 = vsel %vm203_vm3, %v190_v36, %v208_v38  ;;  %v214_v43 = vsel %vm205_vm4, %v198_v37, %v210_v39 }
 0x105   :  { %v266_v44 = vpack.c.bf16 %v212_v42, %v211_v40  ;;  %v271_v45 = vpack.c.bf16 %v214_v43, %v213_v41 }
 0x107   :  { %267 = vst [vmem:[%s428_s4] sm:$0xff] %v266_v44   ;;  %273 = vst [vmem:[%s428_s4 + $0x8] sm:$0xff] %v271_v45  }

// kernel: net7_forward.95
= control target key start
LH: loop header
LB: loop body
LE: loop exit
PB: predicated region body
PF: predicated region fallthrough
CT: control target
= control target key end

     0   :  { %v729_v1 = vmov 0   ;;  %vm353_vm0 = vcmask 523264   ;;  %s972_s1 = inlined_call_operand.vmem [shape: bf16[192,512], index: 1, kind: input, shape index: {}]   ;;  %s973_s0 = inlined_call_operand.vmem [shape: bf16[32,192], index: 0, kind: input, shape index: {}]   ;;  %s974_s2 = inlined_call_operand.vmem [shape: f32[32,1], index: 2, kind: input, shape index: {}]   ;;  %s975_s3 = inlined_call_operand.<no memory space> [shape: f32[1,1], index: 3, kind: input, shape index: {}]   ;;  %s976_s4 = inlined_call_operand.vmem [shape: bf16[32,512], index: 4, kind: output, shape index: {}]  }
   0x1   :  { %v651_v0 = vld [vmem:[%s972_s1 + $0x4] ss:$16 sps:$4 sm:$0xff]   ;;  %649 = vset.pattern.permute.xlu0 %v729_v1  ;;  %650 = vset.pattern.permute.xlu1 %v729_v1  ;;  %v653_v2 = vld [vmem:[%s972_s1 + $0xc] ss:$16 sps:$4 sm:$0xff]   ;;  %v655_v3 = vld [vmem:[%s972_s1] ss:$16 sps:$4 sm:$0xff]   ;;  %v930_v60 = vstv %s975_s3 }
   0x2   :  { %360 = vmatprep.subr.bf16.mxu0 %v651_v0  ;;  %v656_v4 = vld [vmem:[%s972_s1 + $0x8] ss:$16 sps:$4 sm:$0xff]   ;;  %413 = vmatprep.subr.bf16.mxu1 %v653_v2  ;;  %v657_v5 = vld [vmem:[%s972_s1 + $0x24] ss:$16 sps:$4 sm:$0xff]   ;;  %v659_v6 = vld [vmem:[%s972_s1 + $0x2c] ss:$16 sps:$4 sm:$0xff]  }
   0x3   :  { %361 = vmatpush1.bf16.msra.mxu0 %v655_v3  ;;  %414 = vmatpush1.bf16.msra.mxu1 %v656_v4  ;;  %v661_v7 = vld [vmem:[%s972_s1 + $0x20] ss:$16 sps:$4 sm:$0xff]   ;;  %v662_v8 = vld [vmem:[%s972_s1 + $0x28] ss:$16 sps:$4 sm:$0xff]   ;;  %v663_v9 = vld [vmem:[%s972_s1 + $0x44] ss:$16 sps:$4 sm:$0xff]  }
   0x4   :  { %362 = vmatprep.subr.bf16.mxu0 %v657_v5  ;;  %415 = vmatprep.subr.bf16.mxu1 %v659_v6  ;;  %v665_v10 = vld [vmem:[%s972_s1 + $0x4c] ss:$16 sps:$4 sm:$0xff]   ;;  %v667_v11 = vld [vmem:[%s972_s1 + $0x40] ss:$16 sps:$4 sm:$0xff]   ;;  %v668_v12 = vld [vmem:[%s972_s1 + $0x48] ss:$16 sps:$4 sm:$0xff]  }
   0x5   :  { %v669_v13 = vld [vmem:[%s972_s1 + $0x64] ss:$16 sps:$4 sm:$0xff]   ;;  %v671_v14 = vld [vmem:[%s972_s1 + $0x6c] ss:$16 sps:$4 sm:$0xff]   ;;  %v673_v15 = vld [vmem:[%s972_s1 + $0x60] ss:$16 sps:$4 sm:$0xff]  }
   0x6   :  { %v674_v16 = vld [vmem:[%s972_s1 + $0x68] ss:$16 sps:$4 sm:$0xff]   ;;  %v675_v17 = vld [vmem:[%s972_s1 + $0x84] ss:$16 sps:$4 sm:$0xff]   ;;  %v677_v18 = vld [vmem:[%s972_s1 + $0x8c] ss:$16 sps:$4 sm:$0xff]  }
   0x7   :  { %363 = vmatpush1.bf16.msra.mxu0 %v661_v7  ;;  %416 = vmatpush1.bf16.msra.mxu1 %v662_v8  ;;  %v679_v19 = vld [vmem:[%s972_s1 + $0x80] ss:$16 sps:$4 sm:$0xff]   ;;  %v680_v20 = vld [vmem:[%s972_s1 + $0x88] ss:$16 sps:$4 sm:$0xff]   ;;  %v681_v21 = vld [vmem:[%s972_s1 + $0xa4] ss:$16 sps:$4 sm:$0xff]  }
   0x8   :  { %364 = vmatprep.subr.bf16.mxu0 %v663_v9  ;;  %417 = vmatprep.subr.bf16.mxu1 %v665_v10  ;;  %v683_v22 = vld [vmem:[%s972_s1 + $0xac] ss:$16 sps:$4 sm:$0xff]   ;;  %v685_v23 = vld [vmem:[%s972_s1 + $0xa0] ss:$16 sps:$4 sm:$0xff]   ;;  %v686_v24 = vld [vmem:[%s972_s1 + $0xa8] ss:$16 sps:$4 sm:$0xff]  }
   0x9   :  { %v687_v25 = vld [vmem:[%s972_s1 + $0xc4] ss:$16 sps:$4 sm:$0xff]   ;;  %v689_v26 = vld [vmem:[%s972_s1 + $0xcc] ss:$16 sps:$4 sm:$0xff]   ;;  %v691_v27 = vld [vmem:[%s972_s1 + $0xc0] ss:$16 sps:$4 sm:$0xff]  }
   0xa   :  { %v692_v28 = vld [vmem:[%s972_s1 + $0xc8] ss:$16 sps:$4 sm:$0xff]   ;;  %v693_v29 = vld [vmem:[%s972_s1 + $0xe4] ss:$16 sps:$4 sm:$0xff]   ;;  %v695_v30 = vld [vmem:[%s972_s1 + $0xec] ss:$16 sps:$4 sm:$0xff]  }
   0xb   :  { %365 = vmatpush1.bf16.msra.mxu0 %v667_v11  ;;  %418 = vmatpush1.bf16.msra.mxu1 %v668_v12  ;;  %v697_v31 = vld [vmem:[%s972_s1 + $0xe0] ss:$16 sps:$4 sm:$0xff]   ;;  %v698_v32 = vld [vmem:[%s972_s1 + $0xe8] ss:$16 sps:$4 sm:$0xff]   ;;  %v699_v33 = vld [vmem:[%s972_s1 + $0x104] ss:$16 sps:$4 sm:$0xff]  }
   0xc   :  { %366 = vmatprep.subr.bf16.mxu0 %v669_v13  ;;  %419 = vmatprep.subr.bf16.mxu1 %v671_v14  ;;  %v701_v34 = vld [vmem:[%s972_s1 + $0x10c] ss:$16 sps:$4 sm:$0xff]   ;;  %v703_v35 = vld [vmem:[%s972_s1 + $0x100] ss:$16 sps:$4 sm:$0xff]   ;;  %v704_v36 = vld [vmem:[%s972_s1 + $0x108] ss:$16 sps:$4 sm:$0xff]  }
   0xd   :  { %v705_v37 = vld [vmem:[%s972_s1 + $0x124] ss:$16 sps:$4 sm:$0xff]   ;;  %v707_v38 = vld [vmem:[%s972_s1 + $0x12c] ss:$16 sps:$4 sm:$0xff]   ;;  %v709_v42 = vld [vmem:[%s972_s1 + $0x120] ss:$16 sps:$4 sm:$0xff]  }
   0xe   :  { %v725_v39 = vld [vmem:[%s973_s0 + $0x4] ss:$8 sps:$4 sm:$0xff]   ;;  %v73_v41 = vld [vmem:[%s974_s2 + $0x10] sm:$0xff]  ;;  %v710_v43 = vld [vmem:[%s972_s1 + $0x128] ss:$16 sps:$4 sm:$0xff]  }
   0xf   :  { %367 = vmatpush1.bf16.msra.mxu0 %v673_v15  ;;  %420 = vmatpush1.bf16.msra.mxu1 %v674_v16  ;;  %v71_v40 = vld [vmem:[%s974_s2] sm:$0xff]  ;;  %v713_v45 = vld [vmem:[%s972_s1 + $0x14c] ss:$16 sps:$4 sm:$0xff]   ;;  %v716_v49 = vld [vmem:[%s972_s1 + $0x148] ss:$16 sps:$4 sm:$0xff]  }
  0x10   :  { %368 = vmatprep.subr.bf16.mxu0 %v675_v17  ;;  %421 = vmatprep.subr.bf16.mxu1 %v677_v18  ;;  %v711_v44 = vld [vmem:[%s972_s1 + $0x144] ss:$16 sps:$4 sm:$0xff]   ;;  %v72_v46 = vld [vmem:[%s974_s2 + $0x8] sm:$0xff]  ;;  %v74_v47 = vld [vmem:[%s974_s2 + $0x18] sm:$0xff] }
  0x11   :  { %628 = vmatprep.mubr.msk.bf16.mxu0 %vm353_vm0, %v725_v39  ;;  %630 = vmatprep.mubr.msk.bf16.mxu1 %vm353_vm0, %v725_v39  ;;  %v715_v48 = vld [vmem:[%s972_s1 + $0x140] ss:$16 sps:$4 sm:$0xff]   ;;  %v717_v50 = vld [vmem:[%s972_s1 + $0x164] ss:$16 sps:$4 sm:$0xff]   ;;  %v719_v51 = vld [vmem:[%s972_s1 + $0x16c] ss:$16 sps:$4 sm:$0xff]  }
  0x12   :  { %77 = vperm.xlu0 %649, %v71_v40   ;;  %87 = vperm.xlu1 %650, %v73_v41   ;;  %v721_v52 = vld [vmem:[%s972_s1 + $0x160] ss:$16 sps:$4 sm:$0xff]   ;;  %v722_v53 = vld [vmem:[%s972_s1 + $0x168] ss:$16 sps:$4 sm:$0xff]   ;;  %v726_v55 = vld [vmem:[%s973_s0 + $0x14] ss:$8 sps:$4 sm:$0xff]  }
  0x13   :  { %369 = vmatpush1.bf16.msra.mxu0 %v679_v19  ;;  %422 = vmatpush1.bf16.msra.mxu1 %v680_v20  ;;  %v723_v54 = vld [vmem:[%s973_s0] ss:$8 sps:$4 sm:$0xff]   ;;  %v728_v56 = vld [vmem:[%s973_s0 + $0x10] ss:$8 sps:$4 sm:$0xff]  }
  0x14   :  { %370 = vmatprep.subr.bf16.mxu0 %v681_v21  ;;  %423 = vmatprep.subr.bf16.mxu1 %v683_v22 }
  0x16   :  { %82 = vperm.xlu0 %649, %v72_v46   ;;  %92 = vperm.xlu1 %650, %v74_v47  }
  0x17   :  { %371 = vmatpush1.bf16.msra.mxu0 %v685_v23  ;;  %424 = vmatpush1.bf16.msra.mxu1 %v686_v24 }
  0x18   :  { %372 = vmatprep.subr.bf16.mxu0 %v687_v25  ;;  %425 = vmatprep.subr.bf16.mxu1 %v689_v26 }
  0x1b   :  { %373 = vmatpush1.bf16.msra.mxu0 %v691_v27  ;;  %426 = vmatpush1.bf16.msra.mxu1 %v692_v28 }
  0x1c   :  { %374 = vmatprep.subr.bf16.mxu0 %v693_v29  ;;  %427 = vmatprep.subr.bf16.mxu1 %v695_v30 }
  0x1f   :  { %375 = vmatpush1.bf16.msra.mxu0 %v697_v31  ;;  %428 = vmatpush1.bf16.msra.mxu1 %v698_v32 }
  0x20   :  { %376 = vmatprep.subr.bf16.mxu0 %v699_v33  ;;  %429 = vmatprep.subr.bf16.mxu1 %v701_v34 }
  0x23   :  { %377 = vmatpush1.bf16.msra.mxu0 %v703_v35  ;;  %430 = vmatpush1.bf16.msra.mxu1 %v704_v36 }
  0x24   :  { %378 = vmatprep.subr.bf16.mxu0 %v705_v37  ;;  %431 = vmatprep.subr.bf16.mxu1 %v707_v38 }
  0x27   :  { %379 = vmatpush1.bf16.msra.mxu0 %v709_v42  ;;  %432 = vmatpush1.bf16.msra.mxu1 %v710_v43 }
  0x28   :  { %380 = vmatprep.subr.bf16.mxu0 %v711_v44  ;;  %433 = vmatprep.subr.bf16.mxu1 %v713_v45 }
  0x2b   :  { %381 = vmatpush1.bf16.msra.mxu0 %v715_v48  ;;  %434 = vmatpush1.bf16.msra.mxu1 %v716_v49 }
  0x2c   :  { %382 = vmatprep.subr.bf16.mxu0 %v717_v50  ;;  %435 = vmatprep.subr.bf16.mxu1 %v719_v51 }
  0x2f   :  { %383 = vmatpush1.bf16.msra.mxu0 %v721_v52  ;;  %436 = vmatpush1.bf16.msra.mxu1 %v722_v53 }
  0x32   :  { %393 = vmatmul.mubr.bf16.vlgmr.msra.gmra.mrb[0].mxu0 %v723_v54  ;;  %446 = vmatmul.mubr.bf16.vlgmr.msra.gmra.mrb[0].mxu1 %v723_v54 }
  0x33   :  { %629 = vmatprep.mubr.msk.bf16.mxu0 %vm353_vm0, %v726_v55  ;;  %631 = vmatprep.mubr.msk.bf16.mxu1 %vm353_vm0, %v726_v55 }
  0x3a   :  { %403 = vmatmul.mubr.bf16.gmra.mrb[4].mxu0 %v728_v56  ;;  %456 = vmatmul.mubr.bf16.gmra.mrb[4].mxu1 %v728_v56 }
  0x91   :  { %v78_v57 = vpop.permute.xlu0 %77  ;;  %v88_v18 = vpop.permute.xlu1 %87 }
  0x95   :  { %v83_v58 = vpop.permute.xlu0 %82  ;;  %v93_v45 = vpop.permute.xlu1 %92 }
 0x105   :  { %v394_v59 = vpop.f32.mrb[0].mxu0  ;;  %v447_v61 = vpop.f32.mrb[0].mxu1 }
 0x106   :  { %v395_v62 = vadd.f32 %v394_v59, %v78_v57  ;;  %v448_v63 = vadd.f32 %v447_v61, %v78_v57  ;;  %v396_v0 = vpop.f32.mrb[1].mxu0  ;;  %v449_v1 = vpop.f32.mrb[1].mxu1 }
 0x107   :  { %v397_v2 = vadd.f32 %v396_v0, %v78_v57  ;;  %v450_v3 = vadd.f32 %v449_v1, %v78_v57  ;;  %v398_v4 = vpop.f32.mrb[2].mxu0  ;;  %v451_v5 = vpop.f32.mrb[2].mxu1 }
 0x108   :  { %vm467_vm1 = vcmp.ge.f32.partialorder %v395_v62, 0.0  ;;  %v484_v6 = vmul.f32 %v930_v60, %v395_v62  ;;  %vm469_vm2 = vcmp.ge.f32.partialorder %v448_v63, 0.0  ;;  %v486_v7 = vmul.f32 %v930_v60, %v448_v63  ;;  %v400_v8 = vpop.f32.mrb[3].mxu0  ;;  %v453_v9 = vpop.f32.mrb[3].mxu1 }
 0x109   :  { %vm468_vm3 = vcmp.ge.f32.partialorder %v397_v2, 0.0  ;;  %v485_v10 = vmul.f32 %v930_v60, %v397_v2  ;;  %vm470_vm4 = vcmp.ge.f32.partialorder %v450_v3, 0.0  ;;  %v487_v11 = vmul.f32 %v930_v60, %v450_v3 }
 0x10a   :  { %v500_v12 = vsel %vm467_vm1, %v395_v62, %v484_v6  ;;  %v502_v13 = vsel %vm469_vm2, %v448_v63, %v486_v7  ;;  %v399_v14 = vadd.f32 %v398_v4, %v83_v58  ;;  %v452_v15 = vadd.f32 %v451_v5, %v83_v58 }
 0x10b   :  { %v501_v16 = vsel %vm468_vm3, %v397_v2, %v485_v10  ;;  %v503_v17 = vsel %vm470_vm4, %v450_v3, %v487_v11  ;;  %v401_v19 = vadd.f32 %v400_v8, %v83_v58  ;;  %v454_v20 = vadd.f32 %v453_v9, %v83_v58 }
 0x10c   :  { %v640_v21 = vpack.c.bf16 %v501_v16, %v500_v12  ;;  %v641_v22 = vpack.c.bf16 %v503_v17, %v502_v13  ;;  %vm471_vm5 = vcmp.ge.f32.partialorder %v399_v14, 0.0  ;;  %v488_v23 = vmul.f32 %v930_v60, %v399_v14 }
 0x10d   :  { %vm473_vm6 = vcmp.ge.f32.partialorder %v452_v15, 0.0  ;;  %v490_v24 = vmul.f32 %v930_v60, %v452_v15  ;;  %vm472_vm7 = vcmp.ge.f32.partialorder %v401_v19, 0.0  ;;  %v489_v25 = vmul.f32 %v930_v60, %v401_v19  ;;  %v404_v26 = vpop.f32.mrb[4].mxu0  ;;  %v457_v27 = vpop.f32.mrb[4].mxu1 }
 0x10e   :  { %564 = vst [vmem:[%s976_s4] sm:$0xff] %v640_v21  ;;  %565 = vst [vmem:[%s976_s4 + $0x8] sm:$0xff] %v641_v22  ;;  %v504_v28 = vsel %vm471_vm5, %v399_v14, %v488_v23  ;;  %vm474_vm8 = vcmp.ge.f32.partialorder %v454_v20, 0.0  ;;  %v491_v29 = vmul.f32 %v930_v60, %v454_v20  ;;  %v405_v30 = vadd.f32 %v404_v26, %v88_v18  ;;  %v406_v31 = vpop.f32.mrb[5].mxu0  ;;  %v459_v32 = vpop.f32.mrb[5].mxu1 }
 0x10f   :  { %v506_v33 = vsel %vm473_vm6, %v452_v15, %v490_v24  ;;  %v505_v34 = vsel %vm472_vm7, %v401_v19, %v489_v25  ;;  %v458_v35 = vadd.f32 %v457_v27, %v88_v18  ;;  %v407_v36 = vadd.f32 %v406_v31, %v88_v18  ;;  %v408_v37 = vpop.f32.mrb[6].mxu0  ;;  %v461_v38 = vpop.f32.mrb[6].mxu1 }
 0x110   :  { %v642_v39 = vpack.c.bf16 %v505_v34, %v504_v28  ;;  %v507_v40 = vsel %vm474_vm8, %v454_v20, %v491_v29  ;;  %vm475_vm9 = vcmp.ge.f32.partialorder %v405_v30, 0.0  ;;  %v492_v41 = vmul.f32 %v930_v60, %v405_v30  ;;  %v410_v42 = vpop.f32.mrb[7].mxu0  ;;  %v463_v43 = vpop.f32.mrb[7].mxu1 }
 0x111   :  { %v643_v44 = vpack.c.bf16 %v507_v40, %v506_v33  ;;  %vm477_vm10 = vcmp.ge.f32.partialorder %v458_v35, 0.0  ;;  %v494_v46 = vmul.f32 %v930_v60, %v458_v35  ;;  %vm476_vm11 = vcmp.ge.f32.partialorder %v407_v36, 0.0 }
 0x112   :  { %566 = vst [vmem:[%s976_s4 + $0x10] sm:$0xff] %v642_v39  ;;  %v508_v47 = vsel %vm475_vm9, %v405_v30, %v492_v41  ;;  %v493_v48 = vmul.f32 %v930_v60, %v407_v36  ;;  %v460_v49 = vadd.f32 %v459_v32, %v88_v18  ;;  %v409_v50 = vadd.f32 %v408_v37, %v93_v45 }
 0x113   :  { %567 = vst [vmem:[%s976_s4 + $0x18] sm:$0xff] %v643_v44  ;;  %v510_v51 = vsel %vm477_vm10, %v458_v35, %v494_v46  ;;  %v462_v52 = vadd.f32 %v461_v38, %v93_v45  ;;  %v411_v53 = vadd.f32 %v410_v42, %v93_v45  ;;  %v464_v54 = vadd.f32 %v463_v43, %v93_v45 }
 0x114   :  { %v509_v55 = vsel %vm476_vm11, %v407_v36, %v493_v48  ;;  %vm478_vm12 = vcmp.ge.f32.partialorder %v460_v49, 0.0  ;;  %v495_v56 = vmul.f32 %v930_v60, %v460_v49  ;;  %vm479_vm13 = vcmp.ge.f32.partialorder %v409_v50, 0.0 }
 0x115   :  { %v644_v57 = vpack.c.bf16 %v509_v55, %v508_v47  ;;  %v496_v58 = vmul.f32 %v930_v60, %v409_v50  ;;  %vm481_vm14 = vcmp.ge.f32.partialorder %v462_v52, 0.0  ;;  %v498_v59 = vmul.f32 %v930_v60, %v462_v52 }
 0x116   :  { %v511_v61 = vsel %vm478_vm12, %v460_v49, %v495_v56  ;;  %vm480_vm15 = vcmp.ge.f32.partialorder %v411_v53, 0.0  ;;  %v497_v62 = vmul.f32 %v930_v60, %v411_v53  ;;  %vm482_vm0 = vcmp.ge.f32.partialorder %v464_v54, 0.0 }
 0x117   :  { %568 = vst [vmem:[%s976_s4 + $0x20] sm:$0xff] %v644_v57  ;;  %v645_v63 = vpack.c.bf16 %v511_v61, %v510_v51  ;;  %v512_v0 = vsel %vm479_vm13, %v409_v50, %v496_v58  ;;  %v514_v1 = vsel %vm481_vm14, %v462_v52, %v498_v59  ;;  %v499_v2 = vmul.f32 %v930_v60, %v464_v54 }
 0x118   :  { %v513_v3 = vsel %vm480_vm15, %v411_v53, %v497_v62 }
 0x119   :  { %569 = vst [vmem:[%s976_s4 + $0x28] sm:$0xff] %v645_v63  ;;  %v646_v4 = vpack.c.bf16 %v513_v3, %v512_v0  ;;  %v515_v5 = vsel %vm482_vm0, %v464_v54, %v499_v2 }
 0x11a   :  { %v647_v6 = vpack.c.bf16 %v515_v5, %v514_v1 }
 0x11b   :  { %570 = vst [vmem:[%s976_s4 + $0x30] sm:$0xff] %v646_v4 }
 0x11c   :  { %571 = vst [vmem:[%s976_s4 + $0x38] sm:$0xff] %v647_v6 }

// kernel: net7_forward.99
= control target key start
LH: loop header
LB: loop body
LE: loop exit
PB: predicated region body
PF: predicated region fallthrough
CT: control target
= control target key end

     0   :  { %v337_v0 = vmov 0   ;;  %vm161_vm0 = vcmask 523264   ;;  %s458_s1 = inlined_call_operand.vmem [shape: bf16[192,128], index: 1, kind: input, shape index: {}]   ;;  %s459_s0 = inlined_call_operand.vmem [shape: bf16[32,192], index: 0, kind: input, shape index: {}]   ;;  %s460_s2 = inlined_call_operand.vmem [shape: f32[32,1], index: 2, kind: input, shape index: {}]   ;;  %s461_s3 = inlined_call_operand.<no memory space> [shape: f32[1,1], index: 3, kind: input, shape index: {}]   ;;  %s462_s4 = inlined_call_operand.vmem [shape: bf16[32,128], index: 4, kind: output, shape index: {}]  }
   0x1   :  { %168 = vmatprep.subr.bf16.mxu0 %v337_v0  ;;  %292 = vmatprep.subr.bf16.mxu1 %v337_v0  ;;  %v319_v1 = vld [vmem:[%s458_s1] sm:$0xff]   ;;  %v320_v2 = vld [vmem:[%s458_s1 + $0x8] sm:$0xff]   ;;  %v321_v3 = vld [vmem:[%s458_s1 + $0x10] sm:$0xff]   ;;  %v222_v28 = vstv %s461_s3 }
   0x2   :  { %318 = vset.pattern.permute.xlu1 %v337_v0  ;;  %317 = vset.pattern.permute.xlu0 %v337_v0  ;;  %v322_v4 = vld [vmem:[%s458_s1 + $0x18] sm:$0xff]   ;;  %v333_v5 = vld [vmem:[%s459_s0 + $0x4] ss:$8 sps:$4 sm:$0xff]   ;;  %v49_v8 = vld [vmem:[%s460_s2 + $0x10] sm:$0xff] }
   0x3   :  { %169 = vmatpush1.bf16.msra.mxu0 %v319_v1  ;;  %304 = vmatpush1.bf16.msra.mxu1 %v319_v1  ;;  %v323_v6 = vld [vmem:[%s458_s1 + $0x20] sm:$0xff]   ;;  %v336_v7 = vld [vmem:[%s459_s0 + $0x14] ss:$8 sps:$4 sm:$0xff]   ;;  %v324_v10 = vld [vmem:[%s458_s1 + $0x28] sm:$0xff]  }
   0x4   :  { %170 = vmatprep.subr.bf16.mxu0 %v337_v0  ;;  %293 = vmatprep.subr.bf16.mxu1 %v337_v0  ;;  %v47_v9 = vld [vmem:[%s460_s2] sm:$0xff]  ;;  %v50_v11 = vld [vmem:[%s460_s2 + $0x18] sm:$0xff]  ;;  %v48_v12 = vld [vmem:[%s460_s2 + $0x8] sm:$0xff] }
   0x5   :  { %271 = vmatprep.mubr.msk.bf16.mxu0 %vm161_vm0, %v333_v5  ;;  %272 = vmatprep.mubr.msk.bf16.mxu1 %vm161_vm0, %v336_v7  ;;  %v325_v13 = vld [vmem:[%s458_s1 + $0x30] sm:$0xff]   ;;  %v326_v14 = vld [vmem:[%s458_s1 + $0x38] sm:$0xff]   ;;  %v327_v15 = vld [vmem:[%s458_s1 + $0x40] sm:$0xff]  }
   0x6   :  { %63 = vperm.xlu1 %318, %v49_v8   ;;  %53 = vperm.xlu0 %317, %v47_v9   ;;  %v328_v16 = vld [vmem:[%s458_s1 + $0x48] sm:$0xff]   ;;  %v329_v17 = vld [vmem:[%s458_s1 + $0x50] sm:$0xff]   ;;  %v330_v18 = vld [vmem:[%s458_s1 + $0x58] sm:$0xff]  }
   0x7   :  { %171 = vmatpush1.bf16.msra.mxu0 %v320_v2  ;;  %305 = vmatpush1.bf16.msra.mxu1 %v320_v2  ;;  %v331_v19 = vld [vmem:[%s459_s0] ss:$8 sps:$4 sm:$0xff]   ;;  %v334_v20 = vld [vmem:[%s459_s0 + $0x10] ss:$8 sps:$4 sm:$0xff]  }
   0x8   :  { %172 = vmatprep.subr.bf16.mxu0 %v337_v0  ;;  %294 = vmatprep.subr.bf16.mxu1 %v337_v0 }
   0xa   :  { %68 = vperm.xlu1 %318, %v50_v11   ;;  %58 = vperm.xlu0 %317, %v48_v12  }
   0xb   :  { %173 = vmatpush1.bf16.msra.mxu0 %v321_v3  ;;  %306 = vmatpush1.bf16.msra.mxu1 %v321_v3 }
   0xc   :  { %174 = vmatprep.subr.bf16.mxu0 %v337_v0  ;;  %295 = vmatprep.subr.bf16.mxu1 %v337_v0 }
   0xf   :  { %175 = vmatpush1.bf16.msra.mxu0 %v322_v4  ;;  %307 = vmatpush1.bf16.msra.mxu1 %v322_v4 }
  0x10   :  { %176 = vmatprep.subr.bf16.mxu0 %v337_v0  ;;  %296 = vmatprep.subr.bf16.mxu1 %v337_v0 }
  0x13   :  { %177 = vmatpush1.bf16.msra.mxu0 %v323_v6  ;;  %308 = vmatpush1.bf16.msra.mxu1 %v323_v6 }
  0x14   :  { %178 = vmatprep.subr.bf16.mxu0 %v337_v0  ;;  %297 = vmatprep.subr.bf16.mxu1 %v337_v0 }
  0x17   :  { %179 = vmatpush1.bf16.msra.mxu0 %v324_v10  ;;  %309 = vmatpush1.bf16.msra.mxu1 %v324_v10 }
  0x18   :  { %180 = vmatprep.subr.bf16.mxu0 %v337_v0  ;;  %298 = vmatprep.subr.bf16.mxu1 %v337_v0 }
  0x1b   :  { %181 = vmatpush1.bf16.msra.mxu0 %v325_v13  ;;  %310 = vmatpush1.bf16.msra.mxu1 %v325_v13 }
  0x1c   :  { %182 = vmatprep.subr.bf16.mxu0 %v337_v0  ;;  %299 = vmatprep.subr.bf16.mxu1 %v337_v0 }
  0x1f   :  { %183 = vmatpush1.bf16.msra.mxu0 %v326_v14  ;;  %311 = vmatpush1.bf16.msra.mxu1 %v326_v14 }
  0x20   :  { %184 = vmatprep.subr.bf16.mxu0 %v337_v0  ;;  %300 = vmatprep.subr.bf16.mxu1 %v337_v0 }
  0x23   :  { %185 = vmatpush1.bf16.msra.mxu0 %v327_v15  ;;  %312 = vmatpush1.bf16.msra.mxu1 %v327_v15 }
  0x24   :  { %186 = vmatprep.subr.bf16.mxu0 %v337_v0  ;;  %301 = vmatprep.subr.bf16.mxu1 %v337_v0 }
  0x27   :  { %187 = vmatpush1.bf16.msra.mxu0 %v328_v16  ;;  %313 = vmatpush1.bf16.msra.mxu1 %v328_v16 }
  0x28   :  { %188 = vmatprep.subr.bf16.mxu0 %v337_v0  ;;  %302 = vmatprep.subr.bf16.mxu1 %v337_v0 }
  0x2b   :  { %189 = vmatpush1.bf16.msra.mxu0 %v329_v17  ;;  %314 = vmatpush1.bf16.msra.mxu1 %v329_v17 }
  0x2c   :  { %190 = vmatprep.subr.bf16.mxu0 %v337_v0  ;;  %303 = vmatprep.subr.bf16.mxu1 %v337_v0 }
  0x2f   :  { %191 = vmatpush1.bf16.msra.mxu0 %v330_v18  ;;  %315 = vmatpush1.bf16.msra.mxu1 %v330_v18 }
  0x32   :  { %201 = vmatmul.mubr.bf16.vlgmr.msra.gmra.mrb[0].mxu0 %v331_v19  ;;  %209 = vmatmul.mubr.bf16.vlgmr.msra.gmra.mrb[0].mxu1 %v334_v20 }
  0x85   :  { %v64_v21 = vpop.permute.xlu1 %63  ;;  %v54_v22 = vpop.permute.xlu0 %53 }
  0x89   :  { %v69_v23 = vpop.permute.xlu1 %68  ;;  %v59_v24 = vpop.permute.xlu0 %58 }
 0x105   :  { %v202_v25 = vpop.f32.mrb[0].mxu0  ;;  %v210_v26 = vpop.f32.mrb[0].mxu1 }
 0x106   :  { %v203_v27 = vadd.f32 %v202_v25, %v54_v22  ;;  %v211_v29 = vadd.f32 %v210_v26, %v64_v21  ;;  %v204_v30 = vpop.f32.mrb[1].mxu0  ;;  %v212_v31 = vpop.f32.mrb[1].mxu1 }
 0x107   :  { %v205_v32 = vpop.f32.mrb[2].mxu0  ;;  %v213_v33 = vpop.f32.mrb[2].mxu1 }
 0x108   :  { %v207_v34 = vpop.f32.mrb[3].mxu0  ;;  %v215_v35 = vpop.f32.mrb[3].mxu1  ;;  %v223_v36 = vmul.f32 %v222_v28, %v203_v27  ;;  %v225_v37 = vmul.f32 %v222_v28, %v211_v29  ;;  %v206_v38 = vadd.f32 %v205_v32, %v59_v24  ;;  %v214_v39 = vadd.f32 %v213_v33, %v69_v23 }
 0x109   :  { %vm218_vm1 = vcmp.ge.f32.partialorder %v203_v27, 0.0  ;;  %vm220_vm2 = vcmp.ge.f32.partialorder %v211_v29, 0.0 }
 0x10a   :  { %vm219_vm3 = vcmp.ge.f32.partialorder %v206_v38, 0.0  ;;  %v224_v40 = vmul.f32 %v222_v28, %v206_v38  ;;  %vm221_vm4 = vcmp.ge.f32.partialorder %v214_v39, 0.0  ;;  %v226_v41 = vmul.f32 %v222_v28, %v214_v39 }
 0x10b   :  { %v227_v42 = vsel %vm218_vm1, %v203_v27, %v223_v36  ;;  %v229_v43 = vsel %vm220_vm2, %v211_v29, %v225_v37 }
 0x10c   :  { %v228_v44 = vsel %vm219_vm3, %v206_v38, %v224_v40  ;;  %v230_v45 = vsel %vm221_vm4, %v214_v39, %v226_v41 }
 0x10d   :  { %v284_v46 = vpack.c.bf16 %v228_v44, %v227_v42  ;;  %v289_v47 = vpack.c.bf16 %v230_v45, %v229_v43 }
 0x10f   :  { %285 = vst [vmem:[%s462_s4] sm:$0xff] %v284_v46   ;;  %291 = vst [vmem:[%s462_s4 + $0x8] sm:$0xff] %v289_v47  }

// kernel: net7_forward.103
= control target key start
LH: loop header
LB: loop body
LE: loop exit
PB: predicated region body
PF: predicated region fallthrough
CT: control target
= control target key end

     0   :  { %v5179_v36 = vmov 1983009808   ;;  %v541_v38 = vlaneseq  ;;  %vm3140_vm0 = vcmask 785408   ;;  %vm3826_vm1 = vcmask 1041408   ;;  %s6820_s1 = inlined_call_operand.vmem [shape: bf16[2016,512], index: 1, kind: input, shape index: {}]   ;;  %s6821_s3 = inlined_call_operand.<no memory space> [shape: f32[1,1], index: 3, kind: input, shape index: {}]   ;;  %s6822_s0 = inlined_call_operand.vmem [shape: bf16[3,2016], index: 0, kind: input, shape index: {}]   ;;  %s6823_s2 = inlined_call_operand.vmem [shape: f32[3,1], index: 2, kind: input, shape index: {}]   ;;  %s6824_s4 = inlined_call_operand.vmem [shape: bf16[3,512], index: 4, kind: output, shape index: {}]  }
   0x1   :  { %v4419_v0 = vld [vmem:[%s6820_s1 + $0x4] ss:$16 sps:$4 sm:$0xff]   ;;  %v4421_v1 = vld [vmem:[%s6820_s1 + $0xc] ss:$16 sps:$4 sm:$0xff]   ;;  %v4423_v2 = vld [vmem:[%s6820_s1] ss:$16 sps:$4 sm:$0xff]   ;;  %v539_v37 = vunpack.c.l.s4 %v5179_v36 }
   0x2   :  { %3144 = vmatprep.subr.bf16.mxu0 %v4419_v0  ;;  %v4424_v3 = vld [vmem:[%s6820_s1 + $0x8] ss:$16 sps:$4 sm:$0xff]   ;;  %3472 = vmatprep.subr.bf16.mxu1 %v4421_v1  ;;  %v4425_v4 = vld [vmem:[%s6820_s1 + $0x24] ss:$16 sps:$4 sm:$0xff]   ;;  %v4427_v5 = vld [vmem:[%s6820_s1 + $0x2c] ss:$16 sps:$4 sm:$0xff]  }
   0x3   :  { %3145 = vmatpush1.bf16.msra.mxu0 %v4423_v2  ;;  %3473 = vmatpush1.bf16.msra.mxu1 %v4424_v3  ;;  %v4429_v6 = vld [vmem:[%s6820_s1 + $0x20] ss:$16 sps:$4 sm:$0xff]   ;;  %v4430_v7 = vld [vmem:[%s6820_s1 + $0x28] ss:$16 sps:$4 sm:$0xff]   ;;  %v4431_v8 = vld [vmem:[%s6820_s1 + $0x44] ss:$16 sps:$4 sm:$0xff]   ;;  %v540_v42 = vunpack.c.0.s8 %v539_v37 }
   0x4   :  { %3146 = vmatprep.subr.bf16.mxu0 %v4425_v4  ;;  %3474 = vmatprep.subr.bf16.mxu1 %v4427_v5  ;;  %v4433_v9 = vld [vmem:[%s6820_s1 + $0x4c] ss:$16 sps:$4 sm:$0xff]   ;;  %v4435_v10 = vld [vmem:[%s6820_s1 + $0x40] ss:$16 sps:$4 sm:$0xff]   ;;  %v4436_v11 = vld [vmem:[%s6820_s1 + $0x48] ss:$16 sps:$4 sm:$0xff]  }
   0x5   :  { %v4437_v12 = vld [vmem:[%s6820_s1 + $0x64] ss:$16 sps:$4 sm:$0xff]   ;;  %v4439_v13 = vld [vmem:[%s6820_s1 + $0x6c] ss:$16 sps:$4 sm:$0xff]   ;;  %v4441_v14 = vld [vmem:[%s6820_s1 + $0x60] ss:$16 sps:$4 sm:$0xff]  }
   0x6   :  { %v4442_v15 = vld [vmem:[%s6820_s1 + $0x68] ss:$16 sps:$4 sm:$0xff]   ;;  %v4443_v16 = vld [vmem:[%s6820_s1 + $0x84] ss:$16 sps:$4 sm:$0xff]   ;;  %v4445_v17 = vld [vmem:[%s6820_s1 + $0x8c] ss:$16 sps:$4 sm:$0xff]  }
   0x7   :  { %3147 = vmatpush1.bf16.msra.mxu0 %v4429_v6  ;;  %3475 = vmatpush1.bf16.msra.mxu1 %v4430_v7  ;;  %v4447_v18 = vld [vmem:[%s6820_s1 + $0x80] ss:$16 sps:$4 sm:$0xff]   ;;  %v4448_v19 = vld [vmem:[%s6820_s1 + $0x88] ss:$16 sps:$4 sm:$0xff]   ;;  %v4449_v20 = vld [vmem:[%s6820_s1 + $0xa4] ss:$16 sps:$4 sm:$0xff]  }
   0x8   :  { %3148 = vmatprep.subr.bf16.mxu0 %v4431_v8  ;;  %3476 = vmatprep.subr.bf16.mxu1 %v4433_v9  ;;  %v4451_v21 = vld [vmem:[%s6820_s1 + $0xac] ss:$16 sps:$4 sm:$0xff]   ;;  %v4453_v22 = vld [vmem:[%s6820_s1 + $0xa0] ss:$16 sps:$4 sm:$0xff]   ;;  %v4454_v23 = vld [vmem:[%s6820_s1 + $0xa8] ss:$16 sps:$4 sm:$0xff]  }
   0x9   :  { %v4455_v24 = vld [vmem:[%s6820_s1 + $0xc4] ss:$16 sps:$4 sm:$0xff]   ;;  %v4457_v25 = vld [vmem:[%s6820_s1 + $0xcc] ss:$16 sps:$4 sm:$0xff]   ;;  %v4459_v26 = vld [vmem:[%s6820_s1 + $0xc0] ss:$16 sps:$4 sm:$0xff]  }
   0xa   :  { %v4460_v27 = vld [vmem:[%s6820_s1 + $0xc8] ss:$16 sps:$4 sm:$0xff]   ;;  %v4461_v28 = vld [vmem:[%s6820_s1 + $0xe4] ss:$16 sps:$4 sm:$0xff]   ;;  %v4463_v29 = vld [vmem:[%s6820_s1 + $0xec] ss:$16 sps:$4 sm:$0xff]  }
   0xb   :  { %3149 = vmatpush1.bf16.msra.mxu0 %v4435_v10  ;;  %3477 = vmatpush1.bf16.msra.mxu1 %v4436_v11  ;;  %v4465_v30 = vld [vmem:[%s6820_s1 + $0xe0] ss:$16 sps:$4 sm:$0xff]   ;;  %v4466_v31 = vld [vmem:[%s6820_s1 + $0xe8] ss:$16 sps:$4 sm:$0xff]   ;;  %v4467_v32 = vld [vmem:[%s6820_s1 + $0x104] ss:$16 sps:$4 sm:$0xff]  }
   0xc   :  { %3150 = vmatprep.subr.bf16.mxu0 %v4437_v12  ;;  %3478 = vmatprep.subr.bf16.mxu1 %v4439_v13  ;;  %v4469_v33 = vld [vmem:[%s6820_s1 + $0x10c] ss:$16 sps:$4 sm:$0xff]   ;;  %v4471_v34 = vld [vmem:[%s6820_s1 + $0x100] ss:$16 sps:$4 sm:$0xff]   ;;  %v4472_v35 = vld [vmem:[%s6820_s1 + $0x108] ss:$16 sps:$4 sm:$0xff]  }
   0xd   :  { %v4473_v39 = vld [vmem:[%s6820_s1 + $0x124] ss:$16 sps:$4 sm:$0xff]   ;;  %v4475_v40 = vld [vmem:[%s6820_s1 + $0x12c] ss:$16 sps:$4 sm:$0xff]   ;;  %v4477_v41 = vld [vmem:[%s6820_s1 + $0x120] ss:$16 sps:$4 sm:$0xff]  }
   0xe   :  { %v542_v43 = vshrl.u32 %v541_v38, 7  ;;  %v4478_v44 = vld [vmem:[%s6820_s1 + $0x128] ss:$16 sps:$4 sm:$0xff]   ;;  %v4479_v45 = vld [vmem:[%s6820_s1 + $0x144] ss:$16 sps:$4 sm:$0xff]   ;;  %vm3829_vm3 = vcmask 1043458  }
   0xf   :  { %3151 = vmatpush1.bf16.msra.mxu0 %v4441_v14  ;;  %3479 = vmatpush1.bf16.msra.mxu1 %v4442_v15  ;;  %v4481_v46 = vld [vmem:[%s6820_s1 + $0x14c] ss:$16 sps:$4 sm:$0xff]   ;;  %v4483_v47 = vld [vmem:[%s6820_s1 + $0x140] ss:$16 sps:$4 sm:$0xff]   ;;  %v4484_v48 = vld [vmem:[%s6820_s1 + $0x148] ss:$16 sps:$4 sm:$0xff]  }
  0x10   :  { %3152 = vmatprep.subr.bf16.mxu0 %v4443_v16  ;;  %3480 = vmatprep.subr.bf16.mxu1 %v4445_v17  ;;  %v5338_v49 = vsub.s32 %v540_v42, %v542_v43  ;;  %v4485_v50 = vld [vmem:[%s6820_s1 + $0x164] ss:$16 sps:$4 sm:$0xff]   ;;  %v4487_v51 = vld [vmem:[%s6820_s1 + $0x16c] ss:$16 sps:$4 sm:$0xff]   ;;  %v4489_v53 = vld [vmem:[%s6820_s1 + $0x160] ss:$16 sps:$4 sm:$0xff]  }
  0x11   :  { %v19_v52 = vld [vmem:[%s6822_s0] sm:$0xff]  ;;  %v4490_v55 = vld [vmem:[%s6820_s1 + $0x168] ss:$16 sps:$4 sm:$0xff]   ;;  %v4493_v57 = vld [vmem:[%s6820_s1 + $0x18c] ss:$16 sps:$4 sm:$0xff]   ;;  %vm3833_vm7 = vcmask 1045508  }
  0x12   :  { %v544_v54 = vrot.slane %v19_v52, %v5338_v49  ;;  %v4491_v56 = vld [vmem:[%s6820_s1 + $0x184] ss:$16 sps:$4 sm:$0xff]   ;;  %v4495_v59 = vld [vmem:[%s6820_s1 + $0x180] ss:$16 sps:$4 sm:$0xff]   ;;  %v4496_v60 = vld [vmem:[%s6820_s1 + $0x188] ss:$16 sps:$4 sm:$0xff]   ;;  %v537_v7 = vcombine.high %v19_v52, %v19_v52 }
  0x13   :  { %3153 = vmatpush1.bf16.msra.mxu0 %v4447_v18  ;;  %3481 = vmatpush1.bf16.msra.mxu1 %v4448_v19  ;;  %v4497_v61 = vld [vmem:[%s6820_s1 + $0x1a4] ss:$16 sps:$4 sm:$0xff]   ;;  %v4499_v62 = vld [vmem:[%s6820_s1 + $0x1ac] ss:$16 sps:$4 sm:$0xff]   ;;  %v4501_v63 = vld [vmem:[%s6820_s1 + $0x1a0] ss:$16 sps:$4 sm:$0xff]  }
  0x14   :  { %3154 = vmatprep.subr.bf16.mxu0 %v4449_v20  ;;  %3482 = vmatprep.subr.bf16.mxu1 %v4451_v21  ;;  %v552_v58 = vcombine.high %v544_v54, %v544_v54  ;;  %v4502_v0 = vld [vmem:[%s6820_s1 + $0x1a8] ss:$16 sps:$4 sm:$0xff]   ;;  %v4503_v1 = vld [vmem:[%s6820_s1 + $0x1c4] ss:$16 sps:$4 sm:$0xff]   ;;  %v4505_v2 = vld [vmem:[%s6820_s1 + $0x1cc] ss:$16 sps:$4 sm:$0xff]   ;;  %v5411_v12 = vrot.slane %v537_v7, %v5338_v49 }
  0x15   :  { %v4507_v3 = vld [vmem:[%s6820_s1 + $0x1c0] ss:$16 sps:$4 sm:$0xff]   ;;  %v4508_v4 = vld [vmem:[%s6820_s1 + $0x1c8] ss:$16 sps:$4 sm:$0xff]   ;;  %v4509_v5 = vld [vmem:[%s6820_s1 + $0x1e4] ss:$16 sps:$4 sm:$0xff]  }
  0x16   :  { %3176 = vmatprep.mubr.bf16.mxu0 %v552_v58  ;;  %3504 = vmatprep.mubr.bf16.mxu1 %v552_v58  ;;  %v4511_v6 = vld [vmem:[%s6820_s1 + $0x1ec] ss:$16 sps:$4 sm:$0xff]   ;;  %v4513_v8 = vld [vmem:[%s6820_s1 + $0x1e0] ss:$16 sps:$4 sm:$0xff]   ;;  %v4514_v9 = vld [vmem:[%s6820_s1 + $0x1e8] ss:$16 sps:$4 sm:$0xff]   ;;  %v553_v17 = vcombine.high %v5411_v12, %v5411_v12 }
  0x17   :  { %3155 = vmatpush1.bf16.msra.mxu0 %v4453_v22  ;;  %3483 = vmatpush1.bf16.msra.mxu1 %v4454_v23  ;;  %v4518_v10 = vld [vmem:[%s6820_s1 + $0x204] ss:$16 sps:$4 sm:$0xff]   ;;  %v4521_v11 = vld [vmem:[%s6820_s1 + $0x20c] ss:$16 sps:$4 sm:$0xff]   ;;  %v4516_v13 = vld [vmem:[%s6820_s1 + $0x200] ss:$16 sps:$4 sm:$0xff]  }
  0x18   :  { %3156 = vmatprep.subr.bf16.mxu0 %v4455_v24  ;;  %3484 = vmatprep.subr.bf16.mxu1 %v4457_v25  ;;  %v4519_v14 = vld [vmem:[%s6820_s1 + $0x208] ss:$16 sps:$4 sm:$0xff]   ;;  %v4524_v15 = vld [vmem:[%s6820_s1 + $0x224] ss:$16 sps:$4 sm:$0xff]   ;;  %v4527_v16 = vld [vmem:[%s6820_s1 + $0x22c] ss:$16 sps:$4 sm:$0xff]  }
  0x19   :  { %v4522_v18 = vld [vmem:[%s6820_s1 + $0x220] ss:$16 sps:$4 sm:$0xff]   ;;  %v4525_v19 = vld [vmem:[%s6820_s1 + $0x228] ss:$16 sps:$4 sm:$0xff]   ;;  %v4530_v20 = vld [vmem:[%s6820_s1 + $0x244] ss:$16 sps:$4 sm:$0xff]  }
  0x1a   :  { %v4533_v21 = vld [vmem:[%s6820_s1 + $0x24c] ss:$16 sps:$4 sm:$0xff]   ;;  %v4528_v22 = vld [vmem:[%s6820_s1 + $0x240] ss:$16 sps:$4 sm:$0xff]   ;;  %v4531_v23 = vld [vmem:[%s6820_s1 + $0x248] ss:$16 sps:$4 sm:$0xff]  }
  0x1b   :  { %3157 = vmatpush1.bf16.msra.mxu0 %v4459_v26  ;;  %3485 = vmatpush1.bf16.msra.mxu1 %v4460_v27  ;;  %v4536_v24 = vld [vmem:[%s6820_s1 + $0x264] ss:$16 sps:$4 sm:$0xff]   ;;  %v4539_v25 = vld [vmem:[%s6820_s1 + $0x26c] ss:$16 sps:$4 sm:$0xff]   ;;  %v4534_v26 = vld [vmem:[%s6820_s1 + $0x260] ss:$16 sps:$4 sm:$0xff]  }
  0x1c   :  { %3158 = vmatprep.subr.bf16.mxu0 %v4461_v28  ;;  %3486 = vmatprep.subr.bf16.mxu1 %v4463_v29  ;;  %v4537_v27 = vld [vmem:[%s6820_s1 + $0x268] ss:$16 sps:$4 sm:$0xff]   ;;  %v4542_v28 = vld [vmem:[%s6820_s1 + $0x284] ss:$16 sps:$4 sm:$0xff]   ;;  %v4545_v29 = vld [vmem:[%s6820_s1 + $0x28c] ss:$16 sps:$4 sm:$0xff]  }
  0x1d   :  { %v4554_v36 = vld [vmem:[%s6820_s1 + $0x2c4] ss:$16 sps:$4 sm:$0xff]   ;;  %v4557_v37 = vld [vmem:[%s6820_s1 + $0x2cc] ss:$16 sps:$4 sm:$0xff]   ;;  %v4552_v38 = vld [vmem:[%s6820_s1 + $0x2c0] ss:$16 sps:$4 sm:$0xff]  }
  0x1e   :  { %v4558_v42 = vld [vmem:[%s6820_s1 + $0x2e0] ss:$16 sps:$4 sm:$0xff]   ;;  %v4561_v43 = vld [vmem:[%s6820_s1 + $0x2e8] ss:$16 sps:$4 sm:$0xff]   ;;  %v4587_v58 = vld [vmem:[%s6820_s1 + $0x36c] ss:$16 sps:$4 sm:$0xff]  }
  0x1f   :  { %3159 = vmatpush1.bf16.msra.mxu0 %v4465_v30  ;;  %3487 = vmatpush1.bf16.msra.mxu1 %v4466_v31  ;;  %v4540_v30 = vld [vmem:[%s6820_s1 + $0x280] ss:$16 sps:$4 sm:$0xff]   ;;  %v4543_v31 = vld [vmem:[%s6820_s1 + $0x288] ss:$16 sps:$4 sm:$0xff]   ;;  %vm3827_vm2 = vsmask.f32 1280 }
  0x20   :  { %3160 = vmatprep.subr.bf16.mxu0 %v4467_v32  ;;  %3488 = vmatprep.subr.bf16.mxu1 %v4469_v33  ;;  %v4548_v32 = vld [vmem:[%s6820_s1 + $0x2a4] ss:$16 sps:$4 sm:$0xff]   ;;  %v4551_v33 = vld [vmem:[%s6820_s1 + $0x2ac] ss:$16 sps:$4 sm:$0xff]   ;;  %v4573_v52 = vld [vmem:[%s6820_s1 + $0x328] ss:$16 sps:$4 sm:$0xff]  }
  0x21   :  { %v4600_v7 = vld [vmem:[%s6820_s1 + $0x3c0] ss:$16 sps:$4 sm:$0xff]   ;;  %vm3830_vm4 = vsmask.f32 3328  ;;  %vm6800_vm5 = vmand %vm3826_vm1, %vm3827_vm2  ;;  %vm3834_vm8 = vsmask.f32 5376 }
  0x22   :  { %vm6804_vm6 = vmand %vm3829_vm3, %vm3830_vm4  ;;  %vm3837_vm11 = vcmask 1047558   ;;  %vm3838_vm12 = vsmask.f32 7424 }
  0x23   :  { %3161 = vmatpush1.bf16.msra.mxu0 %v4471_v34  ;;  %3489 = vmatpush1.bf16.msra.mxu1 %v4472_v35  ;;  %v4546_v34 = vld [vmem:[%s6820_s1 + $0x2a0] ss:$16 sps:$4 sm:$0xff]   ;;  %v4549_v35 = vld [vmem:[%s6820_s1 + $0x2a8] ss:$16 sps:$4 sm:$0xff]   ;;  %vm3832_vm9 = vmor %vm6804_vm6, %vm6800_vm5 }
  0x24   :  { %3162 = vmatprep.subr.bf16.mxu0 %v4473_v39  ;;  %3490 = vmatprep.subr.bf16.mxu1 %v4475_v40  ;;  %v4555_v39 = vld [vmem:[%s6820_s1 + $0x2c8] ss:$16 sps:$4 sm:$0xff]   ;;  %v4560_v40 = vld [vmem:[%s6820_s1 + $0x2e4] ss:$16 sps:$4 sm:$0xff]   ;;  %vm3835_vm10 = vmand %vm3833_vm7, %vm3834_vm8 }
  0x25   :  { %vm3836_vm13 = vmor %vm3835_vm10, %vm3832_vm9 }
  0x26   :  { %vm3839_vm14 = vmand %vm3837_vm11, %vm3838_vm12 }
  0x27   :  { %3163 = vmatpush1.bf16.msra.mxu0 %v4477_v41  ;;  %3491 = vmatpush1.bf16.msra.mxu1 %v4478_v44  ;;  %v4563_v41 = vld [vmem:[%s6820_s1 + $0x2ec] ss:$16 sps:$4 sm:$0xff]   ;;  %v4566_v44 = vld [vmem:[%s6820_s1 + $0x304] ss:$16 sps:$4 sm:$0xff]   ;;  %vm3840_vm15 = vmor %vm3839_vm14, %vm3836_vm13 }
  0x28   :  { %3164 = vmatprep.subr.bf16.mxu0 %v4479_v45  ;;  %3492 = vmatprep.subr.bf16.mxu1 %v4481_v46  ;;  %v4569_v45 = vld [vmem:[%s6820_s1 + $0x30c] ss:$16 sps:$4 sm:$0xff]   ;;  %v4564_v46 = vld [vmem:[%s6820_s1 + $0x300] ss:$16 sps:$4 sm:$0xff]  }
  0x2b   :  { %3165 = vmatpush1.bf16.msra.mxu0 %v4483_v47  ;;  %3493 = vmatpush1.bf16.msra.mxu1 %v4484_v48  ;;  %v4567_v47 = vld [vmem:[%s6820_s1 + $0x308] ss:$16 sps:$4 sm:$0xff]   ;;  %v4572_v48 = vld [vmem:[%s6820_s1 + $0x324] ss:$16 sps:$4 sm:$0xff]  }
  0x2c   :  { %3166 = vmatprep.subr.bf16.mxu0 %v4485_v50  ;;  %3494 = vmatprep.subr.bf16.mxu1 %v4487_v51  ;;  %v4575_v50 = vld [vmem:[%s6820_s1 + $0x32c] ss:$16 sps:$4 sm:$0xff]   ;;  %v4570_v51 = vld [vmem:[%s6820_s1 + $0x320] ss:$16 sps:$4 sm:$0xff]  }
  0x2f   :  { %3167 = vmatpush1.bf16.msra.mxu0 %v4489_v53  ;;  %3495 = vmatpush1.bf16.msra.mxu1 %v4490_v55  ;;  %v4578_v53 = vld [vmem:[%s6820_s1 + $0x344] ss:$16 sps:$4 sm:$0xff]   ;;  %v4576_v55 = vld [vmem:[%s6820_s1 + $0x340] ss:$16 sps:$4 sm:$0xff]  }
  0x30   :  { %3168 = vmatprep.subr.bf16.mxu0 %v4491_v56  ;;  %3496 = vmatprep.subr.bf16.mxu1 %v4493_v57  ;;  %v4579_v56 = vld [vmem:[%s6820_s1 + $0x348] ss:$16 sps:$4 sm:$0xff]   ;;  %v4584_v57 = vld [vmem:[%s6820_s1 + $0x364] ss:$16 sps:$4 sm:$0xff]  }
  0x33   :  { %3169 = vmatpush1.bf16.msra.mxu0 %v4495_v59  ;;  %3497 = vmatpush1.bf16.msra.mxu1 %v4496_v60  ;;  %v4582_v59 = vld [vmem:[%s6820_s1 + $0x360] ss:$16 sps:$4 sm:$0xff]   ;;  %v4585_v60 = vld [vmem:[%s6820_s1 + $0x368] ss:$16 sps:$4 sm:$0xff]  }
  0x34   :  { %3170 = vmatprep.subr.bf16.mxu0 %v4497_v61  ;;  %3498 = vmatprep.subr.bf16.mxu1 %v4499_v62  ;;  %v4590_v61 = vld [vmem:[%s6820_s1 + $0x384] ss:$16 sps:$4 sm:$0xff]   ;;  %v4593_v62 = vld [vmem:[%s6820_s1 + $0x38c] ss:$16 sps:$4 sm:$0xff]  }
  0x37   :  { %3171 = vmatpush1.bf16.msra.mxu0 %v4501_v63  ;;  %3499 = vmatpush1.bf16.msra.mxu1 %v4502_v0  ;;  %v4588_v63 = vld [vmem:[%s6820_s1 + $0x380] ss:$16 sps:$4 sm:$0xff]   ;;  %v4591_v0 = vld [vmem:[%s6820_s1 + $0x388] ss:$16 sps:$4 sm:$0xff]  }
  0x38   :  { %3172 = vmatprep.subr.bf16.mxu0 %v4503_v1  ;;  %3500 = vmatprep.subr.bf16.mxu1 %v4505_v2  ;;  %v4596_v1 = vld [vmem:[%s6820_s1 + $0x3a4] ss:$16 sps:$4 sm:$0xff]   ;;  %v4599_v2 = vld [vmem:[%s6820_s1 + $0x3ac] ss:$16 sps:$4 sm:$0xff]  }
  0x3b   :  { %3173 = vmatpush1.bf16.msra.mxu0 %v4507_v3  ;;  %3501 = vmatpush1.bf16.msra.mxu1 %v4508_v4  ;;  %v4594_v3 = vld [vmem:[%s6820_s1 + $0x3a0] ss:$16 sps:$4 sm:$0xff]   ;;  %v4597_v4 = vld [vmem:[%s6820_s1 + $0x3a8] ss:$16 sps:$4 sm:$0xff]  }
  0x3c   :  { %3174 = vmatprep.subr.bf16.mxu0 %v4509_v5  ;;  %3502 = vmatprep.subr.bf16.mxu1 %v4511_v6  ;;  %v4602_v5 = vld [vmem:[%s6820_s1 + $0x3c4] ss:$16 sps:$4 sm:$0xff]   ;;  %v4605_v6 = vld [vmem:[%s6820_s1 + $0x3cc] ss:$16 sps:$4 sm:$0xff]  }
  0x3f   :  { %3175 = vmatpush1.bf16.msra.mxu0 %v4513_v8  ;;  %3503 = vmatpush1.bf16.msra.mxu1 %v4514_v9  ;;  %v4603_v8 = vld [vmem:[%s6820_s1 + $0x3c8] ss:$16 sps:$4 sm:$0xff]   ;;  %v4608_v9 = vld [vmem:[%s6820_s1 + $0x3e4] ss:$16 sps:$4 sm:$0xff]  }
  0x40   :  { %3185 = vmatprep.subr.bf16.mxu0 %v4518_v10  ;;  %3513 = vmatprep.subr.bf16.mxu1 %v4521_v11  ;;  %v4611_v10 = vld [vmem:[%s6820_s1 + $0x3ec] ss:$16 sps:$4 sm:$0xff]   ;;  %v4606_v11 = vld [vmem:[%s6820_s1 + $0x3e0] ss:$16 sps:$4 sm:$0xff]  }
  0x42   :  { %3177 = vmatmul.mubr.bf16.vlgmr.msra.gmra.mrb[0].mxu0 %v544_v54  ;;  %3505 = vmatmul.mubr.bf16.vlgmr.msra.gmra.mrb[0].mxu1 %v544_v54  ;;  %v4581_v54 = vld [vmem:[%s6820_s1 + $0x34c] ss:$16 sps:$4 sm:$0xff]  }
  0x43   :  { %3186 = vmatpush1.bf16.msra.mxu0 %v4516_v13  ;;  %3514 = vmatpush1.bf16.msra.mxu1 %v4519_v14  ;;  %v4609_v13 = vld [vmem:[%s6820_s1 + $0x3e8] ss:$16 sps:$4 sm:$0xff]   ;;  %v4614_v14 = vld [vmem:[%s6820_s1 + $0x404] ss:$16 sps:$4 sm:$0xff]  }
  0x44   :  { %3187 = vmatprep.subr.bf16.mxu0 %v4524_v15  ;;  %3515 = vmatprep.subr.bf16.mxu1 %v4527_v16  ;;  %v4617_v15 = vld [vmem:[%s6820_s1 + $0x40c] ss:$16 sps:$4 sm:$0xff]   ;;  %v4612_v16 = vld [vmem:[%s6820_s1 + $0x400] ss:$16 sps:$4 sm:$0xff]  }
  0x45   :  { %3217 = vmatprep.mubr.bf16.mxu0 %v553_v17  ;;  %3545 = vmatprep.mubr.bf16.mxu1 %v553_v17  ;;  %v4615_v17 = vld [vmem:[%s6820_s1 + $0x408] ss:$16 sps:$4 sm:$0xff]  }
  0x47   :  { %3188 = vmatpush1.bf16.msra.mxu0 %v4522_v18  ;;  %3516 = vmatpush1.bf16.msra.mxu1 %v4525_v19  ;;  %v5616_v18 = vld [vmem:[%s6822_s0 + $0x8] sm:$0xff]  ;;  %v4620_v19 = vld [vmem:[%s6820_s1 + $0x424] ss:$16 sps:$4 sm:$0xff]  }
  0x48   :  { %3189 = vmatprep.subr.bf16.mxu0 %v4530_v20  ;;  %3517 = vmatprep.subr.bf16.mxu1 %v4533_v21  ;;  %v4623_v20 = vld [vmem:[%s6820_s1 + $0x42c] ss:$16 sps:$4 sm:$0xff]   ;;  %v5626_v21 = vrot.slane %v5616_v18, %v5338_v49 }
  0x4b   :  { %3190 = vmatpush1.bf16.msra.mxu0 %v4528_v22  ;;  %3518 = vmatpush1.bf16.msra.mxu1 %v4531_v23  ;;  %v569_v22 = vcombine.high %v5626_v21, %v5626_v21  ;;  %v4618_v23 = vld [vmem:[%s6820_s1 + $0x420] ss:$16 sps:$4 sm:$0xff]  }
  0x4c   :  { %3191 = vmatprep.subr.bf16.mxu0 %v4536_v24  ;;  %3519 = vmatprep.subr.bf16.mxu1 %v4539_v25  ;;  %v4621_v24 = vld [vmem:[%s6820_s1 + $0x428] ss:$16 sps:$4 sm:$0xff]   ;;  %v4626_v25 = vld [vmem:[%s6820_s1 + $0x444] ss:$16 sps:$4 sm:$0xff]  }
  0x4f   :  { %3192 = vmatpush1.bf16.msra.mxu0 %v4534_v26  ;;  %3520 = vmatpush1.bf16.msra.mxu1 %v4537_v27  ;;  %v4624_v26 = vld [vmem:[%s6820_s1 + $0x440] ss:$16 sps:$4 sm:$0xff]   ;;  %v4627_v27 = vld [vmem:[%s6820_s1 + $0x448] ss:$16 sps:$4 sm:$0xff]  }
  0x50   :  { %3193 = vmatprep.subr.bf16.mxu0 %v4542_v28  ;;  %3521 = vmatprep.subr.bf16.mxu1 %v4545_v29  ;;  %v4632_v28 = vld [vmem:[%s6820_s1 + $0x464] ss:$16 sps:$4 sm:$0xff]   ;;  %v4635_v29 = vld [vmem:[%s6820_s1 + $0x46c] ss:$16 sps:$4 sm:$0xff]  }
  0x53   :  { %3194 = vmatpush1.bf16.msra.mxu0 %v4540_v30  ;;  %3522 = vmatpush1.bf16.msra.mxu1 %v4543_v31  ;;  %v4630_v30 = vld [vmem:[%s6820_s1 + $0x460] ss:$16 sps:$4 sm:$0xff]   ;;  %v4633_v31 = vld [vmem:[%s6820_s1 + $0x468] ss:$16 sps:$4 sm:$0xff]  }
  0x54   :  { %3195 = vmatprep.subr.bf16.mxu0 %v4548_v32  ;;  %3523 = vmatprep.subr.bf16.mxu1 %v4551_v33  ;;  %v4638_v32 = vld [vmem:[%s6820_s1 + $0x484] ss:$16 sps:$4 sm:$0xff]   ;;  %v4641_v33 = vld [vmem:[%s6820_s1 + $0x48c] ss:$16 sps:$4 sm:$0xff]  }
  0x57   :  { %3196 = vmatpush1.bf16.msra.mxu0 %v4546_v34  ;;  %3524 = vmatpush1.bf16.msra.mxu1 %v4549_v35  ;;  %v4636_v34 = vld [vmem:[%s6820_s1 + $0x480] ss:$16 sps:$4 sm:$0xff]   ;;  %v4639_v35 = vld [vmem:[%s6820_s1 + $0x488] ss:$16 sps:$4 sm:$0xff]  }
  0x58   :  { %3197 = vmatprep.subr.bf16.mxu0 %v4554_v36  ;;  %3525 = vmatprep.subr.bf16.mxu1 %v4557_v37  ;;  %v4644_v36 = vld [vmem:[%s6820_s1 + $0x4a4] ss:$16 sps:$4 sm:$0xff]   ;;  %v4647_v37 = vld [vmem:[%s6820_s1 + $0x4ac] ss:$16 sps:$4 sm:$0xff]  }
  0x5b   :  { %3198 = vmatpush1.bf16.msra.mxu0 %v4552_v38  ;;  %3526 = vmatpush1.bf16.msra.mxu1 %v4555_v39  ;;  %v4642_v38 = vld [vmem:[%s6820_s1 + $0x4a0] ss:$16 sps:$4 sm:$0xff]   ;;  %v4645_v39 = vld [vmem:[%s6820_s1 + $0x4a8] ss:$16 sps:$4 sm:$0xff]  }
  0x5c   :  { %3199 = vmatprep.subr.bf16.mxu0 %v4560_v40  ;;  %3527 = vmatprep.subr.bf16.mxu1 %v4563_v41  ;;  %v4650_v40 = vld [vmem:[%s6820_s1 + $0x4c4] ss:$16 sps:$4 sm:$0xff]   ;;  %v4653_v41 = vld [vmem:[%s6820_s1 + $0x4cc] ss:$16 sps:$4 sm:$0xff]  }
  0x5f   :  { %3200 = vmatpush1.bf16.msra.mxu0 %v4558_v42  ;;  %3528 = vmatpush1.bf16.msra.mxu1 %v4561_v43  ;;  %v4648_v42 = vld [vmem:[%s6820_s1 + $0x4c0] ss:$16 sps:$4 sm:$0xff]   ;;  %v4651_v43 = vld [vmem:[%s6820_s1 + $0x4c8] ss:$16 sps:$4 sm:$0xff]  }
  0x60   :  { %3201 = vmatprep.subr.bf16.mxu0 %v4566_v44  ;;  %3529 = vmatprep.subr.bf16.mxu1 %v4569_v45  ;;  %v4656_v44 = vld [vmem:[%s6820_s1 + $0x4e4] ss:$16 sps:$4 sm:$0xff]   ;;  %v4659_v45 = vld [vmem:[%s6820_s1 + $0x4ec] ss:$16 sps:$4 sm:$0xff]  }
  0x63   :  { %3202 = vmatpush1.bf16.msra.mxu0 %v4564_v46  ;;  %3530 = vmatpush1.bf16.msra.mxu1 %v4567_v47  ;;  %v4654_v46 = vld [vmem:[%s6820_s1 + $0x4e0] ss:$16 sps:$4 sm:$0xff]   ;;  %v4657_v47 = vld [vmem:[%s6820_s1 + $0x4e8] ss:$16 sps:$4 sm:$0xff]  }
  0x64   :  { %3203 = vmatprep.subr.bf16.mxu0 %v4572_v48  ;;  %3531 = vmatprep.subr.bf16.mxu1 %v4575_v50  ;;  %v4662_v48 = vld [vmem:[%s6820_s1 + $0x504] ss:$16 sps:$4 sm:$0xff]   ;;  %v4665_v50 = vld [vmem:[%s6820_s1 + $0x50c] ss:$16 sps:$4 sm:$0xff]  }
  0x67   :  { %3204 = vmatpush1.bf16.msra.mxu0 %v4570_v51  ;;  %3532 = vmatpush1.bf16.msra.mxu1 %v4573_v52  ;;  %v4660_v51 = vld [vmem:[%s6820_s1 + $0x500] ss:$16 sps:$4 sm:$0xff]   ;;  %v4663_v52 = vld [vmem:[%s6820_s1 + $0x508] ss:$16 sps:$4 sm:$0xff]  }
  0x68   :  { %3205 = vmatprep.subr.bf16.mxu0 %v4578_v53  ;;  %3533 = vmatprep.subr.bf16.mxu1 %v4581_v54  ;;  %v4668_v53 = vld [vmem:[%s6820_s1 + $0x524] ss:$16 sps:$4 sm:$0xff]   ;;  %v4671_v54 = vld [vmem:[%s6820_s1 + $0x52c] ss:$16 sps:$4 sm:$0xff]  }
  0x6b   :  { %3206 = vmatpush1.bf16.msra.mxu0 %v4576_v55  ;;  %3534 = vmatpush1.bf16.msra.mxu1 %v4579_v56  ;;  %v4666_v55 = vld [vmem:[%s6820_s1 + $0x520] ss:$16 sps:$4 sm:$0xff]   ;;  %v4669_v56 = vld [vmem:[%s6820_s1 + $0x528] ss:$16 sps:$4 sm:$0xff]  }
  0x6c   :  { %3207 = vmatprep.subr.bf16.mxu0 %v4584_v57  ;;  %3535 = vmatprep.subr.bf16.mxu1 %v4587_v58  ;;  %v4674_v57 = vld [vmem:[%s6820_s1 + $0x544] ss:$16 sps:$4 sm:$0xff]   ;;  %v4677_v58 = vld [vmem:[%s6820_s1 + $0x54c] ss:$16 sps:$4 sm:$0xff]  }
  0x6f   :  { %3208 = vmatpush1.bf16.msra.mxu0 %v4582_v59  ;;  %3536 = vmatpush1.bf16.msra.mxu1 %v4585_v60  ;;  %v4672_v59 = vld [vmem:[%s6820_s1 + $0x540] ss:$16 sps:$4 sm:$0xff]   ;;  %v4675_v60 = vld [vmem:[%s6820_s1 + $0x548] ss:$16 sps:$4 sm:$0xff]  }
  0x70   :  { %3209 = vmatprep.subr.bf16.mxu0 %v4590_v61  ;;  %3537 = vmatprep.subr.bf16.mxu1 %v4593_v62  ;;  %v4680_v61 = vld [vmem:[%s6820_s1 + $0x564] ss:$16 sps:$4 sm:$0xff]   ;;  %v4683_v62 = vld [vmem:[%s6820_s1 + $0x56c] ss:$16 sps:$4 sm:$0xff]  }
  0x73   :  { %3210 = vmatpush1.bf16.msra.mxu0 %v4588_v63  ;;  %3538 = vmatpush1.bf16.msra.mxu1 %v4591_v0  ;;  %v4678_v63 = vld [vmem:[%s6820_s1 + $0x560] ss:$16 sps:$4 sm:$0xff]   ;;  %v4681_v0 = vld [vmem:[%s6820_s1 + $0x568] ss:$16 sps:$4 sm:$0xff]  }
  0x74   :  { %3211 = vmatprep.subr.bf16.mxu0 %v4596_v1  ;;  %3539 = vmatprep.subr.bf16.mxu1 %v4599_v2  ;;  %v4686_v1 = vld [vmem:[%s6820_s1 + $0x584] ss:$16 sps:$4 sm:$0xff]   ;;  %v4689_v2 = vld [vmem:[%s6820_s1 + $0x58c] ss:$16 sps:$4 sm:$0xff]  }
  0x77   :  { %3212 = vmatpush1.bf16.msra.mxu0 %v4594_v3  ;;  %3540 = vmatpush1.bf16.msra.mxu1 %v4597_v4  ;;  %v4684_v3 = vld [vmem:[%s6820_s1 + $0x580] ss:$16 sps:$4 sm:$0xff]   ;;  %v4687_v4 = vld [vmem:[%s6820_s1 + $0x588] ss:$16 sps:$4 sm:$0xff]  }
  0x78   :  { %3213 = vmatprep.subr.bf16.mxu0 %v4602_v5  ;;  %3541 = vmatprep.subr.bf16.mxu1 %v4605_v6  ;;  %v4692_v5 = vld [vmem:[%s6820_s1 + $0x5a4] ss:$16 sps:$4 sm:$0xff]   ;;  %v4695_v6 = vld [vmem:[%s6820_s1 + $0x5ac] ss:$16 sps:$4 sm:$0xff]  }
  0x7b   :  { %3214 = vmatpush1.bf16.msra.mxu0 %v4600_v7  ;;  %3542 = vmatpush1.bf16.msra.mxu1 %v4603_v8  ;;  %v4690_v7 = vld [vmem:[%s6820_s1 + $0x5a0] ss:$16 sps:$4 sm:$0xff]   ;;  %v4693_v8 = vld [vmem:[%s6820_s1 + $0x5a8] ss:$16 sps:$4 sm:$0xff]  }
  0x7c   :  { %3215 = vmatprep.subr.bf16.mxu0 %v4608_v9  ;;  %3543 = vmatprep.subr.bf16.mxu1 %v4611_v10  ;;  %v4698_v9 = vld [vmem:[%s6820_s1 + $0x5c4] ss:$16 sps:$4 sm:$0xff]   ;;  %v4701_v10 = vld [vmem:[%s6820_s1 + $0x5cc] ss:$16 sps:$4 sm:$0xff]  }
  0x7f   :  { %3216 = vmatpush1.bf16.msra.mxu0 %v4606_v11  ;;  %3544 = vmatpush1.bf16.msra.mxu1 %v4609_v13  ;;  %v4696_v11 = vld [vmem:[%s6820_s1 + $0x5c0] ss:$16 sps:$4 sm:$0xff]   ;;  %v4699_v13 = vld [vmem:[%s6820_s1 + $0x5c8] ss:$16 sps:$4 sm:$0xff]  }
  0x80   :  { %3226 = vmatprep.subr.bf16.mxu0 %v4614_v14  ;;  %3554 = vmatprep.subr.bf16.mxu1 %v4617_v15  ;;  %v4704_v14 = vld [vmem:[%s6820_s1 + $0x5e4] ss:$16 sps:$4 sm:$0xff]   ;;  %v4707_v15 = vld [vmem:[%s6820_s1 + $0x5ec] ss:$16 sps:$4 sm:$0xff]  }
  0x82   :  { %3218 = vmatmul.mubr.bf16.vlgmr.msra.gmra.mrb[0].mxu0 %v5411_v12  ;;  %3546 = vmatmul.mubr.bf16.vlgmr.msra.gmra.mrb[0].mxu1 %v5411_v12  ;;  %v4629_v12 = vld [vmem:[%s6820_s1 + $0x44c] ss:$16 sps:$4 sm:$0xff]  }
  0x83   :  { %3227 = vmatpush1.bf16.msra.mxu0 %v4612_v16  ;;  %3555 = vmatpush1.bf16.msra.mxu1 %v4615_v17  ;;  %v554_v16 = vcombine.high %v5616_v18, %v5616_v18  ;;  %v4702_v17 = vld [vmem:[%s6820_s1 + $0x5e0] ss:$16 sps:$4 sm:$0xff]   ;;  %v4713_v18 = vld [vmem:[%s6820_s1 + $0x60c] ss:$16 sps:$4 sm:$0xff]  }
  0x84   :  { %3228 = vmatprep.subr.bf16.mxu0 %v4620_v19  ;;  %3556 = vmatprep.subr.bf16.mxu1 %v4623_v20  ;;  %v4705_v19 = vld [vmem:[%s6820_s1 + $0x5e8] ss:$16 sps:$4 sm:$0xff]   ;;  %v4710_v20 = vld [vmem:[%s6820_s1 + $0x604] ss:$16 sps:$4 sm:$0xff]  }
  0x85   :  { %3258 = vmatprep.mubr.bf16.mxu0 %v569_v22  ;;  %3586 = vmatprep.mubr.bf16.mxu1 %v569_v22  ;;  %v5815_v22 = vrot.slane %v554_v16, %v5338_v49  ;;  %v4792_v16 = vld [vmem:[%s6820_s1 + $0x7c0] ss:$16 sps:$4 sm:$0xff]  }
  0x87   :  { %3229 = vmatpush1.bf16.msra.mxu0 %v4618_v23  ;;  %3557 = vmatpush1.bf16.msra.mxu1 %v4621_v24  ;;  %v4708_v23 = vld [vmem:[%s6820_s1 + $0x600] ss:$16 sps:$4 sm:$0xff]   ;;  %v4711_v24 = vld [vmem:[%s6820_s1 + $0x608] ss:$16 sps:$4 sm:$0xff]  }
  0x88   :  { %3230 = vmatprep.subr.bf16.mxu0 %v4626_v25  ;;  %3558 = vmatprep.subr.bf16.mxu1 %v4629_v12  ;;  %v4716_v25 = vld [vmem:[%s6820_s1 + $0x624] ss:$16 sps:$4 sm:$0xff]   ;;  %v4719_v12 = vld [vmem:[%s6820_s1 + $0x62c] ss:$16 sps:$4 sm:$0xff]  }
  0x8b   :  { %3231 = vmatpush1.bf16.msra.mxu0 %v4624_v26  ;;  %3559 = vmatpush1.bf16.msra.mxu1 %v4627_v27  ;;  %v570_v26 = vcombine.high %v5815_v22, %v5815_v22  ;;  %v4714_v27 = vld [vmem:[%s6820_s1 + $0x620] ss:$16 sps:$4 sm:$0xff]  }
  0x8c   :  { %3232 = vmatprep.subr.bf16.mxu0 %v4632_v28  ;;  %3560 = vmatprep.subr.bf16.mxu1 %v4635_v29  ;;  %v4717_v28 = vld [vmem:[%s6820_s1 + $0x628] ss:$16 sps:$4 sm:$0xff]   ;;  %v4722_v29 = vld [vmem:[%s6820_s1 + $0x644] ss:$16 sps:$4 sm:$0xff]  }
  0x8f   :  { %3233 = vmatpush1.bf16.msra.mxu0 %v4630_v30  ;;  %3561 = vmatpush1.bf16.msra.mxu1 %v4633_v31  ;;  %v4720_v30 = vld [vmem:[%s6820_s1 + $0x640] ss:$16 sps:$4 sm:$0xff]   ;;  %v4723_v31 = vld [vmem:[%s6820_s1 + $0x648] ss:$16 sps:$4 sm:$0xff]  }
  0x90   :  { %3234 = vmatprep.subr.bf16.mxu0 %v4638_v32  ;;  %3562 = vmatprep.subr.bf16.mxu1 %v4641_v33  ;;  %v4728_v32 = vld [vmem:[%s6820_s1 + $0x664] ss:$16 sps:$4 sm:$0xff]   ;;  %v4731_v33 = vld [vmem:[%s6820_s1 + $0x66c] ss:$16 sps:$4 sm:$0xff]  }
  0x93   :  { %3235 = vmatpush1.bf16.msra.mxu0 %v4636_v34  ;;  %3563 = vmatpush1.bf16.msra.mxu1 %v4639_v35  ;;  %v4726_v34 = vld [vmem:[%s6820_s1 + $0x660] ss:$16 sps:$4 sm:$0xff]   ;;  %v4729_v35 = vld [vmem:[%s6820_s1 + $0x668] ss:$16 sps:$4 sm:$0xff]  }
  0x94   :  { %3236 = vmatprep.subr.bf16.mxu0 %v4644_v36  ;;  %3564 = vmatprep.subr.bf16.mxu1 %v4647_v37  ;;  %v4734_v36 = vld [vmem:[%s6820_s1 + $0x684] ss:$16 sps:$4 sm:$0xff]   ;;  %v4737_v37 = vld [vmem:[%s6820_s1 + $0x68c] ss:$16 sps:$4 sm:$0xff]  }
  0x97   :  { %3237 = vmatpush1.bf16.msra.mxu0 %v4642_v38  ;;  %3565 = vmatpush1.bf16.msra.mxu1 %v4645_v39  ;;  %v4732_v38 = vld [vmem:[%s6820_s1 + $0x680] ss:$16 sps:$4 sm:$0xff]   ;;  %v4735_v39 = vld [vmem:[%s6820_s1 + $0x688] ss:$16 sps:$4 sm:$0xff]  }
  0x98   :  { %3238 = vmatprep.subr.bf16.mxu0 %v4650_v40  ;;  %3566 = vmatprep.subr.bf16.mxu1 %v4653_v41  ;;  %v4740_v40 = vld [vmem:[%s6820_s1 + $0x6a4] ss:$16 sps:$4 sm:$0xff]   ;;  %v4743_v41 = vld [vmem:[%s6820_s1 + $0x6ac] ss:$16 sps:$4 sm:$0xff]  }
  0x9b   :  { %3239 = vmatpush1.bf16.msra.mxu0 %v4648_v42  ;;  %3567 = vmatpush1.bf16.msra.mxu1 %v4651_v43  ;;  %v4738_v42 = vld [vmem:[%s6820_s1 + $0x6a0] ss:$16 sps:$4 sm:$0xff]   ;;  %v4741_v43 = vld [vmem:[%s6820_s1 + $0x6a8] ss:$16 sps:$4 sm:$0xff]  }
  0x9c   :  { %3240 = vmatprep.subr.bf16.mxu0 %v4656_v44  ;;  %3568 = vmatprep.subr.bf16.mxu1 %v4659_v45  ;;  %v4746_v44 = vld [vmem:[%s6820_s1 + $0x6c4] ss:$16 sps:$4 sm:$0xff]   ;;  %v4749_v45 = vld [vmem:[%s6820_s1 + $0x6cc] ss:$16 sps:$4 sm:$0xff]  }
  0x9f   :  { %3241 = vmatpush1.bf16.msra.mxu0 %v4654_v46  ;;  %3569 = vmatpush1.bf16.msra.mxu1 %v4657_v47  ;;  %v4744_v46 = vld [vmem:[%s6820_s1 + $0x6c0] ss:$16 sps:$4 sm:$0xff]   ;;  %v4747_v47 = vld [vmem:[%s6820_s1 + $0x6c8] ss:$16 sps:$4 sm:$0xff]  }
  0xa0   :  { %3242 = vmatprep.subr.bf16.mxu0 %v4662_v48  ;;  %3570 = vmatprep.subr.bf16.mxu1 %v4665_v50  ;;  %v4752_v48 = vld [vmem:[%s6820_s1 + $0x6e4] ss:$16 sps:$4 sm:$0xff]   ;;  %v4755_v50 = vld [vmem:[%s6820_s1 + $0x6ec] ss:$16 sps:$4 sm:$0xff]  }
  0xa3   :  { %3243 = vmatpush1.bf16.msra.mxu0 %v4660_v51  ;;  %3571 = vmatpush1.bf16.msra.mxu1 %v4663_v52  ;;  %v4750_v51 = vld [vmem:[%s6820_s1 + $0x6e0] ss:$16 sps:$4 sm:$0xff]   ;;  %v4753_v52 = vld [vmem:[%s6820_s1 + $0x6e8] ss:$16 sps:$4 sm:$0xff]  }
  0xa4   :  { %3244 = vmatprep.subr.bf16.mxu0 %v4668_v53  ;;  %3572 = vmatprep.subr.bf16.mxu1 %v4671_v54  ;;  %v4758_v53 = vld [vmem:[%s6820_s1 + $0x704] ss:$16 sps:$4 sm:$0xff]   ;;  %v4761_v54 = vld [vmem:[%s6820_s1 + $0x70c] ss:$16 sps:$4 sm:$0xff]  }
  0xa7   :  { %3245 = vmatpush1.bf16.msra.mxu0 %v4666_v55  ;;  %3573 = vmatpush1.bf16.msra.mxu1 %v4669_v56  ;;  %v4756_v55 = vld [vmem:[%s6820_s1 + $0x700] ss:$16 sps:$4 sm:$0xff]   ;;  %v4759_v56 = vld [vmem:[%s6820_s1 + $0x708] ss:$16 sps:$4 sm:$0xff]  }
  0xa8   :  { %3246 = vmatprep.subr.bf16.mxu0 %v4674_v57  ;;  %3574 = vmatprep.subr.bf16.mxu1 %v4677_v58  ;;  %v4764_v57 = vld [vmem:[%s6820_s1 + $0x724] ss:$16 sps:$4 sm:$0xff]   ;;  %v4767_v58 = vld [vmem:[%s6820_s1 + $0x72c] ss:$16 sps:$4 sm:$0xff]  }
  0xab   :  { %3247 = vmatpush1.bf16.msra.mxu0 %v4672_v59  ;;  %3575 = vmatpush1.bf16.msra.mxu1 %v4675_v60  ;;  %v4762_v59 = vld [vmem:[%s6820_s1 + $0x720] ss:$16 sps:$4 sm:$0xff]   ;;  %v4765_v60 = vld [vmem:[%s6820_s1 + $0x728] ss:$16 sps:$4 sm:$0xff]  }
  0xac   :  { %3248 = vmatprep.subr.bf16.mxu0 %v4680_v61  ;;  %3576 = vmatprep.subr.bf16.mxu1 %v4683_v62  ;;  %v4770_v61 = vld [vmem:[%s6820_s1 + $0x744] ss:$16 sps:$4 sm:$0xff]   ;;  %v4773_v62 = vld [vmem:[%s6820_s1 + $0x74c] ss:$16 sps:$4 sm:$0xff]  }
  0xaf   :  { %3249 = vmatpush1.bf16.msra.mxu0 %v4678_v63  ;;  %3577 = vmatpush1.bf16.msra.mxu1 %v4681_v0  ;;  %v4768_v63 = vld [vmem:[%s6820_s1 + $0x740] ss:$16 sps:$4 sm:$0xff]   ;;  %v4771_v0 = vld [vmem:[%s6820_s1 + $0x748] ss:$16 sps:$4 sm:$0xff]  }
  0xb0   :  { %3250 = vmatprep.subr.bf16.mxu0 %v4686_v1  ;;  %3578 = vmatprep.subr.bf16.mxu1 %v4689_v2  ;;  %v4776_v1 = vld [vmem:[%s6820_s1 + $0x764] ss:$16 sps:$4 sm:$0xff]   ;;  %v4779_v2 = vld [vmem:[%s6820_s1 + $0x76c] ss:$16 sps:$4 sm:$0xff]  }
  0xb3   :  { %3251 = vmatpush1.bf16.msra.mxu0 %v4684_v3  ;;  %3579 = vmatpush1.bf16.msra.mxu1 %v4687_v4  ;;  %v4774_v3 = vld [vmem:[%s6820_s1 + $0x760] ss:$16 sps:$4 sm:$0xff]   ;;  %v4777_v4 = vld [vmem:[%s6820_s1 + $0x768] ss:$16 sps:$4 sm:$0xff]  }
  0xb4   :  { %3252 = vmatprep.subr.bf16.mxu0 %v4692_v5  ;;  %3580 = vmatprep.subr.bf16.mxu1 %v4695_v6  ;;  %v4782_v5 = vld [vmem:[%s6820_s1 + $0x784] ss:$16 sps:$4 sm:$0xff]   ;;  %v4785_v6 = vld [vmem:[%s6820_s1 + $0x78c] ss:$16 sps:$4 sm:$0xff]  }
  0xb7   :  { %3253 = vmatpush1.bf16.msra.mxu0 %v4690_v7  ;;  %3581 = vmatpush1.bf16.msra.mxu1 %v4693_v8  ;;  %v4780_v7 = vld [vmem:[%s6820_s1 + $0x780] ss:$16 sps:$4 sm:$0xff]   ;;  %v4783_v8 = vld [vmem:[%s6820_s1 + $0x788] ss:$16 sps:$4 sm:$0xff]  }
  0xb8   :  { %3254 = vmatprep.subr.bf16.mxu0 %v4698_v9  ;;  %3582 = vmatprep.subr.bf16.mxu1 %v4701_v10  ;;  %v4788_v9 = vld [vmem:[%s6820_s1 + $0x7a4] ss:$16 sps:$4 sm:$0xff]   ;;  %v4791_v10 = vld [vmem:[%s6820_s1 + $0x7ac] ss:$16 sps:$4 sm:$0xff]  }
  0xbb   :  { %3255 = vmatpush1.bf16.msra.mxu0 %v4696_v11  ;;  %3583 = vmatpush1.bf16.msra.mxu1 %v4699_v13  ;;  %v4786_v11 = vld [vmem:[%s6820_s1 + $0x7a0] ss:$16 sps:$4 sm:$0xff]   ;;  %v4789_v13 = vld [vmem:[%s6820_s1 + $0x7a8] ss:$16 sps:$4 sm:$0xff]  }
  0xbc   :  { %3256 = vmatprep.subr.bf16.mxu0 %v4704_v14  ;;  %3584 = vmatprep.subr.bf16.mxu1 %v4707_v15  ;;  %v4794_v14 = vld [vmem:[%s6820_s1 + $0x7c4] ss:$16 sps:$4 sm:$0xff]   ;;  %v4797_v15 = vld [vmem:[%s6820_s1 + $0x7cc] ss:$16 sps:$4 sm:$0xff]  }
  0xbf   :  { %3257 = vmatpush1.bf16.msra.mxu0 %v4702_v17  ;;  %3585 = vmatpush1.bf16.msra.mxu1 %v4705_v19  ;;  %v4795_v17 = vld [vmem:[%s6820_s1 + $0x7c8] ss:$16 sps:$4 sm:$0xff]   ;;  %v4800_v19 = vld [vmem:[%s6820_s1 + $0x7e4] ss:$16 sps:$4 sm:$0xff]  }
  0xc0   :  { %3267 = vmatprep.subr.bf16.mxu0 %v4710_v20  ;;  %3595 = vmatprep.subr.bf16.mxu1 %v4713_v18  ;;  %v4803_v20 = vld [vmem:[%s6820_s1 + $0x7ec] ss:$16 sps:$4 sm:$0xff]   ;;  %v4798_v18 = vld [vmem:[%s6820_s1 + $0x7e0] ss:$16 sps:$4 sm:$0xff]  }
  0xc2   :  { %3259 = vmatmul.mubr.bf16.vlgmr.msra.gmra.mrb[0].mxu0 %v5626_v21  ;;  %3587 = vmatmul.mubr.bf16.vlgmr.msra.gmra.mrb[0].mxu1 %v5626_v21  ;;  %v4725_v21 = vld [vmem:[%s6820_s1 + $0x64c] ss:$16 sps:$4 sm:$0xff]  }
  0xc3   :  { %3268 = vmatpush1.bf16.msra.mxu0 %v4708_v23  ;;  %3596 = vmatpush1.bf16.msra.mxu1 %v4711_v24  ;;  %v6007_v23 = vld [vmem:[%s6822_s0 + $0x10] sm:$0xff]  ;;  %v4801_v24 = vld [vmem:[%s6820_s1 + $0x7e8] ss:$16 sps:$4 sm:$0xff]  }
  0xc4   :  { %3269 = vmatprep.subr.bf16.mxu0 %v4716_v25  ;;  %3597 = vmatprep.subr.bf16.mxu1 %v4719_v12  ;;  %v4807_v25 = vld [vmem:[%s6820_s1 + $0x804] ss:$16 sps:$4 sm:$0xff]   ;;  %v4810_v12 = vld [vmem:[%s6820_s1 + $0x80c] ss:$16 sps:$4 sm:$0xff]  }
  0xc5   :  { %3299 = vmatprep.mubr.bf16.mxu0 %v570_v26  ;;  %3627 = vmatprep.mubr.bf16.mxu1 %v570_v26  ;;  %v6020_v26 = vrot.slane %v6007_v23, %v5338_v49 }
  0xc7   :  { %3270 = vmatpush1.bf16.msra.mxu0 %v4714_v27  ;;  %3598 = vmatpush1.bf16.msra.mxu1 %v4717_v28  ;;  %v4805_v27 = vld [vmem:[%s6820_s1 + $0x800] ss:$16 sps:$4 sm:$0xff]   ;;  %v4808_v28 = vld [vmem:[%s6820_s1 + $0x808] ss:$16 sps:$4 sm:$0xff]  }
  0xc8   :  { %3271 = vmatprep.subr.bf16.mxu0 %v4722_v29  ;;  %3599 = vmatprep.subr.bf16.mxu1 %v4725_v21  ;;  %v4813_v29 = vld [vmem:[%s6820_s1 + $0x824] ss:$16 sps:$4 sm:$0xff]   ;;  %v4816_v21 = vld [vmem:[%s6820_s1 + $0x82c] ss:$16 sps:$4 sm:$0xff]  }
  0xcb   :  { %3272 = vmatpush1.bf16.msra.mxu0 %v4720_v30  ;;  %3600 = vmatpush1.bf16.msra.mxu1 %v4723_v31  ;;  %v586_v30 = vcombine.high %v6020_v26, %v6020_v26  ;;  %v4811_v31 = vld [vmem:[%s6820_s1 + $0x820] ss:$16 sps:$4 sm:$0xff]  }
  0xcc   :  { %3273 = vmatprep.subr.bf16.mxu0 %v4728_v32  ;;  %3601 = vmatprep.subr.bf16.mxu1 %v4731_v33  ;;  %v4814_v32 = vld [vmem:[%s6820_s1 + $0x828] ss:$16 sps:$4 sm:$0xff]   ;;  %v4819_v33 = vld [vmem:[%s6820_s1 + $0x844] ss:$16 sps:$4 sm:$0xff]  }
  0xcf   :  { %3274 = vmatpush1.bf16.msra.mxu0 %v4726_v34  ;;  %3602 = vmatpush1.bf16.msra.mxu1 %v4729_v35  ;;  %v4817_v34 = vld [vmem:[%s6820_s1 + $0x840] ss:$16 sps:$4 sm:$0xff]   ;;  %v4820_v35 = vld [vmem:[%s6820_s1 + $0x848] ss:$16 sps:$4 sm:$0xff]  }
  0xd0   :  { %3275 = vmatprep.subr.bf16.mxu0 %v4734_v36  ;;  %3603 = vmatprep.subr.bf16.mxu1 %v4737_v37  ;;  %v4825_v36 = vld [vmem:[%s6820_s1 + $0x864] ss:$16 sps:$4 sm:$0xff]   ;;  %v4828_v37 = vld [vmem:[%s6820_s1 + $0x86c] ss:$16 sps:$4 sm:$0xff]  }
  0xd3   :  { %3276 = vmatpush1.bf16.msra.mxu0 %v4732_v38  ;;  %3604 = vmatpush1.bf16.msra.mxu1 %v4735_v39  ;;  %v4823_v38 = vld [vmem:[%s6820_s1 + $0x860] ss:$16 sps:$4 sm:$0xff]   ;;  %v4826_v39 = vld [vmem:[%s6820_s1 + $0x868] ss:$16 sps:$4 sm:$0xff]  }
  0xd4   :  { %3277 = vmatprep.subr.bf16.mxu0 %v4740_v40  ;;  %3605 = vmatprep.subr.bf16.mxu1 %v4743_v41  ;;  %v4831_v40 = vld [vmem:[%s6820_s1 + $0x884] ss:$16 sps:$4 sm:$0xff]   ;;  %v4834_v41 = vld [vmem:[%s6820_s1 + $0x88c] ss:$16 sps:$4 sm:$0xff]  }
  0xd7   :  { %3278 = vmatpush1.bf16.msra.mxu0 %v4738_v42  ;;  %3606 = vmatpush1.bf16.msra.mxu1 %v4741_v43  ;;  %v4829_v42 = vld [vmem:[%s6820_s1 + $0x880] ss:$16 sps:$4 sm:$0xff]   ;;  %v4832_v43 = vld [vmem:[%s6820_s1 + $0x888] ss:$16 sps:$4 sm:$0xff]  }
  0xd8   :  { %3279 = vmatprep.subr.bf16.mxu0 %v4746_v44  ;;  %3607 = vmatprep.subr.bf16.mxu1 %v4749_v45  ;;  %v4837_v44 = vld [vmem:[%s6820_s1 + $0x8a4] ss:$16 sps:$4 sm:$0xff]   ;;  %v4840_v45 = vld [vmem:[%s6820_s1 + $0x8ac] ss:$16 sps:$4 sm:$0xff]  }
  0xdb   :  { %3280 = vmatpush1.bf16.msra.mxu0 %v4744_v46  ;;  %3608 = vmatpush1.bf16.msra.mxu1 %v4747_v47  ;;  %v4835_v46 = vld [vmem:[%s6820_s1 + $0x8a0] ss:$16 sps:$4 sm:$0xff]   ;;  %v4838_v47 = vld [vmem:[%s6820_s1 + $0x8a8] ss:$16 sps:$4 sm:$0xff]  }
  0xdc   :  { %3281 = vmatprep.subr.bf16.mxu0 %v4752_v48  ;;  %3609 = vmatprep.subr.bf16.mxu1 %v4755_v50  ;;  %v4843_v48 = vld [vmem:[%s6820_s1 + $0x8c4] ss:$16 sps:$4 sm:$0xff]   ;;  %v4846_v50 = vld [vmem:[%s6820_s1 + $0x8cc] ss:$16 sps:$4 sm:$0xff]  }
  0xdf   :  { %3282 = vmatpush1.bf16.msra.mxu0 %v4750_v51  ;;  %3610 = vmatpush1.bf16.msra.mxu1 %v4753_v52  ;;  %v4841_v51 = vld [vmem:[%s6820_s1 + $0x8c0] ss:$16 sps:$4 sm:$0xff]   ;;  %v4844_v52 = vld [vmem:[%s6820_s1 + $0x8c8] ss:$16 sps:$4 sm:$0xff]  }
  0xe0   :  { %3283 = vmatprep.subr.bf16.mxu0 %v4758_v53  ;;  %3611 = vmatprep.subr.bf16.mxu1 %v4761_v54  ;;  %v4849_v53 = vld [vmem:[%s6820_s1 + $0x8e4] ss:$16 sps:$4 sm:$0xff]   ;;  %v4852_v54 = vld [vmem:[%s6820_s1 + $0x8ec] ss:$16 sps:$4 sm:$0xff]  }
  0xe3   :  { %3284 = vmatpush1.bf16.msra.mxu0 %v4756_v55  ;;  %3612 = vmatpush1.bf16.msra.mxu1 %v4759_v56  ;;  %v4847_v55 = vld [vmem:[%s6820_s1 + $0x8e0] ss:$16 sps:$4 sm:$0xff]   ;;  %v4850_v56 = vld [vmem:[%s6820_s1 + $0x8e8] ss:$16 sps:$4 sm:$0xff]  }
  0xe4   :  { %3285 = vmatprep.subr.bf16.mxu0 %v4764_v57  ;;  %3613 = vmatprep.subr.bf16.mxu1 %v4767_v58  ;;  %v4855_v57 = vld [vmem:[%s6820_s1 + $0x904] ss:$16 sps:$4 sm:$0xff]   ;;  %v4858_v58 = vld [vmem:[%s6820_s1 + $0x90c] ss:$16 sps:$4 sm:$0xff]  }
  0xe7   :  { %3286 = vmatpush1.bf16.msra.mxu0 %v4762_v59  ;;  %3614 = vmatpush1.bf16.msra.mxu1 %v4765_v60  ;;  %v4853_v59 = vld [vmem:[%s6820_s1 + $0x900] ss:$16 sps:$4 sm:$0xff]   ;;  %v4856_v60 = vld [vmem:[%s6820_s1 + $0x908] ss:$16 sps:$4 sm:$0xff]  }
  0xe8   :  { %3287 = vmatprep.subr.bf16.mxu0 %v4770_v61  ;;  %3615 = vmatprep.subr.bf16.mxu1 %v4773_v62  ;;  %v4861_v61 = vld [vmem:[%s6820_s1 + $0x924] ss:$16 sps:$4 sm:$0xff]   ;;  %v4864_v62 = vld [vmem:[%s6820_s1 + $0x92c] ss:$16 sps:$4 sm:$0xff]  }
  0xeb   :  { %3288 = vmatpush1.bf16.msra.mxu0 %v4768_v63  ;;  %3616 = vmatpush1.bf16.msra.mxu1 %v4771_v0  ;;  %v4859_v63 = vld [vmem:[%s6820_s1 + $0x920] ss:$16 sps:$4 sm:$0xff]   ;;  %v4862_v0 = vld [vmem:[%s6820_s1 + $0x928] ss:$16 sps:$4 sm:$0xff]  }
  0xec   :  { %3289 = vmatprep.subr.bf16.mxu0 %v4776_v1  ;;  %3617 = vmatprep.subr.bf16.mxu1 %v4779_v2  ;;  %v4867_v1 = vld [vmem:[%s6820_s1 + $0x944] ss:$16 sps:$4 sm:$0xff]   ;;  %v4870_v2 = vld [vmem:[%s6820_s1 + $0x94c] ss:$16 sps:$4 sm:$0xff]  }
  0xef   :  { %3290 = vmatpush1.bf16.msra.mxu0 %v4774_v3  ;;  %3618 = vmatpush1.bf16.msra.mxu1 %v4777_v4  ;;  %v4865_v3 = vld [vmem:[%s6820_s1 + $0x940] ss:$16 sps:$4 sm:$0xff]   ;;  %v4868_v4 = vld [vmem:[%s6820_s1 + $0x948] ss:$16 sps:$4 sm:$0xff]  }
  0xf0   :  { %3291 = vmatprep.subr.bf16.mxu0 %v4782_v5  ;;  %3619 = vmatprep.subr.bf16.mxu1 %v4785_v6  ;;  %v4873_v5 = vld [vmem:[%s6820_s1 + $0x964] ss:$16 sps:$4 sm:$0xff]   ;;  %v4876_v6 = vld [vmem:[%s6820_s1 + $0x96c] ss:$16 sps:$4 sm:$0xff]  }
  0xf3   :  { %3292 = vmatpush1.bf16.msra.mxu0 %v4780_v7  ;;  %3620 = vmatpush1.bf16.msra.mxu1 %v4783_v8  ;;  %v4871_v7 = vld [vmem:[%s6820_s1 + $0x960] ss:$16 sps:$4 sm:$0xff]   ;;  %v4874_v8 = vld [vmem:[%s6820_s1 + $0x968] ss:$16 sps:$4 sm:$0xff]  }
  0xf4   :  { %3293 = vmatprep.subr.bf16.mxu0 %v4788_v9  ;;  %3621 = vmatprep.subr.bf16.mxu1 %v4791_v10  ;;  %v4879_v9 = vld [vmem:[%s6820_s1 + $0x984] ss:$16 sps:$4 sm:$0xff]   ;;  %v4882_v10 = vld [vmem:[%s6820_s1 + $0x98c] ss:$16 sps:$4 sm:$0xff]  }
  0xf7   :  { %3294 = vmatpush1.bf16.msra.mxu0 %v4786_v11  ;;  %3622 = vmatpush1.bf16.msra.mxu1 %v4789_v13  ;;  %v4877_v11 = vld [vmem:[%s6820_s1 + $0x980] ss:$16 sps:$4 sm:$0xff]   ;;  %v4880_v13 = vld [vmem:[%s6820_s1 + $0x988] ss:$16 sps:$4 sm:$0xff]  }
  0xf8   :  { %3295 = vmatprep.subr.bf16.mxu0 %v4794_v14  ;;  %3623 = vmatprep.subr.bf16.mxu1 %v4797_v15  ;;  %v4885_v14 = vld [vmem:[%s6820_s1 + $0x9a4] ss:$16 sps:$4 sm:$0xff]   ;;  %v4888_v15 = vld [vmem:[%s6820_s1 + $0x9ac] ss:$16 sps:$4 sm:$0xff]  }
  0xfb   :  { %3296 = vmatpush1.bf16.msra.mxu0 %v4792_v16  ;;  %3624 = vmatpush1.bf16.msra.mxu1 %v4795_v17  ;;  %v4883_v16 = vld [vmem:[%s6820_s1 + $0x9a0] ss:$16 sps:$4 sm:$0xff]   ;;  %v4886_v17 = vld [vmem:[%s6820_s1 + $0x9a8] ss:$16 sps:$4 sm:$0xff]  }
  0xfc   :  { %3297 = vmatprep.subr.bf16.mxu0 %v4800_v19  ;;  %3625 = vmatprep.subr.bf16.mxu1 %v4803_v20  ;;  %v4891_v19 = vld [vmem:[%s6820_s1 + $0x9c4] ss:$16 sps:$4 sm:$0xff]   ;;  %v4894_v20 = vld [vmem:[%s6820_s1 + $0x9cc] ss:$16 sps:$4 sm:$0xff]  }
  0xff   :  { %3298 = vmatpush1.bf16.msra.mxu0 %v4798_v18  ;;  %3626 = vmatpush1.bf16.msra.mxu1 %v4801_v24  ;;  %v4889_v18 = vld [vmem:[%s6820_s1 + $0x9c0] ss:$16 sps:$4 sm:$0xff]   ;;  %v4892_v24 = vld [vmem:[%s6820_s1 + $0x9c8] ss:$16 sps:$4 sm:$0xff]  }
 0x100   :  { %3308 = vmatprep.subr.bf16.mxu0 %v4807_v25  ;;  %3636 = vmatprep.subr.bf16.mxu1 %v4810_v12  ;;  %v4897_v25 = vld [vmem:[%s6820_s1 + $0x9e4] ss:$16 sps:$4 sm:$0xff]   ;;  %v4900_v12 = vld [vmem:[%s6820_s1 + $0x9ec] ss:$16 sps:$4 sm:$0xff]  }
 0x102   :  { %3300 = vmatmul.mubr.bf16.vlgmr.msra.gmra.mrb[0].mxu0 %v5815_v22  ;;  %3628 = vmatmul.mubr.bf16.vlgmr.msra.gmra.mrb[0].mxu1 %v5815_v22  ;;  %v4822_v22 = vld [vmem:[%s6820_s1 + $0x84c] ss:$16 sps:$4 sm:$0xff]  }
 0x103   :  { %3309 = vmatpush1.bf16.msra.mxu0 %v4805_v27  ;;  %3637 = vmatpush1.bf16.msra.mxu1 %v4808_v28  ;;  %v571_v27 = vcombine.high %v6007_v23, %v6007_v23  ;;  %v4895_v28 = vld [vmem:[%s6820_s1 + $0x9e0] ss:$16 sps:$4 sm:$0xff]   ;;  %v4906_v23 = vld [vmem:[%s6820_s1 + $0xa0c] ss:$16 sps:$4 sm:$0xff]  }
 0x104   :  { %3310 = vmatprep.subr.bf16.mxu0 %v4813_v29  ;;  %3638 = vmatprep.subr.bf16.mxu1 %v4816_v21  ;;  %v4898_v29 = vld [vmem:[%s6820_s1 + $0x9e8] ss:$16 sps:$4 sm:$0xff]   ;;  %v4903_v21 = vld [vmem:[%s6820_s1 + $0xa04] ss:$16 sps:$4 sm:$0xff]  }
 0x105   :  { %3340 = vmatprep.mubr.bf16.mxu0 %v586_v30  ;;  %3668 = vmatprep.mubr.bf16.mxu1 %v586_v30  ;;  %v6221_v30 = vrot.slane %v571_v27, %v5338_v49  ;;  %v4985_v27 = vld [vmem:[%s6820_s1 + $0xbc0] ss:$16 sps:$4 sm:$0xff]  }
 0x107   :  { %3311 = vmatpush1.bf16.msra.mxu0 %v4811_v31  ;;  %3639 = vmatpush1.bf16.msra.mxu1 %v4814_v32  ;;  %v4901_v31 = vld [vmem:[%s6820_s1 + $0xa00] ss:$16 sps:$4 sm:$0xff]   ;;  %v4904_v32 = vld [vmem:[%s6820_s1 + $0xa08] ss:$16 sps:$4 sm:$0xff]  }
 0x108   :  { %3312 = vmatprep.subr.bf16.mxu0 %v4819_v33  ;;  %3640 = vmatprep.subr.bf16.mxu1 %v4822_v22  ;;  %v4909_v33 = vld [vmem:[%s6820_s1 + $0xa24] ss:$16 sps:$4 sm:$0xff]   ;;  %v4912_v22 = vld [vmem:[%s6820_s1 + $0xa2c] ss:$16 sps:$4 sm:$0xff]  }
 0x10b   :  { %3313 = vmatpush1.bf16.msra.mxu0 %v4817_v34  ;;  %3641 = vmatpush1.bf16.msra.mxu1 %v4820_v35  ;;  %v587_v34 = vcombine.high %v6221_v30, %v6221_v30  ;;  %v4907_v35 = vld [vmem:[%s6820_s1 + $0xa20] ss:$16 sps:$4 sm:$0xff]  }
 0x10c   :  { %3314 = vmatprep.subr.bf16.mxu0 %v4825_v36  ;;  %3642 = vmatprep.subr.bf16.mxu1 %v4828_v37  ;;  %v4910_v36 = vld [vmem:[%s6820_s1 + $0xa28] ss:$16 sps:$4 sm:$0xff]   ;;  %v4915_v37 = vld [vmem:[%s6820_s1 + $0xa44] ss:$16 sps:$4 sm:$0xff]  }
 0x10f   :  { %3315 = vmatpush1.bf16.msra.mxu0 %v4823_v38  ;;  %3643 = vmatpush1.bf16.msra.mxu1 %v4826_v39  ;;  %v4913_v38 = vld [vmem:[%s6820_s1 + $0xa40] ss:$16 sps:$4 sm:$0xff]   ;;  %v4916_v39 = vld [vmem:[%s6820_s1 + $0xa48] ss:$16 sps:$4 sm:$0xff]  }
 0x110   :  { %3316 = vmatprep.subr.bf16.mxu0 %v4831_v40  ;;  %3644 = vmatprep.subr.bf16.mxu1 %v4834_v41  ;;  %v4921_v40 = vld [vmem:[%s6820_s1 + $0xa64] ss:$16 sps:$4 sm:$0xff]   ;;  %v4924_v41 = vld [vmem:[%s6820_s1 + $0xa6c] ss:$16 sps:$4 sm:$0xff]  }
 0x113   :  { %3317 = vmatpush1.bf16.msra.mxu0 %v4829_v42  ;;  %3645 = vmatpush1.bf16.msra.mxu1 %v4832_v43  ;;  %v4919_v42 = vld [vmem:[%s6820_s1 + $0xa60] ss:$16 sps:$4 sm:$0xff]   ;;  %v4922_v43 = vld [vmem:[%s6820_s1 + $0xa68] ss:$16 sps:$4 sm:$0xff]  }
 0x114   :  { %3318 = vmatprep.subr.bf16.mxu0 %v4837_v44  ;;  %3646 = vmatprep.subr.bf16.mxu1 %v4840_v45  ;;  %v4927_v44 = vld [vmem:[%s6820_s1 + $0xa84] ss:$16 sps:$4 sm:$0xff]   ;;  %v4930_v45 = vld [vmem:[%s6820_s1 + $0xa8c] ss:$16 sps:$4 sm:$0xff]  }
 0x117   :  { %3319 = vmatpush1.bf16.msra.mxu0 %v4835_v46  ;;  %3647 = vmatpush1.bf16.msra.mxu1 %v4838_v47  ;;  %v4925_v46 = vld [vmem:[%s6820_s1 + $0xa80] ss:$16 sps:$4 sm:$0xff]   ;;  %v4928_v47 = vld [vmem:[%s6820_s1 + $0xa88] ss:$16 sps:$4 sm:$0xff]  }
 0x118   :  { %3320 = vmatprep.subr.bf16.mxu0 %v4843_v48  ;;  %3648 = vmatprep.subr.bf16.mxu1 %v4846_v50  ;;  %v4933_v48 = vld [vmem:[%s6820_s1 + $0xaa4] ss:$16 sps:$4 sm:$0xff]   ;;  %v4936_v50 = vld [vmem:[%s6820_s1 + $0xaac] ss:$16 sps:$4 sm:$0xff]  }
 0x11b   :  { %3321 = vmatpush1.bf16.msra.mxu0 %v4841_v51  ;;  %3649 = vmatpush1.bf16.msra.mxu1 %v4844_v52  ;;  %v4931_v51 = vld [vmem:[%s6820_s1 + $0xaa0] ss:$16 sps:$4 sm:$0xff]   ;;  %v4934_v52 = vld [vmem:[%s6820_s1 + $0xaa8] ss:$16 sps:$4 sm:$0xff]  }
 0x11c   :  { %3322 = vmatprep.subr.bf16.mxu0 %v4849_v53  ;;  %3650 = vmatprep.subr.bf16.mxu1 %v4852_v54  ;;  %v4939_v53 = vld [vmem:[%s6820_s1 + $0xac4] ss:$16 sps:$4 sm:$0xff]   ;;  %v4942_v54 = vld [vmem:[%s6820_s1 + $0xacc] ss:$16 sps:$4 sm:$0xff]  }
 0x11f   :  { %3323 = vmatpush1.bf16.msra.mxu0 %v4847_v55  ;;  %3651 = vmatpush1.bf16.msra.mxu1 %v4850_v56  ;;  %v4937_v55 = vld [vmem:[%s6820_s1 + $0xac0] ss:$16 sps:$4 sm:$0xff]   ;;  %v4940_v56 = vld [vmem:[%s6820_s1 + $0xac8] ss:$16 sps:$4 sm:$0xff]  }
 0x120   :  { %3324 = vmatprep.subr.bf16.mxu0 %v4855_v57  ;;  %3652 = vmatprep.subr.bf16.mxu1 %v4858_v58  ;;  %v4945_v57 = vld [vmem:[%s6820_s1 + $0xae4] ss:$16 sps:$4 sm:$0xff]   ;;  %v4948_v58 = vld [vmem:[%s6820_s1 + $0xaec] ss:$16 sps:$4 sm:$0xff]  }
 0x123   :  { %3325 = vmatpush1.bf16.msra.mxu0 %v4853_v59  ;;  %3653 = vmatpush1.bf16.msra.mxu1 %v4856_v60  ;;  %v4943_v59 = vld [vmem:[%s6820_s1 + $0xae0] ss:$16 sps:$4 sm:$0xff]   ;;  %v4946_v60 = vld [vmem:[%s6820_s1 + $0xae8] ss:$16 sps:$4 sm:$0xff]  }
 0x124   :  { %3326 = vmatprep.subr.bf16.mxu0 %v4861_v61  ;;  %3654 = vmatprep.subr.bf16.mxu1 %v4864_v62  ;;  %v4951_v61 = vld [vmem:[%s6820_s1 + $0xb04] ss:$16 sps:$4 sm:$0xff]   ;;  %v4954_v62 = vld [vmem:[%s6820_s1 + $0xb0c] ss:$16 sps:$4 sm:$0xff]  }
 0x127   :  { %3327 = vmatpush1.bf16.msra.mxu0 %v4859_v63  ;;  %3655 = vmatpush1.bf16.msra.mxu1 %v4862_v0  ;;  %v4949_v63 = vld [vmem:[%s6820_s1 + $0xb00] ss:$16 sps:$4 sm:$0xff]   ;;  %v4952_v0 = vld [vmem:[%s6820_s1 + $0xb08] ss:$16 sps:$4 sm:$0xff]  }
 0x128   :  { %3328 = vmatprep.subr.bf16.mxu0 %v4867_v1  ;;  %3656 = vmatprep.subr.bf16.mxu1 %v4870_v2  ;;  %v4957_v1 = vld [vmem:[%s6820_s1 + $0xb24] ss:$16 sps:$4 sm:$0xff]   ;;  %v4960_v2 = vld [vmem:[%s6820_s1 + $0xb2c] ss:$16 sps:$4 sm:$0xff]  }
 0x12b   :  { %3329 = vmatpush1.bf16.msra.mxu0 %v4865_v3  ;;  %3657 = vmatpush1.bf16.msra.mxu1 %v4868_v4  ;;  %v4955_v3 = vld [vmem:[%s6820_s1 + $0xb20] ss:$16 sps:$4 sm:$0xff]   ;;  %v4958_v4 = vld [vmem:[%s6820_s1 + $0xb28] ss:$16 sps:$4 sm:$0xff]  }
 0x12c   :  { %3330 = vmatprep.subr.bf16.mxu0 %v4873_v5  ;;  %3658 = vmatprep.subr.bf16.mxu1 %v4876_v6  ;;  %v4963_v5 = vld [vmem:[%s6820_s1 + $0xb44] ss:$16 sps:$4 sm:$0xff]   ;;  %v4966_v6 = vld [vmem:[%s6820_s1 + $0xb4c] ss:$16 sps:$4 sm:$0xff]  }
 0x12f   :  { %3331 = vmatpush1.bf16.msra.mxu0 %v4871_v7  ;;  %3659 = vmatpush1.bf16.msra.mxu1 %v4874_v8  ;;  %v4961_v7 = vld [vmem:[%s6820_s1 + $0xb40] ss:$16 sps:$4 sm:$0xff]   ;;  %v4964_v8 = vld [vmem:[%s6820_s1 + $0xb48] ss:$16 sps:$4 sm:$0xff]  }
 0x130   :  { %3332 = vmatprep.subr.bf16.mxu0 %v4879_v9  ;;  %3660 = vmatprep.subr.bf16.mxu1 %v4882_v10  ;;  %v4969_v9 = vld [vmem:[%s6820_s1 + $0xb64] ss:$16 sps:$4 sm:$0xff]   ;;  %v4972_v10 = vld [vmem:[%s6820_s1 + $0xb6c] ss:$16 sps:$4 sm:$0xff]  }
 0x133   :  { %3333 = vmatpush1.bf16.msra.mxu0 %v4877_v11  ;;  %3661 = vmatpush1.bf16.msra.mxu1 %v4880_v13  ;;  %v4967_v11 = vld [vmem:[%s6820_s1 + $0xb60] ss:$16 sps:$4 sm:$0xff]   ;;  %v4970_v13 = vld [vmem:[%s6820_s1 + $0xb68] ss:$16 sps:$4 sm:$0xff]  }
 0x134   :  { %3334 = vmatprep.subr.bf16.mxu0 %v4885_v14  ;;  %3662 = vmatprep.subr.bf16.mxu1 %v4888_v15  ;;  %v4975_v14 = vld [vmem:[%s6820_s1 + $0xb84] ss:$16 sps:$4 sm:$0xff]   ;;  %v4978_v15 = vld [vmem:[%s6820_s1 + $0xb8c] ss:$16 sps:$4 sm:$0xff]  }
 0x137   :  { %3335 = vmatpush1.bf16.msra.mxu0 %v4883_v16  ;;  %3663 = vmatpush1.bf16.msra.mxu1 %v4886_v17  ;;  %v4973_v16 = vld [vmem:[%s6820_s1 + $0xb80] ss:$16 sps:$4 sm:$0xff]   ;;  %v4976_v17 = vld [vmem:[%s6820_s1 + $0xb88] ss:$16 sps:$4 sm:$0xff]  }
 0x138   :  { %3336 = vmatprep.subr.bf16.mxu0 %v4891_v19  ;;  %3664 = vmatprep.subr.bf16.mxu1 %v4894_v20  ;;  %v4981_v19 = vld [vmem:[%s6820_s1 + $0xba4] ss:$16 sps:$4 sm:$0xff]   ;;  %v4984_v20 = vld [vmem:[%s6820_s1 + $0xbac] ss:$16 sps:$4 sm:$0xff]  }
 0x13b   :  { %3337 = vmatpush1.bf16.msra.mxu0 %v4889_v18  ;;  %3665 = vmatpush1.bf16.msra.mxu1 %v4892_v24  ;;  %v4979_v18 = vld [vmem:[%s6820_s1 + $0xba0] ss:$16 sps:$4 sm:$0xff]   ;;  %v4982_v24 = vld [vmem:[%s6820_s1 + $0xba8] ss:$16 sps:$4 sm:$0xff]  }
 0x13c   :  { %3338 = vmatprep.subr.bf16.mxu0 %v4897_v25  ;;  %3666 = vmatprep.subr.bf16.mxu1 %v4900_v12  ;;  %v4987_v25 = vld [vmem:[%s6820_s1 + $0xbc4] ss:$16 sps:$4 sm:$0xff]   ;;  %v4990_v12 = vld [vmem:[%s6820_s1 + $0xbcc] ss:$16 sps:$4 sm:$0xff]  }
 0x13f   :  { %3339 = vmatpush1.bf16.msra.mxu0 %v4895_v28  ;;  %3667 = vmatpush1.bf16.msra.mxu1 %v4898_v29  ;;  %v4988_v28 = vld [vmem:[%s6820_s1 + $0xbc8] ss:$16 sps:$4 sm:$0xff]   ;;  %v4993_v29 = vld [vmem:[%s6820_s1 + $0xbe4] ss:$16 sps:$4 sm:$0xff]  }
 0x140   :  { %3349 = vmatprep.subr.bf16.mxu0 %v4903_v21  ;;  %3677 = vmatprep.subr.bf16.mxu1 %v4906_v23  ;;  %v4996_v21 = vld [vmem:[%s6820_s1 + $0xbec] ss:$16 sps:$4 sm:$0xff]  }
 0x141   :  { %v6410_v23 = vld [vmem:[%s6822_s0 + $0x18] sm:$0xff] }
 0x142   :  { %3341 = vmatmul.mubr.bf16.vlgmr.msra.gmra.mrb[0].mxu0 %v6020_v26  ;;  %3669 = vmatmul.mubr.bf16.vlgmr.msra.gmra.mrb[0].mxu1 %v6020_v26  ;;  %v4918_v26 = vld [vmem:[%s6820_s1 + $0xa4c] ss:$16 sps:$4 sm:$0xff]  }
 0x143   :  { %3350 = vmatpush1.bf16.msra.mxu0 %v4901_v31  ;;  %3678 = vmatpush1.bf16.msra.mxu1 %v4904_v32  ;;  %v4991_v31 = vld [vmem:[%s6820_s1 + $0xbe0] ss:$16 sps:$4 sm:$0xff]   ;;  %v4994_v32 = vld [vmem:[%s6820_s1 + $0xbe8] ss:$16 sps:$4 sm:$0xff]  }
 0x144   :  { %3351 = vmatprep.subr.bf16.mxu0 %v4909_v33  ;;  %3679 = vmatprep.subr.bf16.mxu1 %v4912_v22  ;;  %v527_v33 = vld [vmem:[%s6823_s2] sm:$0x7]  ;;  %v5000_v22 = vld [vmem:[%s6820_s1 + $0xc04] ss:$16 sps:$4 sm:$0xff]  }
 0x145   :  { %3381 = vmatprep.mubr.bf16.mxu0 %v587_v34  ;;  %3709 = vmatprep.mubr.bf16.mxu1 %v587_v34  ;;  %v5003_v34 = vld [vmem:[%s6820_s1 + $0xc0c] ss:$16 sps:$4 sm:$0xff]  }
 0x147   :  { %3352 = vmatpush1.bf16.msra.mxu0 %v4907_v35  ;;  %3680 = vmatpush1.bf16.msra.mxu1 %v4910_v36  ;;  %v6429_v35 = vrot.slane %v6410_v23, %v5338_v49  ;;  %v5180_v36 = vmov 0  }
 0x148   :  { %3353 = vmatprep.subr.bf16.mxu0 %v4915_v37  ;;  %3681 = vmatprep.subr.bf16.mxu1 %v4918_v26  ;;  %v4998_v37 = vld [vmem:[%s6820_s1 + $0xc00] ss:$16 sps:$4 sm:$0xff]   ;;  %v5001_v26 = vld [vmem:[%s6820_s1 + $0xc08] ss:$16 sps:$4 sm:$0xff]  }
 0x149   :  { %4418 = vset.pattern.permute.xlu0 %v5180_v36  ;;  %v5093_v36 = vld [vmem:[%s6820_s1 + $0xdec] ss:$16 sps:$4 sm:$0xff]  }
 0x14a   :  { %530 = vperm.xlu0 %4418, %v527_v33   ;;  %v5082_v33 = vld [vmem:[%s6820_s1 + $0xdc0] ss:$16 sps:$4 sm:$0xff]  }
 0x14b   :  { %3354 = vmatpush1.bf16.msra.mxu0 %v4913_v38  ;;  %3682 = vmatpush1.bf16.msra.mxu1 %v4916_v39  ;;  %v5006_v38 = vld [vmem:[%s6820_s1 + $0xc24] ss:$16 sps:$4 sm:$0xff]   ;;  %v5009_v39 = vld [vmem:[%s6820_s1 + $0xc2c] ss:$16 sps:$4 sm:$0xff]  }
 0x14c   :  { %3355 = vmatprep.subr.bf16.mxu0 %v4921_v40  ;;  %3683 = vmatprep.subr.bf16.mxu1 %v4924_v41  ;;  %v603_v40 = vcombine.high %v6429_v35, %v6429_v35  ;;  %v5004_v41 = vld [vmem:[%s6820_s1 + $0xc20] ss:$16 sps:$4 sm:$0xff]  }
 0x14f   :  { %3356 = vmatpush1.bf16.msra.mxu0 %v4919_v42  ;;  %3684 = vmatpush1.bf16.msra.mxu1 %v4922_v43  ;;  %v5007_v42 = vld [vmem:[%s6820_s1 + $0xc28] ss:$16 sps:$4 sm:$0xff]   ;;  %v5012_v43 = vld [vmem:[%s6820_s1 + $0xc44] ss:$16 sps:$4 sm:$0xff]  }
 0x150   :  { %3357 = vmatprep.subr.bf16.mxu0 %v4927_v44  ;;  %3685 = vmatprep.subr.bf16.mxu1 %v4930_v45  ;;  %v5010_v44 = vld [vmem:[%s6820_s1 + $0xc40] ss:$16 sps:$4 sm:$0xff]   ;;  %v5013_v45 = vld [vmem:[%s6820_s1 + $0xc48] ss:$16 sps:$4 sm:$0xff]  }
 0x153   :  { %3358 = vmatpush1.bf16.msra.mxu0 %v4925_v46  ;;  %3686 = vmatpush1.bf16.msra.mxu1 %v4928_v47  ;;  %v5018_v46 = vld [vmem:[%s6820_s1 + $0xc64] ss:$16 sps:$4 sm:$0xff]   ;;  %v5021_v47 = vld [vmem:[%s6820_s1 + $0xc6c] ss:$16 sps:$4 sm:$0xff]  }
 0x154   :  { %3359 = vmatprep.subr.bf16.mxu0 %v4933_v48  ;;  %3687 = vmatprep.subr.bf16.mxu1 %v4936_v50  ;;  %v5016_v48 = vld [vmem:[%s6820_s1 + $0xc60] ss:$16 sps:$4 sm:$0xff]   ;;  %v5019_v50 = vld [vmem:[%s6820_s1 + $0xc68] ss:$16 sps:$4 sm:$0xff]  }
 0x157   :  { %3360 = vmatpush1.bf16.msra.mxu0 %v4931_v51  ;;  %3688 = vmatpush1.bf16.msra.mxu1 %v4934_v52  ;;  %v5024_v51 = vld [vmem:[%s6820_s1 + $0xc84] ss:$16 sps:$4 sm:$0xff]   ;;  %v5027_v52 = vld [vmem:[%s6820_s1 + $0xc8c] ss:$16 sps:$4 sm:$0xff]  }
 0x158   :  { %3361 = vmatprep.subr.bf16.mxu0 %v4939_v53  ;;  %3689 = vmatprep.subr.bf16.mxu1 %v4942_v54  ;;  %v5022_v53 = vld [vmem:[%s6820_s1 + $0xc80] ss:$16 sps:$4 sm:$0xff]   ;;  %v5025_v54 = vld [vmem:[%s6820_s1 + $0xc88] ss:$16 sps:$4 sm:$0xff]  }
 0x15b   :  { %3362 = vmatpush1.bf16.msra.mxu0 %v4937_v55  ;;  %3690 = vmatpush1.bf16.msra.mxu1 %v4940_v56  ;;  %v5030_v55 = vld [vmem:[%s6820_s1 + $0xca4] ss:$16 sps:$4 sm:$0xff]   ;;  %v5033_v56 = vld [vmem:[%s6820_s1 + $0xcac] ss:$16 sps:$4 sm:$0xff]  }
 0x15c   :  { %3363 = vmatprep.subr.bf16.mxu0 %v4945_v57  ;;  %3691 = vmatprep.subr.bf16.mxu1 %v4948_v58  ;;  %v5028_v57 = vld [vmem:[%s6820_s1 + $0xca0] ss:$16 sps:$4 sm:$0xff]   ;;  %v5031_v58 = vld [vmem:[%s6820_s1 + $0xca8] ss:$16 sps:$4 sm:$0xff]  }
 0x15f   :  { %3364 = vmatpush1.bf16.msra.mxu0 %v4943_v59  ;;  %3692 = vmatpush1.bf16.msra.mxu1 %v4946_v60  ;;  %v5036_v59 = vld [vmem:[%s6820_s1 + $0xcc4] ss:$16 sps:$4 sm:$0xff]   ;;  %v5039_v60 = vld [vmem:[%s6820_s1 + $0xccc] ss:$16 sps:$4 sm:$0xff]  }
 0x160   :  { %3365 = vmatprep.subr.bf16.mxu0 %v4951_v61  ;;  %3693 = vmatprep.subr.bf16.mxu1 %v4954_v62  ;;  %v5034_v61 = vld [vmem:[%s6820_s1 + $0xcc0] ss:$16 sps:$4 sm:$0xff]   ;;  %v5037_v62 = vld [vmem:[%s6820_s1 + $0xcc8] ss:$16 sps:$4 sm:$0xff]  }
 0x163   :  { %3366 = vmatpush1.bf16.msra.mxu0 %v4949_v63  ;;  %3694 = vmatpush1.bf16.msra.mxu1 %v4952_v0  ;;  %v5042_v63 = vld [vmem:[%s6820_s1 + $0xce4] ss:$16 sps:$4 sm:$0xff]   ;;  %v5045_v0 = vld [vmem:[%s6820_s1 + $0xcec] ss:$16 sps:$4 sm:$0xff]  }
 0x164   :  { %3367 = vmatprep.subr.bf16.mxu0 %v4957_v1  ;;  %3695 = vmatprep.subr.bf16.mxu1 %v4960_v2  ;;  %v5040_v1 = vld [vmem:[%s6820_s1 + $0xce0] ss:$16 sps:$4 sm:$0xff]   ;;  %v5043_v2 = vld [vmem:[%s6820_s1 + $0xce8] ss:$16 sps:$4 sm:$0xff]  }
 0x167   :  { %3368 = vmatpush1.bf16.msra.mxu0 %v4955_v3  ;;  %3696 = vmatpush1.bf16.msra.mxu1 %v4958_v4  ;;  %v5048_v3 = vld [vmem:[%s6820_s1 + $0xd04] ss:$16 sps:$4 sm:$0xff]   ;;  %v5051_v4 = vld [vmem:[%s6820_s1 + $0xd0c] ss:$16 sps:$4 sm:$0xff]  }
 0x168   :  { %3369 = vmatprep.subr.bf16.mxu0 %v4963_v5  ;;  %3697 = vmatprep.subr.bf16.mxu1 %v4966_v6  ;;  %v5046_v5 = vld [vmem:[%s6820_s1 + $0xd00] ss:$16 sps:$4 sm:$0xff]   ;;  %v5049_v6 = vld [vmem:[%s6820_s1 + $0xd08] ss:$16 sps:$4 sm:$0xff]  }
 0x16b   :  { %3370 = vmatpush1.bf16.msra.mxu0 %v4961_v7  ;;  %3698 = vmatpush1.bf16.msra.mxu1 %v4964_v8  ;;  %v5054_v7 = vld [vmem:[%s6820_s1 + $0xd24] ss:$16 sps:$4 sm:$0xff]   ;;  %v5057_v8 = vld [vmem:[%s6820_s1 + $0xd2c] ss:$16 sps:$4 sm:$0xff]  }
 0x16c   :  { %3371 = vmatprep.subr.bf16.mxu0 %v4969_v9  ;;  %3699 = vmatprep.subr.bf16.mxu1 %v4972_v10  ;;  %v5052_v9 = vld [vmem:[%s6820_s1 + $0xd20] ss:$16 sps:$4 sm:$0xff]   ;;  %v5055_v10 = vld [vmem:[%s6820_s1 + $0xd28] ss:$16 sps:$4 sm:$0xff]  }
 0x16f   :  { %3372 = vmatpush1.bf16.msra.mxu0 %v4967_v11  ;;  %3700 = vmatpush1.bf16.msra.mxu1 %v4970_v13  ;;  %v5060_v11 = vld [vmem:[%s6820_s1 + $0xd44] ss:$16 sps:$4 sm:$0xff]   ;;  %v5063_v13 = vld [vmem:[%s6820_s1 + $0xd4c] ss:$16 sps:$4 sm:$0xff]  }
 0x170   :  { %3373 = vmatprep.subr.bf16.mxu0 %v4975_v14  ;;  %3701 = vmatprep.subr.bf16.mxu1 %v4978_v15  ;;  %v5058_v14 = vld [vmem:[%s6820_s1 + $0xd40] ss:$16 sps:$4 sm:$0xff]   ;;  %v5061_v15 = vld [vmem:[%s6820_s1 + $0xd48] ss:$16 sps:$4 sm:$0xff]  }
 0x173   :  { %3374 = vmatpush1.bf16.msra.mxu0 %v4973_v16  ;;  %3702 = vmatpush1.bf16.msra.mxu1 %v4976_v17  ;;  %v5066_v16 = vld [vmem:[%s6820_s1 + $0xd64] ss:$16 sps:$4 sm:$0xff]   ;;  %v5069_v17 = vld [vmem:[%s6820_s1 + $0xd6c] ss:$16 sps:$4 sm:$0xff]  }
 0x174   :  { %3375 = vmatprep.subr.bf16.mxu0 %v4981_v19  ;;  %3703 = vmatprep.subr.bf16.mxu1 %v4984_v20  ;;  %v5064_v19 = vld [vmem:[%s6820_s1 + $0xd60] ss:$16 sps:$4 sm:$0xff]   ;;  %v5067_v20 = vld [vmem:[%s6820_s1 + $0xd68] ss:$16 sps:$4 sm:$0xff]  }
 0x177   :  { %3376 = vmatpush1.bf16.msra.mxu0 %v4979_v18  ;;  %3704 = vmatpush1.bf16.msra.mxu1 %v4982_v24  ;;  %v5072_v18 = vld [vmem:[%s6820_s1 + $0xd84] ss:$16 sps:$4 sm:$0xff]   ;;  %v5075_v24 = vld [vmem:[%s6820_s1 + $0xd8c] ss:$16 sps:$4 sm:$0xff]  }
 0x178   :  { %3377 = vmatprep.subr.bf16.mxu0 %v4987_v25  ;;  %3705 = vmatprep.subr.bf16.mxu1 %v4990_v12  ;;  %v5070_v25 = vld [vmem:[%s6820_s1 + $0xd80] ss:$16 sps:$4 sm:$0xff]   ;;  %v5073_v12 = vld [vmem:[%s6820_s1 + $0xd88] ss:$16 sps:$4 sm:$0xff]  }
 0x17b   :  { %3378 = vmatpush1.bf16.msra.mxu0 %v4985_v27  ;;  %3706 = vmatpush1.bf16.msra.mxu1 %v4988_v28  ;;  %v5078_v27 = vld [vmem:[%s6820_s1 + $0xda4] ss:$16 sps:$4 sm:$0xff]   ;;  %v5081_v28 = vld [vmem:[%s6820_s1 + $0xdac] ss:$16 sps:$4 sm:$0xff]  }
 0x17c   :  { %3379 = vmatprep.subr.bf16.mxu0 %v4993_v29  ;;  %3707 = vmatprep.subr.bf16.mxu1 %v4996_v21  ;;  %v5076_v29 = vld [vmem:[%s6820_s1 + $0xda0] ss:$16 sps:$4 sm:$0xff]   ;;  %v5079_v21 = vld [vmem:[%s6820_s1 + $0xda8] ss:$16 sps:$4 sm:$0xff]  }
 0x17f   :  { %3380 = vmatpush1.bf16.msra.mxu0 %v4991_v31  ;;  %3708 = vmatpush1.bf16.msra.mxu1 %v4994_v32  ;;  %v5084_v31 = vld [vmem:[%s6820_s1 + $0xdc4] ss:$16 sps:$4 sm:$0xff]   ;;  %v5087_v32 = vld [vmem:[%s6820_s1 + $0xdcc] ss:$16 sps:$4 sm:$0xff]  }
 0x180   :  { %3390 = vmatprep.subr.bf16.mxu0 %v5000_v22  ;;  %3718 = vmatprep.subr.bf16.mxu1 %v5003_v34  ;;  %v5085_v22 = vld [vmem:[%s6820_s1 + $0xdc8] ss:$16 sps:$4 sm:$0xff]   ;;  %v5090_v34 = vld [vmem:[%s6820_s1 + $0xde4] ss:$16 sps:$4 sm:$0xff]  }
 0x182   :  { %3382 = vmatmul.mubr.bf16.vlgmr.msra.gmra.mrb[0].mxu0 %v6221_v30  ;;  %3710 = vmatmul.mubr.bf16.vlgmr.msra.gmra.mrb[0].mxu1 %v6221_v30  ;;  %v5015_v30 = vld [vmem:[%s6820_s1 + $0xc4c] ss:$16 sps:$4 sm:$0xff]  }
 0x183   :  { %3391 = vmatpush1.bf16.msra.mxu0 %v4998_v37  ;;  %3719 = vmatpush1.bf16.msra.mxu1 %v5001_v26  ;;  %v588_v37 = vcombine.high %v6410_v23, %v6410_v23  ;;  %v5088_v26 = vld [vmem:[%s6820_s1 + $0xde0] ss:$16 sps:$4 sm:$0xff]   ;;  %v5100_v23 = vld [vmem:[%s6820_s1 + $0xe0c] ss:$16 sps:$4 sm:$0xff]  }
 0x184   :  { %3392 = vmatprep.subr.bf16.mxu0 %v5006_v38  ;;  %3720 = vmatprep.subr.bf16.mxu1 %v5009_v39  ;;  %v5091_v38 = vld [vmem:[%s6820_s1 + $0xde8] ss:$16 sps:$4 sm:$0xff]   ;;  %v5097_v39 = vld [vmem:[%s6820_s1 + $0xe04] ss:$16 sps:$4 sm:$0xff]  }
 0x185   :  { %3422 = vmatprep.mubr.bf16.mxu0 %v603_v40  ;;  %3750 = vmatprep.mubr.bf16.mxu1 %v603_v40  ;;  %v6630_v40 = vrot.slane %v588_v37, %v5338_v49 }
 0x187   :  { %3393 = vmatpush1.bf16.msra.mxu0 %v5004_v41  ;;  %3721 = vmatpush1.bf16.msra.mxu1 %v5007_v42  ;;  %v5095_v41 = vld [vmem:[%s6820_s1 + $0xe00] ss:$16 sps:$4 sm:$0xff]   ;;  %v5098_v42 = vld [vmem:[%s6820_s1 + $0xe08] ss:$16 sps:$4 sm:$0xff]  }
 0x188   :  { %3394 = vmatprep.subr.bf16.mxu0 %v5012_v43  ;;  %3722 = vmatprep.subr.bf16.mxu1 %v5015_v30  ;;  %v5103_v43 = vld [vmem:[%s6820_s1 + $0xe24] ss:$16 sps:$4 sm:$0xff]   ;;  %v5106_v30 = vld [vmem:[%s6820_s1 + $0xe2c] ss:$16 sps:$4 sm:$0xff]  }
 0x18b   :  { %3395 = vmatpush1.bf16.msra.mxu0 %v5010_v44  ;;  %3723 = vmatpush1.bf16.msra.mxu1 %v5013_v45  ;;  %v604_v44 = vcombine.high %v6630_v40, %v6630_v40  ;;  %v5101_v45 = vld [vmem:[%s6820_s1 + $0xe20] ss:$16 sps:$4 sm:$0xff]  }
 0x18c   :  { %3396 = vmatprep.subr.bf16.mxu0 %v5018_v46  ;;  %3724 = vmatprep.subr.bf16.mxu1 %v5021_v47  ;;  %v5104_v46 = vld [vmem:[%s6820_s1 + $0xe28] ss:$16 sps:$4 sm:$0xff]   ;;  %v5109_v47 = vld [vmem:[%s6820_s1 + $0xe44] ss:$16 sps:$4 sm:$0xff]  }
 0x18f   :  { %3397 = vmatpush1.bf16.msra.mxu0 %v5016_v48  ;;  %3725 = vmatpush1.bf16.msra.mxu1 %v5019_v50  ;;  %v5107_v48 = vld [vmem:[%s6820_s1 + $0xe40] ss:$16 sps:$4 sm:$0xff]   ;;  %v5110_v50 = vld [vmem:[%s6820_s1 + $0xe48] ss:$16 sps:$4 sm:$0xff]  }
 0x190   :  { %3398 = vmatprep.subr.bf16.mxu0 %v5024_v51  ;;  %3726 = vmatprep.subr.bf16.mxu1 %v5027_v52  ;;  %v5115_v51 = vld [vmem:[%s6820_s1 + $0xe64] ss:$16 sps:$4 sm:$0xff]   ;;  %v5118_v52 = vld [vmem:[%s6820_s1 + $0xe6c] ss:$16 sps:$4 sm:$0xff]  }
 0x193   :  { %3399 = vmatpush1.bf16.msra.mxu0 %v5022_v53  ;;  %3727 = vmatpush1.bf16.msra.mxu1 %v5025_v54  ;;  %v5113_v53 = vld [vmem:[%s6820_s1 + $0xe60] ss:$16 sps:$4 sm:$0xff]   ;;  %v5116_v54 = vld [vmem:[%s6820_s1 + $0xe68] ss:$16 sps:$4 sm:$0xff]  }
 0x194   :  { %3400 = vmatprep.subr.bf16.mxu0 %v5030_v55  ;;  %3728 = vmatprep.subr.bf16.mxu1 %v5033_v56  ;;  %v5121_v55 = vld [vmem:[%s6820_s1 + $0xe84] ss:$16 sps:$4 sm:$0xff]   ;;  %v5124_v56 = vld [vmem:[%s6820_s1 + $0xe8c] ss:$16 sps:$4 sm:$0xff]  }
 0x197   :  { %3401 = vmatpush1.bf16.msra.mxu0 %v5028_v57  ;;  %3729 = vmatpush1.bf16.msra.mxu1 %v5031_v58  ;;  %v5119_v57 = vld [vmem:[%s6820_s1 + $0xe80] ss:$16 sps:$4 sm:$0xff]   ;;  %v5122_v58 = vld [vmem:[%s6820_s1 + $0xe88] ss:$16 sps:$4 sm:$0xff]  }
 0x198   :  { %3402 = vmatprep.subr.bf16.mxu0 %v5036_v59  ;;  %3730 = vmatprep.subr.bf16.mxu1 %v5039_v60  ;;  %v5127_v59 = vld [vmem:[%s6820_s1 + $0xea4] ss:$16 sps:$4 sm:$0xff]   ;;  %v5130_v60 = vld [vmem:[%s6820_s1 + $0xeac] ss:$16 sps:$4 sm:$0xff]  }
 0x19b   :  { %3403 = vmatpush1.bf16.msra.mxu0 %v5034_v61  ;;  %3731 = vmatpush1.bf16.msra.mxu1 %v5037_v62  ;;  %v5125_v61 = vld [vmem:[%s6820_s1 + $0xea0] ss:$16 sps:$4 sm:$0xff]   ;;  %v5128_v62 = vld [vmem:[%s6820_s1 + $0xea8] ss:$16 sps:$4 sm:$0xff]  }
 0x19c   :  { %3404 = vmatprep.subr.bf16.mxu0 %v5042_v63  ;;  %3732 = vmatprep.subr.bf16.mxu1 %v5045_v0  ;;  %v5133_v63 = vld [vmem:[%s6820_s1 + $0xec4] ss:$16 sps:$4 sm:$0xff]   ;;  %v5136_v0 = vld [vmem:[%s6820_s1 + $0xecc] ss:$16 sps:$4 sm:$0xff]  }
 0x19f   :  { %3405 = vmatpush1.bf16.msra.mxu0 %v5040_v1  ;;  %3733 = vmatpush1.bf16.msra.mxu1 %v5043_v2  ;;  %v5131_v1 = vld [vmem:[%s6820_s1 + $0xec0] ss:$16 sps:$4 sm:$0xff]   ;;  %v5134_v2 = vld [vmem:[%s6820_s1 + $0xec8] ss:$16 sps:$4 sm:$0xff]  }
 0x1a0   :  { %3406 = vmatprep.subr.bf16.mxu0 %v5048_v3  ;;  %3734 = vmatprep.subr.bf16.mxu1 %v5051_v4  ;;  %v5139_v3 = vld [vmem:[%s6820_s1 + $0xee4] ss:$16 sps:$4 sm:$0xff]   ;;  %v5142_v4 = vld [vmem:[%s6820_s1 + $0xeec] ss:$16 sps:$4 sm:$0xff]  }
 0x1a3   :  { %3407 = vmatpush1.bf16.msra.mxu0 %v5046_v5  ;;  %3735 = vmatpush1.bf16.msra.mxu1 %v5049_v6  ;;  %v5137_v5 = vld [vmem:[%s6820_s1 + $0xee0] ss:$16 sps:$4 sm:$0xff]   ;;  %v5140_v6 = vld [vmem:[%s6820_s1 + $0xee8] ss:$16 sps:$4 sm:$0xff]  }
 0x1a4   :  { %3408 = vmatprep.subr.bf16.mxu0 %v5054_v7  ;;  %3736 = vmatprep.subr.bf16.mxu1 %v5057_v8  ;;  %v5145_v7 = vld [vmem:[%s6820_s1 + $0xf04] ss:$16 sps:$4 sm:$0xff]   ;;  %v5148_v8 = vld [vmem:[%s6820_s1 + $0xf0c] ss:$16 sps:$4 sm:$0xff]  }
 0x1a7   :  { %3409 = vmatpush1.bf16.msra.mxu0 %v5052_v9  ;;  %3737 = vmatpush1.bf16.msra.mxu1 %v5055_v10  ;;  %v5143_v9 = vld [vmem:[%s6820_s1 + $0xf00] ss:$16 sps:$4 sm:$0xff]   ;;  %v5146_v10 = vld [vmem:[%s6820_s1 + $0xf08] ss:$16 sps:$4 sm:$0xff]  }
 0x1a8   :  { %3410 = vmatprep.subr.bf16.mxu0 %v5060_v11  ;;  %3738 = vmatprep.subr.bf16.mxu1 %v5063_v13  ;;  %v5151_v11 = vld [vmem:[%s6820_s1 + $0xf24] ss:$16 sps:$4 sm:$0xff]   ;;  %v5154_v13 = vld [vmem:[%s6820_s1 + $0xf2c] ss:$16 sps:$4 sm:$0xff]  }
 0x1ab   :  { %3411 = vmatpush1.bf16.msra.mxu0 %v5058_v14  ;;  %3739 = vmatpush1.bf16.msra.mxu1 %v5061_v15  ;;  %v5149_v14 = vld [vmem:[%s6820_s1 + $0xf20] ss:$16 sps:$4 sm:$0xff]   ;;  %v5152_v15 = vld [vmem:[%s6820_s1 + $0xf28] ss:$16 sps:$4 sm:$0xff]  }
 0x1ac   :  { %3412 = vmatprep.subr.bf16.mxu0 %v5066_v16  ;;  %3740 = vmatprep.subr.bf16.mxu1 %v5069_v17  ;;  %v5157_v16 = vld [vmem:[%s6820_s1 + $0xf44] ss:$16 sps:$4 sm:$0xff]   ;;  %v5160_v17 = vld [vmem:[%s6820_s1 + $0xf4c] ss:$16 sps:$4 sm:$0xff]  }
 0x1af   :  { %3413 = vmatpush1.bf16.msra.mxu0 %v5064_v19  ;;  %3741 = vmatpush1.bf16.msra.mxu1 %v5067_v20  ;;  %v5155_v19 = vld [vmem:[%s6820_s1 + $0xf40] ss:$16 sps:$4 sm:$0xff]   ;;  %v5158_v20 = vld [vmem:[%s6820_s1 + $0xf48] ss:$16 sps:$4 sm:$0xff]  }
 0x1b0   :  { %3414 = vmatprep.subr.bf16.mxu0 %v5072_v18  ;;  %3742 = vmatprep.subr.bf16.mxu1 %v5075_v24  ;;  %v5163_v18 = vld [vmem:[%s6820_s1 + $0xf64] ss:$16 sps:$4 sm:$0xff]   ;;  %v5166_v24 = vld [vmem:[%s6820_s1 + $0xf6c] ss:$16 sps:$4 sm:$0xff]  }
 0x1b3   :  { %3415 = vmatpush1.bf16.msra.mxu0 %v5070_v25  ;;  %3743 = vmatpush1.bf16.msra.mxu1 %v5073_v12  ;;  %v5161_v25 = vld [vmem:[%s6820_s1 + $0xf60] ss:$16 sps:$4 sm:$0xff]   ;;  %v5164_v12 = vld [vmem:[%s6820_s1 + $0xf68] ss:$16 sps:$4 sm:$0xff]  }
 0x1b4   :  { %3416 = vmatprep.subr.bf16.mxu0 %v5078_v27  ;;  %3744 = vmatprep.subr.bf16.mxu1 %v5081_v28  ;;  %v5169_v27 = vld [vmem:[%s6820_s1 + $0xf84] ss:$16 sps:$4 sm:$0xff]   ;;  %v5172_v28 = vld [vmem:[%s6820_s1 + $0xf8c] ss:$16 sps:$4 sm:$0xff]  }
 0x1b7   :  { %3417 = vmatpush1.bf16.msra.mxu0 %v5076_v29  ;;  %3745 = vmatpush1.bf16.msra.mxu1 %v5079_v21  ;;  %v5167_v29 = vld [vmem:[%s6820_s1 + $0xf80] ss:$16 sps:$4 sm:$0xff]   ;;  %v5170_v21 = vld [vmem:[%s6820_s1 + $0xf88] ss:$16 sps:$4 sm:$0xff]  }
 0x1b8   :  { %3418 = vmatprep.subr.bf16.mxu0 %v5084_v31  ;;  %3746 = vmatprep.subr.bf16.mxu1 %v5087_v32  ;;  %v5175_v31 = vld [vmem:[%s6820_s1 + $0xfa4] ss:$16 sps:$4 sm:$0xff]   ;;  %v5178_v32 = vld [vmem:[%s6820_s1 + $0xfac] ss:$16 sps:$4 sm:$0xff]  }
 0x1bb   :  { %3419 = vmatpush1.bf16.msra.mxu0 %v5082_v33  ;;  %3747 = vmatpush1.bf16.msra.mxu1 %v5085_v22  ;;  %v5173_v33 = vld [vmem:[%s6820_s1 + $0xfa0] ss:$16 sps:$4 sm:$0xff]   ;;  %v5176_v22 = vld [vmem:[%s6820_s1 + $0xfa8] ss:$16 sps:$4 sm:$0xff]  }
 0x1bc   :  { %3420 = vmatprep.subr.bf16.mxu0 %v5090_v34  ;;  %3748 = vmatprep.subr.bf16.mxu1 %v5093_v36 }
 0x1bf   :  { %3421 = vmatpush1.bf16.msra.mxu0 %v5088_v26  ;;  %3749 = vmatpush1.bf16.msra.mxu1 %v5091_v38 }
 0x1c0   :  { %3431 = vmatprep.subr.bf16.mxu0 %v5097_v39  ;;  %3759 = vmatprep.subr.bf16.mxu1 %v5100_v23 }
 0x1c2   :  { %3423 = vmatmul.mubr.bf16.vlgmr.msra.gmra.mrb[0].mxu0 %v6429_v35  ;;  %3751 = vmatmul.mubr.bf16.vlgmr.msra.gmra.mrb[0].mxu1 %v6429_v35  ;;  %v5112_v35 = vld [vmem:[%s6820_s1 + $0xe4c] ss:$16 sps:$4 sm:$0xff]  }
 0x1c3   :  { %3432 = vmatpush1.bf16.msra.mxu0 %v5095_v41  ;;  %3760 = vmatpush1.bf16.msra.mxu1 %v5098_v42 }
 0x1c4   :  { %3433 = vmatprep.subr.bf16.mxu0 %v5103_v43  ;;  %3761 = vmatprep.subr.bf16.mxu1 %v5106_v30 }
 0x1c5   :  { %4352 = vmatprep.mubr.msk.bf16.mxu0 %vm3140_vm0, %v604_v44  ;;  %4353 = vmatprep.mubr.msk.bf16.mxu1 %vm3140_vm0, %v604_v44 }
 0x1c7   :  { %3434 = vmatpush1.bf16.msra.mxu0 %v5101_v45  ;;  %3762 = vmatpush1.bf16.msra.mxu1 %v5104_v46 }
 0x1c8   :  { %3435 = vmatprep.subr.bf16.mxu0 %v5109_v47  ;;  %3763 = vmatprep.subr.bf16.mxu1 %v5112_v35 }
 0x1c9   :  { %v531_v37 = vpop.permute.xlu0 %530 }
 0x1cb   :  { %3436 = vmatpush1.bf16.msra.mxu0 %v5107_v48  ;;  %3764 = vmatpush1.bf16.msra.mxu1 %v5110_v50 }
 0x1cc   :  { %3437 = vmatprep.subr.bf16.mxu0 %v5115_v51  ;;  %3765 = vmatprep.subr.bf16.mxu1 %v5118_v52  ;;  %v3841_v51 = vld [vmem:[%s6824_s4] sm:$0xff] }
 0x1cf   :  { %3438 = vmatpush1.bf16.msra.mxu0 %v5113_v53  ;;  %3766 = vmatpush1.bf16.msra.mxu1 %v5116_v54 }
 0x1d0   :  { %3439 = vmatprep.subr.bf16.mxu0 %v5121_v55  ;;  %3767 = vmatprep.subr.bf16.mxu1 %v5124_v56 }
 0x1d3   :  { %3440 = vmatpush1.bf16.msra.mxu0 %v5119_v57  ;;  %3768 = vmatpush1.bf16.msra.mxu1 %v5122_v58 }
 0x1d4   :  { %3441 = vmatprep.subr.bf16.mxu0 %v5127_v59  ;;  %3769 = vmatprep.subr.bf16.mxu1 %v5130_v60 }
 0x1d7   :  { %3442 = vmatpush1.bf16.msra.mxu0 %v5125_v61  ;;  %3770 = vmatpush1.bf16.msra.mxu1 %v5128_v62 }
 0x1d8   :  { %3443 = vmatprep.subr.bf16.mxu0 %v5133_v63  ;;  %3771 = vmatprep.subr.bf16.mxu1 %v5136_v0 }
 0x1db   :  { %3444 = vmatpush1.bf16.msra.mxu0 %v5131_v1  ;;  %3772 = vmatpush1.bf16.msra.mxu1 %v5134_v2 }
 0x1dc   :  { %3445 = vmatprep.subr.bf16.mxu0 %v5139_v3  ;;  %3773 = vmatprep.subr.bf16.mxu1 %v5142_v4 }
 0x1df   :  { %3446 = vmatpush1.bf16.msra.mxu0 %v5137_v5  ;;  %3774 = vmatpush1.bf16.msra.mxu1 %v5140_v6 }
 0x1e0   :  { %3447 = vmatprep.subr.bf16.mxu0 %v5145_v7  ;;  %3775 = vmatprep.subr.bf16.mxu1 %v5148_v8 }
 0x1e3   :  { %3448 = vmatpush1.bf16.msra.mxu0 %v5143_v9  ;;  %3776 = vmatpush1.bf16.msra.mxu1 %v5146_v10 }
 0x1e4   :  { %3449 = vmatprep.subr.bf16.mxu0 %v5151_v11  ;;  %3777 = vmatprep.subr.bf16.mxu1 %v5154_v13 }
 0x1e7   :  { %3450 = vmatpush1.bf16.msra.mxu0 %v5149_v14  ;;  %3778 = vmatpush1.bf16.msra.mxu1 %v5152_v15 }
 0x1e8   :  { %3451 = vmatprep.subr.bf16.mxu0 %v5157_v16  ;;  %3779 = vmatprep.subr.bf16.mxu1 %v5160_v17 }
 0x1eb   :  { %3452 = vmatpush1.bf16.msra.mxu0 %v5155_v19  ;;  %3780 = vmatpush1.bf16.msra.mxu1 %v5158_v20 }
 0x1ec   :  { %3453 = vmatprep.subr.bf16.mxu0 %v5163_v18  ;;  %3781 = vmatprep.subr.bf16.mxu1 %v5166_v24 }
 0x1ef   :  { %3454 = vmatpush1.bf16.msra.mxu0 %v5161_v25  ;;  %3782 = vmatpush1.bf16.msra.mxu1 %v5164_v12 }
 0x1f0   :  { %3455 = vmatprep.subr.bf16.mxu0 %v5169_v27  ;;  %3783 = vmatprep.subr.bf16.mxu1 %v5172_v28 }
 0x1f3   :  { %3456 = vmatpush1.bf16.msra.mxu0 %v5167_v29  ;;  %3784 = vmatpush1.bf16.msra.mxu1 %v5170_v21 }
 0x1f4   :  { %3457 = vmatprep.subr.bf16.mxu0 %v5175_v31  ;;  %3785 = vmatprep.subr.bf16.mxu1 %v5178_v32 }
 0x1f7   :  { %3458 = vmatpush1.bf16.msra.mxu0 %v5173_v33  ;;  %3786 = vmatpush1.bf16.msra.mxu1 %v5176_v22 }
 0x1fa   :  { %3464 = vmatmul.mubr.bf16.vlgmr.msra.gmra.mrb[0].mxu0 %v6630_v40  ;;  %3792 = vmatmul.mubr.bf16.vlgmr.msra.gmra.mrb[0].mxu1 %v6630_v40 }
 0x2cd   :  { %v3465_v26 = vpop.f32.mrb[0].mxu0  ;;  %v3793_v38 = vpop.f32.mrb[0].mxu1 }
 0x2ce   :  { %v4356_v39 = vadd.f32 %v3465_v26, %v531_v37  ;;  %v4358_v23 = vadd.f32 %v3793_v38, %v531_v37  ;;  %v3467_v40 = vpop.f32.mrb[1].mxu0  ;;  %v3795_v41 = vpop.f32.mrb[1].mxu1 }
 0x2cf   :  { %v4357_v42 = vadd.f32 %v3467_v40, %v531_v37  ;;  %v4359_v43 = vadd.f32 %v3795_v41, %v531_v37  ;;  %v3469_v30 = vpop.f32.mrb[2].mxu0  ;;  %v3797_v44 = vpop.f32.mrb[2].mxu1 }
 0x2d0   :  { %v3470_v45 = vpop.f32.mrb[3].mxu0  ;;  %v3798_v46 = vpop.f32.mrb[3].mxu1 }
 0x2d1   :  { %v4354_v47 = vpack.c.bf16 %v4357_v42, %v4356_v39  ;;  %v4355_v35 = vpack.c.bf16 %v4359_v43, %v4358_v23 }
 0x2d3   :  { %v3816_v48 = vrot.slane %v4354_v47, %v5338_v49  ;;  %v3823_v50 = vrot.slane %v4355_v35, %v5338_v49 }
 0x2d5   :  { %v3824_v52 = vcombine.low %v3816_v48, %v3823_v50 }
 0x2d7   :  { %v3842_v53 = vsel %vm3840_vm15, %v3824_v52, %v3841_v51 }
 0x2d8   :  { %3843 = vst [vmem:[%s6824_s4] sm:$0xff] %v3842_v53 }

</bundles_post_ra>
